<compile_context>
chip_gen: v7x
topology: tpu7x:2x2x1
jax: 0.10.0
libtpu: 0.0.40
codegen_flags: <defaults>
</compile_context>

<pallas_src>
import jax
import jax.numpy as jnp
import numpy as np
from jax.experimental import pallas as pl
from jax.experimental.pallas import tpu as pltpu

NEG_SLOPE = 0.2


# ----------------------------------------------------------------------------
# pltpu.roll shift-direction probe.  Runs eagerly at module import time (never
# inside a jit trace).  Falls back to the jnp.roll convention on any failure.
# ----------------------------------------------------------------------------
def _probe_roll_like_jnp():
    try:
        def probe_kernel(x_ref, o_ref):
            o_ref[...] = pltpu.roll(x_ref[...], 1, axis=1)

        x = jnp.tile(jnp.arange(128, dtype=jnp.float32)[None, :], (8, 1))
        got = jax.device_get(
            pl.pallas_call(
                probe_kernel,
                out_shape=jax.ShapeDtypeStruct((8, 128), jnp.float32),
            )(x))
        # jnp.roll(iota, +1)[..., 0] == 127  (elements move toward higher index)
        return bool(got[0, 0] == 127.0)
    except Exception:
        return True


_ROLL_LIKE_JNP = _probe_roll_like_jnp()


# ----------------------------------------------------------------------------
# Host-side prep (tiny, once per call): im2col of x and weight repacking.
# ----------------------------------------------------------------------------
def _taps(K):
    P = (K - 1) // 2
    return [(p - P, q - P) for p in range(K) for q in range(K)]


def _im2col_circular(x, K):
    """x: (B,C,H,W) -> (K*K*C, B*H*W); row = (p*K+q)*C + c, col = b*HW + h*W + w."""
    B, C, H, W = x.shape
    P = (K - 1) // 2
    cols = [jnp.roll(x, shift=(-(p - P), -(q - P)), axis=(2, 3))
            for p in range(K) for q in range(K)]
    xc = jnp.stack(cols, axis=1).reshape(B, K * K * C, H * W)
    return jnp.transpose(xc, (1, 0, 2)).reshape(K * K * C, B * H * W)


def _prep_weights(params, K, F, C, L, H, W):
    KK = K * K
    f32 = jnp.float32

    # (1) ALL x-branch convs (quad + lin, every layer) as one weight matrix.
    #     rows [2F*l, 2F*l+F) -> quad_l, [2F*l+F, 2F*(l+1)) -> lin_l;
    #     bias folded through the appended ones-row of the x-im2col.
    rows = []
    for l in range(L + 1):
        wq = jnp.transpose(params["wx_quad"][l], (0, 2, 3, 1)).reshape(F, KK * C)
        wl = jnp.transpose(params["wx_lin_w"][l], (0, 2, 3, 1)).reshape(F, KK * C)
        bl = params["wx_lin_b"][l].reshape(F, 1)
        rows.append(jnp.concatenate([wq, jnp.zeros((F, 1), f32)], axis=1))
        rows.append(jnp.concatenate([wl, bl], axis=1))
    wx_all = jnp.concatenate(rows, axis=0).astype(f32)              # (2F(L+1), KK*C+1)

    # (2) forward wz convs packed lane-dense: one (F, KK*F) @ (KK*F, N) matmul.
    if L > 0:
        wz_all = jnp.stack(
            [jnp.transpose(params["wz"][l], (0, 2, 3, 1)).reshape(F, KK * F)
             for l in range(L)], axis=0).astype(f32)                 # (L, F, KK*F)
    else:
        wz_all = jnp.zeros((1, F, KK * F), f32)

    # (3) backward adjoint convs.  For layer l >= 1, fused (F+C, KK*2F) matrix:
    #     rows 0..F-1   : wz[l-1]^T         (consumes gs) -> next g_z
    #     rows F..F+C-1 : [wq[l]^T wl[l]^T] (consumes gq, gs) -> g_x contribution
    def gx_rows(l):                                                  # (KK, C, 2F)
        tq = jnp.transpose(params["wx_quad"][l], (2, 3, 1, 0)).reshape(KK, C, F)
        tl = jnp.transpose(params["wx_lin_w"][l], (2, 3, 1, 0)).reshape(KK, C, F)
        return jnp.concatenate([tq, tl], axis=2)

    if L > 0:
        mats = []
        for l in range(1, L + 1):
            wzT = jnp.transpose(params["wz"][l - 1], (2, 3, 1, 0)).reshape(KK, F, F)
            gz_blk = jnp.concatenate([jnp.zeros((KK, F, F), f32), wzT], axis=2)
            A = jnp.concatenate([gz_blk, gx_rows(l)], axis=1)        # (KK, F+C, 2F)
            mats.append(jnp.transpose(A, (1, 0, 2)).reshape(F + C, KK * 2 * F))
        bwdA_all = jnp.stack(mats, axis=0).astype(f32)               # (L, F+C, KK*2F)
    else:
        bwdA_all = jnp.zeros((1, F + C, KK * 2 * F), f32)
    bwd0 = jnp.transpose(gx_rows(0), (1, 0, 2)).reshape(C, KK * 2 * F).astype(f32)

    # avg-pool backward + final-conv adjoint of a constant -> per-channel scalar.
    gz_init = (jnp.sum(params["final"], axis=(0, 2, 3)) / (H * W)).reshape(F, 1).astype(f32)
    return wx_all, wz_all, bwdA_all, bwd0, gz_init


# ----------------------------------------------------------------------------
# Fused ICNN forward (scalar() sweep + manual VJP) in one Pallas kernel.
# ----------------------------------------------------------------------------
def icnn_forward(params, x, strong_convexity=0.5):
    B, C, H, W = x.shape
    F, _, K, _ = params["wx_quad"][0].shape
    L = len(params["wz"])
    KK = K * K
    HW = H * W
    P = (K - 1) // 2
    taps = _taps(K)
    sc = float(strong_convexity)
    roll_like_jnp = _ROLL_LIKE_JNP

    # One whole image per grid step (lane-dense blocks, free circular h-wrap).
    assert HW % 128 == 0, "H*W must be a multiple of 128 for per-image lane blocks"
    # TODO(synk): add a masked / multi-image-block fallback for H*W % 128 != 0.

    xcol = _im2col_circular(x, K).astype(jnp.float32)                # (KK*C, B*HW)
    xcol_aug = jnp.concatenate([xcol, jnp.ones((1, B * HW), jnp.float32)], axis=0)
    wx_all, wz_all, bwdA_all, bwd0, gz_init = _prep_weights(params, K, F, C, L, H, W)

    def kernel(xcol_ref, wx_ref, wz_ref, bwdA_ref, bwd0_ref, gz0_ref, out_ref, res_ref):
        f32 = jnp.float32
        Nb = HW
        xcol_v = xcol_ref[...]

        # ---- hoisted wrap masks (only w-wrap needed: each block = one image) ----
        col_w = jax.lax.broadcasted_iota(jnp.int32, (1, Nb), 1) % W

        def make_masks(rows):
            pos = {s: jnp.broadcast_to(col_w >= (W - s), (rows, Nb)) for s in range(1, P + 1)}
            neg = {s: jnp.broadcast_to(col_w < s, (rows, Nb)) for s in range(1, P + 1)}
            return pos, neg

        masks = {h: make_masks(h) for h in {F, 2 * F}}

        def rolled(arr, d):
            # out[:, k] = arr[:, (k + d) mod Nb]   (== jnp.roll(arr, -d, axis=1))
            amt = ((-d) if roll_like_jnp else d) % Nb
            if amt == 0:
                return arr
            return pltpu.roll(arr, amt, axis=1)

        def im2col(arr, sign):
            # (rows, Nb) -> (KK*rows, Nb); row-block t = circular shift of `arr`
            # by sign*taps[t].  Separable: masked w-shift first (5 cached copies),
            # then pure h-rolls (the mod-Nb roll IS the circular h-wrap because
            # every block holds exactly one image).
            rows = arr.shape[0]
            pos_m, neg_m = masks[rows]

            def w_shift(sw):
                if sw == 0:
                    return arr
                if sw > 0:
                    return jnp.where(pos_m[sw], rolled(arr, sw - W), rolled(arr, sw))
                return jnp.where(neg_m[-sw], rolled(arr, sw + W), rolled(arr, sw))

            w_cache = {sw: w_shift(sw) for sw in range(-P, P + 1)}
            blocks = [rolled(w_cache[sign * sw], sign * sh * W) for (sh, sw) in taps]
            return jnp.concatenate(blocks, axis=0)

        # -------- forward sweep of scalar(): all x-branch convs in ONE matmul -----
        mx_all = jnp.dot(wx_ref[...], xcol_v, preferred_element_type=f32)  # (2F(L+1), Nb)

        def act_and_save(l, a, s):
            d1 = jnp.where(s > 0, 1.0, NEG_SLOPE)                     # lrelu'(s)
            res_ref[l] = jnp.concatenate([(2.0 * a) * d1, d1], axis=0)  # [d2 ; d1]
            return d1 * s                                             # leaky_relu(s)

        a = mx_all[0:F, :]
        s = a * a + mx_all[F:2 * F, :]
        z = act_and_save(0, a, s)
        for l in range(L):
            u = jnp.dot(wz_ref[l], im2col(z, +1), preferred_element_type=f32)
            r0 = 2 * F * (l + 1)
            a = mx_all[r0:r0 + F, :]
            s = u + a * a + mx_all[r0 + F:r0 + 2 * F, :]
            z = act_and_save(l + 1, a, s)
        # final conv + avg-pool values are not needed: only their gradient is.

        # -------- manual VJP: g_x = d[sum(scalar(x))]/dx --------
        gz = gz0_ref[...]                                 # (F, 1): constant over space
        g_x = jnp.zeros((C, Nb), f32)
        for l in range(L, 0, -1):
            stacked = jnp.concatenate([gz, gz], axis=0) * res_ref[l]      # [gq ; gs]
            r = jnp.dot(bwdA_ref[l - 1], im2col(stacked, -1), preferred_element_type=f32)
            gz = r[:F, :]
            g_x = g_x + r[F:, :]
        stacked = jnp.concatenate([gz, gz], axis=0) * res_ref[0]
        g_x = g_x + jnp.dot(bwd0_ref[...], im2col(stacked, -1), preferred_element_type=f32)

        # un-shifted x = center-tap rows of the x-im2col
        x_center = xcol_v[(P * K + P) * C:(P * K + P) * C + C, :]
        out_ref[...] = ((1.0 - sc) * g_x + sc * x_center).astype(out_ref.dtype)

    out_flat = pl.pallas_call(
        kernel,
        out_shape=jax.ShapeDtypeStruct((C, B * HW), x.dtype),
        grid=(B,),
        in_specs=[
            pl.BlockSpec((KK * C + 1, HW), lambda b: (0, b)),   # x im2col (per image)
            pl.BlockSpec(wx_all.shape, lambda b: (0, 0)),
            pl.BlockSpec(wz_all.shape, lambda b: (0, 0, 0)),
            pl.BlockSpec(bwdA_all.shape, lambda b: (0, 0, 0)),
            pl.BlockSpec(bwd0.shape, lambda b: (0, 0)),
            pl.BlockSpec(gz_init.shape, lambda b: (0, 0)),
        ],
        out_specs=pl.BlockSpec((C, HW), lambda b: (0, b)),
        scratch_shapes=[pltpu.VMEM((L + 1, 2 * F, HW), jnp.float32)],   # [d2; d1] per layer
        compiler_params=pltpu.CompilerParams(dimension_semantics=("parallel",)),
    )(xcol_aug, wx_all, wz_all, bwdA_all, bwd0, gz_init)

    return jnp.transpose(out_flat.reshape(C, B, HW), (1, 0, 2)).reshape(B, C, H, W)


# ----------------------------------------------------------------------------
# ICNN parameters
# ----------------------------------------------------------------------------
def init_icnn_params(key, num_in_channels=1, num_filters=8, kernel_dim=5, num_layers=3):
    F, C, K, L = num_filters, num_in_channels, kernel_dim, num_layers
    keys = list(jax.random.split(key, 4 * L + 6))
    it = iter(keys)

    def u(shape, lo, hi):
        return jax.random.uniform(next(it), shape, jnp.float32, lo, hi)

    return {
        "wz": [u((F, F, K, K), 0.0, 0.001) for _ in range(L)],            # no bias
        "wx_quad": [u((F, C, K, K), -0.1, 0.1) for _ in range(L + 1)],    # no bias
        "wx_lin_w": [u((F, C, K, K), -0.1, 0.1) for _ in range(L + 1)],
        "wx_lin_b": [u((F,), -0.1, 0.1) for _ in range(L + 1)],
        "final": u((C, F, K, K), 0.0, 0.001),                             # no bias
    }


# ----------------------------------------------------------------------------
# Pure-JAX reference (verification only)
# ----------------------------------------------------------------------------
def _conv_ref(x, w, bias=None):
    C_out, C_in, K, _ = w.shape
    P = (K - 1) // 2
    out = 0.0
    for p in range(K):
        for q in range(K):
            xr = jnp.roll(x, shift=(-(p - P), -(q - P)), axis=(2, 3))
            out = out + jnp.einsum("oc,bcij->boij", w[:, :, p, q], xr)
    if bias is not None:
        out = out + bias[None, :, None, None]
    return out


def _scalar_ref(params, x):
    L = len(params["wz"])
    lrelu = lambda s: jnp.where(s > 0, s, NEG_SLOPE * s)
    z = lrelu(_conv_ref(x, params["wx_quad"][0]) ** 2
              + _conv_ref(x, params["wx_lin_w"][0], params["wx_lin_b"][0]))
    for l in range(L):
        z = lrelu(_conv_ref(z, params["wz"][l])
                  + _conv_ref(x, params["wx_quad"][l + 1]) ** 2
                  + _conv_ref(x, params["wx_lin_w"][l + 1], params["wx_lin_b"][l + 1]))
    z = _conv_ref(z, params["final"])
    return jnp.mean(z, axis=(2, 3))


def icnn_forward_ref(params, x, strong_convexity=0.5):
    g = jax.grad(lambda xx: jnp.sum(_scalar_ref(params, xx)))(x)
    return (1.0 - strong_convexity) * g + strong_convexity * x


# ----------------------------------------------------------------------------
if __name__ == "__main__":
    key = jax.random.PRNGKey(0)
    kp, kx = jax.random.split(key)

    num_in_channels, num_filters, kernel_dim, num_layers = 1, 8, 5, 3
    params = init_icnn_params(kp, num_in_channels, num_filters, kernel_dim, num_layers)

    B, H, W = 2, 16, 16
    x = jax.random.normal(kx, (B, num_in_channels, H, W), jnp.float32)

    fwd = jax.jit(lambda p, xx: icnn_forward(p, xx, strong_convexity=0.5))
    out = jax.block_until_ready(fwd(params, x))

    ref = jax.block_until_ready(
        jax.jit(lambda p, xx: icnn_forward_ref(p, xx, strong_convexity=0.5))(params, x))

    np.testing.assert_allclose(np.asarray(out), np.asarray(ref), rtol=1e-3, atol=3e-5)
    print("KERNEL_OK")
</pallas_src>

<mosaic_0001>
module attributes {stable_mosaic.version = 11 : i64} {
  func.func @probe_kernel(%arg0: memref<8x128xf32, #tpu.memory_space<vmem>>, %arg1: memref<8x128xf32, #tpu.memory_space<vmem>>) attributes {dimension_semantics = [], scalar_prefetch = 0 : i64, scratch_operands = 0 : i64, tpu.core_type = #tpu.core_type<tc>} {
    %c0 = arith.constant 0 : index
    %c0_0 = arith.constant 0 : index
    %0 = vector.load %arg0[%c0, %c0_0] : memref<8x128xf32, #tpu.memory_space<vmem>>, vector<8x128xf32>
    %c1_i32 = arith.constant 1 : i32
    %1 = tpu.dynamic_rotate %0 by %c1_i32 dim 1 : vector<8x128xf32>, i32 -> vector<8x128xf32>
    %c0_1 = arith.constant 0 : index
    %c0_2 = arith.constant 0 : index
    %2 = vector.load %arg1[%c0_1, %c0_2] : memref<8x128xf32, #tpu.memory_space<vmem>>, vector<8x128xf32>
    tpu.vector_store %arg1[%c0_1, %c0_2], %1 {strides = array<i32>} : memref<8x128xf32, #tpu.memory_space<vmem>>, vector<8x128xf32>,
    return
  }
}

module attributes {stable_mosaic.version = 11 : i64} {
  func.func @kernel(%arg0: i32, %arg1: memref<26x256xf32, #tpu.memory_space<vmem>>, %arg2: memref<64x26xf32, #tpu.memory_space<vmem>>, %arg3: memref<3x8x200xf32, #tpu.memory_space<vmem>>, %arg4: memref<3x9x400xf32, #tpu.memory_space<vmem>>, %arg5: memref<1x400xf32, #tpu.memory_space<vmem>>, %arg6: memref<8x1xf32, #tpu.memory_space<vmem>>, %arg7: memref<1x256xf32, #tpu.memory_space<vmem>>, %arg8: memref<4x16x256xf32, #tpu.memory_space<vmem>>) attributes {dimension_semantics = [#tpu.dimension_semantics<parallel>], iteration_bounds = array<i64: 2>, scalar_prefetch = 0 : i64, scratch_operands = 1 : i64, tpu.core_type = #tpu.core_type<tc>, window_params = [{transform_indices = @transform_0, window_bounds = array<i64: 26, 256>}, {pipeline_mode = #tpu.pipeline_mode<synchronous>, transform_indices = @transform_1, window_bounds = array<i64: 64, 26>}, {pipeline_mode = #tpu.pipeline_mode<synchronous>, transform_indices = @transform_2, window_bounds = array<i64: 3, 8, 200>}, {pipeline_mode = #tpu.pipeline_mode<synchronous>, transform_indices = @transform_3, window_bounds = array<i64: 3, 9, 400>}, {pipeline_mode = #tpu.pipeline_mode<synchronous>, transform_indices = @transform_4, window_bounds = array<i64: 1, 400>}, {pipeline_mode = #tpu.pipeline_mode<synchronous>, transform_indices = @transform_5, window_bounds = array<i64: 8, 1>}, {transform_indices = @transform_6, window_bounds = array<i64: 1, 256>}]} {
    %c0 = arith.constant 0 : index
    %c0_0 = arith.constant 0 : index
    %0 = vector.load %arg1[%c0, %c0_0] : memref<26x256xf32, #tpu.memory_space<vmem>>, vector<26x256xf32>
    %1 = tpu.iota {dimensions = array<i32: 1>} : vector<1x256xi32>
    %c16_i32 = arith.constant 16 : i32
    %c0_i32 = arith.constant 0 : i32
    %2 = arith.cmpi eq, %c16_i32, %c0_i32 : i32
    %c1_i32 = arith.constant 1 : i32
    %3 = arith.select %2, %c1_i32, %c16_i32 : i32
    %4 = vector.broadcast %3 : i32 to vector<1x256xi32>
    %5 = arith.remsi %1, %4 : vector<1x256xi32>
    %c0_i32_1 = arith.constant 0 : i32
    %6 = vector.broadcast %c0_i32_1 : i32 to vector<1x256xi32>
    %7 = arith.cmpi ne, %5, %6 : vector<1x256xi32>
    %c0_i32_2 = arith.constant 0 : i32
    %8 = vector.broadcast %c0_i32_2 : i32 to vector<1x256xi32>
    %9 = arith.cmpi slt, %5, %8 : vector<1x256xi32>
    %c0_i32_3 = arith.constant 0 : i32
    %10 = arith.cmpi slt, %3, %c0_i32_3 : i32
    %11 = vector.broadcast %10 : i1 to vector<1x256xi1>
    %12 = vector.broadcast %11 : vector<1x256xi1> to vector<1x256xi1>
    %13 = arith.xori %9, %12 : vector<1x256xi1>
    %14 = arith.andi %13, %7 : vector<1x256xi1>
    %15 = vector.broadcast %3 : i32 to vector<1x256xi32>
    %16 = arith.addi %5, %15 : vector<1x256xi32>
    %17 = arith.select %14, %16, %5 : vector<1x256xi1>, vector<1x256xi32>
    %c15_i32 = arith.constant 15 : i32
    %18 = vector.broadcast %c15_i32 : i32 to vector<1x256xi32>
    %19 = arith.cmpi sge, %17, %18 : vector<1x256xi32>
    %20 = vector.shape_cast %19 : vector<1x256xi1> to vector<1x256xi1>
    %21 = vector.broadcast %20 : vector<1x256xi1> to vector<8x256xi1>
    %c14_i32 = arith.constant 14 : i32
    %22 = vector.broadcast %c14_i32 : i32 to vector<1x256xi32>
    %23 = arith.cmpi sge, %17, %22 : vector<1x256xi32>
    %24 = vector.shape_cast %23 : vector<1x256xi1> to vector<1x256xi1>
    %25 = vector.broadcast %24 : vector<1x256xi1> to vector<8x256xi1>
    %c1_i32_4 = arith.constant 1 : i32
    %26 = vector.broadcast %c1_i32_4 : i32 to vector<1x256xi32>
    %27 = arith.cmpi slt, %17, %26 : vector<1x256xi32>
    %28 = vector.shape_cast %27 : vector<1x256xi1> to vector<1x256xi1>
    %29 = vector.broadcast %28 : vector<1x256xi1> to vector<8x256xi1>
    %c2_i32 = arith.constant 2 : i32
    %30 = vector.broadcast %c2_i32 : i32 to vector<1x256xi32>
    %31 = arith.cmpi slt, %17, %30 : vector<1x256xi32>
    %32 = vector.shape_cast %31 : vector<1x256xi1> to vector<1x256xi1>
    %33 = vector.broadcast %32 : vector<1x256xi1> to vector<8x256xi1>
    %c15_i32_5 = arith.constant 15 : i32
    %34 = vector.broadcast %c15_i32_5 : i32 to vector<1x256xi32>
    %35 = arith.cmpi sge, %17, %34 : vector<1x256xi32>
    %36 = vector.shape_cast %35 : vector<1x256xi1> to vector<1x256xi1>
    %37 = vector.broadcast %36 : vector<1x256xi1> to vector<16x256xi1>
    %c14_i32_6 = arith.constant 14 : i32
    %38 = vector.broadcast %c14_i32_6 : i32 to vector<1x256xi32>
    %39 = arith.cmpi sge, %17, %38 : vector<1x256xi32>
    %40 = vector.shape_cast %39 : vector<1x256xi1> to vector<1x256xi1>
    %41 = vector.broadcast %40 : vector<1x256xi1> to vector<16x256xi1>
    %c1_i32_7 = arith.constant 1 : i32
    %42 = vector.broadcast %c1_i32_7 : i32 to vector<1x256xi32>
    %43 = arith.cmpi slt, %17, %42 : vector<1x256xi32>
    %44 = vector.shape_cast %43 : vector<1x256xi1> to vector<1x256xi1>
    %45 = vector.broadcast %44 : vector<1x256xi1> to vector<16x256xi1>
    %c2_i32_8 = arith.constant 2 : i32
    %46 = vector.broadcast %c2_i32_8 : i32 to vector<1x256xi32>
    %47 = arith.cmpi slt, %17, %46 : vector<1x256xi32>
    %48 = vector.shape_cast %47 : vector<1x256xi1> to vector<1x256xi1>
    %49 = vector.broadcast %48 : vector<1x256xi1> to vector<16x256xi1>
    %c0_9 = arith.constant 0 : index
    %c0_10 = arith.constant 0 : index
    %50 = vector.load %arg2[%c0_9, %c0_10] : memref<64x26xf32, #tpu.memory_space<vmem>>, vector<64x26xf32>
    %cst = arith.constant dense<0.000000e+00> : vector<64x256xf32>
    %51 = tpu.matmul %50, %0, %cst {dimension_numbers = #tpu.dot_dimension_numbers<[1], [0], [0], [1], [0, 0, 1, 1], [], []>} : vector<64x26xf32>, vector<26x256xf32>, vector<64x256xf32> -> vector<64x256xf32>
    %52 = vector.extract_strided_slice %51 {offsets = [0, 0], sizes = [8, 256], strides = [1, 1]} : vector<64x256xf32> to vector<8x256xf32>
    %53 = arith.mulf %52, %52 : vector<8x256xf32>
    %54 = vector.extract_strided_slice %51 {offsets = [8, 0], sizes = [8, 256], strides = [1, 1]} : vector<64x256xf32> to vector<8x256xf32>
    %55 = arith.addf %53, %54 : vector<8x256xf32>
    %cst_11 = arith.constant 0.000000e+00 : f32
    %56 = vector.broadcast %cst_11 : f32 to vector<8x256xf32>
    %57 = arith.cmpf ogt, %55, %56 : vector<8x256xf32>
    %cst_12 = arith.constant 1.000000e+00 : f32
    %cst_13 = arith.constant 2.000000e-01 : f32
    %58 = vector.broadcast %cst_12 : f32 to vector<8x256xf32>
    %59 = vector.broadcast %cst_13 : f32 to vector<8x256xf32>
    %60 = arith.select %57, %58, %59 : vector<8x256xi1>, vector<8x256xf32>
    %cst_14 = arith.constant 2.000000e+00 : f32
    %61 = vector.broadcast %cst_14 : f32 to vector<8x256xf32>
    %62 = arith.mulf %61, %52 : vector<8x256xf32>
    %63 = arith.mulf %62, %60 : vector<8x256xf32>
    %64 = tpu.concatenate %63, %60 in 0 : vector<8x256xf32>, vector<8x256xf32> -> vector<16x256xf32>
    %c0_15 = arith.constant 0 : index
    %c0_16 = arith.constant 0 : index
    %c0_17 = arith.constant 0 : index
    %65 = vector.load %arg8[%c0_15, %c0_16, %c0_17] : memref<4x16x256xf32, #tpu.memory_space<vmem>>, vector<1x16x256xf32>
    %66 = vector.shape_cast %65 : vector<1x16x256xf32> to vector<16x256xf32>
    %67 = vector.shape_cast %64 : vector<16x256xf32> to vector<1x16x256xf32>
    tpu.vector_store %arg8[%c0_15, %c0_16, %c0_17], %67 {strides = array<i32>} : memref<4x16x256xf32, #tpu.memory_space<vmem>>, vector<1x16x256xf32>,
    %68 = arith.mulf %60, %55 : vector<8x256xf32>
    %c0_18 = arith.constant 0 : index
    %c0_19 = arith.constant 0 : index
    %c0_20 = arith.constant 0 : index
    %69 = vector.load %arg3[%c0_18, %c0_19, %c0_20] : memref<3x8x200xf32, #tpu.memory_space<vmem>>, vector<1x8x200xf32>
    %70 = vector.shape_cast %69 : vector<1x8x200xf32> to vector<8x200xf32>
    %c242_i32 = arith.constant 242 : i32
    %71 = tpu.dynamic_rotate %68 by %c242_i32 dim 1 : vector<8x256xf32>, i32 -> vector<8x256xf32>
    %c2_i32_21 = arith.constant 2 : i32
    %72 = tpu.dynamic_rotate %68 by %c2_i32_21 dim 1 : vector<8x256xf32>, i32 -> vector<8x256xf32>
    %73 = arith.select %33, %71, %72 : vector<8x256xi1>, vector<8x256xf32>
    %c241_i32 = arith.constant 241 : i32
    %74 = tpu.dynamic_rotate %68 by %c241_i32 dim 1 : vector<8x256xf32>, i32 -> vector<8x256xf32>
    %c1_i32_22 = arith.constant 1 : i32
    %75 = tpu.dynamic_rotate %68 by %c1_i32_22 dim 1 : vector<8x256xf32>, i32 -> vector<8x256xf32>
    %76 = arith.select %29, %74, %75 : vector<8x256xi1>, vector<8x256xf32>
    %c15_i32_23 = arith.constant 15 : i32
    %77 = tpu.dynamic_rotate %68 by %c15_i32_23 dim 1 : vector<8x256xf32>, i32 -> vector<8x256xf32>
    %c255_i32 = arith.constant 255 : i32
    %78 = tpu.dynamic_rotate %68 by %c255_i32 dim 1 : vector<8x256xf32>, i32 -> vector<8x256xf32>
    %79 = arith.select %21, %77, %78 : vector<8x256xi1>, vector<8x256xf32>
    %c14_i32_24 = arith.constant 14 : i32
    %80 = tpu.dynamic_rotate %68 by %c14_i32_24 dim 1 : vector<8x256xf32>, i32 -> vector<8x256xf32>
    %c254_i32 = arith.constant 254 : i32
    %81 = tpu.dynamic_rotate %68 by %c254_i32 dim 1 : vector<8x256xf32>, i32 -> vector<8x256xf32>
    %82 = arith.select %25, %80, %81 : vector<8x256xi1>, vector<8x256xf32>
    %c32_i32 = arith.constant 32 : i32
    %83 = tpu.dynamic_rotate %73 by %c32_i32 dim 1 : vector<8x256xf32>, i32 -> vector<8x256xf32>
    %c32_i32_25 = arith.constant 32 : i32
    %84 = tpu.dynamic_rotate %76 by %c32_i32_25 dim 1 : vector<8x256xf32>, i32 -> vector<8x256xf32>
    %c32_i32_26 = arith.constant 32 : i32
    %85 = tpu.dynamic_rotate %68 by %c32_i32_26 dim 1 : vector<8x256xf32>, i32 -> vector<8x256xf32>
    %c32_i32_27 = arith.constant 32 : i32
    %86 = tpu.dynamic_rotate %79 by %c32_i32_27 dim 1 : vector<8x256xf32>, i32 -> vector<8x256xf32>
    %c32_i32_28 = arith.constant 32 : i32
    %87 = tpu.dynamic_rotate %82 by %c32_i32_28 dim 1 : vector<8x256xf32>, i32 -> vector<8x256xf32>
    %c16_i32_29 = arith.constant 16 : i32
    %88 = tpu.dynamic_rotate %73 by %c16_i32_29 dim 1 : vector<8x256xf32>, i32 -> vector<8x256xf32>
    %c16_i32_30 = arith.constant 16 : i32
    %89 = tpu.dynamic_rotate %76 by %c16_i32_30 dim 1 : vector<8x256xf32>, i32 -> vector<8x256xf32>
    %c16_i32_31 = arith.constant 16 : i32
    %90 = tpu.dynamic_rotate %68 by %c16_i32_31 dim 1 : vector<8x256xf32>, i32 -> vector<8x256xf32>
    %c16_i32_32 = arith.constant 16 : i32
    %91 = tpu.dynamic_rotate %79 by %c16_i32_32 dim 1 : vector<8x256xf32>, i32 -> vector<8x256xf32>
    %c16_i32_33 = arith.constant 16 : i32
    %92 = tpu.dynamic_rotate %82 by %c16_i32_33 dim 1 : vector<8x256xf32>, i32 -> vector<8x256xf32>
    %c240_i32 = arith.constant 240 : i32
    %93 = tpu.dynamic_rotate %73 by %c240_i32 dim 1 : vector<8x256xf32>, i32 -> vector<8x256xf32>
    %c240_i32_34 = arith.constant 240 : i32
    %94 = tpu.dynamic_rotate %76 by %c240_i32_34 dim 1 : vector<8x256xf32>, i32 -> vector<8x256xf32>
    %c240_i32_35 = arith.constant 240 : i32
    %95 = tpu.dynamic_rotate %68 by %c240_i32_35 dim 1 : vector<8x256xf32>, i32 -> vector<8x256xf32>
    %c240_i32_36 = arith.constant 240 : i32
    %96 = tpu.dynamic_rotate %79 by %c240_i32_36 dim 1 : vector<8x256xf32>, i32 -> vector<8x256xf32>
    %c240_i32_37 = arith.constant 240 : i32
    %97 = tpu.dynamic_rotate %82 by %c240_i32_37 dim 1 : vector<8x256xf32>, i32 -> vector<8x256xf32>
    %c224_i32 = arith.constant 224 : i32
    %98 = tpu.dynamic_rotate %73 by %c224_i32 dim 1 : vector<8x256xf32>, i32 -> vector<8x256xf32>
    %c224_i32_38 = arith.constant 224 : i32
    %99 = tpu.dynamic_rotate %76 by %c224_i32_38 dim 1 : vector<8x256xf32>, i32 -> vector<8x256xf32>
    %c224_i32_39 = arith.constant 224 : i32
    %100 = tpu.dynamic_rotate %68 by %c224_i32_39 dim 1 : vector<8x256xf32>, i32 -> vector<8x256xf32>
    %c224_i32_40 = arith.constant 224 : i32
    %101 = tpu.dynamic_rotate %79 by %c224_i32_40 dim 1 : vector<8x256xf32>, i32 -> vector<8x256xf32>
    %c224_i32_41 = arith.constant 224 : i32
    %102 = tpu.dynamic_rotate %82 by %c224_i32_41 dim 1 : vector<8x256xf32>, i32 -> vector<8x256xf32>
    %103 = tpu.concatenate %83, %84, %85, %86, %87, %88, %89, %90, %91, %92, %73, %76, %68, %79, %82, %93 in 0 : vector<8x256xf32>, vector<8x256xf32>, vector<8x256xf32>, vector<8x256xf32>, vector<8x256xf32>, vector<8x256xf32>, vector<8x256xf32>, vector<8x256xf32>, vector<8x256xf32>, vector<8x256xf32>, vector<8x256xf32>, vector<8x256xf32>, vector<8x256xf32>, vector<8x256xf32>, vector<8x256xf32>, vector<8x256xf32> -> vector<128x256xf32>
    %104 = tpu.concatenate %94, %95, %96, %97, %98, %99, %100, %101, %102 in 0 : vector<8x256xf32>, vector<8x256xf32>, vector<8x256xf32>, vector<8x256xf32>, vector<8x256xf32>, vector<8x256xf32>, vector<8x256xf32>, vector<8x256xf32>, vector<8x256xf32> -> vector<72x256xf32>
    %105 = tpu.concatenate %103, %104 in 0 : vector<128x256xf32>, vector<72x256xf32> -> vector<200x256xf32>
    %cst_42 = arith.constant dense<0.000000e+00> : vector<8x256xf32>
    %106 = tpu.matmul %70, %105, %cst_42 {dimension_numbers = #tpu.dot_dimension_numbers<[1], [0], [0], [1], [0, 0, 1, 1], [], []>} : vector<8x200xf32>, vector<200x256xf32>, vector<8x256xf32> -> vector<8x256xf32>
    %107 = vector.extract_strided_slice %51 {offsets = [16, 0], sizes = [8, 256], strides = [1, 1]} : vector<64x256xf32> to vector<8x256xf32>
    %108 = arith.mulf %107, %107 : vector<8x256xf32>
    %109 = arith.addf %106, %108 : vector<8x256xf32>
    %110 = vector.extract_strided_slice %51 {offsets = [24, 0], sizes = [8, 256], strides = [1, 1]} : vector<64x256xf32> to vector<8x256xf32>
    %111 = arith.addf %109, %110 : vector<8x256xf32>
    %cst_43 = arith.constant 0.000000e+00 : f32
    %112 = vector.broadcast %cst_43 : f32 to vector<8x256xf32>
    %113 = arith.cmpf ogt, %111, %112 : vector<8x256xf32>
    %cst_44 = arith.constant 1.000000e+00 : f32
    %cst_45 = arith.constant 2.000000e-01 : f32
    %114 = vector.broadcast %cst_44 : f32 to vector<8x256xf32>
    %115 = vector.broadcast %cst_45 : f32 to vector<8x256xf32>
    %116 = arith.select %113, %114, %115 : vector<8x256xi1>, vector<8x256xf32>
    %cst_46 = arith.constant 2.000000e+00 : f32
    %117 = vector.broadcast %cst_46 : f32 to vector<8x256xf32>
    %118 = arith.mulf %117, %107 : vector<8x256xf32>
    %119 = arith.mulf %118, %116 : vector<8x256xf32>
    %120 = tpu.concatenate %119, %116 in 0 : vector<8x256xf32>, vector<8x256xf32> -> vector<16x256xf32>
    %c1 = arith.constant 1 : index
    %c0_47 = arith.constant 0 : index
    %c0_48 = arith.constant 0 : index
    %121 = vector.load %arg8[%c1, %c0_47, %c0_48] : memref<4x16x256xf32, #tpu.memory_space<vmem>>, vector<1x16x256xf32>
    %122 = vector.shape_cast %121 : vector<1x16x256xf32> to vector<16x256xf32>
    %123 = vector.shape_cast %120 : vector<16x256xf32> to vector<1x16x256xf32>
    tpu.vector_store %arg8[%c1, %c0_47, %c0_48], %123 {strides = array<i32>} : memref<4x16x256xf32, #tpu.memory_space<vmem>>, vector<1x16x256xf32>,
    %124 = arith.mulf %116, %111 : vector<8x256xf32>
    %c1_49 = arith.constant 1 : index
    %c0_50 = arith.constant 0 : index
    %c0_51 = arith.constant 0 : index
    %125 = vector.load %arg3[%c1_49, %c0_50, %c0_51] : memref<3x8x200xf32, #tpu.memory_space<vmem>>, vector<1x8x200xf32>
    %126 = vector.shape_cast %125 : vector<1x8x200xf32> to vector<8x200xf32>
    %c242_i32_52 = arith.constant 242 : i32
    %127 = tpu.dynamic_rotate %124 by %c242_i32_52 dim 1 : vector<8x256xf32>, i32 -> vector<8x256xf32>
    %c2_i32_53 = arith.constant 2 : i32
    %128 = tpu.dynamic_rotate %124 by %c2_i32_53 dim 1 : vector<8x256xf32>, i32 -> vector<8x256xf32>
    %129 = arith.select %33, %127, %128 : vector<8x256xi1>, vector<8x256xf32>
    %c241_i32_54 = arith.constant 241 : i32
    %130 = tpu.dynamic_rotate %124 by %c241_i32_54 dim 1 : vector<8x256xf32>, i32 -> vector<8x256xf32>
    %c1_i32_55 = arith.constant 1 : i32
    %131 = tpu.dynamic_rotate %124 by %c1_i32_55 dim 1 : vector<8x256xf32>, i32 -> vector<8x256xf32>
    %132 = arith.select %29, %130, %131 : vector<8x256xi1>, vector<8x256xf32>
    %c15_i32_56 = arith.constant 15 : i32
    %133 = tpu.dynamic_rotate %124 by %c15_i32_56 dim 1 : vector<8x256xf32>, i32 -> vector<8x256xf32>
    %c255_i32_57 = arith.constant 255 : i32
    %134 = tpu.dynamic_rotate %124 by %c255_i32_57 dim 1 : vector<8x256xf32>, i32 -> vector<8x256xf32>
    %135 = arith.select %21, %133, %134 : vector<8x256xi1>, vector<8x256xf32>
    %c14_i32_58 = arith.constant 14 : i32
    %136 = tpu.dynamic_rotate %124 by %c14_i32_58 dim 1 : vector<8x256xf32>, i32 -> vector<8x256xf32>
    %c254_i32_59 = arith.constant 254 : i32
    %137 = tpu.dynamic_rotate %124 by %c254_i32_59 dim 1 : vector<8x256xf32>, i32 -> vector<8x256xf32>
    %138 = arith.select %25, %136, %137 : vector<8x256xi1>, vector<8x256xf32>
    %c32_i32_60 = arith.constant 32 : i32
    %139 = tpu.dynamic_rotate %129 by %c32_i32_60 dim 1 : vector<8x256xf32>, i32 -> vector<8x256xf32>
    %c32_i32_61 = arith.constant 32 : i32
    %140 = tpu.dynamic_rotate %132 by %c32_i32_61 dim 1 : vector<8x256xf32>, i32 -> vector<8x256xf32>
    %c32_i32_62 = arith.constant 32 : i32
    %141 = tpu.dynamic_rotate %124 by %c32_i32_62 dim 1 : vector<8x256xf32>, i32 -> vector<8x256xf32>
    %c32_i32_63 = arith.constant 32 : i32
    %142 = tpu.dynamic_rotate %135 by %c32_i32_63 dim 1 : vector<8x256xf32>, i32 -> vector<8x256xf32>
    %c32_i32_64 = arith.constant 32 : i32
    %143 = tpu.dynamic_rotate %138 by %c32_i32_64 dim 1 : vector<8x256xf32>, i32 -> vector<8x256xf32>
    %c16_i32_65 = arith.constant 16 : i32
    %144 = tpu.dynamic_rotate %129 by %c16_i32_65 dim 1 : vector<8x256xf32>, i32 -> vector<8x256xf32>
    %c16_i32_66 = arith.constant 16 : i32
    %145 = tpu.dynamic_rotate %132 by %c16_i32_66 dim 1 : vector<8x256xf32>, i32 -> vector<8x256xf32>
    %c16_i32_67 = arith.constant 16 : i32
    %146 = tpu.dynamic_rotate %124 by %c16_i32_67 dim 1 : vector<8x256xf32>, i32 -> vector<8x256xf32>
    %c16_i32_68 = arith.constant 16 : i32
    %147 = tpu.dynamic_rotate %135 by %c16_i32_68 dim 1 : vector<8x256xf32>, i32 -> vector<8x256xf32>
    %c16_i32_69 = arith.constant 16 : i32
    %148 = tpu.dynamic_rotate %138 by %c16_i32_69 dim 1 : vector<8x256xf32>, i32 -> vector<8x256xf32>
    %c240_i32_70 = arith.constant 240 : i32
    %149 = tpu.dynamic_rotate %129 by %c240_i32_70 dim 1 : vector<8x256xf32>, i32 -> vector<8x256xf32>
    %c240_i32_71 = arith.constant 240 : i32
    %150 = tpu.dynamic_rotate %132 by %c240_i32_71 dim 1 : vector<8x256xf32>, i32 -> vector<8x256xf32>
    %c240_i32_72 = arith.constant 240 : i32
    %151 = tpu.dynamic_rotate %124 by %c240_i32_72 dim 1 : vector<8x256xf32>, i32 -> vector<8x256xf32>
    %c240_i32_73 = arith.constant 240 : i32
    %152 = tpu.dynamic_rotate %135 by %c240_i32_73 dim 1 : vector<8x256xf32>, i32 -> vector<8x256xf32>
    %c240_i32_74 = arith.constant 240 : i32
    %153 = tpu.dynamic_rotate %138 by %c240_i32_74 dim 1 : vector<8x256xf32>, i32 -> vector<8x256xf32>
    %c224_i32_75 = arith.constant 224 : i32
    %154 = tpu.dynamic_rotate %129 by %c224_i32_75 dim 1 : vector<8x256xf32>, i32 -> vector<8x256xf32>
    %c224_i32_76 = arith.constant 224 : i32
    %155 = tpu.dynamic_rotate %132 by %c224_i32_76 dim 1 : vector<8x256xf32>, i32 -> vector<8x256xf32>
    %c224_i32_77 = arith.constant 224 : i32
    %156 = tpu.dynamic_rotate %124 by %c224_i32_77 dim 1 : vector<8x256xf32>, i32 -> vector<8x256xf32>
    %c224_i32_78 = arith.constant 224 : i32
    %157 = tpu.dynamic_rotate %135 by %c224_i32_78 dim 1 : vector<8x256xf32>, i32 -> vector<8x256xf32>
    %c224_i32_79 = arith.constant 224 : i32
    %158 = tpu.dynamic_rotate %138 by %c224_i32_79 dim 1 : vector<8x256xf32>, i32 -> vector<8x256xf32>
    %159 = tpu.concatenate %139, %140, %141, %142, %143, %144, %145, %146, %147, %148, %129, %132, %124, %135, %138, %149 in 0 : vector<8x256xf32>, vector<8x256xf32>, vector<8x256xf32>, vector<8x256xf32>, vector<8x256xf32>, vector<8x256xf32>, vector<8x256xf32>, vector<8x256xf32>, vector<8x256xf32>, vector<8x256xf32>, vector<8x256xf32>, vector<8x256xf32>, vector<8x256xf32>, vector<8x256xf32>, vector<8x256xf32>, vector<8x256xf32> -> vector<128x256xf32>
    %160 = tpu.concatenate %150, %151, %152, %153, %154, %155, %156, %157, %158 in 0 : vector<8x256xf32>, vector<8x256xf32>, vector<8x256xf32>, vector<8x256xf32>, vector<8x256xf32>, vector<8x256xf32>, vector<8x256xf32>, vector<8x256xf32>, vector<8x256xf32> -> vector<72x256xf32>
    %161 = tpu.concatenate %159, %160 in 0 : vector<128x256xf32>, vector<72x256xf32> -> vector<200x256xf32>
    %cst_80 = arith.constant dense<0.000000e+00> : vector<8x256xf32>
    %162 = tpu.matmul %126, %161, %cst_80 {dimension_numbers = #tpu.dot_dimension_numbers<[1], [0], [0], [1], [0, 0, 1, 1], [], []>} : vector<8x200xf32>, vector<200x256xf32>, vector<8x256xf32> -> vector<8x256xf32>
    %163 = vector.extract_strided_slice %51 {offsets = [32, 0], sizes = [8, 256], strides = [1, 1]} : vector<64x256xf32> to vector<8x256xf32>
    %164 = arith.mulf %163, %163 : vector<8x256xf32>
    %165 = arith.addf %162, %164 : vector<8x256xf32>
    %166 = vector.extract_strided_slice %51 {offsets = [40, 0], sizes = [8, 256], strides = [1, 1]} : vector<64x256xf32> to vector<8x256xf32>
    %167 = arith.addf %165, %166 : vector<8x256xf32>
    %cst_81 = arith.constant 0.000000e+00 : f32
    %168 = vector.broadcast %cst_81 : f32 to vector<8x256xf32>
    %169 = arith.cmpf ogt, %167, %168 : vector<8x256xf32>
    %cst_82 = arith.constant 1.000000e+00 : f32
    %cst_83 = arith.constant 2.000000e-01 : f32
    %170 = vector.broadcast %cst_82 : f32 to vector<8x256xf32>
    %171 = vector.broadcast %cst_83 : f32 to vector<8x256xf32>
    %172 = arith.select %169, %170, %171 : vector<8x256xi1>, vector<8x256xf32>
    %cst_84 = arith.constant 2.000000e+00 : f32
    %173 = vector.broadcast %cst_84 : f32 to vector<8x256xf32>
    %174 = arith.mulf %173, %163 : vector<8x256xf32>
    %175 = arith.mulf %174, %172 : vector<8x256xf32>
    %176 = tpu.concatenate %175, %172 in 0 : vector<8x256xf32>, vector<8x256xf32> -> vector<16x256xf32>
    %c2 = arith.constant 2 : index
    %c0_85 = arith.constant 0 : index
    %c0_86 = arith.constant 0 : index
    %177 = vector.load %arg8[%c2, %c0_85, %c0_86] : memref<4x16x256xf32, #tpu.memory_space<vmem>>, vector<1x16x256xf32>
    %178 = vector.shape_cast %177 : vector<1x16x256xf32> to vector<16x256xf32>
    %179 = vector.shape_cast %176 : vector<16x256xf32> to vector<1x16x256xf32>
    tpu.vector_store %arg8[%c2, %c0_85, %c0_86], %179 {strides = array<i32>} : memref<4x16x256xf32, #tpu.memory_space<vmem>>, vector<1x16x256xf32>,
    %180 = arith.mulf %172, %167 : vector<8x256xf32>
    %c2_87 = arith.constant 2 : index
    %c0_88 = arith.constant 0 : index
    %c0_89 = arith.constant 0 : index
    %181 = vector.load %arg3[%c2_87, %c0_88, %c0_89] : memref<3x8x200xf32, #tpu.memory_space<vmem>>, vector<1x8x200xf32>
    %182 = vector.shape_cast %181 : vector<1x8x200xf32> to vector<8x200xf32>
    %c242_i32_90 = arith.constant 242 : i32
    %183 = tpu.dynamic_rotate %180 by %c242_i32_90 dim 1 : vector<8x256xf32>, i32 -> vector<8x256xf32>
    %c2_i32_91 = arith.constant 2 : i32
    %184 = tpu.dynamic_rotate %180 by %c2_i32_91 dim 1 : vector<8x256xf32>, i32 -> vector<8x256xf32>
    %185 = arith.select %33, %183, %184 : vector<8x256xi1>, vector<8x256xf32>
    %c241_i32_92 = arith.constant 241 : i32
    %186 = tpu.dynamic_rotate %180 by %c241_i32_92 dim 1 : vector<8x256xf32>, i32 -> vector<8x256xf32>
    %c1_i32_93 = arith.constant 1 : i32
    %187 = tpu.dynamic_rotate %180 by %c1_i32_93 dim 1 : vector<8x256xf32>, i32 -> vector<8x256xf32>
    %188 = arith.select %29, %186, %187 : vector<8x256xi1>, vector<8x256xf32>
    %c15_i32_94 = arith.constant 15 : i32
    %189 = tpu.dynamic_rotate %180 by %c15_i32_94 dim 1 : vector<8x256xf32>, i32 -> vector<8x256xf32>
    %c255_i32_95 = arith.constant 255 : i32
    %190 = tpu.dynamic_rotate %180 by %c255_i32_95 dim 1 : vector<8x256xf32>, i32 -> vector<8x256xf32>
    %191 = arith.select %21, %189, %190 : vector<8x256xi1>, vector<8x256xf32>
    %c14_i32_96 = arith.constant 14 : i32
    %192 = tpu.dynamic_rotate %180 by %c14_i32_96 dim 1 : vector<8x256xf32>, i32 -> vector<8x256xf32>
    %c254_i32_97 = arith.constant 254 : i32
    %193 = tpu.dynamic_rotate %180 by %c254_i32_97 dim 1 : vector<8x256xf32>, i32 -> vector<8x256xf32>
    %194 = arith.select %25, %192, %193 : vector<8x256xi1>, vector<8x256xf32>
    %c32_i32_98 = arith.constant 32 : i32
    %195 = tpu.dynamic_rotate %185 by %c32_i32_98 dim 1 : vector<8x256xf32>, i32 -> vector<8x256xf32>
    %c32_i32_99 = arith.constant 32 : i32
    %196 = tpu.dynamic_rotate %188 by %c32_i32_99 dim 1 : vector<8x256xf32>, i32 -> vector<8x256xf32>
    %c32_i32_100 = arith.constant 32 : i32
    %197 = tpu.dynamic_rotate %180 by %c32_i32_100 dim 1 : vector<8x256xf32>, i32 -> vector<8x256xf32>
    %c32_i32_101 = arith.constant 32 : i32
    %198 = tpu.dynamic_rotate %191 by %c32_i32_101 dim 1 : vector<8x256xf32>, i32 -> vector<8x256xf32>
    %c32_i32_102 = arith.constant 32 : i32
    %199 = tpu.dynamic_rotate %194 by %c32_i32_102 dim 1 : vector<8x256xf32>, i32 -> vector<8x256xf32>
    %c16_i32_103 = arith.constant 16 : i32
    %200 = tpu.dynamic_rotate %185 by %c16_i32_103 dim 1 : vector<8x256xf32>, i32 -> vector<8x256xf32>
    %c16_i32_104 = arith.constant 16 : i32
    %201 = tpu.dynamic_rotate %188 by %c16_i32_104 dim 1 : vector<8x256xf32>, i32 -> vector<8x256xf32>
    %c16_i32_105 = arith.constant 16 : i32
    %202 = tpu.dynamic_rotate %180 by %c16_i32_105 dim 1 : vector<8x256xf32>, i32 -> vector<8x256xf32>
    %c16_i32_106 = arith.constant 16 : i32
    %203 = tpu.dynamic_rotate %191 by %c16_i32_106 dim 1 : vector<8x256xf32>, i32 -> vector<8x256xf32>
    %c16_i32_107 = arith.constant 16 : i32
    %204 = tpu.dynamic_rotate %194 by %c16_i32_107 dim 1 : vector<8x256xf32>, i32 -> vector<8x256xf32>
    %c240_i32_108 = arith.constant 240 : i32
    %205 = tpu.dynamic_rotate %185 by %c240_i32_108 dim 1 : vector<8x256xf32>, i32 -> vector<8x256xf32>
    %c240_i32_109 = arith.constant 240 : i32
    %206 = tpu.dynamic_rotate %188 by %c240_i32_109 dim 1 : vector<8x256xf32>, i32 -> vector<8x256xf32>
    %c240_i32_110 = arith.constant 240 : i32
    %207 = tpu.dynamic_rotate %180 by %c240_i32_110 dim 1 : vector<8x256xf32>, i32 -> vector<8x256xf32>
    %c240_i32_111 = arith.constant 240 : i32
    %208 = tpu.dynamic_rotate %191 by %c240_i32_111 dim 1 : vector<8x256xf32>, i32 -> vector<8x256xf32>
    %c240_i32_112 = arith.constant 240 : i32
    %209 = tpu.dynamic_rotate %194 by %c240_i32_112 dim 1 : vector<8x256xf32>, i32 -> vector<8x256xf32>
    %c224_i32_113 = arith.constant 224 : i32
    %210 = tpu.dynamic_rotate %185 by %c224_i32_113 dim 1 : vector<8x256xf32>, i32 -> vector<8x256xf32>
    %c224_i32_114 = arith.constant 224 : i32
    %211 = tpu.dynamic_rotate %188 by %c224_i32_114 dim 1 : vector<8x256xf32>, i32 -> vector<8x256xf32>
    %c224_i32_115 = arith.constant 224 : i32
    %212 = tpu.dynamic_rotate %180 by %c224_i32_115 dim 1 : vector<8x256xf32>, i32 -> vector<8x256xf32>
    %c224_i32_116 = arith.constant 224 : i32
    %213 = tpu.dynamic_rotate %191 by %c224_i32_116 dim 1 : vector<8x256xf32>, i32 -> vector<8x256xf32>
    %c224_i32_117 = arith.constant 224 : i32
    %214 = tpu.dynamic_rotate %194 by %c224_i32_117 dim 1 : vector<8x256xf32>, i32 -> vector<8x256xf32>
    %215 = tpu.concatenate %195, %196, %197, %198, %199, %200, %201, %202, %203, %204, %185, %188, %180, %191, %194, %205 in 0 : vector<8x256xf32>, vector<8x256xf32>, vector<8x256xf32>, vector<8x256xf32>, vector<8x256xf32>, vector<8x256xf32>, vector<8x256xf32>, vector<8x256xf32>, vector<8x256xf32>, vector<8x256xf32>, vector<8x256xf32>, vector<8x256xf32>, vector<8x256xf32>, vector<8x256xf32>, vector<8x256xf32>, vector<8x256xf32> -> vector<128x256xf32>
    %216 = tpu.concatenate %206, %207, %208, %209, %210, %211, %212, %213, %214 in 0 : vector<8x256xf32>, vector<8x256xf32>, vector<8x256xf32>, vector<8x256xf32>, vector<8x256xf32>, vector<8x256xf32>, vector<8x256xf32>, vector<8x256xf32>, vector<8x256xf32> -> vector<72x256xf32>
    %217 = tpu.concatenate %215, %216 in 0 : vector<128x256xf32>, vector<72x256xf32> -> vector<200x256xf32>
    %cst_118 = arith.constant dense<0.000000e+00> : vector<8x256xf32>
    %218 = tpu.matmul %182, %217, %cst_118 {dimension_numbers = #tpu.dot_dimension_numbers<[1], [0], [0], [1], [0, 0, 1, 1], [], []>} : vector<8x200xf32>, vector<200x256xf32>, vector<8x256xf32> -> vector<8x256xf32>
    %219 = vector.extract_strided_slice %51 {offsets = [48, 0], sizes = [8, 256], strides = [1, 1]} : vector<64x256xf32> to vector<8x256xf32>
    %220 = arith.mulf %219, %219 : vector<8x256xf32>
    %221 = arith.addf %218, %220 : vector<8x256xf32>
    %222 = vector.extract_strided_slice %51 {offsets = [56, 0], sizes = [8, 256], strides = [1, 1]} : vector<64x256xf32> to vector<8x256xf32>
    %223 = arith.addf %221, %222 : vector<8x256xf32>
    %cst_119 = arith.constant 0.000000e+00 : f32
    %224 = vector.broadcast %cst_119 : f32 to vector<8x256xf32>
    %225 = arith.cmpf ogt, %223, %224 : vector<8x256xf32>
    %cst_120 = arith.constant 1.000000e+00 : f32
    %cst_121 = arith.constant 2.000000e-01 : f32
    %226 = vector.broadcast %cst_120 : f32 to vector<8x256xf32>
    %227 = vector.broadcast %cst_121 : f32 to vector<8x256xf32>
    %228 = arith.select %225, %226, %227 : vector<8x256xi1>, vector<8x256xf32>
    %cst_122 = arith.constant 2.000000e+00 : f32
    %229 = vector.broadcast %cst_122 : f32 to vector<8x256xf32>
    %230 = arith.mulf %229, %219 : vector<8x256xf32>
    %231 = arith.mulf %230, %228 : vector<8x256xf32>
    %232 = tpu.concatenate %231, %228 in 0 : vector<8x256xf32>, vector<8x256xf32> -> vector<16x256xf32>
    %c3 = arith.constant 3 : index
    %c0_123 = arith.constant 0 : index
    %c0_124 = arith.constant 0 : index
    %233 = vector.load %arg8[%c3, %c0_123, %c0_124] : memref<4x16x256xf32, #tpu.memory_space<vmem>>, vector<1x16x256xf32>
    %234 = vector.shape_cast %233 : vector<1x16x256xf32> to vector<16x256xf32>
    %235 = vector.shape_cast %232 : vector<16x256xf32> to vector<1x16x256xf32>
    tpu.vector_store %arg8[%c3, %c0_123, %c0_124], %235 {strides = array<i32>} : memref<4x16x256xf32, #tpu.memory_space<vmem>>, vector<1x16x256xf32>,
    %c0_125 = arith.constant 0 : index
    %c0_126 = arith.constant 0 : index
    %236 = vector.load %arg6[%c0_125, %c0_126] : memref<8x1xf32, #tpu.memory_space<vmem>>, vector<8x1xf32>
    %cst_127 = arith.constant 0.000000e+00 : f32
    %237 = vector.broadcast %cst_127 : f32 to vector<1x256xf32>
    %238 = tpu.concatenate %236, %236 in 0 : vector<8x1xf32>, vector<8x1xf32> -> vector<16x1xf32>
    %c3_128 = arith.constant 3 : index
    %c0_129 = arith.constant 0 : index
    %c0_130 = arith.constant 0 : index
    %239 = vector.load %arg8[%c3_128, %c0_129, %c0_130] : memref<4x16x256xf32, #tpu.memory_space<vmem>>, vector<1x16x256xf32>
    %240 = vector.shape_cast %239 : vector<1x16x256xf32> to vector<16x256xf32>
    %241 = vector.broadcast %238 : vector<16x1xf32> to vector<16x256xf32>
    %242 = arith.mulf %241, %240 : vector<16x256xf32>
    %c2_131 = arith.constant 2 : index
    %c0_132 = arith.constant 0 : index
    %c0_133 = arith.constant 0 : index
    %243 = vector.load %arg4[%c2_131, %c0_132, %c0_133] : memref<3x9x400xf32, #tpu.memory_space<vmem>>, vector<1x9x400xf32>
    %244 = vector.shape_cast %243 : vector<1x9x400xf32> to vector<9x400xf32>
    %c242_i32_134 = arith.constant 242 : i32
    %245 = tpu.dynamic_rotate %242 by %c242_i32_134 dim 1 : vector<16x256xf32>, i32 -> vector<16x256xf32>
    %c2_i32_135 = arith.constant 2 : i32
    %246 = tpu.dynamic_rotate %242 by %c2_i32_135 dim 1 : vector<16x256xf32>, i32 -> vector<16x256xf32>
    %247 = arith.select %49, %245, %246 : vector<16x256xi1>, vector<16x256xf32>
    %c241_i32_136 = arith.constant 241 : i32
    %248 = tpu.dynamic_rotate %242 by %c241_i32_136 dim 1 : vector<16x256xf32>, i32 -> vector<16x256xf32>
    %c1_i32_137 = arith.constant 1 : i32
    %249 = tpu.dynamic_rotate %242 by %c1_i32_137 dim 1 : vector<16x256xf32>, i32 -> vector<16x256xf32>
    %250 = arith.select %45, %248, %249 : vector<16x256xi1>, vector<16x256xf32>
    %c15_i32_138 = arith.constant 15 : i32
    %251 = tpu.dynamic_rotate %242 by %c15_i32_138 dim 1 : vector<16x256xf32>, i32 -> vector<16x256xf32>
    %c255_i32_139 = arith.constant 255 : i32
    %252 = tpu.dynamic_rotate %242 by %c255_i32_139 dim 1 : vector<16x256xf32>, i32 -> vector<16x256xf32>
    %253 = arith.select %37, %251, %252 : vector<16x256xi1>, vector<16x256xf32>
    %c14_i32_140 = arith.constant 14 : i32
    %254 = tpu.dynamic_rotate %242 by %c14_i32_140 dim 1 : vector<16x256xf32>, i32 -> vector<16x256xf32>
    %c254_i32_141 = arith.constant 254 : i32
    %255 = tpu.dynamic_rotate %242 by %c254_i32_141 dim 1 : vector<16x256xf32>, i32 -> vector<16x256xf32>
    %256 = arith.select %41, %254, %255 : vector<16x256xi1>, vector<16x256xf32>
    %c224_i32_142 = arith.constant 224 : i32
    %257 = tpu.dynamic_rotate %256 by %c224_i32_142 dim 1 : vector<16x256xf32>, i32 -> vector<16x256xf32>
    %c224_i32_143 = arith.constant 224 : i32
    %258 = tpu.dynamic_rotate %253 by %c224_i32_143 dim 1 : vector<16x256xf32>, i32 -> vector<16x256xf32>
    %c224_i32_144 = arith.constant 224 : i32
    %259 = tpu.dynamic_rotate %242 by %c224_i32_144 dim 1 : vector<16x256xf32>, i32 -> vector<16x256xf32>
    %c224_i32_145 = arith.constant 224 : i32
    %260 = tpu.dynamic_rotate %250 by %c224_i32_145 dim 1 : vector<16x256xf32>, i32 -> vector<16x256xf32>
    %c224_i32_146 = arith.constant 224 : i32
    %261 = tpu.dynamic_rotate %247 by %c224_i32_146 dim 1 : vector<16x256xf32>, i32 -> vector<16x256xf32>
    %c240_i32_147 = arith.constant 240 : i32
    %262 = tpu.dynamic_rotate %256 by %c240_i32_147 dim 1 : vector<16x256xf32>, i32 -> vector<16x256xf32>
    %c240_i32_148 = arith.constant 240 : i32
    %263 = tpu.dynamic_rotate %253 by %c240_i32_148 dim 1 : vector<16x256xf32>, i32 -> vector<16x256xf32>
    %c240_i32_149 = arith.constant 240 : i32
    %264 = tpu.dynamic_rotate %242 by %c240_i32_149 dim 1 : vector<16x256xf32>, i32 -> vector<16x256xf32>
    %c240_i32_150 = arith.constant 240 : i32
    %265 = tpu.dynamic_rotate %250 by %c240_i32_150 dim 1 : vector<16x256xf32>, i32 -> vector<16x256xf32>
    %c240_i32_151 = arith.constant 240 : i32
    %266 = tpu.dynamic_rotate %247 by %c240_i32_151 dim 1 : vector<16x256xf32>, i32 -> vector<16x256xf32>
    %c16_i32_152 = arith.constant 16 : i32
    %267 = tpu.dynamic_rotate %256 by %c16_i32_152 dim 1 : vector<16x256xf32>, i32 -> vector<16x256xf32>
    %c16_i32_153 = arith.constant 16 : i32
    %268 = tpu.dynamic_rotate %253 by %c16_i32_153 dim 1 : vector<16x256xf32>, i32 -> vector<16x256xf32>
    %c16_i32_154 = arith.constant 16 : i32
    %269 = tpu.dynamic_rotate %242 by %c16_i32_154 dim 1 : vector<16x256xf32>, i32 -> vector<16x256xf32>
    %c16_i32_155 = arith.constant 16 : i32
    %270 = tpu.dynamic_rotate %250 by %c16_i32_155 dim 1 : vector<16x256xf32>, i32 -> vector<16x256xf32>
    %c16_i32_156 = arith.constant 16 : i32
    %271 = tpu.dynamic_rotate %247 by %c16_i32_156 dim 1 : vector<16x256xf32>, i32 -> vector<16x256xf32>
    %c32_i32_157 = arith.constant 32 : i32
    %272 = tpu.dynamic_rotate %256 by %c32_i32_157 dim 1 : vector<16x256xf32>, i32 -> vector<16x256xf32>
    %c32_i32_158 = arith.constant 32 : i32
    %273 = tpu.dynamic_rotate %253 by %c32_i32_158 dim 1 : vector<16x256xf32>, i32 -> vector<16x256xf32>
    %c32_i32_159 = arith.constant 32 : i32
    %274 = tpu.dynamic_rotate %242 by %c32_i32_159 dim 1 : vector<16x256xf32>, i32 -> vector<16x256xf32>
    %c32_i32_160 = arith.constant 32 : i32
    %275 = tpu.dynamic_rotate %250 by %c32_i32_160 dim 1 : vector<16x256xf32>, i32 -> vector<16x256xf32>
    %c32_i32_161 = arith.constant 32 : i32
    %276 = tpu.dynamic_rotate %247 by %c32_i32_161 dim 1 : vector<16x256xf32>, i32 -> vector<16x256xf32>
    %277 = tpu.concatenate %257, %258, %259, %260, %261, %262, %263, %264, %265, %266, %256, %253, %242, %250, %247, %267 in 0 : vector<16x256xf32>, vector<16x256xf32>, vector<16x256xf32>, vector<16x256xf32>, vector<16x256xf32>, vector<16x256xf32>, vector<16x256xf32>, vector<16x256xf32>, vector<16x256xf32>, vector<16x256xf32>, vector<16x256xf32>, vector<16x256xf32>, vector<16x256xf32>, vector<16x256xf32>, vector<16x256xf32>, vector<16x256xf32> -> vector<256x256xf32>
    %278 = tpu.concatenate %268, %269, %270, %271, %272, %273, %274, %275, %276 in 0 : vector<16x256xf32>, vector<16x256xf32>, vector<16x256xf32>, vector<16x256xf32>, vector<16x256xf32>, vector<16x256xf32>, vector<16x256xf32>, vector<16x256xf32>, vector<16x256xf32> -> vector<144x256xf32>
    %279 = tpu.concatenate %277, %278 in 0 : vector<256x256xf32>, vector<144x256xf32> -> vector<400x256xf32>
    %cst_162 = arith.constant dense<0.000000e+00> : vector<9x256xf32>
    %280 = tpu.matmul %244, %279, %cst_162 {dimension_numbers = #tpu.dot_dimension_numbers<[1], [0], [0], [1], [0, 0, 1, 1], [], []>} : vector<9x400xf32>, vector<400x256xf32>, vector<9x256xf32> -> vector<9x256xf32>
    %281 = vector.extract_strided_slice %280 {offsets = [0, 0], sizes = [8, 256], strides = [1, 1]} : vector<9x256xf32> to vector<8x256xf32>
    %282 = vector.extract_strided_slice %280 {offsets = [8, 0], sizes = [1, 256], strides = [1, 1]} : vector<9x256xf32> to vector<1x256xf32>
    %283 = arith.addf %237, %282 : vector<1x256xf32>
    %284 = tpu.concatenate %281, %281 in 0 : vector<8x256xf32>, vector<8x256xf32> -> vector<16x256xf32>
    %c2_163 = arith.constant 2 : index
    %c0_164 = arith.constant 0 : index
    %c0_165 = arith.constant 0 : index
    %285 = vector.load %arg8[%c2_163, %c0_164, %c0_165] : memref<4x16x256xf32, #tpu.memory_space<vmem>>, vector<1x16x256xf32>
    %286 = vector.shape_cast %285 : vector<1x16x256xf32> to vector<16x256xf32>
    %287 = arith.mulf %284, %286 : vector<16x256xf32>
    %c1_166 = arith.constant 1 : index
    %c0_167 = arith.constant 0 : index
    %c0_168 = arith.constant 0 : index
    %288 = vector.load %arg4[%c1_166, %c0_167, %c0_168] : memref<3x9x400xf32, #tpu.memory_space<vmem>>, vector<1x9x400xf32>
    %289 = vector.shape_cast %288 : vector<1x9x400xf32> to vector<9x400xf32>
    %c242_i32_169 = arith.constant 242 : i32
    %290 = tpu.dynamic_rotate %287 by %c242_i32_169 dim 1 : vector<16x256xf32>, i32 -> vector<16x256xf32>
    %c2_i32_170 = arith.constant 2 : i32
    %291 = tpu.dynamic_rotate %287 by %c2_i32_170 dim 1 : vector<16x256xf32>, i32 -> vector<16x256xf32>
    %292 = arith.select %49, %290, %291 : vector<16x256xi1>, vector<16x256xf32>
    %c241_i32_171 = arith.constant 241 : i32
    %293 = tpu.dynamic_rotate %287 by %c241_i32_171 dim 1 : vector<16x256xf32>, i32 -> vector<16x256xf32>
    %c1_i32_172 = arith.constant 1 : i32
    %294 = tpu.dynamic_rotate %287 by %c1_i32_172 dim 1 : vector<16x256xf32>, i32 -> vector<16x256xf32>
    %295 = arith.select %45, %293, %294 : vector<16x256xi1>, vector<16x256xf32>
    %c15_i32_173 = arith.constant 15 : i32
    %296 = tpu.dynamic_rotate %287 by %c15_i32_173 dim 1 : vector<16x256xf32>, i32 -> vector<16x256xf32>
    %c255_i32_174 = arith.constant 255 : i32
    %297 = tpu.dynamic_rotate %287 by %c255_i32_174 dim 1 : vector<16x256xf32>, i32 -> vector<16x256xf32>
    %298 = arith.select %37, %296, %297 : vector<16x256xi1>, vector<16x256xf32>
    %c14_i32_175 = arith.constant 14 : i32
    %299 = tpu.dynamic_rotate %287 by %c14_i32_175 dim 1 : vector<16x256xf32>, i32 -> vector<16x256xf32>
    %c254_i32_176 = arith.constant 254 : i32
    %300 = tpu.dynamic_rotate %287 by %c254_i32_176 dim 1 : vector<16x256xf32>, i32 -> vector<16x256xf32>
    %301 = arith.select %41, %299, %300 : vector<16x256xi1>, vector<16x256xf32>
    %c224_i32_177 = arith.constant 224 : i32
    %302 = tpu.dynamic_rotate %301 by %c224_i32_177 dim 1 : vector<16x256xf32>, i32 -> vector<16x256xf32>
    %c224_i32_178 = arith.constant 224 : i32
    %303 = tpu.dynamic_rotate %298 by %c224_i32_178 dim 1 : vector<16x256xf32>, i32 -> vector<16x256xf32>
    %c224_i32_179 = arith.constant 224 : i32
    %304 = tpu.dynamic_rotate %287 by %c224_i32_179 dim 1 : vector<16x256xf32>, i32 -> vector<16x256xf32>
    %c224_i32_180 = arith.constant 224 : i32
    %305 = tpu.dynamic_rotate %295 by %c224_i32_180 dim 1 : vector<16x256xf32>, i32 -> vector<16x256xf32>
    %c224_i32_181 = arith.constant 224 : i32
    %306 = tpu.dynamic_rotate %292 by %c224_i32_181 dim 1 : vector<16x256xf32>, i32 -> vector<16x256xf32>
    %c240_i32_182 = arith.constant 240 : i32
    %307 = tpu.dynamic_rotate %301 by %c240_i32_182 dim 1 : vector<16x256xf32>, i32 -> vector<16x256xf32>
    %c240_i32_183 = arith.constant 240 : i32
    %308 = tpu.dynamic_rotate %298 by %c240_i32_183 dim 1 : vector<16x256xf32>, i32 -> vector<16x256xf32>
    %c240_i32_184 = arith.constant 240 : i32
    %309 = tpu.dynamic_rotate %287 by %c240_i32_184 dim 1 : vector<16x256xf32>, i32 -> vector<16x256xf32>
    %c240_i32_185 = arith.constant 240 : i32
    %310 = tpu.dynamic_rotate %295 by %c240_i32_185 dim 1 : vector<16x256xf32>, i32 -> vector<16x256xf32>
    %c240_i32_186 = arith.constant 240 : i32
    %311 = tpu.dynamic_rotate %292 by %c240_i32_186 dim 1 : vector<16x256xf32>, i32 -> vector<16x256xf32>
    %c16_i32_187 = arith.constant 16 : i32
    %312 = tpu.dynamic_rotate %301 by %c16_i32_187 dim 1 : vector<16x256xf32>, i32 -> vector<16x256xf32>
    %c16_i32_188 = arith.constant 16 : i32
    %313 = tpu.dynamic_rotate %298 by %c16_i32_188 dim 1 : vector<16x256xf32>, i32 -> vector<16x256xf32>
    %c16_i32_189 = arith.constant 16 : i32
    %314 = tpu.dynamic_rotate %287 by %c16_i32_189 dim 1 : vector<16x256xf32>, i32 -> vector<16x256xf32>
    %c16_i32_190 = arith.constant 16 : i32
    %315 = tpu.dynamic_rotate %295 by %c16_i32_190 dim 1 : vector<16x256xf32>, i32 -> vector<16x256xf32>
    %c16_i32_191 = arith.constant 16 : i32
    %316 = tpu.dynamic_rotate %292 by %c16_i32_191 dim 1 : vector<16x256xf32>, i32 -> vector<16x256xf32>
    %c32_i32_192 = arith.constant 32 : i32
    %317 = tpu.dynamic_rotate %301 by %c32_i32_192 dim 1 : vector<16x256xf32>, i32 -> vector<16x256xf32>
    %c32_i32_193 = arith.constant 32 : i32
    %318 = tpu.dynamic_rotate %298 by %c32_i32_193 dim 1 : vector<16x256xf32>, i32 -> vector<16x256xf32>
    %c32_i32_194 = arith.constant 32 : i32
    %319 = tpu.dynamic_rotate %287 by %c32_i32_194 dim 1 : vector<16x256xf32>, i32 -> vector<16x256xf32>
    %c32_i32_195 = arith.constant 32 : i32
    %320 = tpu.dynamic_rotate %295 by %c32_i32_195 dim 1 : vector<16x256xf32>, i32 -> vector<16x256xf32>
    %c32_i32_196 = arith.constant 32 : i32
    %321 = tpu.dynamic_rotate %292 by %c32_i32_196 dim 1 : vector<16x256xf32>, i32 -> vector<16x256xf32>
    %322 = tpu.concatenate %302, %303, %304, %305, %306, %307, %308, %309, %310, %311, %301, %298, %287, %295, %292, %312 in 0 : vector<16x256xf32>, vector<16x256xf32>, vector<16x256xf32>, vector<16x256xf32>, vector<16x256xf32>, vector<16x256xf32>, vector<16x256xf32>, vector<16x256xf32>, vector<16x256xf32>, vector<16x256xf32>, vector<16x256xf32>, vector<16x256xf32>, vector<16x256xf32>, vector<16x256xf32>, vector<16x256xf32>, vector<16x256xf32> -> vector<256x256xf32>
    %323 = tpu.concatenate %313, %314, %315, %316, %317, %318, %319, %320, %321 in 0 : vector<16x256xf32>, vector<16x256xf32>, vector<16x256xf32>, vector<16x256xf32>, vector<16x256xf32>, vector<16x256xf32>, vector<16x256xf32>, vector<16x256xf32>, vector<16x256xf32> -> vector<144x256xf32>
    %324 = tpu.concatenate %322, %323 in 0 : vector<256x256xf32>, vector<144x256xf32> -> vector<400x256xf32>
    %cst_197 = arith.constant dense<0.000000e+00> : vector<9x256xf32>
    %325 = tpu.matmul %289, %324, %cst_197 {dimension_numbers = #tpu.dot_dimension_numbers<[1], [0], [0], [1], [0, 0, 1, 1], [], []>} : vector<9x400xf32>, vector<400x256xf32>, vector<9x256xf32> -> vector<9x256xf32>
    %326 = vector.extract_strided_slice %325 {offsets = [0, 0], sizes = [8, 256], strides = [1, 1]} : vector<9x256xf32> to vector<8x256xf32>
    %327 = vector.extract_strided_slice %325 {offsets = [8, 0], sizes = [1, 256], strides = [1, 1]} : vector<9x256xf32> to vector<1x256xf32>
    %328 = arith.addf %283, %327 : vector<1x256xf32>
    %329 = tpu.concatenate %326, %326 in 0 : vector<8x256xf32>, vector<8x256xf32> -> vector<16x256xf32>
    %c1_198 = arith.constant 1 : index
    %c0_199 = arith.constant 0 : index
    %c0_200 = arith.constant 0 : index
    %330 = vector.load %arg8[%c1_198, %c0_199, %c0_200] : memref<4x16x256xf32, #tpu.memory_space<vmem>>, vector<1x16x256xf32>
    %331 = vector.shape_cast %330 : vector<1x16x256xf32> to vector<16x256xf32>
    %332 = arith.mulf %329, %331 : vector<16x256xf32>
    %c0_201 = arith.constant 0 : index
    %c0_202 = arith.constant 0 : index
    %c0_203 = arith.constant 0 : index
    %333 = vector.load %arg4[%c0_201, %c0_202, %c0_203] : memref<3x9x400xf32, #tpu.memory_space<vmem>>, vector<1x9x400xf32>
    %334 = vector.shape_cast %333 : vector<1x9x400xf32> to vector<9x400xf32>
    %c242_i32_204 = arith.constant 242 : i32
    %335 = tpu.dynamic_rotate %332 by %c242_i32_204 dim 1 : vector<16x256xf32>, i32 -> vector<16x256xf32>
    %c2_i32_205 = arith.constant 2 : i32
    %336 = tpu.dynamic_rotate %332 by %c2_i32_205 dim 1 : vector<16x256xf32>, i32 -> vector<16x256xf32>
    %337 = arith.select %49, %335, %336 : vector<16x256xi1>, vector<16x256xf32>
    %c241_i32_206 = arith.constant 241 : i32
    %338 = tpu.dynamic_rotate %332 by %c241_i32_206 dim 1 : vector<16x256xf32>, i32 -> vector<16x256xf32>
    %c1_i32_207 = arith.constant 1 : i32
    %339 = tpu.dynamic_rotate %332 by %c1_i32_207 dim 1 : vector<16x256xf32>, i32 -> vector<16x256xf32>
    %340 = arith.select %45, %338, %339 : vector<16x256xi1>, vector<16x256xf32>
    %c15_i32_208 = arith.constant 15 : i32
    %341 = tpu.dynamic_rotate %332 by %c15_i32_208 dim 1 : vector<16x256xf32>, i32 -> vector<16x256xf32>
    %c255_i32_209 = arith.constant 255 : i32
    %342 = tpu.dynamic_rotate %332 by %c255_i32_209 dim 1 : vector<16x256xf32>, i32 -> vector<16x256xf32>
    %343 = arith.select %37, %341, %342 : vector<16x256xi1>, vector<16x256xf32>
    %c14_i32_210 = arith.constant 14 : i32
    %344 = tpu.dynamic_rotate %332 by %c14_i32_210 dim 1 : vector<16x256xf32>, i32 -> vector<16x256xf32>
    %c254_i32_211 = arith.constant 254 : i32
    %345 = tpu.dynamic_rotate %332 by %c254_i32_211 dim 1 : vector<16x256xf32>, i32 -> vector<16x256xf32>
    %346 = arith.select %41, %344, %345 : vector<16x256xi1>, vector<16x256xf32>
    %c224_i32_212 = arith.constant 224 : i32
    %347 = tpu.dynamic_rotate %346 by %c224_i32_212 dim 1 : vector<16x256xf32>, i32 -> vector<16x256xf32>
    %c224_i32_213 = arith.constant 224 : i32
    %348 = tpu.dynamic_rotate %343 by %c224_i32_213 dim 1 : vector<16x256xf32>, i32 -> vector<16x256xf32>
    %c224_i32_214 = arith.constant 224 : i32
    %349 = tpu.dynamic_rotate %332 by %c224_i32_214 dim 1 : vector<16x256xf32>, i32 -> vector<16x256xf32>
    %c224_i32_215 = arith.constant 224 : i32
    %350 = tpu.dynamic_rotate %340 by %c224_i32_215 dim 1 : vector<16x256xf32>, i32 -> vector<16x256xf32>
    %c224_i32_216 = arith.constant 224 : i32
    %351 = tpu.dynamic_rotate %337 by %c224_i32_216 dim 1 : vector<16x256xf32>, i32 -> vector<16x256xf32>
    %c240_i32_217 = arith.constant 240 : i32
    %352 = tpu.dynamic_rotate %346 by %c240_i32_217 dim 1 : vector<16x256xf32>, i32 -> vector<16x256xf32>
    %c240_i32_218 = arith.constant 240 : i32
    %353 = tpu.dynamic_rotate %343 by %c240_i32_218 dim 1 : vector<16x256xf32>, i32 -> vector<16x256xf32>
    %c240_i32_219 = arith.constant 240 : i32
    %354 = tpu.dynamic_rotate %332 by %c240_i32_219 dim 1 : vector<16x256xf32>, i32 -> vector<16x256xf32>
    %c240_i32_220 = arith.constant 240 : i32
    %355 = tpu.dynamic_rotate %340 by %c240_i32_220 dim 1 : vector<16x256xf32>, i32 -> vector<16x256xf32>
    %c240_i32_221 = arith.constant 240 : i32
    %356 = tpu.dynamic_rotate %337 by %c240_i32_221 dim 1 : vector<16x256xf32>, i32 -> vector<16x256xf32>
    %c16_i32_222 = arith.constant 16 : i32
    %357 = tpu.dynamic_rotate %346 by %c16_i32_222 dim 1 : vector<16x256xf32>, i32 -> vector<16x256xf32>
    %c16_i32_223 = arith.constant 16 : i32
    %358 = tpu.dynamic_rotate %343 by %c16_i32_223 dim 1 : vector<16x256xf32>, i32 -> vector<16x256xf32>
    %c16_i32_224 = arith.constant 16 : i32
    %359 = tpu.dynamic_rotate %332 by %c16_i32_224 dim 1 : vector<16x256xf32>, i32 -> vector<16x256xf32>
    %c16_i32_225 = arith.constant 16 : i32
    %360 = tpu.dynamic_rotate %340 by %c16_i32_225 dim 1 : vector<16x256xf32>, i32 -> vector<16x256xf32>
    %c16_i32_226 = arith.constant 16 : i32
    %361 = tpu.dynamic_rotate %337 by %c16_i32_226 dim 1 : vector<16x256xf32>, i32 -> vector<16x256xf32>
    %c32_i32_227 = arith.constant 32 : i32
    %362 = tpu.dynamic_rotate %346 by %c32_i32_227 dim 1 : vector<16x256xf32>, i32 -> vector<16x256xf32>
    %c32_i32_228 = arith.constant 32 : i32
    %363 = tpu.dynamic_rotate %343 by %c32_i32_228 dim 1 : vector<16x256xf32>, i32 -> vector<16x256xf32>
    %c32_i32_229 = arith.constant 32 : i32
    %364 = tpu.dynamic_rotate %332 by %c32_i32_229 dim 1 : vector<16x256xf32>, i32 -> vector<16x256xf32>
    %c32_i32_230 = arith.constant 32 : i32
    %365 = tpu.dynamic_rotate %340 by %c32_i32_230 dim 1 : vector<16x256xf32>, i32 -> vector<16x256xf32>
    %c32_i32_231 = arith.constant 32 : i32
    %366 = tpu.dynamic_rotate %337 by %c32_i32_231 dim 1 : vector<16x256xf32>, i32 -> vector<16x256xf32>
    %367 = tpu.concatenate %347, %348, %349, %350, %351, %352, %353, %354, %355, %356, %346, %343, %332, %340, %337, %357 in 0 : vector<16x256xf32>, vector<16x256xf32>, vector<16x256xf32>, vector<16x256xf32>, vector<16x256xf32>, vector<16x256xf32>, vector<16x256xf32>, vector<16x256xf32>, vector<16x256xf32>, vector<16x256xf32>, vector<16x256xf32>, vector<16x256xf32>, vector<16x256xf32>, vector<16x256xf32>, vector<16x256xf32>, vector<16x256xf32> -> vector<256x256xf32>
    %368 = tpu.concatenate %358, %359, %360, %361, %362, %363, %364, %365, %366 in 0 : vector<16x256xf32>, vector<16x256xf32>, vector<16x256xf32>, vector<16x256xf32>, vector<16x256xf32>, vector<16x256xf32>, vector<16x256xf32>, vector<16x256xf32>, vector<16x256xf32> -> vector<144x256xf32>
    %369 = tpu.concatenate %367, %368 in 0 : vector<256x256xf32>, vector<144x256xf32> -> vector<400x256xf32>
    %cst_232 = arith.constant dense<0.000000e+00> : vector<9x256xf32>
    %370 = tpu.matmul %334, %369, %cst_232 {dimension_numbers = #tpu.dot_dimension_numbers<[1], [0], [0], [1], [0, 0, 1, 1], [], []>} : vector<9x400xf32>, vector<400x256xf32>, vector<9x256xf32> -> vector<9x256xf32>
    %371 = vector.extract_strided_slice %370 {offsets = [0, 0], sizes = [8, 256], strides = [1, 1]} : vector<9x256xf32> to vector<8x256xf32>
    %372 = vector.extract_strided_slice %370 {offsets = [8, 0], sizes = [1, 256], strides = [1, 1]} : vector<9x256xf32> to vector<1x256xf32>
    %373 = arith.addf %328, %372 : vector<1x256xf32>
    %374 = tpu.concatenate %371, %371 in 0 : vector<8x256xf32>, vector<8x256xf32> -> vector<16x256xf32>
    %c0_233 = arith.constant 0 : index
    %c0_234 = arith.constant 0 : index
    %c0_235 = arith.constant 0 : index
    %375 = vector.load %arg8[%c0_233, %c0_234, %c0_235] : memref<4x16x256xf32, #tpu.memory_space<vmem>>, vector<1x16x256xf32>
    %376 = vector.shape_cast %375 : vector<1x16x256xf32> to vector<16x256xf32>
    %377 = arith.mulf %374, %376 : vector<16x256xf32>
    %c0_236 = arith.constant 0 : index
    %c0_237 = arith.constant 0 : index
    %378 = vector.load %arg5[%c0_236, %c0_237] : memref<1x400xf32, #tpu.memory_space<vmem>>, vector<1x400xf32>
    %c242_i32_238 = arith.constant 242 : i32
    %379 = tpu.dynamic_rotate %377 by %c242_i32_238 dim 1 : vector<16x256xf32>, i32 -> vector<16x256xf32>
    %c2_i32_239 = arith.constant 2 : i32
    %380 = tpu.dynamic_rotate %377 by %c2_i32_239 dim 1 : vector<16x256xf32>, i32 -> vector<16x256xf32>
    %381 = arith.select %49, %379, %380 : vector<16x256xi1>, vector<16x256xf32>
    %c241_i32_240 = arith.constant 241 : i32
    %382 = tpu.dynamic_rotate %377 by %c241_i32_240 dim 1 : vector<16x256xf32>, i32 -> vector<16x256xf32>
    %c1_i32_241 = arith.constant 1 : i32
    %383 = tpu.dynamic_rotate %377 by %c1_i32_241 dim 1 : vector<16x256xf32>, i32 -> vector<16x256xf32>
    %384 = arith.select %45, %382, %383 : vector<16x256xi1>, vector<16x256xf32>
    %c15_i32_242 = arith.constant 15 : i32
    %385 = tpu.dynamic_rotate %377 by %c15_i32_242 dim 1 : vector<16x256xf32>, i32 -> vector<16x256xf32>
    %c255_i32_243 = arith.constant 255 : i32
    %386 = tpu.dynamic_rotate %377 by %c255_i32_243 dim 1 : vector<16x256xf32>, i32 -> vector<16x256xf32>
    %387 = arith.select %37, %385, %386 : vector<16x256xi1>, vector<16x256xf32>
    %c14_i32_244 = arith.constant 14 : i32
    %388 = tpu.dynamic_rotate %377 by %c14_i32_244 dim 1 : vector<16x256xf32>, i32 -> vector<16x256xf32>
    %c254_i32_245 = arith.constant 254 : i32
    %389 = tpu.dynamic_rotate %377 by %c254_i32_245 dim 1 : vector<16x256xf32>, i32 -> vector<16x256xf32>
    %390 = arith.select %41, %388, %389 : vector<16x256xi1>, vector<16x256xf32>
    %c224_i32_246 = arith.constant 224 : i32
    %391 = tpu.dynamic_rotate %390 by %c224_i32_246 dim 1 : vector<16x256xf32>, i32 -> vector<16x256xf32>
    %c224_i32_247 = arith.constant 224 : i32
    %392 = tpu.dynamic_rotate %387 by %c224_i32_247 dim 1 : vector<16x256xf32>, i32 -> vector<16x256xf32>
    %c224_i32_248 = arith.constant 224 : i32
    %393 = tpu.dynamic_rotate %377 by %c224_i32_248 dim 1 : vector<16x256xf32>, i32 -> vector<16x256xf32>
    %c224_i32_249 = arith.constant 224 : i32
    %394 = tpu.dynamic_rotate %384 by %c224_i32_249 dim 1 : vector<16x256xf32>, i32 -> vector<16x256xf32>
    %c224_i32_250 = arith.constant 224 : i32
    %395 = tpu.dynamic_rotate %381 by %c224_i32_250 dim 1 : vector<16x256xf32>, i32 -> vector<16x256xf32>
    %c240_i32_251 = arith.constant 240 : i32
    %396 = tpu.dynamic_rotate %390 by %c240_i32_251 dim 1 : vector<16x256xf32>, i32 -> vector<16x256xf32>
    %c240_i32_252 = arith.constant 240 : i32
    %397 = tpu.dynamic_rotate %387 by %c240_i32_252 dim 1 : vector<16x256xf32>, i32 -> vector<16x256xf32>
    %c240_i32_253 = arith.constant 240 : i32
    %398 = tpu.dynamic_rotate %377 by %c240_i32_253 dim 1 : vector<16x256xf32>, i32 -> vector<16x256xf32>
    %c240_i32_254 = arith.constant 240 : i32
    %399 = tpu.dynamic_rotate %384 by %c240_i32_254 dim 1 : vector<16x256xf32>, i32 -> vector<16x256xf32>
    %c240_i32_255 = arith.constant 240 : i32
    %400 = tpu.dynamic_rotate %381 by %c240_i32_255 dim 1 : vector<16x256xf32>, i32 -> vector<16x256xf32>
    %c16_i32_256 = arith.constant 16 : i32
    %401 = tpu.dynamic_rotate %390 by %c16_i32_256 dim 1 : vector<16x256xf32>, i32 -> vector<16x256xf32>
    %c16_i32_257 = arith.constant 16 : i32
    %402 = tpu.dynamic_rotate %387 by %c16_i32_257 dim 1 : vector<16x256xf32>, i32 -> vector<16x256xf32>
    %c16_i32_258 = arith.constant 16 : i32
    %403 = tpu.dynamic_rotate %377 by %c16_i32_258 dim 1 : vector<16x256xf32>, i32 -> vector<16x256xf32>
    %c16_i32_259 = arith.constant 16 : i32
    %404 = tpu.dynamic_rotate %384 by %c16_i32_259 dim 1 : vector<16x256xf32>, i32 -> vector<16x256xf32>
    %c16_i32_260 = arith.constant 16 : i32
    %405 = tpu.dynamic_rotate %381 by %c16_i32_260 dim 1 : vector<16x256xf32>, i32 -> vector<16x256xf32>
    %c32_i32_261 = arith.constant 32 : i32
    %406 = tpu.dynamic_rotate %390 by %c32_i32_261 dim 1 : vector<16x256xf32>, i32 -> vector<16x256xf32>
    %c32_i32_262 = arith.constant 32 : i32
    %407 = tpu.dynamic_rotate %387 by %c32_i32_262 dim 1 : vector<16x256xf32>, i32 -> vector<16x256xf32>
    %c32_i32_263 = arith.constant 32 : i32
    %408 = tpu.dynamic_rotate %377 by %c32_i32_263 dim 1 : vector<16x256xf32>, i32 -> vector<16x256xf32>
    %c32_i32_264 = arith.constant 32 : i32
    %409 = tpu.dynamic_rotate %384 by %c32_i32_264 dim 1 : vector<16x256xf32>, i32 -> vector<16x256xf32>
    %c32_i32_265 = arith.constant 32 : i32
    %410 = tpu.dynamic_rotate %381 by %c32_i32_265 dim 1 : vector<16x256xf32>, i32 -> vector<16x256xf32>
    %411 = tpu.concatenate %391, %392, %393, %394, %395, %396, %397, %398, %399, %400, %390, %387, %377, %384, %381, %401 in 0 : vector<16x256xf32>, vector<16x256xf32>, vector<16x256xf32>, vector<16x256xf32>, vector<16x256xf32>, vector<16x256xf32>, vector<16x256xf32>, vector<16x256xf32>, vector<16x256xf32>, vector<16x256xf32>, vector<16x256xf32>, vector<16x256xf32>, vector<16x256xf32>, vector<16x256xf32>, vector<16x256xf32>, vector<16x256xf32> -> vector<256x256xf32>
    %412 = tpu.concatenate %402, %403, %404, %405, %406, %407, %408, %409, %410 in 0 : vector<16x256xf32>, vector<16x256xf32>, vector<16x256xf32>, vector<16x256xf32>, vector<16x256xf32>, vector<16x256xf32>, vector<16x256xf32>, vector<16x256xf32>, vector<16x256xf32> -> vector<144x256xf32>
    %413 = tpu.concatenate %411, %412 in 0 : vector<256x256xf32>, vector<144x256xf32> -> vector<400x256xf32>
    %cst_266 = arith.constant dense<0.000000e+00> : vector<1x256xf32>
    %414 = tpu.matmul %378, %413, %cst_266 {dimension_numbers = #tpu.dot_dimension_numbers<[1], [0], [0], [1], [0, 0, 1, 1], [], []>} : vector<1x400xf32>, vector<400x256xf32>, vector<1x256xf32> -> vector<1x256xf32>
    %415 = arith.addf %373, %414 : vector<1x256xf32>
    %416 = vector.extract_strided_slice %0 {offsets = [12, 0], sizes = [1, 256], strides = [1, 1]} : vector<26x256xf32> to vector<1x256xf32>
    %cst_267 = arith.constant 5.000000e-01 : f32
    %417 = vector.broadcast %cst_267 : f32 to vector<1x256xf32>
    %418 = arith.mulf %417, %415 : vector<1x256xf32>
    %cst_268 = arith.constant 5.000000e-01 : f32
    %419 = vector.broadcast %cst_268 : f32 to vector<1x256xf32>
    %420 = arith.mulf %419, %416 : vector<1x256xf32>
    %421 = arith.addf %418, %420 : vector<1x256xf32>
    %c0_269 = arith.constant 0 : index
    %c0_270 = arith.constant 0 : index
    %422 = vector.load %arg7[%c0_269, %c0_270] : memref<1x256xf32, #tpu.memory_space<vmem>>, vector<1x256xf32>
    tpu.vector_store %arg7[%c0_269, %c0_270], %421 {strides = array<i32>} : memref<1x256xf32, #tpu.memory_space<vmem>>, vector<1x256xf32>,
    return
  }
  func.func @transform_0(%arg0: i32) -> (i32, i32) {
    %c0_i32 = arith.constant 0 : i32
    %c0_i32_0 = arith.constant 0 : i32
    return %c0_i32, %arg0 : i32, i32
  }
  func.func @transform_1(%arg0: i32) -> (i32, i32) {
    %c0_i32 = arith.constant 0 : i32
    %c0_i32_0 = arith.constant 0 : i32
    %c0_i32_1 = arith.constant 0 : i32
    return %c0_i32, %c0_i32_0 : i32, i32
  }
  func.func @transform_2(%arg0: i32) -> (i32, i32, i32) {
    %c0_i32 = arith.constant 0 : i32
    %c0_i32_0 = arith.constant 0 : i32
    %c0_i32_1 = arith.constant 0 : i32
    %c0_i32_2 = arith.constant 0 : i32
    return %c0_i32, %c0_i32_0, %c0_i32_1 : i32, i32, i32
  }
  func.func @transform_3(%arg0: i32) -> (i32, i32, i32) {
    %c0_i32 = arith.constant 0 : i32
    %c0_i32_0 = arith.constant 0 : i32
    %c0_i32_1 = arith.constant 0 : i32
    %c0_i32_2 = arith.constant 0 : i32
    return %c0_i32, %c0_i32_0, %c0_i32_1 : i32, i32, i32
  }
  func.func @transform_4(%arg0: i32) -> (i32, i32) {
    %c0_i32 = arith.constant 0 : i32
    %c0_i32_0 = arith.constant 0 : i32
    %c0_i32_1 = arith.constant 0 : i32
    return %c0_i32, %c0_i32_0 : i32, i32
  }
  func.func @transform_5(%arg0: i32) -> (i32, i32) {
    %c0_i32 = arith.constant 0 : i32
    %c0_i32_0 = arith.constant 0 : i32
    %c0_i32_1 = arith.constant 0 : i32
    return %c0_i32, %c0_i32_0 : i32, i32
  }
  func.func @transform_6(%arg0: i32) -> (i32, i32) {
    %c0_i32 = arith.constant 0 : i32
    %c0_i32_0 = arith.constant 0 : i32
    return %c0_i32, %arg0 : i32, i32
  }
}

</mosaic_0001>

<bundles_post_ra>
// kernel: tpu_custom_call.1
= control target key start
LH: loop header
LB: loop body
LE: loop exit
PB: predicated region body
PF: predicated region fallthrough
CT: control target
= control target key end

     0   :  { %6 = vsyncpa [#allocation3], 0  ;;  %s128_s0 = inlined_call_operand.hbm [shape: f32[8,128], index: 0, kind: input, shape index: {}]   ;;  %s129_s1 = inlined_call_operand.hbm [shape: f32[8,128], index: 1, kind: output, shape index: {}]  }
   0x1   :  { %7 = vsyncpa [#allocation4], 0  ;;  %s91_s6 = smov [#allocation2]   ;;  %s43_s10 = scalar_lea.hbm %s128_s0, 128 }
   0x2   :  { %s14_s7 = sshll.u32 %s91_s6, 4  ;;  %p44_p0 = scmp.ne.s32.totalorder %s128_s0, %s43_s10  ;;  %s15_s7 = int_to_ptr.vmem [resolvable:$true] %s14_s7 }
   0x3   :  { %p47_p1 = scmp.lt.u32.totalorder %s43_s10, %s128_s0 }
   0x5   :  { %p49_p2 = pnand %p47_p1, %p44_p0 }
   0x7   :  { %52 = shalt.err (!%p49_p2)
}
   0x8   :  { %s53_s15 = scalar_lea.vmem %s15_s7, 128  ;;  %p58_p4 = scmp.lt.s32.totalorder %s15_s7, %s15_s7 }
   0x9   :  { %p54_p3 = scmp.ne.s32.totalorder %s15_s7, %s53_s15  ;;  %p59_p5 = scmp.lt.s32.totalorder %s53_s15, %s53_s15 }
   0xb   :  { %p60_p6 = por %p59_p5, %p58_p4 }
   0xd   :  { %p61_p7 = pnand %p60_p6, %p54_p3 }
   0xf   :  { %64 = shalt.err (!%p61_p7)
}
  0x10   :  { %17 = dma.hbm_to_vmem [thread:$0]  %s128_s0, 128, %s15_s7, [#allocation3]  }
  0x11   :  { %87 = dma.done.wait [#allocation3], 128  }
  0x12   :  { %88 = vsyncadd [#allocation3], 4294967168  ;;  %v21_v0 = vld [vmem:[#allocation2] sm:$0xff]  ;;  %s92_s18 = smov 1   ;;  %s93_s19 = smov [#allocation5]  }
  0x13   :  { %22 = vrot.lane.b32.xlu0 %v21_v0, %s92_s18  ;;  %s31_s20 = sshll.u32 %s93_s19, 4  ;;  %s32_s20 = int_to_ptr.vmem [resolvable:$true] %s31_s20 }
  0x14   :  { %s65_s21 = scalar_lea.vmem %s32_s20, 128  ;;  %p70_p9 = scmp.lt.s32.totalorder %s32_s20, %s32_s20 }
  0x15   :  { %p66_p8 = scmp.ne.s32.totalorder %s32_s20, %s65_s21  ;;  %p71_p10 = scmp.lt.s32.totalorder %s65_s21, %s65_s21 }
  0x17   :  { %p72_p11 = por %p71_p10, %p70_p9 }
  0x19   :  { %p73_p12 = pnand %p72_p11, %p66_p8 }
  0x85   :  { %v23_v1 = vpop.permute.xlu0 %22 }
  0x86   :  { %24 = vst [vmem:[#allocation5] sm:$0xff] %v23_v1 }
  0x87   :  { %76 = shalt.err (!%p73_p12)
}
  0x88   :  { %s77_s0 = scalar_lea.hbm %s129_s1, 128 }
  0x89   :  { %p78_p13 = scmp.ne.s32.totalorder %s129_s1, %s77_s0  ;;  %p81_p0 = scmp.lt.u32.totalorder %s77_s0, %s129_s1 }
  0x8b   :  { %p83_p1 = pnand %p81_p0, %p78_p13 }
  0x8d   :  { %86 = shalt.err (!%p83_p1)
}
  0x8e   :  { %34 = dma.vmem_to_hbm [thread:$0]  %s32_s20, 128, %s129_s1, [#allocation4]  }
  0x8f   :  { %89 = dma.done.wait [#allocation4], 128  }
  0x90   :  { %90 = vsyncadd [#allocation4], 4294967168 }
  0x91   :  { %38 = vsyncpa [#allocation3], 1 }
  0x92   :  { %39 = vsyncpa [#allocation4], 1 }

// kernel: _lambda_.1
= control target key start
LH: loop header
LB: loop body
LE: loop exit
PB: predicated region body
PF: predicated region fallthrough
CT: control target
= control target key end

     0   :  { %s5814_s21 = smov 0   ;;  %s5816_s22 = smov 0   ;;  %s8779_s0 = inlined_call_operand.vmem [shape: f32[26,512], index: 0, kind: input, shape index: {}]   ;;  %s8780_s1 = inlined_call_operand.vmem [shape: f32[64,26], index: 1, kind: input, shape index: {}]   ;;  %s8781_s2 = inlined_call_operand.vmem [shape: f32[3,8,200], index: 2, kind: input, shape index: {}]   ;;  %s8782_s3 = inlined_call_operand.vmem [shape: f32[3,9,400], index: 3, kind: input, shape index: {}]   ;;  %s8783_s4 = inlined_call_operand.vmem [shape: f32[1,400], index: 4, kind: input, shape index: {}]   ;;  %s8784_s5 = inlined_call_operand.vmem [shape: f32[8,1], index: 5, kind: input, shape index: {}]   ;;  %s8785_s6 = inlined_call_operand.vmem [shape: f32[1,512], index: 6, kind: output, shape index: {}]  }
   0x1   :  { %s5818_s23 = smov 0  }
   0x2 LB: > { %s3559_s24 = sadd.s32 4294967295, %s5760_s23   ;;  %s5831_s25 = sadd.s32 1, %s5760_s23   ;;  %s5760_s23 = sphi %s5818_s23, %s9291_s23   ;;  %s5756_s22 = sphi %s5816_s22, %s9290_s22   ;;  %s5752_s21 = sphi %s5814_s21, %s9289_s21  }
   0x3   : > { %s20_s26 = ssub.s32 %s5760_s23, %s5831_s25  ;;  %s23_s27 = sadd.s32 1, %s5756_s22 }
   0x4   : > { %p21_p0 = scmp.eq.s32.totalorder %s20_s26, 0  ;;  %p30_p1 = scmp.ne.s32.totalorder %s5756_s22, %s5752_s21 }
   0x5   : > { %p31_p2 = scmp.eq.s32.totalorder %s5760_s23, 0  ;;  %p3562_p4 = scmp.ge.s32.totalorder %s5760_s23, 2 }
   0x6   : > { %s5840_s28 = scalar_select %p21_p0, %s5756_s22, %s23_s27  }
   0x7   : > { %p32_p3 = por %p31_p2, %p30_p1  ;;  %202 = sbr.rel (%p3562_p4) target bundleno = 22 (0x16), region = 36 }
   0xe   : > { %205 = sbr.rel (!%p32_p3) target bundleno = 22 (0x16), region = 40  ;;  %s207_s29 = sand.u32 (%p32_p3), 1, %s5756_s22  }
   0xf   : > { %s3611_s30 = sshll.u32 (%p32_p3), %s5760_s23, 4  ;;  %s3563_s7 = sshll.u32 (%p32_p3), %s207_s29, 6 }
  0x10   : > { %s212_s10 = scalar_lea.vmem (%p32_p3), %s8779_s0, %s3611_s30  ;;  %s209_s11 = scalar_lea.vmem (%p32_p3), [#allocation3], %s3563_s7 }
  0x11   : > { %v225_v0 = vld [vmem:[%s212_s10] sm:$0xff] (%p32_p3)  ;;  %v227_v1 = vld [vmem:[%s212_s10 + $0x8] sm:$0xff] (%p32_p3) }
  0x12   : > { %v229_v2 = vld [vmem:[%s212_s10 + $0x20] sm:$0xff] (%p32_p3)  ;;  %226 = vst [vmem:[%s209_s11] sm:$0xff] (%p32_p3), %v225_v0  ;;  %228 = vst [vmem:[%s209_s11 + $0x8] sm:$0xff] (%p32_p3), %v227_v1  ;;  %v231_v3 = vld [vmem:[%s212_s10 + $0x28] sm:$0xff] (%p32_p3) }
  0x13   : > { %230 = vst [vmem:[%s209_s11 + $0x10] sm:$0xff] (%p32_p3), %v229_v2  ;;  %v233_v4 = vld [vmem:[%s212_s10 + $0x40] sm:$0xff] (%p32_p3)  ;;  %v235_v5 = vld [vmem:[%s212_s10 + $0x48] sm:$0xff] (%p32_p3)  ;;  %232 = vst [vmem:[%s209_s11 + $0x18] sm:$0xff] (%p32_p3), %v231_v3 }
  0x14   : > { %234 = vst [vmem:[%s209_s11 + $0x20] sm:$0xff] (%p32_p3), %v233_v4  ;;  %236 = vst [vmem:[%s209_s11 + $0x28] sm:$0xff] (%p32_p3), %v235_v5  ;;  %v237_v6 = vld [vmem:[%s212_s10 + $0x60] sm:$0xff] (%p32_p3)  ;;  %v239_v7 = vld [vmem:[%s212_s10 + $0x68] sm:$0xff] (%p32_p3) }
  0x15   : > { %238 = vst [vmem:[%s209_s11 + $0x30] sm:$0xff] %v237_v6  ;;  %240 = vst [vmem:[%s209_s11 + $0x38] sm:$0xff] %v239_v7 }
  0x16 PF: > { %p3566_p5 = scmp.ge.s32.totalorder %s5760_s23, 1  ;;  %p245_p6 = scmp.lt.s32.totalorder %s5760_s23, 3 }
  0x18   : > { %p246_p7 = pnand %p3566_p5, %p245_p6 }
  0x1a   : > { %249 = sbr.rel (%p246_p7) target bundleno = 4059 (0xfdb), region = 63 }
  0x21   : > { %s252_s12 = sand.u32 1, %s5752_s21   ;;  %v5762_v8 = vmov 0.0   ;;  %vm378_vm0 = vcmask 1041408   ;;  %vm5763_vm1 = vmmov 1   ;;  %v345_v21 = vld [vmem:[%s8780_s1] sm:$0xff]  ;;  %vm8794_vm3 = vcmask 211968  }
  0x22   : > { %s3567_s13 = sshll.u32 %s252_s12, 6  ;;  %449 = vmatprep.mubr.f32.mxu1 %v5762_v8  ;;  %vm3617_vm2 = vmpackc.low %vm378_vm0, %vm5763_vm1  ;;  %v346_v22 = vld [vmem:[%s8780_s1 + $0x8] sm:$0xff]  ;;  %v5764_v31 = vmov 0.2   ;;  %s5765_s19 = smov 14   ;;  %v8799_v37 = vlaneseq }
  0x23   : > { %s5852_s14 = scalar_lea.vmem [#allocation3], %s3567_s13  ;;  %s5766_s20 = smov 113  }
  0x24   : > { %v287_v9 = vld [vmem:[%s5852_s14 + $0x8] sm:$0xff]  ;;  %v289_v10 = vld [vmem:[%s5852_s14 + $0x18] sm:$0xff]  ;;  %v286_v11 = vld [vmem:[%s5852_s14] sm:$0xff]  ;;  %s5767_s21 = smov 114   ;;  %s5768_s26 = smov 1   ;;  %v5917_v38 = vand.u32 127, %v8799_v37 }
  0x25   : > { %v3612_v12 = vpack.c.bf16 %v289_v10, %v287_v9  ;;  %v288_v13 = vld [vmem:[%s5852_s14 + $0x10] sm:$0xff]  ;;  %v291_v14 = vld [vmem:[%s5852_s14 + $0x28] sm:$0xff]  ;;  %v293_v15 = vld [vmem:[%s5852_s14 + $0x38] sm:$0x3]  ;;  %s5769_s27 = smov 2   ;;  %s5770_s29 = smov 127  }
  0x26   : > { %v3614_v16 = vpack.c.bf16 %v288_v13, %v286_v11  ;;  %v3616_v17 = vpack.c.bf16 %v293_v15, %v291_v14  ;;  %v290_v18 = vld [vmem:[%s5852_s14 + $0x20] sm:$0xff]  ;;  %v292_v19 = vld [vmem:[%s5852_s14 + $0x30] sm:$0x3]  ;;  %s5771_s30 = smov 15   ;;  %s5772_s7 = smov 126   ;;  %v296_v39 = vadd.s32 128, %v5917_v38 }
  0x27   : > { %3613 = vmatprep.subr.bf16.mxu1 %v3612_v12  ;;  %v3619_v20 = vpack.c.bf16 %v292_v19, %v290_v18  ;;  %v5923_v42 = vand.u32 15, %v5917_v38  ;;  %vm538_vm6 = vcmp.lt.s32.totalorder %v5917_v38, 113  ;;  %vm522_vm7 = vcmp.lt.s32.totalorder %v5917_v38, 114  ;;  %s5773_s8 = smov 32   ;;  %s5774_s9 = smov 16  }
  0x28   : > { %3615 = vmatpush1.bf16.msra.mxu1 %v3614_v16  ;;  %v5925_v43 = vand.u32 15, %v296_v39  ;;  %vm545_vm8 = vcmp.lt.s32.totalorder %v5917_v38, 1  ;;  %vm529_vm9 = vcmp.lt.s32.totalorder %v5917_v38, 2  ;;  %vm561_vm10 = vcmp.lt.s32.totalorder %v5917_v38, 127  ;;  %s5775_s10 = smov 112   ;;  %s5776_s11 = smov 96  }
  0x29   : > { %3618 = vmatprep.subr.msk.bf16.mxu1 %vm3617_vm2, %v3616_v17  ;;  %vm333_vm11 = vcmp.lt.s32.totalorder %v5923_v42, 1  ;;  %vm339_vm13 = vcmp.lt.s32.totalorder %v5923_v42, 2  ;;  %vm8786_vm15 = vcmp.lt.s32.totalorder %v5917_v38, 15  ;;  %vm321_vm0 = vcmp.ge.s32.totalorder %v5923_v42, 15 }
  0x2a   : > { %vm334_vm12 = vcmp.lt.s32.totalorder %v5925_v43, 1  ;;  %vm8798_vm14 = vcmp.lt.s32.totalorder %v5925_v43, 2  ;;  %vm8797_vm1 = vcmp.ge.s32.totalorder %v5925_v43, 15 }
  0x2c   : > { %3621 = vmatpush1.bf16.msk.msra.mxu1 %vm3617_vm2, %v3619_v20  ;;  %vm8796_vm2 = vcmp.lt.s32.totalorder %v5917_v38, 14 }
  0x2f   : > { %3571 = vmatmul.mubr.msk.f32.vlgmr.msra.gmra.mrb[0].mxu1 %vm8794_vm3, %v345_v21 }
  0x30   : > { %455 = vmatprep.mubr.f32.mxu1 %v5762_v8 }
  0x33   : > { %3572 = vmatmul.mubr.msk.f32.gmra.mrb[2].mxu1 %vm8794_vm3, %v346_v22 }
  0x34   : > { %461 = vmatprep.mubr.f32.mxu1 %v5762_v8 }
 0x102   : > { %v5872_v23 = vpop.f32.mrb[0].mxu1 }
 0x103   : > { %v5874_v24 = vpop.f32.mrb[1].mxu1  ;;  %v498_v25 = vmul.f32 %v5872_v23, %v5872_v23 }
 0x104   : > { %v499_v26 = vmul.f32 %v5874_v24, %v5874_v24 }
 0x106   : > { %v457_v27 = vpop.f32.mrb[2].mxu1 }
 0x107   : > { %v500_v28 = vadd.f32 %v498_v25, %v457_v27  ;;  %v459_v29 = vpop.f32.mrb[3].mxu1 }
 0x108   : > { %v501_v30 = vadd.f32 %v499_v26, %v459_v29 }
 0x109   : > { %vm502_vm4 = vcmp.gt.f32.partialorder %v500_v28, 0.0 }
 0x10a   : > { %v5881_v32 = vsel %vm502_vm4, 1.0, %v5764_v31  ;;  %vm503_vm5 = vcmp.gt.f32.partialorder %v501_v30, 0.0  ;;  %vm8788_vm4 = vcmp.ge.s32.totalorder %v5923_v42, 14 }
 0x10b   : > { %v5884_v33 = vmul.f32 %v5881_v32, %v500_v28  ;;  %v5887_v34 = vsel %vm503_vm5, 1.0, %v5764_v31  ;;  %vm8795_vm5 = vcmp.lt.s32.totalorder %v5917_v38, 126 }
 0x10c   : > { %8804 = vst [vmem:[#allocation4_spill] sm:$0xff] %v5887_v34  ;;  %v5890_v35 = vmul.f32 %v5887_v34, %v501_v30 }
 0x10d   : > { %566 = vrot.lane.b32.xlu0 %v5884_v33, %s5765_s19 }
 0x10e   : > { %v5896_v36 = vpack.i.bf16 %v5890_v35, %v5884_v33 }
 0x110   : > { %4250 = vrot.lane.b32.xlu1 %v5896_v36, %s5766_s20 }
 0x111   : > { %4240 = vrot.lane.b32.xlu0 %v5896_v36, %s5767_s21 }
 0x114   : > { %4255 = vrot.lane.b32.xlu1 %v5896_v36, %s5768_s26 }
 0x115   : > { %4245 = vrot.lane.b32.xlu0 %v5896_v36, %s5769_s27 }
 0x118   : > { %4265 = vrot.lane.b32.xlu1 %v5896_v36, %s5770_s29 }
 0x119   : > { %4260 = vrot.lane.b32.xlu0 %v5896_v36, %s5771_s30 }
 0x11c   : > { %568 = vrot.lane.b32.xlu1 %v5890_v35, %s5765_s19 }
 0x11d   : > { %573 = vrot.lane.b32.xlu0 %v5884_v33, %s5772_s7 }
 0x120   : > { %575 = vrot.lane.b32.xlu1 %v5890_v35, %s5772_s7 }
 0x17f   : > { %v5920_v40 = vpop.permute.xlu0 %566 }
 0x182   : > { %v4251_v41 = vpop.permute.xlu1 %4250 }
 0x183   : > { %v4241_v44 = vpop.permute.xlu0 %4240  ;;  %v4253_v45 = vunpack.i.h.bf16 %v4251_v41  ;;  %v4252_v46 = vunpack.i.l.bf16 %v4251_v41  ;;  %v347_v41 = vld [vmem:[%s8780_s1 + $0x10] sm:$0xff] }
 0x184   : > { %v4243_v47 = vunpack.i.h.bf16 %v4241_v44  ;;  %v4242_v48 = vunpack.i.l.bf16 %v4241_v44  ;;  %3573 = vmatmul.mubr.msk.f32.gmra.mrb[4].mxu1 %vm8794_vm3, %v347_v41  ;;  %v348_v44 = vld [vmem:[%s8780_s1 + $0x18] sm:$0xff] }
 0x185   : > { %v539_v53 = vsel %vm538_vm6, %v4252_v46, %v4253_v45  ;;  %v540_v54 = vsel %vm538_vm6, %v4253_v45, %v4252_v46  ;;  %467 = vmatprep.mubr.f32.mxu1 %v5762_v8 }
 0x186   : > { %v4256_v49 = vpop.permute.xlu1 %4255  ;;  %v523_v57 = vsel %vm522_vm7, %v4242_v48, %v4243_v47  ;;  %v524_v58 = vsel %vm522_vm7, %v4243_v47, %v4242_v48 }
 0x187   : > { %v4258_v50 = vunpack.i.h.bf16 %v4256_v49  ;;  %v4257_v51 = vunpack.i.l.bf16 %v4256_v49  ;;  %v4246_v52 = vpop.permute.xlu0 %4245 }
 0x188   : > { %v4248_v55 = vunpack.i.h.bf16 %v4246_v52  ;;  %v4247_v56 = vunpack.i.l.bf16 %v4246_v52  ;;  %3574 = vmatmul.mubr.msk.f32.gmra.mrb[6].mxu1 %vm8794_vm3, %v348_v44 }
 0x189   : > { %v546_v59 = vsel %vm545_vm8, %v4257_v51, %v4258_v50  ;;  %v547_v60 = vsel %vm545_vm8, %v4258_v50, %v4257_v51  ;;  %473 = vmatprep.mubr.f32.mxu1 %v5762_v8 }
 0x18a   : > { %v530_v61 = vsel %vm529_vm9, %v4247_v56, %v4248_v55  ;;  %v531_v62 = vsel %vm529_vm9, %v4248_v55, %v4247_v56  ;;  %v4266_v63 = vpop.permute.xlu1 %4265  ;;  %v5956_v0 = vsel %vm333_vm11, %v539_v53, %v547_v60  ;;  %v5960_v1 = vsel %vm334_vm12, %v540_v54, %v546_v59 }
 0x18b   : > { %v4268_v2 = vunpack.i.h.bf16 %v4266_v63  ;;  %v4267_v3 = vunpack.i.l.bf16 %v4266_v63  ;;  %v4261_v4 = vpop.permute.xlu0 %4260  ;;  %v4279_v5 = vpack.i.bf16 %v5960_v1, %v5956_v0  ;;  %v5966_v6 = vsel %vm339_vm13, %v523_v57, %v531_v62 }
 0x18c   : > { %v4263_v7 = vunpack.i.h.bf16 %v4261_v4  ;;  %v4262_v9 = vunpack.i.l.bf16 %v4261_v4  ;;  %v5970_v10 = vsel %vm8798_vm14, %v524_v58, %v530_v61  ;;  %v3644_v21 = vpack.c.bf16 %v5956_v0, %v5966_v6 }
 0x18d   : > { %v562_v11 = vsel %vm561_vm10, %v4267_v3, %v4268_v2  ;;  %v563_v12 = vsel %vm561_vm10, %v4268_v2, %v4267_v3  ;;  %4280 = vrot.lane.b32.xlu1 %v4279_v5, %s5773_s8  ;;  %v4269_v13 = vpack.i.bf16 %v5970_v10, %v5966_v6  ;;  %v3642_v20 = vpack.c.bf16 %v5960_v1, %v5970_v10 }
 0x18e   : > { %v555_v14 = vsel %vm8786_vm15, %v4262_v9, %v4263_v7  ;;  %v556_v15 = vsel %vm8786_vm15, %v4263_v7, %v4262_v9  ;;  %v569_v16 = vpop.permute.xlu1 %568  ;;  %vm8787_vm15 = vcmp.ge.s32.totalorder %v5925_v43, 14 }
 0x18f   : > { %4270 = vrot.lane.b32.xlu0 %v4269_v13, %s5773_s8  ;;  %v5987_v17 = vsel %vm321_vm0, %v556_v15, %v562_v11  ;;  %v5991_v18 = vsel %vm8797_vm1, %v555_v14, %v563_v12  ;;  %v574_v22 = vpop.permute.xlu0 %573  ;;  %v571_v26 = vsel %vm8796_vm2, %v5920_v40, %v569_v16  ;;  %v572_v27 = vsel %vm8796_vm2, %v569_v16, %v5920_v40 }
 0x190   : > { %v4284_v19 = vpack.i.bf16 %v5991_v18, %v5987_v17  ;;  %v3648_v1 = vpack.c.bf16 %v5987_v17, %v5884_v33 }
 0x192   : > { %v576_v25 = vpop.permute.xlu1 %575  ;;  %4285 = vrot.lane.b32.xlu1 %v4284_v19, %s5773_s8 }
 0x193   : > { %v578_v28 = vsel %vm8795_vm5, %v574_v22, %v576_v25  ;;  %v579_v29 = vsel %vm8795_vm5, %v576_v25, %v574_v22  ;;  %4275 = vrot.lane.b32.xlu0 %v5896_v36, %s5773_s8 }
 0x194   : > { %v6018_v30 = vsel %vm8788_vm4, %v572_v27, %v578_v28  ;;  %v6022_v39 = vsel %vm8787_vm15, %v571_v26, %v579_v29  ;;  %vm8789_vm15 = vcmask 588800   ;;  %vm8790_vm4 = vcmp.lt.s32.totalorder %v5917_v38, 32 }
 0x195   : > { %v4289_v40 = vpack.i.bf16 %v6022_v39, %v6018_v30 }
 0x196   : > { %4295 = vrot.lane.b32.xlu1 %v4269_v13, %s5774_s9 }
 0x197   : > { %4290 = vrot.lane.b32.xlu0 %v4289_v40, %s5773_s8 }
 0x19a   : > { %4300 = vrot.lane.b32.xlu1 %v5896_v36, %s5774_s9 }
 0x19b   : > { %4305 = vrot.lane.b32.xlu0 %v4279_v5, %s5774_s9 }
 0x19e   : > { %4315 = vrot.lane.b32.xlu1 %v4289_v40, %s5774_s9 }
 0x19f   : > { %4310 = vrot.lane.b32.xlu0 %v4284_v19, %s5774_s9 }
 0x1a2   : > { %4330 = vrot.lane.b32.xlu1 %v4279_v5, %s5775_s10 }
 0x1a3   : > { %4320 = vrot.lane.b32.xlu0 %v4269_v13, %s5775_s10 }
 0x1a6   : > { %4335 = vrot.lane.b32.xlu1 %v4284_v19, %s5775_s10 }
 0x1a7   : > { %4325 = vrot.lane.b32.xlu0 %v5896_v36, %s5775_s10 }
 0x1aa   : > { %4345 = vrot.lane.b32.xlu1 %v4269_v13, %s5776_s11 }
 0x1ab   : > { %4340 = vrot.lane.b32.xlu0 %v4289_v40, %s5775_s10 }
 0x1ae   : > { %4350 = vrot.lane.b32.xlu1 %v5896_v36, %s5776_s11  ;;  %v517_v36 = vld [vmem:[%s8781_s2 + $0x8] sm:$0xff] }
 0x1af   : > { %4355 = vrot.lane.b32.xlu0 %v4279_v5, %s5776_s11  ;;  %3579 = vmatprep.mubr.msk.f32.mxu0 %vm8789_vm15, %v517_v36  ;;  %vm8791_vm15 = vcmp.lt.s32.totalorder %v5917_v38, 16 }
 0x1b2   : > { %700 = vrot.lane.b32.xlu1 %v6018_v30, %s5776_s11 }
 0x1b3   : > { %4360 = vrot.lane.b32.xlu0 %v4284_v19, %s5776_s11 }
 0x1b7   : > { %702 = vrot.lane.b32.xlu0 %v6022_v39, %s5776_s11 }
 0x1ff   : > { %v4281_v45 = vpop.permute.xlu1 %4280 }
 0x200   : > { %v4283_v46 = vunpack.i.h.bf16 %v4281_v45  ;;  %v4282_v47 = vunpack.i.l.bf16 %v4281_v45 }
 0x201   : > { %v4271_v48 = vpop.permute.xlu0 %4270 }
 0x202   : > { %v4273_v49 = vunpack.i.h.bf16 %v4271_v48  ;;  %v4272_v50 = vunpack.i.l.bf16 %v4271_v48  ;;  %v593_v51 = vsel %vm8790_vm4, %v4282_v47, %v4283_v46  ;;  %v594_v52 = vsel %vm8790_vm4, %v4283_v46, %v4282_v47 }
 0x204   : > { %v4286_v53 = vpop.permute.xlu1 %4285  ;;  %v587_v54 = vsel %vm8790_vm4, %v4272_v50, %v4273_v49  ;;  %v588_v55 = vsel %vm8790_vm4, %v4273_v49, %v4272_v50 }
 0x205   : > { %v4288_v56 = vunpack.i.h.bf16 %v4286_v53  ;;  %v4287_v57 = vunpack.i.l.bf16 %v4286_v53  ;;  %v4276_v58 = vpop.permute.xlu0 %4275  ;;  %v3622_v59 = vpack.c.bf16 %v593_v51, %v587_v54  ;;  %v3624_v60 = vpack.c.bf16 %v594_v52, %v588_v55 }
 0x206   : > { %v4278_v61 = vunpack.i.h.bf16 %v4276_v58  ;;  %v4277_v62 = vunpack.i.l.bf16 %v4276_v58 }
 0x207   : > { %3623 = vmatprep.subr.bf16.mxu0 %v3622_v59  ;;  %v605_v63 = vsel %vm8790_vm4, %v4287_v57, %v4288_v56  ;;  %v606_v2 = vsel %vm8790_vm4, %v4288_v56, %v4287_v57 }
 0x208   : > { %3625 = vmatpush1.bf16.msra.mxu0 %v3624_v60  ;;  %v4296_v3 = vpop.permute.xlu1 %4295  ;;  %v599_v4 = vsel %vm8790_vm4, %v4277_v62, %v4278_v61  ;;  %v600_v5 = vsel %vm8790_vm4, %v4278_v61, %v4277_v62 }
 0x209   : > { %v4298_v7 = vunpack.i.h.bf16 %v4296_v3  ;;  %v4297_v9 = vunpack.i.l.bf16 %v4296_v3  ;;  %v4291_v11 = vpop.permute.xlu0 %4290  ;;  %v3626_v12 = vpack.c.bf16 %v605_v63, %v599_v4  ;;  %v3628_v13 = vpack.c.bf16 %v606_v2, %v600_v5 }
 0x20a   : > { %v4293_v14 = vunpack.i.h.bf16 %v4291_v11  ;;  %v4292_v15 = vunpack.i.l.bf16 %v4291_v11 }
 0x20b   : > { %3627 = vmatprep.subr.bf16.mxu0 %v3626_v12  ;;  %v618_v16 = vsel %vm8791_vm15, %v4297_v9, %v4298_v7  ;;  %v619_v19 = vsel %vm8791_vm15, %v4298_v7, %v4297_v9  ;;  %v3646_v9 = vpack.c.bf16 %v5991_v18, %v5890_v35 }
 0x20c   : > { %3629 = vmatpush1.bf16.msra.mxu0 %v3628_v13  ;;  %v4301_v22 = vpop.permute.xlu1 %4300  ;;  %v611_v25 = vsel %vm8790_vm4, %v4292_v15, %v4293_v14  ;;  %v612_v26 = vsel %vm8790_vm4, %v4293_v14, %v4292_v15  ;;  %vm8793_vm4 = vcmp.lt.s32.totalorder %v5917_v38, 112 }
 0x20d   : > { %v4303_v27 = vunpack.i.h.bf16 %v4301_v22  ;;  %v4302_v28 = vunpack.i.l.bf16 %v4301_v22  ;;  %v4306_v29 = vpop.permute.xlu0 %4305  ;;  %v3630_v40 = vpack.c.bf16 %v618_v16, %v611_v25  ;;  %v3632_v41 = vpack.c.bf16 %v619_v19, %v612_v26 }
 0x20e   : > { %v4308_v44 = vunpack.i.h.bf16 %v4306_v29  ;;  %v4307_v36 = vunpack.i.l.bf16 %v4306_v29 }
 0x20f   : > { %3631 = vmatprep.subr.bf16.mxu0 %v3630_v40  ;;  %v630_v45 = vsel %vm8791_vm15, %v4302_v28, %v4303_v27  ;;  %v631_v46 = vsel %vm8791_vm15, %v4303_v27, %v4302_v28 }
 0x210   : > { %v4316_v47 = vpop.permute.xlu1 %4315  ;;  %3633 = vmatpush1.bf16.msra.mxu0 %v3632_v41  ;;  %v624_v48 = vsel %vm8791_vm15, %v4307_v36, %v4308_v44  ;;  %v625_v49 = vsel %vm8791_vm15, %v4308_v44, %v4307_v36 }
 0x211   : > { %v4318_v50 = vunpack.i.h.bf16 %v4316_v47  ;;  %v4317_v51 = vunpack.i.l.bf16 %v4316_v47  ;;  %v4311_v52 = vpop.permute.xlu0 %4310  ;;  %v3634_v53 = vpack.c.bf16 %v630_v45, %v624_v48  ;;  %v3636_v54 = vpack.c.bf16 %v631_v46, %v625_v49 }
 0x212   : > { %v4313_v55 = vunpack.i.h.bf16 %v4311_v52  ;;  %v4312_v56 = vunpack.i.l.bf16 %v4311_v52 }
 0x213   : > { %3635 = vmatprep.subr.bf16.mxu0 %v3634_v53  ;;  %v642_v57 = vsel %vm8791_vm15, %v4317_v51, %v4318_v50  ;;  %v643_v58 = vsel %vm8791_vm15, %v4318_v50, %v4317_v51 }
 0x214   : > { %3637 = vmatpush1.bf16.msra.mxu0 %v3636_v54  ;;  %v636_v59 = vsel %vm8791_vm15, %v4312_v56, %v4313_v55  ;;  %v637_v60 = vsel %vm8791_vm15, %v4313_v55, %v4312_v56  ;;  %v4331_v61 = vpop.permute.xlu1 %4330  ;;  %vm8792_vm15 = vcmp.lt.s32.totalorder %v5917_v38, 96 }
 0x215   : > { %v4321_v62 = vpop.permute.xlu0 %4320  ;;  %v3638_v63 = vpack.c.bf16 %v642_v57, %v636_v59  ;;  %v3640_v2 = vpack.c.bf16 %v643_v58, %v637_v60  ;;  %v4333_v15 = vunpack.i.h.bf16 %v4331_v61  ;;  %v4332_v16 = vunpack.i.l.bf16 %v4331_v61 }
 0x216   : > { %v4323_v3 = vunpack.i.h.bf16 %v4321_v62  ;;  %v4322_v4 = vunpack.i.l.bf16 %v4321_v62 }
 0x217   : > { %3639 = vmatprep.subr.bf16.mxu0 %v3638_v63  ;;  %v656_v33 = vsel %vm8793_vm4, %v4333_v15, %v4332_v16  ;;  %v655_v40 = vsel %vm8793_vm4, %v4332_v16, %v4333_v15 }
 0x218   : > { %3641 = vmatpush1.bf16.msra.mxu0 %v3640_v2  ;;  %v4336_v7 = vpop.permute.xlu1 %4335  ;;  %v650_v13 = vsel %vm8793_vm4, %v4323_v3, %v4322_v4  ;;  %v649_v35 = vsel %vm8793_vm4, %v4322_v4, %v4323_v3 }
 0x219   : > { %v4326_v5 = vpop.permute.xlu0 %4325  ;;  %3643 = vmatprep.subr.bf16.mxu0 %v3642_v20  ;;  %v3650_v10 = vpack.c.bf16 %v650_v13, %v6022_v39  ;;  %v4338_v19 = vunpack.i.h.bf16 %v4336_v7  ;;  %v4337_v22 = vunpack.i.l.bf16 %v4336_v7  ;;  %v3652_v25 = vpack.c.bf16 %v649_v35, %v6018_v30 }
 0x21a   : > { %v4328_v11 = vunpack.i.h.bf16 %v4326_v5  ;;  %v4327_v12 = vunpack.i.l.bf16 %v4326_v5 }
 0x21b   : > { %v668_v36 = vsel %vm8793_vm4, %v4338_v19, %v4337_v22  ;;  %v667_v51 = vsel %vm8793_vm4, %v4337_v22, %v4338_v19 }
 0x21c   : > { %3645 = vmatpush1.bf16.msra.mxu0 %v3644_v21  ;;  %v662_v0 = vsel %vm8793_vm4, %v4328_v11, %v4327_v12  ;;  %v4346_v6 = vpop.permute.xlu1 %4345  ;;  %v661_v39 = vsel %vm8793_vm4, %v4327_v12, %v4328_v11 }
 0x21d   : > { %v4341_v14 = vpop.permute.xlu0 %4340  ;;  %3647 = vmatprep.subr.bf16.mxu0 %v3646_v9  ;;  %v3654_v17 = vpack.c.bf16 %v662_v0, %v656_v33  ;;  %v4348_v41 = vunpack.i.h.bf16 %v4346_v6  ;;  %v4347_v30 = vunpack.i.l.bf16 %v4346_v6  ;;  %v3656_v44 = vpack.c.bf16 %v661_v39, %v655_v40  ;;  %v516_v9 = vld [vmem:[%s8781_s2] sm:$0xff] }
 0x21e   : > { %v4343_v18 = vunpack.i.h.bf16 %v4341_v14  ;;  %v4342_v20 = vunpack.i.l.bf16 %v4341_v14 }
 0x21f   : > { %v681_v55 = vsel %vm8792_vm15, %v4348_v41, %v4347_v30  ;;  %v680_v59 = vsel %vm8792_vm15, %v4347_v30, %v4348_v41 }
 0x220   : > { %3649 = vmatpush1.bf16.msra.mxu0 %v3648_v1  ;;  %v674_v28 = vsel %vm8793_vm4, %v4343_v18, %v4342_v20  ;;  %v4351_v45 = vpop.permute.xlu1 %4350  ;;  %v673_v47 = vsel %vm8793_vm4, %v4342_v20, %v4343_v18 }
 0x221   : > { %v4356_v21 = vpop.permute.xlu0 %4355  ;;  %3651 = vmatprep.subr.bf16.mxu0 %v3650_v10  ;;  %v3658_v46 = vpack.c.bf16 %v674_v28, %v668_v36  ;;  %v4353_v52 = vunpack.i.h.bf16 %v4351_v45  ;;  %v4352_v53 = vunpack.i.l.bf16 %v4351_v45  ;;  %v3660_v54 = vpack.c.bf16 %v673_v47, %v667_v51 }
 0x222   : > { %v4358_v26 = vunpack.i.h.bf16 %v4356_v21  ;;  %v4357_v27 = vunpack.i.l.bf16 %v4356_v21 }
 0x223   : > { %v693_v61 = vsel %vm8792_vm15, %v4353_v52, %v4352_v53  ;;  %v692_v3 = vsel %vm8792_vm15, %v4352_v53, %v4353_v52 }
 0x224   : > { %3653 = vmatpush1.bf16.msra.mxu0 %v3652_v25  ;;  %v687_v50 = vsel %vm8792_vm15, %v4358_v26, %v4357_v27  ;;  %v686_v57 = vsel %vm8792_vm15, %v4357_v27, %v4358_v26  ;;  %v701_v5 = vpop.permute.xlu1 %700 }
 0x225   : > { %v4361_v29 = vpop.permute.xlu0 %4360  ;;  %3655 = vmatprep.subr.bf16.mxu0 %v3654_v17  ;;  %v3662_v56 = vpack.c.bf16 %v687_v50, %v681_v55  ;;  %v3664_v60 = vpack.c.bf16 %v686_v57, %v680_v59 }
 0x226   : > { %v4363_v48 = vunpack.i.h.bf16 %v4361_v29  ;;  %v4362_v49 = vunpack.i.l.bf16 %v4361_v29 }
 0x228   : > { %3657 = vmatpush1.bf16.msra.mxu0 %v3656_v44  ;;  %v699_v58 = vsel %vm8792_vm15, %v4363_v48, %v4362_v49  ;;  %v698_v63 = vsel %vm8792_vm15, %v4362_v49, %v4363_v48 }
 0x229   : > { %3659 = vmatprep.subr.bf16.mxu0 %v3658_v46  ;;  %v3666_v62 = vpack.c.bf16 %v699_v58, %v693_v61  ;;  %v703_v2 = vpop.permute.xlu0 %702  ;;  %v3668_v4 = vpack.c.bf16 %v698_v63, %v692_v3 }
 0x22a   : > { %v705_v7 = vsel %vm8792_vm15, %v703_v2, %v701_v5  ;;  %v704_v11 = vsel %vm8792_vm15, %v701_v5, %v703_v2 }
 0x22c   : > { %3661 = vmatpush1.bf16.msra.mxu0 %v3660_v54 }
 0x22d   : > { %3663 = vmatprep.subr.bf16.mxu0 %v3662_v56 }
 0x230   : > { %3665 = vmatpush1.bf16.msra.mxu0 %v3664_v60 }
 0x231   : > { %3667 = vmatprep.subr.bf16.mxu0 %v3666_v62 }
 0x234   : > { %3669 = vmatpush1.bf16.msra.mxu0 %v3668_v4 }
 0x235   : > { %760 = vmatprep.subr.mxu0 %v705_v7 }
 0x238   : > { %761 = vmatpush1.msra.mxu0 %v704_v11 }
 0x239   : > { %777 = vmatmul.mubr.f32.vlgmr.msra.gmra.mrb[0].mxu0 %v516_v9 }
 0x257   : > { %v6161_v12 = vpop.f32.mrb[4].mxu1 }
 0x258   : > { %v706_v13 = vmul.f32 %v6161_v12, %v6161_v12  ;;  %v6165_v14 = vpop.f32.mrb[5].mxu1 }
 0x259   : > { %v707_v15 = vmul.f32 %v6165_v14, %v6165_v14 }
 0x25b   : > { %v469_v16 = vpop.f32.mrb[6].mxu1 }
 0x25c   : > { %v4166_v1 = vadd.f32 %v706_v13, %v469_v16  ;;  %v471_v10 = vpop.f32.mrb[7].mxu1 }
 0x25d   : > { %v4168_v35 = vadd.f32 %v707_v15, %v471_v10 }
 0x30c   : > { %v778_v18 = vpop.f32.mrb[0].mxu0 }
 0x30d   : > { %v4167_v20 = vadd.f32 %v4166_v1, %v778_v18  ;;  %v780_v0 = vpop.f32.mrb[1].mxu0 }
 0x30e   : > { %v4169_v6 = vadd.f32 %v4168_v35, %v780_v0 }
 0x30f   : > { %vm785_vm15 = vcmp.gt.f32.partialorder %v4167_v20, 0.0 }
 0x310   : > { %v6170_v21 = vsel %vm785_vm15, 1.0, %v5764_v31  ;;  %vm786_vm4 = vcmp.gt.f32.partialorder %v4169_v6, 0.0  ;;  %vm8805_vm15 = vcmp.lt.s32.totalorder %v5917_v38, 15 }
 0x311   : > { %v6173_v19 = vmul.f32 %v4167_v20, %v6170_v21  ;;  %v6176_v22 = vsel %vm786_vm4, 1.0, %v5764_v31  ;;  %vm8806_vm4 = vmmov %vm8805_vm15 }
 0x312   : > { %v6179_v25 = vmul.f32 %v4169_v6, %v6176_v22 }
 0x313   : > { %845 = vrot.lane.b32.xlu1 %v6173_v19, %s5765_s19 }
 0x314   : > { %v6185_v33 = vpack.i.bf16 %v6179_v25, %v6173_v19 }
 0x316   : > { %4370 = vrot.lane.b32.xlu0 %v6185_v33, %s5769_s27 }
 0x317   : > { %4365 = vrot.lane.b32.xlu1 %v6185_v33, %s5767_s21 }
 0x31a   : > { %4380 = vrot.lane.b32.xlu0 %v6185_v33, %s5768_s26 }
 0x31b   : > { %4375 = vrot.lane.b32.xlu1 %v6185_v33, %s5766_s20 }
 0x31e   : > { %4390 = vrot.lane.b32.xlu0 %v6185_v33, %s5770_s29 }
 0x31f   : > { %4385 = vrot.lane.b32.xlu1 %v6185_v33, %s5771_s30 }
 0x322   : > { %847 = vrot.lane.b32.xlu0 %v6179_v25, %s5765_s19 }
 0x323   : > { %851 = vrot.lane.b32.xlu1 %v6173_v19, %s5772_s7 }
 0x326   : > { %853 = vrot.lane.b32.xlu0 %v6179_v25, %s5772_s7 }
 0x385   : > { %v846_v17 = vpop.permute.xlu1 %845 }
 0x388   : > { %v4371_v39 = vpop.permute.xlu0 %4370 }
 0x389   : > { %v4373_v26 = vunpack.i.h.bf16 %v4371_v39  ;;  %v4372_v27 = vunpack.i.l.bf16 %v4371_v39  ;;  %v4366_v28 = vpop.permute.xlu1 %4365 }
 0x38a   : > { %v4368_v29 = vunpack.i.h.bf16 %v4366_v28  ;;  %v4367_v40 = vunpack.i.l.bf16 %v4366_v28 }
 0x38b   : > { %v813_v41 = vsel %vm529_vm9, %v4372_v27, %v4373_v26  ;;  %v814_v30 = vsel %vm529_vm9, %v4373_v26, %v4372_v27 }
 0x38c   : > { %v807_v44 = vsel %vm522_vm7, %v4367_v40, %v4368_v29  ;;  %v808_v36 = vsel %vm522_vm7, %v4368_v29, %v4367_v40  ;;  %v4381_v45 = vpop.permute.xlu0 %4380  ;;  %v350_v40 = vld [vmem:[%s8780_s1 + $0x28] sm:$0xff] }
 0x38d   : > { %v4383_v46 = vunpack.i.h.bf16 %v4381_v45  ;;  %v4382_v47 = vunpack.i.l.bf16 %v4381_v45  ;;  %v4376_v48 = vpop.permute.xlu1 %4375  ;;  %v6215_v49 = vsel %vm339_vm13, %v807_v44, %v814_v30  ;;  %v6219_v50 = vsel %vm8798_vm14, %v808_v36, %v813_v41 }
 0x38e   : > { %v4378_v51 = vunpack.i.h.bf16 %v4376_v48  ;;  %v4377_v52 = vunpack.i.l.bf16 %v4376_v48  ;;  %v4394_v53 = vpack.i.bf16 %v6219_v50, %v6215_v49 }
 0x38f   : > { %v827_v54 = vsel %vm545_vm8, %v4382_v47, %v4383_v46  ;;  %v828_v55 = vsel %vm545_vm8, %v4383_v46, %v4382_v47 }
 0x390   : > { %v821_v56 = vsel %vm538_vm6, %v4377_v52, %v4378_v51  ;;  %v822_v57 = vsel %vm538_vm6, %v4378_v51, %v4377_v52  ;;  %v4391_v58 = vpop.permute.xlu0 %4390  ;;  %4395 = vrot.lane.b32.xlu1 %v4394_v53, %s5773_s8 }
 0x391   : > { %v4393_v59 = vunpack.i.h.bf16 %v4391_v58  ;;  %v4392_v60 = vunpack.i.l.bf16 %v4391_v58  ;;  %v4386_v61 = vpop.permute.xlu1 %4385  ;;  %v6234_v62 = vsel %vm333_vm11, %v821_v56, %v828_v55  ;;  %v6238_v63 = vsel %vm334_vm12, %v822_v57, %v827_v54 }
 0x392   : > { %v4388_v2 = vunpack.i.h.bf16 %v4386_v61  ;;  %v4387_v3 = vunpack.i.l.bf16 %v4386_v61  ;;  %v4404_v4 = vpack.i.bf16 %v6238_v63, %v6234_v62  ;;  %v3690_v15 = vpack.c.bf16 %v6238_v63, %v6219_v50 }
 0x393   : > { %v841_v5 = vsel %vm561_vm10, %v4392_v60, %v4393_v59  ;;  %v842_v7 = vsel %vm561_vm10, %v4393_v59, %v4392_v60  ;;  %v3692_v35 = vpack.c.bf16 %v6234_v62, %v6215_v49 }
 0x394   : > { %v835_v9 = vsel %vm8805_vm15, %v4387_v3, %v4388_v2  ;;  %v836_v11 = vsel %vm8806_vm4, %v4388_v2, %v4387_v3  ;;  %v848_v13 = vpop.permute.xlu0 %847  ;;  %4405 = vrot.lane.b32.xlu0 %v4404_v4, %s5773_s8  ;;  %4400 = vrot.lane.b32.xlu1 %v6185_v33, %s5773_s8  ;;  %vm8807_vm15 = vcmp.ge.s32.totalorder %v5923_v42, 14  ;;  %vm8808_vm4 = vcmp.ge.s32.totalorder %v5925_v43, 14 }
 0x395   : > { %v6257_v16 = vsel %vm321_vm0, %v836_v11, %v841_v5  ;;  %v6261_v1 = vsel %vm8797_vm1, %v835_v9, %v842_v7  ;;  %v852_v18 = vpop.permute.xlu1 %851  ;;  %v849_v0 = vsel %vm8796_vm2, %v846_v17, %v848_v13  ;;  %v850_v6 = vsel %vm8796_vm2, %v848_v13, %v846_v17  ;;  %v349_v17 = vld [vmem:[%s8780_s1 + $0x20] sm:$0xff] }
 0x396   : > { %v4409_v10 = vpack.i.bf16 %v6261_v1, %v6257_v16  ;;  %3575 = vmatmul.mubr.msk.f32.gmra.mrb[8].mxu1 %vm8794_vm3, %v349_v17  ;;  %v3696_v50 = vpack.c.bf16 %v6257_v16, %v6173_v19 }
 0x397   : > { %479 = vmatprep.mubr.f32.mxu1 %v5762_v8 }
 0x398   : > { %v854_v20 = vpop.permute.xlu0 %853  ;;  %4410 = vrot.lane.b32.xlu0 %v4409_v10, %s5773_s8 }
 0x399   : > { %v855_v39 = vsel %vm8795_vm5, %v852_v18, %v854_v20  ;;  %v856_v26 = vsel %vm8795_vm5, %v854_v20, %v852_v18 }
 0x39a   : > { %v6278_v27 = vsel %vm8807_vm15, %v850_v6, %v855_v39  ;;  %v6282_v28 = vsel %vm8808_vm4, %v849_v0, %v856_v26  ;;  %3576 = vmatmul.mubr.msk.f32.gmra.mrb[10].mxu1 %vm8794_vm3, %v350_v40  ;;  %vm8809_vm15 = vcmask 588800   ;;  %vm8810_vm4 = vcmp.lt.s32.totalorder %v5917_v38, 32 }
 0x39b   : > { %v4414_v29 = vpack.i.bf16 %v6282_v28, %v6278_v27  ;;  %485 = vmatprep.mubr.f32.mxu1 %v5762_v8  ;;  %vm8811_vm3 = vmmov %vm8810_vm4 }
 0x39c   : > { %4420 = vrot.lane.b32.xlu0 %v4394_v53, %s5774_s9  ;;  %vm8812_vm5 = vmmov %vm8811_vm3 }
 0x39d   : > { %4415 = vrot.lane.b32.xlu1 %v4414_v29, %s5773_s8  ;;  %vm8814_vm2 = vmmov %vm8811_vm3 }
 0x3a0   : > { %4425 = vrot.lane.b32.xlu0 %v6185_v33, %s5774_s9 }
 0x3a1   : > { %4430 = vrot.lane.b32.xlu1 %v4404_v4, %s5774_s9 }
 0x3a4   : > { %4440 = vrot.lane.b32.xlu0 %v4414_v29, %s5774_s9 }
 0x3a5   : > { %4435 = vrot.lane.b32.xlu1 %v4409_v10, %s5774_s9 }
 0x3a8   : > { %4455 = vrot.lane.b32.xlu0 %v4404_v4, %s5775_s10 }
 0x3a9   : > { %4445 = vrot.lane.b32.xlu1 %v4394_v53, %s5775_s10 }
 0x3ac   : > { %4460 = vrot.lane.b32.xlu0 %v4409_v10, %s5775_s10 }
 0x3ad   : > { %4450 = vrot.lane.b32.xlu1 %v6185_v33, %s5775_s10 }
 0x3b0   : > { %4470 = vrot.lane.b32.xlu0 %v4394_v53, %s5776_s11 }
 0x3b1   : > { %4465 = vrot.lane.b32.xlu1 %v4414_v29, %s5775_s10 }
 0x3b4   : > { %4475 = vrot.lane.b32.xlu0 %v6185_v33, %s5776_s11  ;;  %v3581_v33 = vld [vmem:[%s8781_s2 + $0x18] sm:$0xff] }
 0x3b5   : > { %4480 = vrot.lane.b32.xlu1 %v4404_v4, %s5776_s11  ;;  %3582 = vmatprep.mubr.msk.f32.mxu0 %vm8809_vm15, %v3581_v33  ;;  %vm8813_vm15 = vmmov %vm8811_vm3 }
 0x3b8   : > { %973 = vrot.lane.b32.xlu0 %v6278_v27, %s5776_s11 }
 0x3b9   : > { %4485 = vrot.lane.b32.xlu1 %v4409_v10, %s5776_s11 }
 0x3bd   : > { %975 = vrot.lane.b32.xlu1 %v6282_v28, %s5776_s11 }
 0x402   : > { %v4396_v41 = vpop.permute.xlu1 %4395 }
 0x403   : > { %v4398_v30 = vunpack.i.h.bf16 %v4396_v41  ;;  %v4397_v44 = vunpack.i.l.bf16 %v4396_v41 }
 0x405   : > { %v864_v48 = vsel %vm8810_vm4, %v4398_v30, %v4397_v44  ;;  %v863_v51 = vsel %vm8811_vm3, %v4397_v44, %v4398_v30  ;;  %vm8815_vm4 = vmmov %vm8814_vm2 }
 0x406   : > { %v4406_v36 = vpop.permute.xlu0 %4405  ;;  %v4401_v45 = vpop.permute.xlu1 %4400  ;;  %vm8816_vm3 = vmmov %vm8814_vm2 }
 0x407   : > { %v4408_v46 = vunpack.i.h.bf16 %v4406_v36  ;;  %v4407_v47 = vunpack.i.l.bf16 %v4406_v36  ;;  %v4403_v53 = vunpack.i.h.bf16 %v4401_v45  ;;  %v4402_v54 = vunpack.i.l.bf16 %v4401_v45 }
 0x409   : > { %v870_v52 = vsel %vm8812_vm5, %v4408_v46, %v4407_v47  ;;  %v869_v55 = vsel %vm8813_vm15, %v4407_v47, %v4408_v46  ;;  %v876_v61 = vsel %vm8814_vm2, %v4403_v53, %v4402_v54  ;;  %v875_v3 = vsel %vm8816_vm3, %v4402_v54, %v4403_v53  ;;  %vm8817_vm5 = vmmov %vm8814_vm2 }
 0x40a   : > { %v4411_v56 = vpop.permute.xlu0 %4410  ;;  %v3670_v57 = vpack.c.bf16 %v869_v55, %v863_v51  ;;  %v3672_v58 = vpack.c.bf16 %v870_v52, %v864_v48  ;;  %vm8818_vm2 = vcmp.lt.s32.totalorder %v5917_v38, 16 }
 0x40b   : > { %v4413_v59 = vunpack.i.h.bf16 %v4411_v56  ;;  %v4412_v60 = vunpack.i.l.bf16 %v4411_v56  ;;  %vm8819_vm15 = vmmov %vm8818_vm2 }
 0x40c   : > { %3671 = vmatprep.subr.bf16.mxu0 %v3670_v57 }
 0x40d   : > { %v882_v2 = vsel %vm8815_vm4, %v4413_v59, %v4412_v60  ;;  %3673 = vmatpush1.bf16.msra.mxu0 %v3672_v58  ;;  %v881_v4 = vsel %vm8817_vm5, %v4412_v60, %v4413_v59  ;;  %vm8820_vm4 = vmmov %vm8816_vm3 }
 0x40e   : > { %v4421_v5 = vpop.permute.xlu0 %4420  ;;  %v3674_v7 = vpack.c.bf16 %v881_v4, %v875_v3  ;;  %v3676_v9 = vpack.c.bf16 %v882_v2, %v876_v61  ;;  %vm8821_vm5 = vmmov %vm8818_vm2 }
 0x40f   : > { %v4423_v11 = vunpack.i.h.bf16 %v4421_v5  ;;  %v4422_v13 = vunpack.i.l.bf16 %v4421_v5  ;;  %v4416_v10 = vpop.permute.xlu1 %4415 }
 0x410   : > { %v4418_v18 = vunpack.i.h.bf16 %v4416_v10  ;;  %v4417_v20 = vunpack.i.l.bf16 %v4416_v10  ;;  %3675 = vmatprep.subr.bf16.mxu0 %v3674_v7 }
 0x411   : > { %v894_v0 = vsel %vm8818_vm2, %v4423_v11, %v4422_v13  ;;  %3677 = vmatpush1.bf16.msra.mxu0 %v3676_v9  ;;  %v893_v6 = vsel %vm8819_vm15, %v4422_v13, %v4423_v11  ;;  %vm8822_vm15 = vmmov %vm8818_vm2 }
 0x412   : > { %v888_v39 = vsel %vm8820_vm4, %v4418_v18, %v4417_v20  ;;  %v4426_v26 = vpop.permute.xlu0 %4425  ;;  %v887_v29 = vsel %vm8816_vm3, %v4417_v20, %v4418_v18  ;;  %vm8823_vm4 = vmmov %vm8818_vm2  ;;  %v3694_v18 = vpack.c.bf16 %v6261_v1, %v6179_v25 }
 0x413   : > { %v4428_v17 = vunpack.i.h.bf16 %v4426_v26  ;;  %v4427_v40 = vunpack.i.l.bf16 %v4426_v26  ;;  %v4431_v33 = vpop.permute.xlu1 %4430  ;;  %v3678_v41 = vpack.c.bf16 %v893_v6, %v887_v29  ;;  %v3680_v30 = vpack.c.bf16 %v894_v0, %v888_v39  ;;  %vm8824_vm3 = vmmov %vm8818_vm2 }
 0x414   : > { %v4433_v44 = vunpack.i.h.bf16 %v4431_v33  ;;  %v4432_v36 = vunpack.i.l.bf16 %v4431_v33 }
 0x415   : > { %v906_v45 = vsel %vm8821_vm5, %v4428_v17, %v4427_v40  ;;  %3679 = vmatprep.subr.bf16.mxu0 %v3678_v41  ;;  %v905_v46 = vsel %vm8818_vm2, %v4427_v40, %v4428_v17  ;;  %vm8825_vm5 = vmmov %vm8818_vm2 }
 0x416   : > { %v900_v47 = vsel %vm8822_vm15, %v4433_v44, %v4432_v36  ;;  %v4441_v48 = vpop.permute.xlu0 %4440  ;;  %3681 = vmatpush1.bf16.msra.mxu0 %v3680_v30  ;;  %v899_v51 = vsel %vm8823_vm4, %v4432_v36, %v4433_v44  ;;  %vm8826_vm15 = vmmov %vm8818_vm2  ;;  %vm8827_vm4 = vcmp.lt.s32.totalorder %v5917_v38, 112 }
 0x417   : > { %v4443_v52 = vunpack.i.h.bf16 %v4441_v48  ;;  %v4442_v53 = vunpack.i.l.bf16 %v4441_v48  ;;  %v4436_v54 = vpop.permute.xlu1 %4435  ;;  %v3682_v55 = vpack.c.bf16 %v905_v46, %v899_v51  ;;  %v3684_v56 = vpack.c.bf16 %v906_v45, %v900_v47 }
 0x418   : > { %v4438_v57 = vunpack.i.h.bf16 %v4436_v54  ;;  %v4437_v58 = vunpack.i.l.bf16 %v4436_v54 }
 0x419   : > { %v918_v59 = vsel %vm8824_vm3, %v4443_v52, %v4442_v53  ;;  %3683 = vmatprep.subr.bf16.mxu0 %v3682_v55  ;;  %v917_v60 = vsel %vm8825_vm5, %v4442_v53, %v4443_v52  ;;  %vm8828_vm3 = vmmov %vm8827_vm4 }
 0x41a   : > { %v912_v61 = vsel %vm8818_vm2, %v4438_v57, %v4437_v58  ;;  %3685 = vmatpush1.bf16.msra.mxu0 %v3684_v56  ;;  %v911_v2 = vsel %vm8826_vm15, %v4437_v58, %v4438_v57  ;;  %v4456_v3 = vpop.permute.xlu0 %4455  ;;  %vm8829_vm5 = vmmov %vm8828_vm3 }
 0x41b   : > { %v4446_v4 = vpop.permute.xlu1 %4445  ;;  %v3686_v5 = vpack.c.bf16 %v917_v60, %v911_v2  ;;  %v3688_v7 = vpack.c.bf16 %v918_v59, %v912_v61  ;;  %v4458_v26 = vunpack.i.h.bf16 %v4456_v3  ;;  %v4457_v29 = vunpack.i.l.bf16 %v4456_v3  ;;  %vm8830_vm2 = vmmov %vm8828_vm3 }
 0x41c   : > { %v4448_v9 = vunpack.i.h.bf16 %v4446_v4  ;;  %v4447_v11 = vunpack.i.l.bf16 %v4446_v4  ;;  %vm8831_vm15 = vmmov %vm8830_vm2 }
 0x41d   : > { %3687 = vmatprep.subr.bf16.mxu0 %v3686_v5  ;;  %v930_v19 = vsel %vm8830_vm2, %v4458_v26, %v4457_v29 }
 0x41e   : > { %3689 = vmatpush1.bf16.msra.mxu0 %v3688_v7  ;;  %v4461_v10 = vpop.permute.xlu0 %4460  ;;  %v924_v6 = vsel %vm8827_vm4, %v4448_v9, %v4447_v11  ;;  %v923_v63 = vsel %vm8828_vm3, %v4447_v11, %v4448_v9  ;;  %vm8832_vm4 = vmmov %vm8830_vm2 }
 0x41f   : > { %v4451_v13 = vpop.permute.xlu1 %4450  ;;  %3691 = vmatprep.subr.bf16.mxu0 %v3690_v15  ;;  %v3698_v25 = vpack.c.bf16 %v924_v6, %v6282_v28  ;;  %v4463_v17 = vunpack.i.h.bf16 %v4461_v10  ;;  %v4462_v40 = vunpack.i.l.bf16 %v4461_v10  ;;  %v3700_v33 = vpack.c.bf16 %v923_v63, %v6278_v27  ;;  %vm8833_vm3 = vmmov %vm8830_vm2 }
 0x420   : > { %v4453_v20 = vunpack.i.h.bf16 %v4451_v13  ;;  %v4452_v0 = vunpack.i.l.bf16 %v4451_v13  ;;  %v929_v36 = vsel %vm8833_vm3, %v4457_v29, %v4458_v26 }
 0x422   : > { %3693 = vmatpush1.bf16.msra.mxu0 %v3692_v35  ;;  %v936_v49 = vsel %vm8829_vm5, %v4453_v20, %v4452_v0  ;;  %v4471_v62 = vpop.permute.xlu0 %4470  ;;  %v935_v16 = vsel %vm8831_vm15, %v4452_v0, %v4453_v20  ;;  %vm8834_vm5 = vmmov %vm8830_vm2  ;;  %vm8835_vm15 = vcmp.lt.s32.totalorder %v5917_v38, 96 }
 0x423   : > { %v4466_v39 = vpop.permute.xlu1 %4465  ;;  %3695 = vmatprep.subr.bf16.mxu0 %v3694_v18  ;;  %v3702_v28 = vpack.c.bf16 %v936_v49, %v930_v19  ;;  %v4473_v46 = vunpack.i.h.bf16 %v4471_v62  ;;  %v4472_v27 = vunpack.i.l.bf16 %v4471_v62  ;;  %v3704_v47 = vpack.c.bf16 %v935_v16, %v929_v36  ;;  %vm8837_vm3 = vmmov %vm8835_vm15 }
 0x424   : > { %v4468_v15 = vunpack.i.h.bf16 %v4466_v39  ;;  %v4467_v1 = vunpack.i.l.bf16 %v4466_v39  ;;  %v942_v48 = vsel %vm8834_vm5, %v4463_v17, %v4462_v40  ;;  %vm8838_vm5 = vmmov %vm8837_vm3  ;;  %v3580_v39 = vld [vmem:[%s8781_s2 + $0x10] sm:$0xff] }
 0x425   : > { %v954_v61 = vsel %vm8837_vm3, %v4473_v46, %v4472_v27 }
 0x426   : > { %3697 = vmatpush1.bf16.msra.mxu0 %v3696_v50  ;;  %v948_v44 = vsel %vm8832_vm4, %v4468_v15, %v4467_v1  ;;  %v947_v51 = vsel %vm8830_vm2, %v4467_v1, %v4468_v15  ;;  %v4476_v52 = vpop.permute.xlu0 %4475  ;;  %vm8836_vm4 = vmmov %vm8830_vm2 }
 0x427   : > { %v4481_v35 = vpop.permute.xlu1 %4480  ;;  %3699 = vmatprep.subr.bf16.mxu0 %v3698_v25  ;;  %v3706_v53 = vpack.c.bf16 %v948_v44, %v942_v48  ;;  %v941_v57 = vsel %vm8836_vm4, %v4462_v40, %v4463_v17  ;;  %v4478_v58 = vunpack.i.h.bf16 %v4476_v52  ;;  %v4477_v59 = vunpack.i.l.bf16 %v4476_v52  ;;  %vm8839_vm2 = vmmov %vm8837_vm3 }
 0x428   : > { %v4483_v41 = vunpack.i.h.bf16 %v4481_v35  ;;  %v4482_v30 = vunpack.i.l.bf16 %v4481_v35  ;;  %v3708_v60 = vpack.c.bf16 %v947_v51, %v941_v57  ;;  %vm8841_vm4 = vmmov %vm8839_vm2 }
 0x429   : > { %v966_v9 = vsel %vm8841_vm4, %v4478_v58, %v4477_v59  ;;  %vm8842_vm1 = vmmov %vm8839_vm2  ;;  %vm8845_vm4 = vcmp.lt.s32.totalorder %v5917_v38, 15 }
 0x42a   : > { %3701 = vmatpush1.bf16.msra.mxu0 %v3700_v33  ;;  %v960_v56 = vsel %vm8835_vm15, %v4483_v41, %v4482_v30  ;;  %v959_v2 = vsel %vm8838_vm5, %v4482_v30, %v4483_v41  ;;  %vm8840_vm15 = vmmov %vm8839_vm2  ;;  %v974_v0 = vpop.permute.xlu0 %973 }
 0x42b   : > { %v4486_v45 = vpop.permute.xlu1 %4485  ;;  %3703 = vmatprep.subr.bf16.mxu0 %v3702_v28  ;;  %v3710_v3 = vpack.c.bf16 %v960_v56, %v954_v61  ;;  %v953_v5 = vsel %vm8840_vm15, %v4472_v27, %v4473_v46  ;;  %vm8843_vm3 = vmmov %vm8842_vm1 }
 0x42c   : > { %v4488_v54 = vunpack.i.h.bf16 %v4486_v45  ;;  %v4487_v55 = vunpack.i.l.bf16 %v4486_v45  ;;  %v3712_v7 = vpack.c.bf16 %v959_v2, %v953_v5  ;;  %v965_v10 = vsel %vm8843_vm3, %v4477_v59, %v4478_v58  ;;  %vm8844_vm5 = vmmov %vm8842_vm1 }
 0x42d   : > { %vm8846_vm3 = vmmov %vm8845_vm4 }
 0x42e   : > { %3705 = vmatpush1.bf16.msra.mxu0 %v3704_v47  ;;  %v972_v4 = vsel %vm8839_vm2, %v4488_v54, %v4487_v55  ;;  %v971_v11 = vsel %vm8842_vm1, %v4487_v55, %v4488_v54 }
 0x42f   : > { %3707 = vmatprep.subr.bf16.mxu0 %v3706_v53  ;;  %v3714_v13 = vpack.c.bf16 %v972_v4, %v966_v9  ;;  %v976_v18 = vpop.permute.xlu1 %975  ;;  %v3716_v20 = vpack.c.bf16 %v971_v11, %v965_v10 }
 0x430   : > { %v978_v6 = vsel %vm8844_vm5, %v976_v18, %v974_v0  ;;  %v977_v26 = vsel %vm8842_vm1, %v974_v0, %v976_v18  ;;  %vm8847_vm5 = vcmp.ge.s32.totalorder %v5925_v43, 15  ;;  %vm8848_vm1 = vcmp.lt.s32.totalorder %v5917_v38, 14 }
 0x432   : > { %3709 = vmatpush1.bf16.msra.mxu0 %v3708_v60 }
 0x433   : > { %3711 = vmatprep.subr.bf16.mxu0 %v3710_v3 }
 0x436   : > { %3713 = vmatpush1.bf16.msra.mxu0 %v3712_v7 }
 0x437   : > { %3715 = vmatprep.subr.bf16.mxu0 %v3714_v13 }
 0x43a   : > { %3717 = vmatpush1.bf16.msra.mxu0 %v3716_v20 }
 0x43b   : > { %1032 = vmatprep.subr.mxu0 %v978_v6 }
 0x43e   : > { %1033 = vmatpush1.msra.mxu0 %v977_v26 }
 0x43f   : > { %1049 = vmatmul.mubr.f32.vlgmr.msra.gmra.mrb[2].mxu0 %v3580_v39 }
 0x469   : > { %v6417_v29 = vpop.f32.mrb[8].mxu1 }
 0x46a   : > { %v979_v50 = vmul.f32 %v6417_v29, %v6417_v29  ;;  %v6421_v63 = vpop.f32.mrb[9].mxu1 }
 0x46b   : > { %v980_v25 = vmul.f32 %v6421_v63, %v6421_v63 }
 0x46d   : > { %v481_v15 = vpop.f32.mrb[10].mxu1 }
 0x46e   : > { %v4170_v1 = vadd.f32 %v979_v50, %v481_v15  ;;  %v483_v49 = vpop.f32.mrb[11].mxu1 }
 0x46f   : > { %v4172_v62 = vadd.f32 %v980_v25, %v483_v49 }
 0x512   : > { %v1050_v35 = vpop.f32.mrb[2].mxu0 }
 0x513   : > { %v4171_v17 = vadd.f32 %v4170_v1, %v1050_v35  ;;  %v1052_v40 = vpop.f32.mrb[3].mxu0 }
 0x514   : > { %v4173_v33 = vadd.f32 %v4172_v62, %v1052_v40 }
 0x515   : > { %vm1057_vm2 = vcmp.gt.f32.partialorder %v4171_v17, 0.0 }
 0x516   : > { %v6426_v19 = vsel %vm1057_vm2, 1.0, %v5764_v31  ;;  %vm1058_vm15 = vcmp.gt.f32.partialorder %v4173_v33, 0.0  ;;  %vm8849_vm2 = vmmov %vm8848_vm1 }
 0x517   : > { %v6429_v16 = vmul.f32 %v4171_v17, %v6426_v19  ;;  %v6432_v28 = vsel %vm1058_vm15, 1.0, %v5764_v31  ;;  %vm8850_vm15 = vcmp.lt.s32.totalorder %v5917_v38, 126 }
 0x518   : > { %v6435_v41 = vmul.f32 %v4173_v33, %v6432_v28 }
 0x519   : > { %1117 = vrot.lane.b32.xlu0 %v6429_v16, %s5765_s19 }
 0x51a   : > { %v6441_v30 = vpack.i.bf16 %v6435_v41, %v6429_v16 }
 0x51c   : > { %4495 = vrot.lane.b32.xlu1 %v6441_v30, %s5769_s27 }
 0x51d   : > { %4490 = vrot.lane.b32.xlu0 %v6441_v30, %s5767_s21 }
 0x520   : > { %4505 = vrot.lane.b32.xlu1 %v6441_v30, %s5768_s26 }
 0x521   : > { %4500 = vrot.lane.b32.xlu0 %v6441_v30, %s5766_s20 }
 0x524   : > { %4515 = vrot.lane.b32.xlu1 %v6441_v30, %s5770_s29 }
 0x525   : > { %4510 = vrot.lane.b32.xlu0 %v6441_v30, %s5771_s30 }
 0x528   : > { %1119 = vrot.lane.b32.xlu1 %v6435_v41, %s5765_s19 }
 0x529   : > { %1123 = vrot.lane.b32.xlu0 %v6429_v16, %s5772_s7 }
 0x52c   : > { %1125 = vrot.lane.b32.xlu1 %v6435_v41, %s5772_s7 }
 0x58b   : > { %v1118_v44 = vpop.permute.xlu0 %1117 }
 0x58e   : > { %v4496_v36 = vpop.permute.xlu1 %4495 }
 0x58f   : > { %v4498_v45 = vunpack.i.h.bf16 %v4496_v36  ;;  %v4497_v46 = vunpack.i.l.bf16 %v4496_v36  ;;  %v4491_v27 = vpop.permute.xlu0 %4490 }
 0x590   : > { %v4493_v47 = vunpack.i.h.bf16 %v4491_v27  ;;  %v4492_v48 = vunpack.i.l.bf16 %v4491_v27 }
 0x591   : > { %v1085_v51 = vsel %vm529_vm9, %v4497_v46, %v4498_v45  ;;  %v1086_v52 = vsel %vm529_vm9, %v4498_v45, %v4497_v46 }
 0x592   : > { %v1079_v53 = vsel %vm522_vm7, %v4492_v48, %v4493_v47  ;;  %v1080_v54 = vsel %vm522_vm7, %v4493_v47, %v4492_v48  ;;  %v4506_v55 = vpop.permute.xlu1 %4505 }
 0x593   : > { %v4508_v56 = vunpack.i.h.bf16 %v4506_v55  ;;  %v4507_v57 = vunpack.i.l.bf16 %v4506_v55  ;;  %v4501_v58 = vpop.permute.xlu0 %4500  ;;  %v6471_v59 = vsel %vm339_vm13, %v1079_v53, %v1086_v52  ;;  %v6475_v60 = vsel %vm8798_vm14, %v1080_v54, %v1085_v51  ;;  %v352_v54 = vld [vmem:[%s8780_s1 + $0x38] sm:$0xff] }
 0x594   : > { %v4503_v61 = vunpack.i.h.bf16 %v4501_v58  ;;  %v4502_v2 = vunpack.i.l.bf16 %v4501_v58  ;;  %v4519_v3 = vpack.i.bf16 %v6475_v60, %v6471_v59  ;;  %v5777_v55 = vmov 0  }
 0x595   : > { %v1099_v4 = vsel %vm545_vm8, %v4507_v57, %v4508_v56  ;;  %v1100_v5 = vsel %vm545_vm8, %v4508_v56, %v4507_v57  ;;  %4614 = vset.pattern.permute.xlu1 %v5777_v55  ;;  %5735 = vset.pattern.permute.xlu0 %v5777_v55 }
 0x596   : > { %v1093_v7 = vsel %vm538_vm6, %v4502_v2, %v4503_v61  ;;  %v1094_v9 = vsel %vm538_vm6, %v4503_v61, %v4502_v2  ;;  %v4516_v11 = vpop.permute.xlu1 %4515  ;;  %4520 = vrot.lane.b32.xlu0 %v4519_v3, %s5773_s8 }
 0x597   : > { %v4518_v13 = vunpack.i.h.bf16 %v4516_v11  ;;  %v4517_v10 = vunpack.i.l.bf16 %v4516_v11  ;;  %v4511_v18 = vpop.permute.xlu0 %4510  ;;  %v6490_v20 = vsel %vm333_vm11, %v1093_v7, %v1100_v5  ;;  %v6494_v0 = vsel %vm334_vm12, %v1094_v9, %v1099_v4 }
 0x598   : > { %v4513_v6 = vunpack.i.h.bf16 %v4511_v18  ;;  %v4512_v39 = vunpack.i.l.bf16 %v4511_v18  ;;  %v4529_v26 = vpack.i.bf16 %v6494_v0, %v6490_v20  ;;  %v3738_v62 = vpack.c.bf16 %v6494_v0, %v6475_v60 }
 0x599   : > { %v1113_v50 = vsel %vm561_vm10, %v4517_v10, %v4518_v13  ;;  %v1114_v25 = vsel %vm561_vm10, %v4518_v13, %v4517_v10  ;;  %v3740_v33 = vpack.c.bf16 %v6490_v20, %v6471_v59 }
 0x59a   : > { %v1107_v15 = vsel %vm8845_vm4, %v4512_v39, %v4513_v6  ;;  %v1108_v1 = vsel %vm8846_vm3, %v4513_v6, %v4512_v39  ;;  %v1120_v49 = vpop.permute.xlu1 %1119  ;;  %4530 = vrot.lane.b32.xlu1 %v4529_v26, %s5773_s8  ;;  %4525 = vrot.lane.b32.xlu0 %v6441_v30, %s5773_s8  ;;  %vm8851_vm4 = vmmov %vm8850_vm15  ;;  %vm8852_vm3 = vcmp.ge.s32.totalorder %v5923_v42, 14 }
 0x59b   : > { %v6513_v35 = vsel %vm321_vm0, %v1108_v1, %v1113_v50  ;;  %v6517_v17 = vsel %vm8847_vm5, %v1107_v15, %v1114_v25  ;;  %v1124_v36 = vpop.permute.xlu0 %1123  ;;  %v1121_v46 = vsel %vm8848_vm1, %v1118_v44, %v1120_v49  ;;  %v1122_v27 = vsel %vm8849_vm2, %v1120_v49, %v1118_v44  ;;  %v351_v44 = vld [vmem:[%s8780_s1 + $0x30] sm:$0xff] }
 0x59c   : > { %v4534_v40 = vpack.i.bf16 %v6517_v17, %v6513_v35  ;;  %vm8853_vm5 = vcmp.ge.s32.totalorder %v5925_v43, 14  ;;  %vm8854_vm1 = vcmask 211968   ;;  %v3744_v60 = vpack.c.bf16 %v6513_v35, %v6429_v16 }
 0x59d   : > { %3577 = vmatmul.mubr.msk.f32.gmra.mrb[12].mxu1 %vm8854_vm1, %v351_v44  ;;  %vm8855_vm2 = vmmov %vm8854_vm1 }
 0x59e   : > { %v1126_v45 = vpop.permute.xlu1 %1125  ;;  %4535 = vrot.lane.b32.xlu1 %v4534_v40, %s5773_s8  ;;  %491 = vmatprep.mubr.f32.mxu1 %v5762_v8  ;;  %v1342_v8 = vld [vmem:[%s8784_s5] sm:$0xff] }
 0x59f   : > { %v1127_v47 = vsel %vm8850_vm15, %v1124_v36, %v1126_v45  ;;  %v1128_v48 = vsel %vm8851_vm4, %v1126_v45, %v1124_v36  ;;  %vm8856_vm15 = vcmask 588800   ;;  %vm8857_vm4 = vcmp.lt.s32.totalorder %v5917_v38, 32 }
 0x5a0   : > { %v6534_v51 = vsel %vm8852_vm3, %v1122_v27, %v1127_v47  ;;  %v6538_v52 = vsel %vm8853_vm5, %v1121_v46, %v1128_v48  ;;  %vm8858_vm3 = vmmov %vm8857_vm4 }
 0x5a1   : > { %v4539_v53 = vpack.i.bf16 %v6538_v52, %v6534_v51  ;;  %3578 = vmatmul.mubr.msk.f32.gmra.mrb[14].mxu1 %vm8855_vm2, %v352_v54  ;;  %vm8859_vm5 = vmmov %vm8858_vm3 }
 0x5a2   : > { %4545 = vrot.lane.b32.xlu1 %v4519_v3, %s5774_s9  ;;  %vm8860_vm1 = vmmov %vm8858_vm3 }
 0x5a3   : > { %4540 = vrot.lane.b32.xlu0 %v4539_v53, %s5773_s8  ;;  %vm8861_vm2 = vmmov %vm8860_vm1 }
 0x5a6   : > { %4550 = vrot.lane.b32.xlu1 %v6441_v30, %s5774_s9 }
 0x5a7   : > { %4555 = vrot.lane.b32.xlu0 %v4529_v26, %s5774_s9 }
 0x5aa   : > { %4565 = vrot.lane.b32.xlu1 %v4539_v53, %s5774_s9 }
 0x5ab   : > { %4560 = vrot.lane.b32.xlu0 %v4534_v40, %s5774_s9 }
 0x5ae   : > { %4580 = vrot.lane.b32.xlu1 %v4529_v26, %s5775_s10 }
 0x5af   : > { %4570 = vrot.lane.b32.xlu0 %v4519_v3, %s5775_s10 }
 0x5b2   : > { %4585 = vrot.lane.b32.xlu1 %v4534_v40, %s5775_s10 }
 0x5b3   : > { %4575 = vrot.lane.b32.xlu0 %v6441_v30, %s5775_s10 }
 0x5b6   : > { %4595 = vrot.lane.b32.xlu1 %v4519_v3, %s5776_s11 }
 0x5b7   : > { %4590 = vrot.lane.b32.xlu0 %v4539_v53, %s5775_s10 }
 0x5ba   : > { %4600 = vrot.lane.b32.xlu1 %v6441_v30, %s5776_s11  ;;  %v3584_v30 = vld [vmem:[%s8781_s2 + $0x28] sm:$0xff] }
 0x5bb   : > { %4605 = vrot.lane.b32.xlu0 %v4529_v26, %s5776_s11  ;;  %3585 = vmatprep.mubr.msk.f32.mxu0 %vm8856_vm15, %v3584_v30  ;;  %vm8862_vm15 = vmmov %vm8860_vm1 }
 0x5be   : > { %1245 = vrot.lane.b32.xlu1 %v6534_v51, %s5776_s11 }
 0x5bf   : > { %4610 = vrot.lane.b32.xlu0 %v4534_v40, %s5776_s11 }
 0x5c2   : > { %1349 = vperm.xlu1 %4614, %v1342_v8  }
 0x5c3   : > { %1247 = vrot.lane.b32.xlu0 %v6538_v52, %s5776_s11 }
 0x608   : > { %v4521_v56 = vpop.permute.xlu0 %4520 }
 0x609   : > { %v4523_v57 = vunpack.i.h.bf16 %v4521_v56  ;;  %v4522_v58 = vunpack.i.l.bf16 %v4521_v56 }
 0x60b   : > { %v1136_v5 = vsel %vm8857_vm4, %v4523_v57, %v4522_v58  ;;  %v1135_v7 = vsel %vm8858_vm3, %v4522_v58, %v4523_v57  ;;  %vm8863_vm4 = vmmov %vm8860_vm1 }
 0x60c   : > { %v4531_v61 = vpop.permute.xlu1 %4530  ;;  %v4526_v2 = vpop.permute.xlu0 %4525  ;;  %vm8864_vm3 = vmmov %vm8860_vm1 }
 0x60d   : > { %v4533_v3 = vunpack.i.h.bf16 %v4531_v61  ;;  %v4532_v4 = vunpack.i.l.bf16 %v4531_v61  ;;  %v4528_v11 = vunpack.i.h.bf16 %v4526_v2  ;;  %v4527_v13 = vunpack.i.l.bf16 %v4526_v2 }
 0x60f   : > { %v1142_v9 = vsel %vm8859_vm5, %v4533_v3, %v4532_v4  ;;  %v1141_v10 = vsel %vm8860_vm1, %v4532_v4, %v4533_v3  ;;  %v1148_v25 = vsel %vm8861_vm2, %v4528_v11, %v4527_v13  ;;  %v1147_v1 = vsel %vm8863_vm4, %v4527_v13, %v4528_v11 }
 0x610   : > { %v4536_v18 = vpop.permute.xlu1 %4535  ;;  %v3718_v6 = vpack.c.bf16 %v1141_v10, %v1135_v7  ;;  %v3720_v39 = vpack.c.bf16 %v1142_v9, %v1136_v5  ;;  %vm8865_vm5 = vcmp.lt.s32.totalorder %v5917_v38, 16 }
 0x611   : > { %v4538_v26 = vunpack.i.h.bf16 %v4536_v18  ;;  %v4537_v50 = vunpack.i.l.bf16 %v4536_v18  ;;  %vm8866_vm1 = vmmov %vm8865_vm5 }
 0x612   : > { %3719 = vmatprep.subr.bf16.mxu0 %v3718_v6  ;;  %vm8868_vm4 = vmmov %vm8866_vm1 }
 0x613   : > { %v1154_v15 = vsel %vm8862_vm15, %v4538_v26, %v4537_v50  ;;  %3721 = vmatpush1.bf16.msra.mxu0 %v3720_v39  ;;  %v1153_v49 = vsel %vm8864_vm3, %v4537_v50, %v4538_v26  ;;  %vm8867_vm15 = vmmov %vm8861_vm2 }
 0x614   : > { %v4546_v40 = vpop.permute.xlu1 %4545  ;;  %v3722_v36 = vpack.c.bf16 %v1153_v49, %v1147_v1  ;;  %v3724_v45 = vpack.c.bf16 %v1154_v15, %v1148_v25  ;;  %vm8869_vm3 = vmmov %vm8866_vm1 }
 0x615   : > { %v4548_v46 = vunpack.i.h.bf16 %v4546_v40  ;;  %v4547_v27 = vunpack.i.l.bf16 %v4546_v40  ;;  %v4541_v47 = vpop.permute.xlu0 %4540 }
 0x616   : > { %v4543_v48 = vunpack.i.h.bf16 %v4541_v47  ;;  %v4542_v53 = vunpack.i.l.bf16 %v4541_v47  ;;  %3723 = vmatprep.subr.bf16.mxu0 %v3722_v36 }
 0x617   : > { %v1166_v44 = vsel %vm8865_vm5, %v4548_v46, %v4547_v27  ;;  %3725 = vmatpush1.bf16.msra.mxu0 %v3724_v45  ;;  %v1165_v54 = vsel %vm8866_vm1, %v4547_v27, %v4548_v46  ;;  %vm8870_vm5 = vmmov %vm8866_vm1 }
 0x618   : > { %v1160_v30 = vsel %vm8861_vm2, %v4543_v48, %v4542_v53  ;;  %v4551_v8 = vpop.permute.xlu1 %4550  ;;  %v1159_v55 = vsel %vm8867_vm15, %v4542_v53, %v4543_v48  ;;  %vm8871_vm2 = vmmov %vm8866_vm1 }
 0x619   : > { %v4553_v56 = vunpack.i.h.bf16 %v4551_v8  ;;  %v4552_v57 = vunpack.i.l.bf16 %v4551_v8  ;;  %v4556_v58 = vpop.permute.xlu0 %4555  ;;  %v3726_v61 = vpack.c.bf16 %v1165_v54, %v1159_v55  ;;  %v3728_v2 = vpack.c.bf16 %v1166_v44, %v1160_v30  ;;  %vm8872_vm15 = vmmov %vm8866_vm1 }
 0x61a   : > { %v4558_v3 = vunpack.i.h.bf16 %v4556_v58  ;;  %v4557_v4 = vunpack.i.l.bf16 %v4556_v58  ;;  %v3742_v54 = vpack.c.bf16 %v6517_v17, %v6435_v41 }
 0x61b   : > { %v1178_v5 = vsel %vm8868_vm4, %v4553_v56, %v4552_v57  ;;  %3727 = vmatprep.subr.bf16.mxu0 %v3726_v61  ;;  %v1177_v7 = vsel %vm8869_vm3, %v4552_v57, %v4553_v56  ;;  %vm8873_vm4 = vmmov %vm8866_vm1 }
 0x61c   : > { %v1172_v9 = vsel %vm8870_vm5, %v4558_v3, %v4557_v4  ;;  %v4566_v11 = vpop.permute.xlu1 %4565  ;;  %3729 = vmatpush1.bf16.msra.mxu0 %v3728_v2  ;;  %v1171_v13 = vsel %vm8866_vm1, %v4557_v4, %v4558_v3  ;;  %vm8874_vm3 = vmmov %vm8866_vm1  ;;  %vm8875_vm5 = vcmp.lt.s32.totalorder %v5917_v38, 112 }
 0x61d   : > { %v4568_v10 = vunpack.i.h.bf16 %v4566_v11  ;;  %v4567_v18 = vunpack.i.l.bf16 %v4566_v11  ;;  %v4561_v6 = vpop.permute.xlu0 %4560  ;;  %v3730_v39 = vpack.c.bf16 %v1177_v7, %v1171_v13  ;;  %v3732_v26 = vpack.c.bf16 %v1178_v5, %v1172_v9  ;;  %vm8876_vm1 = vmmov %vm8875_vm5 }
 0x61e   : > { %v4563_v50 = vunpack.i.h.bf16 %v4561_v6  ;;  %v4562_v25 = vunpack.i.l.bf16 %v4561_v6 }
 0x61f   : > { %v1190_v15 = vsel %vm8871_vm2, %v4568_v10, %v4567_v18  ;;  %3731 = vmatprep.subr.bf16.mxu0 %v3730_v39  ;;  %v1189_v1 = vsel %vm8872_vm15, %v4567_v18, %v4568_v10  ;;  %vm8877_vm2 = vmmov %vm8876_vm1 }
 0x620   : > { %v1184_v49 = vsel %vm8873_vm4, %v4563_v50, %v4562_v25  ;;  %3733 = vmatpush1.bf16.msra.mxu0 %v3732_v26  ;;  %v1183_v40 = vsel %vm8874_vm3, %v4562_v25, %v4563_v50  ;;  %v4581_v36 = vpop.permute.xlu1 %4580  ;;  %vm8878_vm15 = vmmov %vm8876_vm1 }
 0x621   : > { %v4571_v45 = vpop.permute.xlu0 %4570  ;;  %v3734_v46 = vpack.c.bf16 %v1189_v1, %v1183_v40  ;;  %v3736_v27 = vpack.c.bf16 %v1190_v15, %v1184_v49  ;;  %v4583_v57 = vunpack.i.h.bf16 %v4581_v36  ;;  %v4582_v58 = vunpack.i.l.bf16 %v4581_v36  ;;  %vm8879_vm4 = vmmov %vm8876_vm1 }
 0x622   : > { %v4573_v47 = vunpack.i.h.bf16 %v4571_v45  ;;  %v4572_v48 = vunpack.i.l.bf16 %v4571_v45  ;;  %vm8880_vm3 = vmmov %vm8876_vm1 }
 0x623   : > { %3735 = vmatprep.subr.bf16.mxu0 %v3734_v46  ;;  %v1202_v16 = vsel %vm8878_vm15, %v4583_v57, %v4582_v58  ;;  %vm8883_vm15 = vcmp.lt.s32.totalorder %v5917_v38, 96 }
 0x624   : > { %3737 = vmatpush1.bf16.msra.mxu0 %v3736_v27  ;;  %v4586_v44 = vpop.permute.xlu1 %4585  ;;  %v1196_v55 = vsel %vm8875_vm5, %v4573_v47, %v4572_v48  ;;  %v1195_v0 = vsel %vm8876_vm1, %v4572_v48, %v4573_v47  ;;  %vm8881_vm5 = vmmov %vm8876_vm1 }
 0x625   : > { %v4576_v53 = vpop.permute.xlu0 %4575  ;;  %3739 = vmatprep.subr.bf16.mxu0 %v3738_v62  ;;  %v3746_v41 = vpack.c.bf16 %v1196_v55, %v6538_v52  ;;  %v4588_v61 = vunpack.i.h.bf16 %v4586_v44  ;;  %v4587_v2 = vunpack.i.l.bf16 %v4586_v44  ;;  %v3748_v3 = vpack.c.bf16 %v1195_v0, %v6534_v51 }
 0x626   : > { %v4578_v30 = vunpack.i.h.bf16 %v4576_v53  ;;  %v4577_v8 = vunpack.i.l.bf16 %v4576_v53  ;;  %v1201_v9 = vsel %vm8881_vm5, %v4582_v58, %v4583_v57 }
 0x627   : > { %v1214_v18 = vsel %vm8876_vm1, %v4588_v61, %v4587_v2 }
 0x628   : > { %3741 = vmatpush1.bf16.msra.mxu0 %v3740_v33  ;;  %v1208_v59 = vsel %vm8877_vm2, %v4578_v30, %v4577_v8  ;;  %v4596_v20 = vpop.permute.xlu1 %4595  ;;  %v1207_v35 = vsel %vm8879_vm4, %v4577_v8, %v4578_v30  ;;  %vm8882_vm2 = vmmov %vm8876_vm1 }
 0x629   : > { %v4591_v56 = vpop.permute.xlu0 %4590  ;;  %3743 = vmatprep.subr.bf16.mxu0 %v3742_v54  ;;  %v3750_v52 = vpack.c.bf16 %v1208_v59, %v1202_v16  ;;  %v4598_v13 = vunpack.i.h.bf16 %v4596_v20  ;;  %v4597_v51 = vunpack.i.l.bf16 %v4596_v20  ;;  %v3752_v10 = vpack.c.bf16 %v1207_v35, %v1201_v9  ;;  %vm8884_vm4 = vmmov %vm8876_vm1 }
 0x62a   : > { %v4593_v62 = vunpack.i.h.bf16 %v4591_v56  ;;  %v4592_v17 = vunpack.i.l.bf16 %v4591_v56  ;;  %v1213_v1 = vsel %vm8884_vm4, %v4587_v2, %v4588_v61 }
 0x62c   : > { %3745 = vmatpush1.bf16.msra.mxu0 %v3744_v60  ;;  %v1220_v7 = vsel %vm8880_vm3, %v4593_v62, %v4592_v17  ;;  %v1219_v6 = vsel %vm8882_vm2, %v4592_v17, %v4593_v62  ;;  %v4601_v39 = vpop.permute.xlu1 %4600  ;;  %vm8885_vm3 = vmmov %vm8883_vm15  ;;  %v3583_v60 = vld [vmem:[%s8781_s2 + $0x20] sm:$0xff] }
 0x62d   : > { %v4606_v33 = vpop.permute.xlu0 %4605  ;;  %3747 = vmatprep.subr.bf16.mxu0 %v3746_v41  ;;  %v3754_v26 = vpack.c.bf16 %v1220_v7, %v1214_v18  ;;  %v4603_v49 = vunpack.i.h.bf16 %v4601_v39  ;;  %v4602_v40 = vunpack.i.l.bf16 %v4601_v39  ;;  %v3756_v36 = vpack.c.bf16 %v1219_v6, %v1213_v1  ;;  %vm8886_vm5 = vmmov %vm8885_vm3 }
 0x62e   : > { %v4608_v4 = vunpack.i.h.bf16 %v4606_v33  ;;  %v4607_v5 = vunpack.i.l.bf16 %v4606_v33  ;;  %v1226_v45 = vsel %vm8885_vm3, %v4598_v13, %v4597_v51  ;;  %vm8887_vm1 = vmmov %vm8885_vm3 }
 0x62f   : > { %vm8888_vm2 = vmmov %vm8887_vm1 }
 0x630   : > { %3749 = vmatpush1.bf16.msra.mxu0 %v3748_v3  ;;  %v1232_v15 = vsel %vm8883_vm15, %v4608_v4, %v4607_v5  ;;  %v1231_v46 = vsel %vm8886_vm5, %v4607_v5, %v4608_v4  ;;  %v1225_v48 = vsel %vm8888_vm2, %v4597_v51, %v4598_v13  ;;  %vm8889_vm15 = vmmov %vm8887_vm1  ;;  %v1246_v57 = vpop.permute.xlu1 %1245 }
 0x631   : > { %v4611_v11 = vpop.permute.xlu0 %4610  ;;  %3751 = vmatprep.subr.bf16.mxu0 %v3750_v52  ;;  %v3758_v27 = vpack.c.bf16 %v1232_v15, %v1226_v45  ;;  %v3760_v53 = vpack.c.bf16 %v1231_v46, %v1225_v48  ;;  %v1238_v44 = vsel %vm8889_vm15, %v4603_v49, %v4602_v40  ;;  %vm8890_vm4 = vmmov %vm8887_vm1 }
 0x632   : > { %v4613_v50 = vunpack.i.h.bf16 %v4611_v11  ;;  %v4612_v25 = vunpack.i.l.bf16 %v4611_v11  ;;  %vm8891_vm3 = vmmov %vm8887_vm1 }
 0x633   : > { %v1237_v8 = vsel %vm8891_vm3, %v4602_v40, %v4603_v49  ;;  %vm8892_vm5 = vmmov %vm8887_vm1 }
 0x634   : > { %3753 = vmatpush1.bf16.msra.mxu0 %v3752_v10  ;;  %v1244_v47 = vsel %vm8887_vm1, %v4613_v50, %v4612_v25  ;;  %v1243_v54 = vsel %vm8890_vm4, %v4612_v25, %v4613_v50  ;;  %vm8893_vm4 = vcmp.lt.s32.totalorder %v5917_v38, 14 }
 0x635   : > { %3755 = vmatprep.subr.bf16.mxu0 %v3754_v26  ;;  %v3762_v30 = vpack.c.bf16 %v1244_v47, %v1238_v44  ;;  %v1248_v55 = vpop.permute.xlu0 %1247  ;;  %v3764_v56 = vpack.c.bf16 %v1243_v54, %v1237_v8  ;;  %vm8894_vm3 = vmmov %vm8893_vm4 }
 0x636   : > { %v1250_v58 = vsel %vm8892_vm5, %v1248_v55, %v1246_v57  ;;  %v1249_v0 = vsel %vm8887_vm1, %v1246_v57, %v1248_v55  ;;  %vm8895_vm5 = vmmov %vm8894_vm3 }
 0x637   : > { %vm8896_vm1 = vmmov %vm8894_vm3 }
 0x638   : > { %3757 = vmatpush1.bf16.msra.mxu0 %v3756_v36 }
 0x639   : > { %3759 = vmatprep.subr.bf16.mxu0 %v3758_v27 }
 0x63c   : > { %3761 = vmatpush1.bf16.msra.mxu0 %v3760_v53 }
 0x63d   : > { %3763 = vmatprep.subr.bf16.mxu0 %v3762_v30 }
 0x640   : > { %3765 = vmatpush1.bf16.msra.mxu0 %v3764_v56 }
 0x641   : > { %1304 = vmatprep.subr.mxu0 %v1250_v58  ;;  %v1350_v9 = vpop.permute.xlu1 %1349 }
 0x644   : > { %1305 = vmatpush1.msra.mxu0 %v1249_v0 }
 0x645   : > { %1321 = vmatmul.mubr.f32.vlgmr.msra.gmra.mrb[4].mxu0 %v3583_v60 }
 0x670   : > { %v487_v41 = vpop.f32.mrb[12].mxu1 }
 0x671   : > { %v1251_v62 = vmul.f32 %v487_v41, %v487_v41  ;;  %v489_v17 = vpop.f32.mrb[13].mxu1  ;;  %v1333_v4 = vmul.f32 2.0, %v487_v41 }
 0x672   : > { %v1252_v59 = vmul.f32 %v489_v17, %v489_v17  ;;  %v1334_v5 = vmul.f32 2.0, %v489_v17 }
 0x674   : > { %v493_v20 = vpop.f32.mrb[14].mxu1 }
 0x675   : > { %v4174_v33 = vadd.f32 %v1251_v62, %v493_v20  ;;  %v495_v61 = vpop.f32.mrb[15].mxu1 }
 0x676   : > { %v4176_v2 = vadd.f32 %v1252_v59, %v495_v61 }
 0x718   : > { %v1322_v3 = vpop.f32.mrb[4].mxu0 }
 0x719   : > { %v4175_v16 = vadd.f32 %v4174_v33, %v1322_v3  ;;  %v1324_v35 = vpop.f32.mrb[5].mxu0 }
 0x71a   : > { %v4177_v52 = vadd.f32 %v4176_v2, %v1324_v35 }
 0x71b   : > { %vm1329_vm2 = vcmp.gt.f32.partialorder %v4175_v16, 0.0 }
 0x71c   : > { %v1331_v7 = vsel %vm1329_vm2, 1.0, %v5764_v31  ;;  %vm1330_vm15 = vcmp.gt.f32.partialorder %v4177_v52, 0.0  ;;  %vm8897_vm2 = vcmp.lt.s32.totalorder %v5917_v38, 126 }
 0x71d   : > { %v1335_v11 = vmul.f32 %v1333_v4, %v1331_v7  ;;  %v1332_v13 = vsel %vm1330_vm15, 1.0, %v5764_v31  ;;  %v6679_v18 = vmul.f32 %v1350_v9, %v1331_v7  ;;  %vm8898_vm15 = vmmov %vm8897_vm2 }
 0x71e   : > { %v1336_v51 = vmul.f32 %v1334_v5, %v1332_v13  ;;  %v6683_v39 = vmul.f32 %v1350_v9, %v1332_v13  ;;  %vm8899_vm14 = vmmov %vm8897_vm2 }
 0x71f   : > { %v6677_v10 = vmul.f32 %v1350_v9, %v1335_v11 }
 0x720   : > { %v6681_v6 = vmul.f32 %v1350_v9, %v1336_v51 }
 0x721   : > { %v4615_v26 = vpack.i.bf16 %v6679_v18, %v6677_v10 }
 0x722   : > { %v4655_v50 = vpack.i.bf16 %v6683_v39, %v6681_v6 }
 0x723   : > { %4616 = vrot.lane.b32.xlu0 %v4615_v26, %s5765_s19 }
 0x724   : > { %4656 = vrot.lane.b32.xlu1 %v4655_v50, %s5765_s19 }
 0x727   : > { %4621 = vrot.lane.b32.xlu0 %v4615_v26, %s5772_s7 }
 0x728   : > { %4661 = vrot.lane.b32.xlu1 %v4655_v50, %s5772_s7 }
 0x72b   : > { %4626 = vrot.lane.b32.xlu0 %v4615_v26, %s5771_s30 }
 0x72c   : > { %4666 = vrot.lane.b32.xlu1 %v4655_v50, %s5771_s30 }
 0x72f   : > { %4631 = vrot.lane.b32.xlu0 %v4615_v26, %s5770_s29 }
 0x730   : > { %4671 = vrot.lane.b32.xlu1 %v4655_v50, %s5770_s29 }
 0x733   : > { %4636 = vrot.lane.b32.xlu0 %v4615_v26, %s5766_s20 }
 0x734   : > { %4676 = vrot.lane.b32.xlu1 %v4655_v50, %s5766_s20 }
 0x737   : > { %4641 = vrot.lane.b32.xlu0 %v4615_v26, %s5768_s26 }
 0x738   : > { %4681 = vrot.lane.b32.xlu1 %v4655_v50, %s5768_s26 }
 0x73b   : > { %4646 = vrot.lane.b32.xlu0 %v4615_v26, %s5767_s21 }
 0x73c   : > { %4686 = vrot.lane.b32.xlu1 %v4655_v50, %s5767_s21 }
 0x73f   : > { %4651 = vrot.lane.b32.xlu0 %v4615_v26, %s5769_s27 }
 0x740   : > { %4691 = vrot.lane.b32.xlu1 %v4655_v50, %s5769_s27 }
 0x743   : > { %4696 = vrot.lane.b32.xlu0 %v4615_v26, %s5776_s11 }
 0x744   : > { %4716 = vrot.lane.b32.xlu1 %v4655_v50, %s5776_s11 }
 0x747   : > { %4701 = vrot.lane.b32.xlu0 %v4615_v26, %s5775_s10 }
 0x748   : > { %4721 = vrot.lane.b32.xlu1 %v4655_v50, %s5775_s10 }
 0x74b   : > { %4706 = vrot.lane.b32.xlu0 %v4615_v26, %s5774_s9 }
 0x74c   : > { %4726 = vrot.lane.b32.xlu1 %v4655_v50, %s5774_s9 }
 0x74f   : > { %4711 = vrot.lane.b32.xlu0 %v4615_v26, %s5773_s8 }
 0x750   : > { %4731 = vrot.lane.b32.xlu1 %v4655_v50, %s5773_s8 }
 0x795   : > { %v4617_v15 = vpop.permute.xlu0 %4616 }
 0x796   : > { %v4657_v1 = vpop.permute.xlu1 %4656  ;;  %v4619_v49 = vunpack.i.h.bf16 %v4617_v15  ;;  %v4618_v40 = vunpack.i.l.bf16 %v4617_v15 }
 0x797   : > { %v4659_v36 = vunpack.i.h.bf16 %v4657_v1  ;;  %v4658_v45 = vunpack.i.l.bf16 %v4657_v1 }
 0x799   : > { %v4622_v46 = vpop.permute.xlu0 %4621  ;;  %v1458_v54 = vsel %vm8893_vm4, %v4619_v49, %v4659_v36  ;;  %v1460_v30 = vsel %vm8894_vm3, %v4659_v36, %v4619_v49  ;;  %v1457_v8 = vsel %vm8895_vm5, %v4618_v40, %v4658_v45  ;;  %v1459_v55 = vsel %vm8896_vm1, %v4658_v45, %v4618_v40  ;;  %vm8900_vm4 = vmmov %vm8897_vm2 }
 0x79a   : > { %v4624_v27 = vunpack.i.h.bf16 %v4622_v46  ;;  %v4623_v47 = vunpack.i.l.bf16 %v4622_v46  ;;  %v4662_v48 = vpop.permute.xlu1 %4661  ;;  %vm8901_vm3 = vcmp.ge.s32.totalorder %v5923_v42, 14  ;;  %vm8902_vm5 = vcmp.ge.s32.totalorder %v5925_v43, 14 }
 0x79b   : > { %v4664_v53 = vunpack.i.h.bf16 %v4662_v48  ;;  %v4663_v44 = vunpack.i.l.bf16 %v4662_v48  ;;  %vm8903_vm1 = vmmov %vm8901_vm3 }
 0x79d   : > { %v1470_v56 = vsel %vm8897_vm2, %v4624_v27, %v4664_v53  ;;  %v1472_v57 = vsel %vm8898_vm15, %v4664_v53, %v4624_v27  ;;  %v1469_v58 = vsel %vm8899_vm14, %v4623_v47, %v4663_v44  ;;  %v1471_v60 = vsel %vm8900_vm4, %v4663_v44, %v4623_v47  ;;  %v4627_v0 = vpop.permute.xlu0 %4626  ;;  %vm8904_vm2 = vmmov %vm8902_vm5 }
 0x79e   : > { %v6735_v41 = vsel %vm8901_vm3, %v1459_v55, %v1469_v58  ;;  %v6739_v62 = vsel %vm8902_vm5, %v1457_v8, %v1471_v60  ;;  %v6743_v17 = vsel %vm8903_vm1, %v1460_v30, %v1470_v56  ;;  %v6747_v59 = vsel %vm8904_vm2, %v1458_v54, %v1472_v57  ;;  %v4667_v20 = vpop.permute.xlu1 %4666 }
 0x79f   : > { %v4629_v33 = vunpack.i.h.bf16 %v4627_v0  ;;  %v4669_v61 = vunpack.i.h.bf16 %v4667_v20  ;;  %v4628_v2 = vunpack.i.l.bf16 %v4627_v0  ;;  %v4668_v3 = vunpack.i.l.bf16 %v4667_v20 }
 0x7a0   : > { %v6751_v16 = vpack.i.bf16 %v6743_v17, %v6735_v41  ;;  %v6755_v35 = vpack.i.bf16 %v6747_v59, %v6739_v62  ;;  %vm8905_vm14 = vcmp.lt.s32.totalorder %v5917_v38, 15  ;;  %vm8909_vm5 = vcmp.ge.s32.totalorder %v5925_v43, 15 }
 0x7a1   : > { %v4632_v52 = vpop.permute.xlu0 %4631  ;;  %v1430_v4 = vsel %vm8905_vm14, %v4629_v33, %v4669_v61  ;;  %vm8906_vm15 = vmmov %vm8905_vm14  ;;  %vm8911_vm2 = vcmp.lt.s32.totalorder %v5925_v43, 2 }
 0x7a2   : > { %v1432_v5 = vsel %vm8906_vm15, %v4669_v61, %v4629_v33  ;;  %v4634_v7 = vunpack.i.h.bf16 %v4632_v52  ;;  %v4633_v9 = vunpack.i.l.bf16 %v4632_v52  ;;  %4736 = vrot.lane.b32.xlu0 %v6751_v16, %s5776_s11  ;;  %4741 = vrot.lane.b32.xlu1 %v6755_v35, %s5776_s11  ;;  %v4672_v11 = vpop.permute.xlu1 %4671  ;;  %vm8907_vm4 = vmmov %vm8905_vm14  ;;  %vm8801_vm15 = vcmask 130048  }
 0x7a3   : > { %v4674_v13 = vunpack.i.h.bf16 %v4672_v11  ;;  %v4673_v51 = vunpack.i.l.bf16 %v4672_v11  ;;  %v1429_v26 = vsel %vm8907_vm4, %v4628_v2, %v4668_v3  ;;  %vm8908_vm3 = vmmov %vm8907_vm4  ;;  %vm8913_vm4 = vcmp.lt.s32.totalorder %v5917_v38, 96 }
 0x7a4   : > { %v1431_v50 = vsel %vm8908_vm3, %v4668_v3, %v4628_v2  ;;  %vm8910_vm1 = vmmov %vm8909_vm5 }
 0x7a5   : > { %v1442_v49 = vsel %vm561_vm10, %v4634_v7, %v4674_v13  ;;  %v1444_v40 = vsel %vm561_vm10, %v4674_v13, %v4634_v7  ;;  %v1441_v36 = vsel %vm561_vm10, %v4633_v9, %v4673_v51  ;;  %v1443_v45 = vsel %vm561_vm10, %v4673_v51, %v4633_v9  ;;  %v4637_v46 = vpop.permute.xlu0 %4636  ;;  %vm8912_vm14 = vmmov %vm8911_vm2 }
 0x7a6   : > { %v6783_v27 = vsel %vm321_vm0, %v1431_v50, %v1441_v36  ;;  %v6787_v47 = vsel %vm8909_vm5, %v1429_v26, %v1443_v45  ;;  %v6791_v48 = vsel %vm321_vm0, %v1432_v5, %v1442_v49  ;;  %v6795_v53 = vsel %vm8910_vm1, %v1430_v4, %v1444_v40  ;;  %v4677_v44 = vpop.permute.xlu1 %4676  ;;  %vm8914_vm3 = vmmov %vm8913_vm4 }
 0x7a7   : > { %v4639_v54 = vunpack.i.h.bf16 %v4637_v46  ;;  %v4679_v30 = vunpack.i.h.bf16 %v4677_v44  ;;  %v4638_v8 = vunpack.i.l.bf16 %v4637_v46  ;;  %v4678_v55 = vunpack.i.l.bf16 %v4677_v44  ;;  %vm8915_vm5 = vmmov %vm8914_vm3 }
 0x7a8   : > { %v6799_v56 = vpack.i.bf16 %v6791_v48, %v6783_v27  ;;  %v6803_v57 = vpack.i.bf16 %v6795_v53, %v6787_v47  ;;  %vm8916_vm1 = vmmov %vm8914_vm3 }
 0x7a9   : > { %v4642_v58 = vpop.permute.xlu0 %4641  ;;  %v1402_v33 = vsel %vm538_vm6, %v4639_v54, %v4679_v30  ;;  %v1404_v61 = vsel %vm538_vm6, %v4679_v30, %v4639_v54  ;;  %v1401_v52 = vsel %vm538_vm6, %v4638_v8, %v4678_v55  ;;  %v1403_v4 = vsel %vm538_vm6, %v4678_v55, %v4638_v8 }
 0x7aa   : > { %v4644_v60 = vunpack.i.h.bf16 %v4642_v58  ;;  %v4643_v0 = vunpack.i.l.bf16 %v4642_v58  ;;  %4746 = vrot.lane.b32.xlu0 %v6799_v56, %s5776_s11  ;;  %4751 = vrot.lane.b32.xlu1 %v6803_v57, %s5776_s11  ;;  %v4682_v20 = vpop.permute.xlu1 %4681 }
 0x7ab   : > { %v4684_v2 = vunpack.i.h.bf16 %v4682_v20  ;;  %v4683_v3 = vunpack.i.l.bf16 %v4682_v20 }
 0x7ad   : > { %v1414_v9 = vsel %vm545_vm8, %v4644_v60, %v4684_v2  ;;  %v1416_v11 = vsel %vm545_vm8, %v4684_v2, %v4644_v60  ;;  %v1413_v13 = vsel %vm545_vm8, %v4643_v0, %v4683_v3  ;;  %v1415_v51 = vsel %vm545_vm8, %v4683_v3, %v4643_v0  ;;  %v4647_v26 = vpop.permute.xlu0 %4646 }
 0x7ae   : > { %v6831_v50 = vsel %vm333_vm11, %v1401_v52, %v1415_v51  ;;  %v6835_v49 = vsel %vm334_vm12, %v1403_v4, %v1413_v13  ;;  %v6839_v40 = vsel %vm333_vm11, %v1402_v33, %v1416_v11  ;;  %v6843_v36 = vsel %vm334_vm12, %v1404_v61, %v1414_v9  ;;  %v4687_v45 = vpop.permute.xlu1 %4686 }
 0x7af   : > { %v4649_v46 = vunpack.i.h.bf16 %v4647_v26  ;;  %v4689_v44 = vunpack.i.h.bf16 %v4687_v45  ;;  %v4648_v54 = vunpack.i.l.bf16 %v4647_v26  ;;  %v4688_v30 = vunpack.i.l.bf16 %v4687_v45 }
 0x7b0   : > { %v4755_v8 = vpack.i.bf16 %v6839_v40, %v6831_v50  ;;  %v4760_v55 = vpack.i.bf16 %v6843_v36, %v6835_v49 }
 0x7b1   : > { %v4652_v58 = vpop.permute.xlu0 %4651  ;;  %v1374_v33 = vsel %vm522_vm7, %v4649_v46, %v4689_v44  ;;  %v1376_v61 = vsel %vm522_vm7, %v4689_v44, %v4649_v46  ;;  %v1373_v52 = vsel %vm522_vm7, %v4648_v54, %v4688_v30  ;;  %v1375_v4 = vsel %vm522_vm7, %v4688_v30, %v4648_v54 }
 0x7b2   : > { %v4654_v60 = vunpack.i.h.bf16 %v4652_v58  ;;  %v4653_v0 = vunpack.i.l.bf16 %v4652_v58  ;;  %4756 = vrot.lane.b32.xlu0 %v4755_v8, %s5776_s11  ;;  %4761 = vrot.lane.b32.xlu1 %v4760_v55, %s5776_s11  ;;  %v4692_v20 = vpop.permute.xlu1 %4691 }
 0x7b3   : > { %v4694_v2 = vunpack.i.h.bf16 %v4692_v20  ;;  %v4693_v3 = vunpack.i.l.bf16 %v4692_v20 }
 0x7b5   : > { %v1386_v13 = vsel %vm529_vm9, %v4654_v60, %v4694_v2  ;;  %v1388_v51 = vsel %vm529_vm9, %v4694_v2, %v4654_v60  ;;  %v1385_v26 = vsel %vm529_vm9, %v4653_v0, %v4693_v3  ;;  %v1387_v45 = vsel %vm529_vm9, %v4693_v3, %v4653_v0 }
 0x7b6   : > { %v6873_v46 = vsel %vm339_vm13, %v1373_v52, %v1387_v45  ;;  %v6877_v44 = vsel %vm8911_vm2, %v1375_v4, %v1385_v26  ;;  %v6881_v54 = vsel %vm339_vm13, %v1374_v33, %v1388_v51  ;;  %v6885_v30 = vsel %vm8912_vm14, %v1376_v61, %v1386_v13  ;;  %v3587_v33 = vld [vmem:[%s8782_s3 + $0x88] sm:$0xff]  ;;  %v3589_v61 = vld [vmem:[%s8782_s3 + $0x98] sm:$0xff]  ;;  %vm8917_vm2 = vmmov %vm8916_vm1 }
 0x7b7   : > { %v4765_v58 = vpack.i.bf16 %v6881_v54, %v6873_v46  ;;  %v4770_v60 = vpack.i.bf16 %v6885_v30, %v6877_v44  ;;  %1788 = vmatprep.mubr.f32.mxu0 %v3587_v33  ;;  %3594 = vmatprep.mubr.msk.f32.mxu1 %vm8801_vm15, %v3589_v61  ;;  %vm8918_vm14 = vmmov %vm8916_vm1 }
 0x7b8   : > { %vm8922_vm15 = vmmov %vm8916_vm1 }
 0x7b9   : > { %4766 = vrot.lane.b32.xlu0 %v4765_v58, %s5776_s11  ;;  %4771 = vrot.lane.b32.xlu1 %v4770_v60, %s5776_s11 }
 0x7bd   : > { %4776 = vrot.lane.b32.xlu0 %v6751_v16, %s5775_s10  ;;  %4781 = vrot.lane.b32.xlu1 %v6755_v35, %s5775_s10 }
 0x7c1   : > { %4786 = vrot.lane.b32.xlu0 %v6799_v56, %s5775_s10  ;;  %4791 = vrot.lane.b32.xlu1 %v6803_v57, %s5775_s10 }
 0x7c5   : > { %4796 = vrot.lane.b32.xlu0 %v6799_v56, %s5774_s9  ;;  %4801 = vrot.lane.b32.xlu1 %v6803_v57, %s5774_s9 }
 0x7c9   : > { %4806 = vrot.lane.b32.xlu0 %v4755_v8, %s5775_s10  ;;  %4811 = vrot.lane.b32.xlu1 %v4760_v55, %s5775_s10 }
 0x7cd   : > { %4816 = vrot.lane.b32.xlu0 %v4765_v58, %s5775_s10  ;;  %4821 = vrot.lane.b32.xlu1 %v4770_v60, %s5775_s10 }
 0x7d1   : > { %4826 = vrot.lane.b32.xlu0 %v4755_v8, %s5774_s9  ;;  %4831 = vrot.lane.b32.xlu1 %v4760_v55, %s5774_s9 }
 0x7d5   : > { %4836 = vrot.lane.b32.xlu0 %v4765_v58, %s5774_s9  ;;  %4841 = vrot.lane.b32.xlu1 %v4770_v60, %s5774_s9 }
 0x7d9   : > { %4846 = vrot.lane.b32.xlu0 %v6751_v16, %s5773_s8  ;;  %4851 = vrot.lane.b32.xlu1 %v6755_v35, %s5773_s8 }
 0x7dd   : > { %4856 = vrot.lane.b32.xlu0 %v6799_v56, %s5773_s8  ;;  %4861 = vrot.lane.b32.xlu1 %v6803_v57, %s5773_s8  ;;  %v4697_v56 = vpop.permute.xlu0 %4696  ;;  %v4717_v57 = vpop.permute.xlu1 %4716 }
 0x7de   : > { %v4699_v0 = vunpack.i.h.bf16 %v4697_v56  ;;  %v4698_v11 = vunpack.i.l.bf16 %v4697_v56  ;;  %v4719_v9 = vunpack.i.h.bf16 %v4717_v57 }
 0x7e1   : > { %4866 = vrot.lane.b32.xlu0 %v4755_v8, %s5773_s8  ;;  %4871 = vrot.lane.b32.xlu1 %v4760_v55, %s5773_s8  ;;  %v6940_v8 = vpop.permute.xlu0 %4701  ;;  %v6942_v55 = vpop.permute.xlu1 %4721 }
 0x7e5   : > { %4876 = vrot.lane.b32.xlu0 %v6751_v16, %s5774_s9  ;;  %4881 = vrot.lane.b32.xlu1 %v6755_v35, %s5774_s9  ;;  %v6944_v2 = vpop.permute.xlu0 %4706  ;;  %v6946_v3 = vpop.permute.xlu1 %4726 }
 0x7e9   : > { %4886 = vrot.lane.b32.xlu0 %v4765_v58, %s5773_s8  ;;  %4891 = vrot.lane.b32.xlu1 %v4770_v60, %s5773_s8  ;;  %v6948_v52 = vpop.permute.xlu0 %4711  ;;  %v6950_v16 = vpop.permute.xlu1 %4731 }
 0x814   : > { %v4737_v4 = vpop.permute.xlu0 %4736  ;;  %v4742_v35 = vpop.permute.xlu1 %4741 }
 0x815   : > { %v4739_v13 = vunpack.i.h.bf16 %v4737_v4  ;;  %v4738_v51 = vunpack.i.l.bf16 %v4737_v4  ;;  %v4744_v26 = vunpack.i.h.bf16 %v4742_v35  ;;  %v4743_v45 = vunpack.i.l.bf16 %v4742_v35 }
 0x816   : > { %v4718_v4 = vunpack.i.l.bf16 %v4717_v57 }
 0x817   : > { %v1486_v58 = vsel %vm8913_vm4, %v4739_v13, %v4744_v26  ;;  %v1485_v60 = vsel %vm8914_vm3, %v4738_v51, %v4743_v45  ;;  %v1487_v33 = vsel %vm8915_vm5, %v4743_v45, %v4738_v51  ;;  %v1488_v61 = vsel %vm8916_vm1, %v4744_v26, %v4739_v13  ;;  %vm8919_vm4 = vmmov %vm8916_vm1 }
 0x818   : > { %v3766_v37 = vpack.c.bf16 %v1488_v61, %v1487_v33  ;;  %v3768_v20 = vpack.c.bf16 %v1486_v58, %v1485_v60  ;;  %v1511_v51 = vsel %vm8917_vm2, %v4718_v4, %v4698_v11  ;;  %v1512_v13 = vsel %vm8918_vm14, %v4719_v9, %v4699_v0  ;;  %vm8920_vm3 = vmmov %vm8916_vm1 }
 0x819   : > { %vm8921_vm5 = vmmov %vm8916_vm1  ;;  %v1510_v45 = vsel %vm8922_vm15, %v4699_v0, %v4719_v9  ;;  %v3774_v60 = vpack.c.bf16 %v1512_v13, %v1511_v51 }
 0x81a   : > { %3767 = vmatprep.subr.bf16.mxu0 %v3766_v37  ;;  %vm8923_vm2 = vmmov %vm8916_vm1 }
 0x81b   : > { %3769 = vmatpush1.bf16.msra.mxu0 %v3768_v20  ;;  %v1509_v58 = vsel %vm8923_vm2, %v4698_v11, %v4718_v4  ;;  %vm8924_vm14 = vmmov %vm8916_vm1 }
 0x81c   : > { %v4747_v35 = vpop.permute.xlu0 %4746  ;;  %v4752_v25 = vpop.permute.xlu1 %4751  ;;  %vm8926_vm15 = vmmov %vm8916_vm1 }
 0x81d   : > { %v4749_v31 = vunpack.i.h.bf16 %v4747_v35  ;;  %v4748_v7 = vunpack.i.l.bf16 %v4747_v35  ;;  %v4754_v5 = vunpack.i.h.bf16 %v4752_v25  ;;  %v4753_v1 = vunpack.i.l.bf16 %v4752_v25  ;;  %vm8929_vm2 = vmmov %vm8916_vm1 }
 0x81e   : > { %v3776_v35 = vpack.c.bf16 %v1510_v45, %v1509_v58  ;;  %v4724_v45 = vunpack.i.h.bf16 %v6942_v55 }
 0x81f   : > { %v1498_v26 = vsel %vm8919_vm4, %v4749_v31, %v4754_v5  ;;  %v1497_v56 = vsel %vm8920_vm3, %v4748_v7, %v4753_v1  ;;  %v1499_v37 = vsel %vm8921_vm5, %v4753_v1, %v4748_v7  ;;  %v1500_v20 = vsel %vm8916_vm1, %v4754_v5, %v4749_v31  ;;  %vm8925_vm4 = vmmov %vm8916_vm1 }
 0x820   : > { %v3770_v57 = vpack.c.bf16 %v1500_v20, %v1499_v37  ;;  %v3772_v25 = vpack.c.bf16 %v1498_v26, %v1497_v56  ;;  %vm8927_vm3 = vmmov %vm8916_vm1 }
 0x821   : > { %vm8928_vm5 = vmmov %vm8916_vm1 }
 0x822   : > { %3771 = vmatprep.subr.bf16.mxu0 %v3770_v57  ;;  %v4704_v57 = vunpack.i.h.bf16 %v6940_v8 }
 0x823   : > { %3773 = vmatpush1.bf16.msra.mxu0 %v3772_v25  ;;  %v4703_v25 = vunpack.i.l.bf16 %v6940_v8 }
 0x824   : > { %v4757_v33 = vpop.permute.xlu0 %4756  ;;  %v4762_v61 = vpop.permute.xlu1 %4761  ;;  %3775 = vmatprep.subr.bf16.mxu0 %v3774_v60 }
 0x825   : > { %v4759_v15 = vunpack.i.h.bf16 %v4757_v33  ;;  %v4758_v1 = vunpack.i.l.bf16 %v4757_v33  ;;  %v4764_v7 = vunpack.i.h.bf16 %v4762_v61  ;;  %v4763_v34 = vunpack.i.l.bf16 %v4762_v61 }
 0x827   : > { %v1522_v31 = vsel %vm8924_vm14, %v4759_v15, %v4764_v7  ;;  %v1521_v5 = vsel %vm8925_vm4, %v4758_v1, %v4763_v34  ;;  %3777 = vmatpush1.bf16.msra.mxu0 %v3776_v35  ;;  %v1523_v9 = vsel %vm8926_vm15, %v4763_v34, %v4758_v1  ;;  %v1524_v11 = vsel %vm8927_vm3, %v4764_v7, %v4759_v15  ;;  %vm8930_vm14 = vmmov %vm8916_vm1 }
 0x828   : > { %v3778_v0 = vpack.c.bf16 %v1524_v11, %v1523_v9  ;;  %v3780_v4 = vpack.c.bf16 %v1522_v31, %v1521_v5  ;;  %v4723_v34 = vunpack.i.l.bf16 %v6942_v55  ;;  %vm8931_vm4 = vcmp.lt.s32.totalorder %v5917_v38, 112 }
 0x829   : > { %v1570_v9 = vsel %vm8931_vm4, %v4704_v57, %v4724_v45  ;;  %vm8932_vm15 = vmmov %vm8931_vm4 }
 0x82a   : > { %3779 = vmatprep.subr.bf16.mxu0 %v3778_v0  ;;  %v1569_v11 = vsel %vm8932_vm15, %v4703_v25, %v4723_v34  ;;  %vm8933_vm3 = vmmov %vm8931_vm4 }
 0x82b   : > { %3781 = vmatpush1.bf16.msra.mxu0 %v3780_v4  ;;  %v4767_v51 = vpop.permute.xlu0 %4766  ;;  %v4772_v13 = vpop.permute.xlu1 %4771 }
 0x82c   : > { %v4769_v26 = vunpack.i.h.bf16 %v4767_v51  ;;  %v4768_v56 = vunpack.i.l.bf16 %v4767_v51  ;;  %v4774_v37 = vunpack.i.h.bf16 %v4772_v13  ;;  %v4773_v20 = vunpack.i.l.bf16 %v4772_v13 }
 0x82e   : > { %v1534_v15 = vsel %vm8928_vm5, %v4769_v26, %v4774_v37  ;;  %v1533_v58 = vsel %vm8916_vm1, %v4768_v56, %v4773_v20  ;;  %v1535_v60 = vsel %vm8929_vm2, %v4773_v20, %v4768_v56  ;;  %v1536_v33 = vsel %vm8930_vm14, %v4774_v37, %v4769_v26  ;;  %vm8934_vm5 = vmmov %vm8933_vm3 }
 0x82f   : > { %v4777_v61 = vpop.permute.xlu0 %4776  ;;  %v4782_v35 = vpop.permute.xlu1 %4781  ;;  %v3782_v1 = vpack.c.bf16 %v1536_v33, %v1535_v60  ;;  %v3784_v8 = vpack.c.bf16 %v1534_v15, %v1533_v58  ;;  %vm8935_vm1 = vmmov %vm8933_vm3 }
 0x830   : > { %v4779_v7 = vunpack.i.h.bf16 %v4777_v61  ;;  %v4778_v31 = vunpack.i.l.bf16 %v4777_v61  ;;  %v4784_v5 = vunpack.i.h.bf16 %v4782_v35  ;;  %v4783_v55 = vunpack.i.l.bf16 %v4782_v35  ;;  %vm8936_vm2 = vmmov %vm8935_vm1 }
 0x831   : > { %3783 = vmatprep.subr.bf16.mxu0 %v3782_v1  ;;  %vm8937_vm14 = vmmov %vm8935_vm1  ;;  %v4709_v1 = vunpack.i.h.bf16 %v6944_v2 }
 0x832   : > { %v1546_v0 = vsel %vm8933_vm3, %v4779_v7, %v4784_v5  ;;  %v1545_v4 = vsel %vm8934_vm5, %v4778_v31, %v4783_v55  ;;  %3785 = vmatpush1.bf16.msra.mxu0 %v3784_v8  ;;  %v1547_v51 = vsel %vm8935_vm1, %v4783_v55, %v4778_v31  ;;  %v1548_v13 = vsel %vm8936_vm2, %v4784_v5, %v4779_v7  ;;  %vm8938_vm4 = vmmov %vm8935_vm1 }
 0x833   : > { %v4787_v26 = vpop.permute.xlu0 %4786  ;;  %v4792_v56 = vpop.permute.xlu1 %4791  ;;  %v3786_v37 = vpack.c.bf16 %v1548_v13, %v1547_v51  ;;  %v3788_v20 = vpack.c.bf16 %v1546_v0, %v1545_v4  ;;  %v1571_v15 = vsel %vm8937_vm14, %v4723_v34, %v4703_v25  ;;  %v1572_v58 = vsel %vm8938_vm4, %v4724_v45, %v4704_v57  ;;  %vm8939_vm15 = vmmov %vm8935_vm1 }
 0x834   : > { %v4789_v60 = vunpack.i.h.bf16 %v4787_v26  ;;  %v4788_v33 = vunpack.i.l.bf16 %v4787_v26  ;;  %v4794_v61 = vunpack.i.h.bf16 %v4792_v56  ;;  %v4793_v35 = vunpack.i.l.bf16 %v4792_v56  ;;  %vm8940_vm3 = vmmov %vm8935_vm1 }
 0x835   : > { %v4708_v8 = vunpack.i.l.bf16 %v6944_v2  ;;  %v4729_v7 = vunpack.i.h.bf16 %v6946_v3  ;;  %v4728_v31 = vunpack.i.l.bf16 %v6946_v3  ;;  %3787 = vmatprep.subr.bf16.mxu0 %v3786_v37  ;;  %vm8941_vm5 = vmmov %vm8935_vm1  ;;  %v3794_v26 = vpack.c.bf16 %v1572_v58, %v1571_v15 }
 0x836   : > { %v1558_v5 = vsel %vm8939_vm15, %v4789_v60, %v4794_v61  ;;  %v1557_v25 = vsel %vm8940_vm3, %v4788_v33, %v4793_v35  ;;  %3789 = vmatpush1.bf16.msra.mxu0 %v3788_v20  ;;  %v1559_v57 = vsel %vm8941_vm5, %v4793_v35, %v4788_v33  ;;  %v1560_v45 = vsel %vm8935_vm1, %v4794_v61, %v4789_v60 }
 0x837   : > { %v4797_v34 = vpop.permute.xlu0 %4796  ;;  %v4802_v2 = vpop.permute.xlu1 %4801  ;;  %v3790_v55 = vpack.c.bf16 %v1560_v45, %v1559_v57  ;;  %v3792_v0 = vpack.c.bf16 %v1558_v5, %v1557_v25  ;;  %v3796_v56 = vpack.c.bf16 %v1570_v9, %v1569_v11  ;;  %vm8942_vm2 = vcmp.lt.s32.totalorder %v5917_v38, 16 }
 0x838   : > { %v4799_v4 = vunpack.i.h.bf16 %v4797_v34  ;;  %v4798_v3 = vunpack.i.l.bf16 %v4797_v34  ;;  %v4804_v51 = vunpack.i.h.bf16 %v4802_v2  ;;  %v4803_v13 = vunpack.i.l.bf16 %v4802_v2  ;;  %vm8943_vm14 = vmmov %vm8942_vm2 }
 0x839   : > { %3791 = vmatprep.subr.bf16.mxu0 %v3790_v55  ;;  %v1629_v37 = vsel %vm8942_vm2, %v4708_v8, %v4728_v31  ;;  %v1630_v20 = vsel %vm8943_vm14, %v4709_v1, %v4729_v7  ;;  %vm8944_vm4 = vmmov %vm8942_vm2  ;;  %vm8950_vm14 = vcmp.lt.s32.totalorder %v5917_v38, 112 }
 0x83a   : > { %v1620_v60 = vsel %vm8944_vm4, %v4804_v51, %v4799_v4  ;;  %vm8945_vm15 = vmmov %vm8942_vm2  ;;  %3793 = vmatpush1.bf16.msra.mxu0 %v3792_v0  ;;  %v3834_v55 = vpack.c.bf16 %v1630_v20, %v1629_v37 }
 0x83b   : > { %v1619_v33 = vsel %vm8945_vm15, %v4803_v13, %v4798_v3  ;;  %vm8946_vm3 = vmmov %vm8942_vm2  ;;  %v4807_v58 = vpop.permute.xlu0 %4806  ;;  %v4812_v35 = vpop.permute.xlu1 %4811  ;;  %3795 = vmatprep.subr.bf16.mxu0 %v3794_v26 }
 0x83c   : > { %v1617_v61 = vsel %vm8946_vm3, %v4798_v3, %v4803_v13  ;;  %vm8947_vm5 = vmmov %vm8942_vm2  ;;  %v3832_v25 = vpack.c.bf16 %v1620_v60, %v1619_v33  ;;  %v4809_v57 = vunpack.i.h.bf16 %v4807_v58  ;;  %v4808_v45 = vunpack.i.l.bf16 %v4807_v58 }
 0x83d   : > { %v1618_v15 = vsel %vm8947_vm5, %v4799_v4, %v4804_v51  ;;  %vm8948_vm1 = vmmov %vm8942_vm2  ;;  %v4814_v34 = vunpack.i.h.bf16 %v4812_v35  ;;  %v4813_v2 = vunpack.i.l.bf16 %v4812_v35 }
 0x83e   : > { %v1632_v9 = vsel %vm8948_vm1, %v4729_v7, %v4709_v1  ;;  %vm8949_vm2 = vmmov %vm8948_vm1  ;;  %v3830_v5 = vpack.c.bf16 %v1618_v15, %v1617_v61  ;;  %3797 = vmatpush1.bf16.msra.mxu0 %v3796_v56 }
 0x83f   : > { %v1631_v11 = vsel %vm8949_vm2, %v4728_v31, %v4708_v8  ;;  %v1582_v0 = vsel %vm8950_vm14, %v4809_v57, %v4814_v34  ;;  %vm8951_vm4 = vmmov %vm8950_vm14  ;;  %v4817_v7 = vpop.permute.xlu0 %4816  ;;  %v4822_v31 = vpop.permute.xlu1 %4821 }
 0x840   : > { %3831 = vmatprep.subr.bf16.mxu1 %v3830_v5  ;;  %v1581_v1 = vsel %vm8951_vm4, %v4808_v45, %v4813_v2  ;;  %vm8952_vm15 = vmmov %vm8951_vm4  ;;  %v3836_v51 = vpack.c.bf16 %v1632_v9, %v1631_v11  ;;  %v4819_v13 = vunpack.i.h.bf16 %v4817_v7  ;;  %v4818_v26 = vunpack.i.l.bf16 %v4817_v7 }
 0x841   : > { %3833 = vmatpush1.bf16.msra.mxu1 %v3832_v25  ;;  %v1583_v8 = vsel %vm8952_vm15, %v4813_v2, %v4808_v45  ;;  %vm8953_vm3 = vmmov %vm8951_vm4  ;;  %v3800_v3 = vpack.c.bf16 %v1582_v0, %v1581_v1  ;;  %v4824_v37 = vunpack.i.h.bf16 %v4822_v31  ;;  %v4823_v20 = vunpack.i.l.bf16 %v4822_v31 }
 0x842   : > { %3835 = vmatprep.subr.bf16.mxu1 %v3834_v55  ;;  %v1584_v4 = vsel %vm8953_vm3, %v4814_v34, %v4809_v57  ;;  %vm8954_vm5 = vmmov %vm8953_vm3  ;;  %vm8958_vm4 = vcmp.lt.s32.totalorder %v5917_v38, 16 }
 0x843   : > { %v3798_v60 = vpack.c.bf16 %v1584_v4, %v1583_v8  ;;  %v1594_v56 = vsel %vm8954_vm5, %v4819_v13, %v4824_v37  ;;  %vm8955_vm1 = vmmov %vm8953_vm3  ;;  %v4827_v9 = vpop.permute.xlu0 %4826  ;;  %v4832_v11 = vpop.permute.xlu1 %4831 }
 0x844   : > { %v1593_v33 = vsel %vm8955_vm1, %v4818_v26, %v4823_v20  ;;  %vm8956_vm2 = vmmov %vm8955_vm1  ;;  %v4829_v5 = vunpack.i.h.bf16 %v4827_v9  ;;  %v4828_v25 = vunpack.i.l.bf16 %v4827_v9  ;;  %v4834_v57 = vunpack.i.h.bf16 %v4832_v11 }
 0x845   : > { %3837 = vmatpush1.bf16.msra.mxu1 %v3836_v51  ;;  %v1595_v61 = vsel %vm8956_vm2, %v4823_v20, %v4818_v26  ;;  %vm8957_vm14 = vmmov %vm8955_vm1  ;;  %3799 = vmatprep.subr.bf16.mxu0 %v3798_v60  ;;  %v3804_v35 = vpack.c.bf16 %v1594_v56, %v1593_v33  ;;  %v4833_v45 = vunpack.i.l.bf16 %v4832_v11  ;;  %v8962_v26 = vpack.c.bf16 %v6747_v59, %v6739_v62 }
 0x846   : > { %v1596_v15 = vsel %vm8957_vm14, %v4824_v37, %v4819_v13  ;;  %3801 = vmatpush1.bf16.msra.mxu0 %v3800_v3  ;;  %v1644_v34 = vsel %vm8958_vm4, %v4834_v57, %v4829_v5  ;;  %vm8959_vm15 = vmmov %vm8958_vm4  ;;  %v8967_v62 = vpack.c.bf16 %v6743_v17, %v6735_v41 }
 0x847   : > { %v3802_v58 = vpack.c.bf16 %v1596_v15, %v1595_v61  ;;  %v1643_v2 = vsel %vm8959_vm15, %v4833_v45, %v4828_v25  ;;  %vm8960_vm3 = vmmov %vm8958_vm4  ;;  %v4837_v1 = vpop.permute.xlu0 %4836  ;;  %v4842_v8 = vpop.permute.xlu1 %4841  ;;  %vm8969_vm15 = vcmp.lt.s32.totalorder %v5917_v38, 32 }
 0x848   : > { %v1641_v55 = vsel %vm8960_vm3, %v4828_v25, %v4833_v45  ;;  %vm8961_vm5 = vmmov %vm8960_vm3  ;;  %v3840_v31 = vpack.c.bf16 %v1644_v34, %v1643_v2  ;;  %v4839_v4 = vunpack.i.h.bf16 %v4837_v1  ;;  %v4838_v3 = vunpack.i.l.bf16 %v4837_v1 }
 0x849   : > { %3803 = vmatprep.subr.bf16.mxu0 %v3802_v58  ;;  %v1642_v0 = vsel %vm8961_vm5, %v4829_v5, %v4834_v57  ;;  %v4844_v51 = vunpack.i.h.bf16 %v4842_v8  ;;  %v4843_v13 = vunpack.i.l.bf16 %v4842_v8  ;;  %vm8963_vm1 = vmmov %vm8960_vm3  ;;  %v4714_v5 = vunpack.i.h.bf16 %v6948_v52 }
 0x84a   : > { %v3838_v7 = vpack.c.bf16 %v1642_v0, %v1641_v55  ;;  %3805 = vmatpush1.bf16.msra.mxu0 %v3804_v35  ;;  %vm8964_vm2 = vmmov %vm8963_vm1  ;;  %v4713_v25 = vunpack.i.l.bf16 %v6948_v52  ;;  %v4734_v57 = vunpack.i.h.bf16 %v6950_v16  ;;  %v4733_v45 = vunpack.i.l.bf16 %v6950_v16 }
 0x84b   : > { %3807 = vmatprep.subr.bf16.mxu0 %v8962_v26  ;;  %v1656_v37 = vsel %vm8963_vm1, %v4844_v51, %v4839_v4  ;;  %v1655_v20 = vsel %vm8964_vm2, %v4843_v13, %v4838_v3  ;;  %vm8965_vm14 = vmmov %vm8963_vm1  ;;  %v4847_v33 = vpop.permute.xlu0 %4846  ;;  %v4852_v61 = vpop.permute.xlu1 %4851  ;;  %v8968_v34 = vpack.c.bf16 %v6795_v53, %v6787_v47  ;;  %v8973_v47 = vpack.c.bf16 %v6791_v48, %v6783_v27 }
 0x84c   : > { %3839 = vmatprep.subr.bf16.mxu1 %v3838_v7  ;;  %v1653_v60 = vsel %vm8965_vm14, %v4838_v3, %v4843_v13  ;;  %vm8966_vm4 = vmmov %vm8963_vm1  ;;  %v3844_v9 = vpack.c.bf16 %v1656_v37, %v1655_v20  ;;  %v4849_v59 = vunpack.i.h.bf16 %v4847_v33  ;;  %v4848_v11 = vunpack.i.l.bf16 %v4847_v33 }
 0x84d   : > { %3841 = vmatpush1.bf16.msra.mxu1 %v3840_v31  ;;  %v1654_v56 = vsel %vm8966_vm4, %v4839_v4, %v4844_v51  ;;  %v4854_v58 = vunpack.i.h.bf16 %v4852_v61  ;;  %v4853_v35 = vunpack.i.l.bf16 %v4852_v61  ;;  %vm8970_vm3 = vmmov %vm8969_vm15  ;;  %v8974_v4 = vpack.c.bf16 %v6683_v39, %v6681_v6 }
 0x84e   : > { %v3842_v15 = vpack.c.bf16 %v1654_v56, %v1653_v60  ;;  %3809 = vmatpush1.bf16.msra.mxu0 %v8967_v62  ;;  %vm8971_vm5 = vmmov %vm8970_vm3  ;;  %v8982_v33 = vpack.c.bf16 %v6679_v18, %v6677_v10 }
 0x84f   : > { %3811 = vmatprep.subr.bf16.mxu0 %v8968_v34  ;;  %v1668_v41 = vsel %vm8969_vm15, %v4854_v58, %v4849_v59  ;;  %v1667_v17 = vsel %vm8970_vm3, %v4853_v35, %v4848_v11  ;;  %v1665_v2 = vsel %vm8971_vm5, %v4848_v11, %v4853_v35  ;;  %vm8972_vm1 = vmmov %vm8970_vm3  ;;  %v4857_v55 = vpop.permute.xlu0 %4856  ;;  %v4862_v16 = vpop.permute.xlu1 %4861 }
 0x850   : > { %3843 = vmatprep.subr.bf16.mxu1 %v3842_v15  ;;  %v1666_v52 = vsel %vm8972_vm1, %v4849_v59, %v4854_v58  ;;  %v3848_v1 = vpack.c.bf16 %v1668_v41, %v1667_v17  ;;  %v4859_v53 = vunpack.i.h.bf16 %v4857_v55  ;;  %v4858_v8 = vunpack.i.l.bf16 %v4857_v55  ;;  %vm8975_vm2 = vmmov %vm8972_vm1 }
 0x851   : > { %3845 = vmatpush1.bf16.msra.mxu1 %v3844_v9  ;;  %v3846_v0 = vpack.c.bf16 %v1666_v52, %v1665_v2  ;;  %v4864_v7 = vunpack.i.h.bf16 %v4862_v16  ;;  %v4863_v31 = vunpack.i.l.bf16 %v4862_v16  ;;  %v1689_v3 = vsel %vm8975_vm2, %v4713_v25, %v4733_v45  ;;  %vm8976_vm14 = vmmov %vm8972_vm1 }
 0x852   : > { %3813 = vmatpush1.bf16.msra.mxu0 %v8973_v47  ;;  %v1690_v51 = vsel %vm8976_vm14, %v4714_v5, %v4734_v57  ;;  %vm8977_vm4 = vmmov %vm8972_vm1  ;;  %v1692_v39 = vsel %vm8972_vm1, %v4734_v57, %v4714_v5  ;;  %v8983_v59 = vpack.c.bf16 %v6843_v36, %v6835_v49  ;;  %v8988_v36 = vpack.c.bf16 %v6839_v40, %v6831_v50 }
 0x853   : > { %3815 = vmatprep.subr.bf16.mxu0 %v8974_v4  ;;  %3847 = vmatprep.subr.bf16.mxu1 %v3846_v0  ;;  %v1680_v13 = vsel %vm8977_vm4, %v4864_v7, %v4859_v53  ;;  %vm8978_vm15 = vmmov %vm8972_vm1  ;;  %v4867_v37 = vpop.permute.xlu0 %4866  ;;  %v4872_v20 = vpop.permute.xlu1 %4871  ;;  %v3854_v11 = vpack.c.bf16 %v1690_v51, %v1689_v3  ;;  %v8989_v17 = vpack.c.bf16 %v6885_v30, %v6877_v44 }
 0x854   : > { %v1679_v27 = vsel %vm8978_vm15, %v4863_v31, %v4858_v8  ;;  %vm8979_vm3 = vmmov %vm8972_vm1  ;;  %v4869_v61 = vunpack.i.h.bf16 %v4867_v37  ;;  %v4868_v15 = vunpack.i.l.bf16 %v4867_v37  ;;  %v4874_v9 = vunpack.i.h.bf16 %v4872_v20 }
 0x855   : > { %3849 = vmatpush1.bf16.msra.mxu1 %v3848_v1  ;;  %v1677_v48 = vsel %vm8979_vm3, %v4858_v8, %v4863_v31  ;;  %vm8980_vm5 = vmmov %vm8972_vm1  ;;  %v3852_v56 = vpack.c.bf16 %v1680_v13, %v1679_v27  ;;  %v4873_v62 = vunpack.i.l.bf16 %v4872_v20  ;;  %v8994_v47 = vpack.c.bf16 %v6881_v54, %v6873_v46  ;;  %v3586_v27 = vld [vmem:[%s8782_s3 + $0x80] sm:$0xff] }
 0x856   : > { %v1678_v6 = vsel %vm8980_vm5, %v4859_v53, %v4864_v7  ;;  %vm8981_vm2 = vmmov %vm8972_vm1  ;;  %3817 = vmatpush1.bf16.msra.mxu0 %v8982_v33  ;;  %vm8990_vm5 = vcmp.lt.s32.totalorder %v5917_v38, 16  ;;  %v1062_v37 = vmul.f32 2.0, %v6421_v63 }
 0x857   : > { %v1691_v26 = vsel %vm8981_vm2, %v4733_v45, %v4713_v25  ;;  %v3850_v60 = vpack.c.bf16 %v1678_v6, %v1677_v48  ;;  %3819 = vmatprep.subr.bf16.mxu0 %v8983_v59  ;;  %vm8984_vm14 = vmmov %vm8972_vm1  ;;  %v4877_v5 = vpop.permute.xlu0 %4876  ;;  %v4882_v25 = vpop.permute.xlu1 %4881  ;;  %v3588_v48 = vld [vmem:[%s8782_s3 + $0x90] sm:$0xff] }
 0x858   : > { %v1701_v58 = vsel %vm8984_vm14, %v4868_v15, %v4873_v62  ;;  %vm8985_vm4 = vmmov %vm8972_vm1  ;;  %v3856_v49 = vpack.c.bf16 %v1692_v39, %v1691_v26  ;;  %v4879_v57 = vunpack.i.h.bf16 %v4877_v5  ;;  %v4878_v45 = vunpack.i.l.bf16 %v4877_v5 }
 0x859   : > { %3851 = vmatprep.subr.bf16.mxu1 %v3850_v60  ;;  %v1702_v35 = vsel %vm8985_vm4, %v4869_v61, %v4874_v9  ;;  %vm8986_vm15 = vmmov %vm8972_vm1  ;;  %v4884_v34 = vunpack.i.h.bf16 %v4882_v25  ;;  %v4883_v41 = vunpack.i.l.bf16 %v4882_v25  ;;  %v1061_v39 = vmul.f32 2.0, %v6417_v29 }
 0x85a   : > { %3853 = vmatpush1.bf16.msra.mxu1 %v3852_v56  ;;  %v1704_v10 = vsel %vm8986_vm15, %v4874_v9, %v4869_v61  ;;  %vm8987_vm3 = vmmov %vm8972_vm1  ;;  %3821 = vmatpush1.bf16.msra.mxu0 %v8988_v36  ;;  %v3858_v2 = vpack.c.bf16 %v1702_v35, %v1701_v58  ;;  %v1064_v61 = vmul.f32 %v1062_v37, %v6432_v28 }
 0x85b   : > { %v1703_v18 = vsel %vm8987_vm3, %v4873_v62, %v4868_v15  ;;  %3855 = vmatprep.subr.bf16.mxu1 %v3854_v11  ;;  %3823 = vmatprep.subr.bf16.mxu0 %v8989_v17  ;;  %v1608_v52 = vsel %vm8990_vm5, %v4884_v34, %v4879_v57  ;;  %vm8991_vm1 = vmmov %vm8990_vm5  ;;  %v4887_v16 = vpop.permute.xlu0 %4886  ;;  %v4892_v0 = vpop.permute.xlu1 %4891  ;;  %v1063_v60 = vmul.f32 %v1061_v39, %v6426_v19 }
 0x85c   : > { %v1607_v55 = vsel %vm8991_vm1, %v4883_v41, %v4878_v45  ;;  %vm8992_vm2 = vmmov %vm8991_vm1  ;;  %v3860_v30 = vpack.c.bf16 %v1704_v10, %v1703_v18  ;;  %v4889_v53 = vunpack.i.h.bf16 %v4887_v16  ;;  %v4888_v8 = vunpack.i.l.bf16 %v4887_v16 }
 0x85d   : > { %v1605_v50 = vsel %vm8992_vm2, %v4878_v45, %v4883_v41  ;;  %vm8993_vm14 = vmmov %vm8991_vm1  ;;  %v3828_v44 = vpack.c.bf16 %v1608_v52, %v1607_v55  ;;  %v4894_v7 = vunpack.i.h.bf16 %v4892_v0  ;;  %v4893_v31 = vunpack.i.l.bf16 %v4892_v0 }
 0x85e   : > { %3857 = vmatpush1.bf16.msra.mxu1 %v3856_v49  ;;  %v1606_v40 = vsel %vm8993_vm14, %v4879_v57, %v4884_v34  ;;  %3825 = vmatpush1.bf16.msra.mxu0 %v8994_v47  ;;  %vm8995_vm4 = vmmov %vm8987_vm3  ;;  %vm8998_vm1 = vcmp.lt.s32.totalorder %v5917_v38, 14 }
 0x85f   : > { %3859 = vmatprep.subr.bf16.mxu1 %v3858_v2  ;;  %v3826_v1 = vpack.c.bf16 %v1606_v40, %v1605_v50  ;;  %v1716_v4 = vsel %vm8995_vm4, %v4894_v7, %v4889_v53  ;;  %vm8996_vm15 = vmmov %vm8987_vm3  ;;  %v1713_v51 = vsel %vm8987_vm3, %v4888_v8, %v4893_v31 }
 0x860   : > { %v1715_v3 = vsel %vm8996_vm15, %v4893_v31, %v4888_v8  ;;  %vm8997_vm5 = vmmov %vm8987_vm3  ;;  %vm9002_vm15 = vcmp.lt.s32.totalorder %v5917_v38, 126 }
 0x861   : > { %3827 = vmatprep.subr.bf16.mxu0 %v3826_v1  ;;  %v1714_v13 = vsel %vm8997_vm5, %v4889_v53, %v4894_v7  ;;  %v3864_v54 = vpack.c.bf16 %v1716_v4, %v1715_v3  ;;  %vm8999_vm2 = vmmov %vm8998_vm1 }
 0x862   : > { %3861 = vmatpush1.bf16.msra.mxu1 %v3860_v30  ;;  %v3862_v46 = vpack.c.bf16 %v1714_v13, %v1713_v51  ;;  %3829 = vmatpush1.bf16.msra.mxu0 %v3828_v44  ;;  %vm9000_vm14 = vmmov %vm8998_vm1 }
 0x863   : > { %vm9001_vm4 = vmmov %vm8998_vm1 }
 0x864   : > { %3863 = vmatprep.subr.bf16.mxu1 %v3862_v46  ;;  %vm9003_vm3 = vmmov %vm9002_vm15 }
 0x865   : > { %1789 = vmatmul.mubr.f32.vlgmr.msra.gmra.mrb[6].mxu0 %v3586_v27  ;;  %vm9004_vm5 = vmmov %vm9003_vm3 }
 0x866   : > { %3865 = vmatpush1.bf16.msra.mxu1 %v3864_v54 }
 0x869   : > { %1866 = vmatmul.mubr.f32.vlgmr.msra.gmra.mrb[16].mxu1 %v3588_v48 }
 0x938   : > { %v1790_v6 = vpop.f32.mrb[6].mxu0 }
 0x939   : > { %v1792_v26 = vpop.f32.mrb[7].mxu0 }
 0x93c   : > { %v1867_v20 = vpop.f32.mrb[16].mxu1 }
 0x93d   : > { %v1868_v56 = vadd.f32 %v1867_v20, %v1790_v6  ;;  %v1869_v33 = vpop.f32.mrb[17].mxu1 }
 0x93e   : > { %v1870_v15 = vadd.f32 %v1869_v33, %v1792_v26 }
 0x93f   : > { %v7164_v9 = vmul.f32 %v1868_v56, %v1063_v60  ;;  %v7167_v62 = vmul.f32 %v1868_v56, %v6426_v19 }
 0x940   : > { %v7169_v59 = vmul.f32 %v1870_v15, %v1064_v61  ;;  %v7172_v29 = vmul.f32 %v1870_v15, %v6432_v28 }
 0x941   : > { %v7176_v63 = vpack.i.bf16 %v7167_v62, %v7164_v9  ;;  %v3916_v28 = vpack.c.bf16 %v7167_v62, %v7164_v9 }
 0x942   : > { %v7180_v11 = vpack.i.bf16 %v7172_v29, %v7169_v59  ;;  %v3914_v19 = vpack.c.bf16 %v7172_v29, %v7169_v59 }
 0x943   : > { %4896 = vrot.lane.b32.xlu0 %v7176_v63, %s5765_s19 }
 0x944   : > { %4936 = vrot.lane.b32.xlu1 %v7180_v11, %s5765_s19 }
 0x947   : > { %4901 = vrot.lane.b32.xlu0 %v7176_v63, %s5772_s7 }
 0x948   : > { %4941 = vrot.lane.b32.xlu1 %v7180_v11, %s5772_s7 }
 0x94b   : > { %4906 = vrot.lane.b32.xlu0 %v7176_v63, %s5771_s30 }
 0x94c   : > { %4946 = vrot.lane.b32.xlu1 %v7180_v11, %s5771_s30 }
 0x94f   : > { %4911 = vrot.lane.b32.xlu0 %v7176_v63, %s5770_s29 }
 0x950   : > { %4951 = vrot.lane.b32.xlu1 %v7180_v11, %s5770_s29 }
 0x953   : > { %4916 = vrot.lane.b32.xlu0 %v7176_v63, %s5766_s20 }
 0x954   : > { %4956 = vrot.lane.b32.xlu1 %v7180_v11, %s5766_s20 }
 0x957   : > { %4921 = vrot.lane.b32.xlu0 %v7176_v63, %s5768_s26 }
 0x958   : > { %4961 = vrot.lane.b32.xlu1 %v7180_v11, %s5768_s26 }
 0x95b   : > { %4926 = vrot.lane.b32.xlu0 %v7176_v63, %s5767_s21 }
 0x95c   : > { %4966 = vrot.lane.b32.xlu1 %v7180_v11, %s5767_s21 }
 0x95f   : > { %4931 = vrot.lane.b32.xlu0 %v7176_v63, %s5769_s27 }
 0x960   : > { %4971 = vrot.lane.b32.xlu1 %v7180_v11, %s5769_s27 }
 0x9b5   : > { %v4897_v58 = vpop.permute.xlu0 %4896 }
 0x9b6   : > { %v4937_v35 = vpop.permute.xlu1 %4936  ;;  %v4899_v10 = vunpack.i.h.bf16 %v4897_v58  ;;  %v4898_v18 = vunpack.i.l.bf16 %v4897_v58 }
 0x9b7   : > { %v4939_v5 = vunpack.i.h.bf16 %v4937_v35  ;;  %v4938_v25 = vunpack.i.l.bf16 %v4937_v35 }
 0x9b9   : > { %v4902_v49 = vpop.permute.xlu0 %4901  ;;  %v1990_v17 = vsel %vm8998_vm1, %v4899_v10, %v4939_v5  ;;  %v1992_v2 = vsel %vm8999_vm2, %v4939_v5, %v4899_v10  ;;  %v1989_v52 = vsel %vm9000_vm14, %v4898_v18, %v4938_v25  ;;  %v1991_v55 = vsel %vm9001_vm4, %v4938_v25, %v4898_v18  ;;  %vm9005_vm1 = vmmov %vm9003_vm3 }
 0x9ba   : > { %v4904_v36 = vunpack.i.h.bf16 %v4902_v49  ;;  %v4903_v57 = vunpack.i.l.bf16 %v4902_v49  ;;  %v4942_v45 = vpop.permute.xlu1 %4941  ;;  %vm9006_vm2 = vcmp.ge.s32.totalorder %v5923_v42, 14  ;;  %vm9007_vm14 = vcmp.ge.s32.totalorder %v5925_v43, 14 }
 0x9bb   : > { %v4944_v34 = vunpack.i.h.bf16 %v4942_v45  ;;  %v4943_v41 = vunpack.i.l.bf16 %v4942_v45  ;;  %vm9008_vm4 = vmmov %vm9006_vm2 }
 0x9bd   : > { %v2002_v50 = vsel %vm9002_vm15, %v4904_v36, %v4944_v34  ;;  %v2004_v40 = vsel %vm9003_vm3, %v4944_v34, %v4904_v36  ;;  %v2001_v16 = vsel %vm9004_vm5, %v4903_v57, %v4943_v41  ;;  %v2003_v0 = vsel %vm9005_vm1, %v4943_v41, %v4903_v57  ;;  %v4907_v1 = vpop.permute.xlu0 %4906  ;;  %vm9009_vm15 = vmmov %vm9007_vm14 }
 0x9be   : > { %v7236_v44 = vsel %vm9006_vm2, %v1991_v55, %v2001_v16  ;;  %v7240_v30 = vsel %vm9007_vm14, %v1989_v52, %v2003_v0  ;;  %v7244_v47 = vsel %vm9008_vm4, %v1992_v2, %v2002_v50  ;;  %v7248_v53 = vsel %vm9009_vm15, %v1990_v17, %v2004_v40  ;;  %v4947_v8 = vpop.permute.xlu1 %4946 }
 0x9bf   : > { %v4909_v7 = vunpack.i.h.bf16 %v4907_v1  ;;  %v4949_v31 = vunpack.i.h.bf16 %v4947_v8  ;;  %v4908_v4 = vunpack.i.l.bf16 %v4907_v1  ;;  %v4948_v3 = vunpack.i.l.bf16 %v4947_v8 }
 0x9c0   : > { %v7252_v51 = vpack.i.bf16 %v7244_v47, %v7236_v44  ;;  %v7256_v13 = vpack.i.bf16 %v7248_v53, %v7240_v30  ;;  %vm9010_vm3 = vcmp.lt.s32.totalorder %v5917_v38, 15  ;;  %v3906_v56 = vpack.c.bf16 %v7248_v53, %v7240_v30 }
 0x9c1   : > { %v4912_v46 = vpop.permute.xlu0 %4911  ;;  %v1962_v54 = vsel %vm9010_vm3, %v4909_v7, %v4949_v31  ;;  %vm9011_vm5 = vmmov %vm9010_vm3  ;;  %v3908_v33 = vpack.c.bf16 %v7244_v47, %v7236_v44  ;;  %vm9014_vm14 = vcmp.ge.s32.totalorder %v5925_v43, 15  ;;  %vm9016_vm15 = vcmp.lt.s32.totalorder %v5925_v43, 2 }
 0x9c2   : > { %v1964_v27 = vsel %vm9011_vm5, %v4949_v31, %v4909_v7  ;;  %v4914_v48 = vunpack.i.h.bf16 %v4912_v46  ;;  %v4913_v6 = vunpack.i.l.bf16 %v4912_v46  ;;  %4976 = vrot.lane.b32.xlu0 %v7252_v51, %s5776_s11  ;;  %4981 = vrot.lane.b32.xlu1 %v7256_v13, %s5776_s11  ;;  %v4952_v39 = vpop.permute.xlu1 %4951  ;;  %vm9012_vm1 = vmmov %vm9010_vm3  ;;  %vm9018_vm5 = vcmask 130048  }
 0x9c3   : > { %v4954_v26 = vunpack.i.h.bf16 %v4952_v39  ;;  %v4953_v37 = vunpack.i.l.bf16 %v4952_v39  ;;  %v1961_v20 = vsel %vm9012_vm1, %v4908_v4, %v4948_v3  ;;  %vm9013_vm2 = vmmov %vm9012_vm1  ;;  %vm9019_vm1 = vcmp.lt.s32.totalorder %v5917_v38, 96 }
 0x9c4   : > { %v1963_v60 = vsel %vm9013_vm2, %v4948_v3, %v4908_v4  ;;  %vm9015_vm4 = vmmov %vm9014_vm14 }
 0x9c5   : > { %v1974_v61 = vsel %vm561_vm10, %v4914_v48, %v4954_v26  ;;  %v1976_v15 = vsel %vm561_vm10, %v4954_v26, %v4914_v48  ;;  %v1973_v58 = vsel %vm561_vm10, %v4913_v6, %v4953_v37  ;;  %v1975_v35 = vsel %vm561_vm10, %v4953_v37, %v4913_v6  ;;  %v4917_v10 = vpop.permute.xlu0 %4916  ;;  %vm9017_vm3 = vmmov %vm9016_vm15 }
 0x9c6   : > { %v7284_v18 = vsel %vm321_vm0, %v1963_v60, %v1973_v58  ;;  %v7288_v5 = vsel %vm9014_vm14, %v1961_v20, %v1975_v35  ;;  %v7292_v25 = vsel %vm321_vm0, %v1964_v27, %v1974_v61  ;;  %v7296_v49 = vsel %vm9015_vm4, %v1962_v54, %v1976_v15  ;;  %v4957_v36 = vpop.permute.xlu1 %4956  ;;  %vm9020_vm2 = vmmov %vm9019_vm1 }
 0x9c7   : > { %v4919_v57 = vunpack.i.h.bf16 %v4917_v10  ;;  %v4959_v45 = vunpack.i.h.bf16 %v4957_v36  ;;  %v4918_v34 = vunpack.i.l.bf16 %v4917_v10  ;;  %v4958_v41 = vunpack.i.l.bf16 %v4957_v36  ;;  %vm9021_vm14 = vmmov %vm9019_vm1 }
 0x9c8   : > { %v7300_v17 = vpack.i.bf16 %v7292_v25, %v7284_v18  ;;  %v7304_v2 = vpack.i.bf16 %v7296_v49, %v7288_v5  ;;  %v3910_v4 = vpack.c.bf16 %v7296_v49, %v7288_v5  ;;  %v3912_v3 = vpack.c.bf16 %v7292_v25, %v7284_v18  ;;  %vm9022_vm4 = vmmov %vm9019_vm1 }
 0x9c9   : > { %v4922_v52 = vpop.permute.xlu0 %4921  ;;  %v1934_v16 = vsel %vm538_vm6, %v4919_v57, %v4959_v45  ;;  %v1936_v0 = vsel %vm538_vm6, %v4959_v45, %v4919_v57  ;;  %v1933_v7 = vsel %vm538_vm6, %v4918_v34, %v4958_v41  ;;  %v1935_v31 = vsel %vm538_vm6, %v4958_v41, %v4918_v34 }
 0x9ca   : > { %v4924_v55 = vunpack.i.h.bf16 %v4922_v52  ;;  %v4923_v50 = vunpack.i.l.bf16 %v4922_v52  ;;  %4986 = vrot.lane.b32.xlu0 %v7300_v17, %s5776_s11  ;;  %4996 = vrot.lane.b32.xlu1 %v7304_v2, %s5776_s11  ;;  %v4962_v40 = vpop.permute.xlu1 %4961 }
 0x9cb   : > { %v4964_v1 = vunpack.i.h.bf16 %v4962_v40  ;;  %v4963_v8 = vunpack.i.l.bf16 %v4962_v40 }
 0x9cd   : > { %v1946_v46 = vsel %vm545_vm8, %v4924_v55, %v4964_v1  ;;  %v1948_v54 = vsel %vm545_vm8, %v4964_v1, %v4924_v55  ;;  %v1945_v27 = vsel %vm545_vm8, %v4923_v50, %v4963_v8  ;;  %v1947_v48 = vsel %vm545_vm8, %v4963_v8, %v4923_v50  ;;  %v4927_v6 = vpop.permute.xlu0 %4926 }
 0x9ce   : > { %v7332_v39 = vsel %vm333_vm11, %v1933_v7, %v1947_v48  ;;  %v7336_v26 = vsel %vm334_vm12, %v1935_v31, %v1945_v27  ;;  %v7340_v37 = vsel %vm333_vm11, %v1934_v16, %v1948_v54  ;;  %v7344_v20 = vsel %vm334_vm12, %v1936_v0, %v1946_v46  ;;  %4991 = vrot.lane.b32.xlu0 %v7176_v63, %s5776_s11  ;;  %v4967_v60 = vpop.permute.xlu1 %4966 }
 0x9cf   : > { %v4929_v61 = vunpack.i.h.bf16 %v4927_v6  ;;  %5001 = vrot.lane.b32.xlu1 %v7180_v11, %s5776_s11  ;;  %v4969_v15 = vunpack.i.h.bf16 %v4967_v60  ;;  %v4928_v58 = vunpack.i.l.bf16 %v4927_v6  ;;  %v4968_v35 = vunpack.i.l.bf16 %v4967_v60 }
 0x9d0   : > { %v5005_v10 = vpack.i.bf16 %v7340_v37, %v7332_v39  ;;  %v5010_v36 = vpack.i.bf16 %v7344_v20, %v7336_v26  ;;  %v3918_v1 = vpack.c.bf16 %v7344_v20, %v7336_v26  ;;  %v3920_v8 = vpack.c.bf16 %v7340_v37, %v7332_v39 }
 0x9d1   : > { %v4932_v57 = vpop.permute.xlu0 %4931  ;;  %v1906_v52 = vsel %vm522_vm7, %v4929_v61, %v4969_v15  ;;  %v1908_v55 = vsel %vm522_vm7, %v4969_v15, %v4929_v61  ;;  %v1905_v16 = vsel %vm522_vm7, %v4928_v58, %v4968_v35  ;;  %v1907_v0 = vsel %vm522_vm7, %v4968_v35, %v4928_v58 }
 0x9d2   : > { %v4934_v45 = vunpack.i.h.bf16 %v4932_v57  ;;  %v4933_v34 = vunpack.i.l.bf16 %v4932_v57  ;;  %5006 = vrot.lane.b32.xlu0 %v5005_v10, %s5776_s11  ;;  %v4972_v41 = vpop.permute.xlu1 %4971  ;;  %v3593_v57 = vld [vmem:[%s8782_s3 + $0xb8] sm:$0x1] }
 0x9d3   : > { %5011 = vrot.lane.b32.xlu1 %v5010_v36, %s5776_s11  ;;  %v4974_v50 = vunpack.i.h.bf16 %v4972_v41  ;;  %v4973_v40 = vunpack.i.l.bf16 %v4972_v41  ;;  %3595 = vmatprep.mubr.msk.f32.mxu1 %vm9018_vm5, %v3593_v57  ;;  %vm9025_vm5 = vmmov %vm9019_vm1 }
 0x9d5   : > { %v1918_v7 = vsel %vm529_vm9, %v4934_v45, %v4974_v50  ;;  %v1920_v31 = vsel %vm529_vm9, %v4974_v50, %v4934_v45  ;;  %v1917_v46 = vsel %vm529_vm9, %v4933_v34, %v4973_v40  ;;  %v1919_v54 = vsel %vm529_vm9, %v4973_v40, %v4933_v34  ;;  %v3592_v45 = vld [vmem:[%s8782_s3 + $0xb0] sm:$0x1]  ;;  %v3597_v34 = vld [vmem:[%s8782_s3 + $0x48] sm:$0xff] }
 0x9d6   : > { %v7378_v27 = vsel %vm339_vm13, %v1905_v16, %v1919_v54  ;;  %v7382_v48 = vsel %vm9016_vm15, %v1907_v0, %v1917_v46  ;;  %v7386_v6 = vsel %vm339_vm13, %v1906_v52, %v1920_v31  ;;  %v7390_v60 = vsel %vm9017_vm3, %v1908_v55, %v1918_v7  ;;  %1872 = vmatmul.mubr.f32.gmra.mrb[18].mxu1 %v3592_v45  ;;  %vm9023_vm15 = vmmov %vm9019_vm1 }
 0x9d7   : > { %v5015_v61 = vpack.i.bf16 %v7386_v6, %v7378_v27  ;;  %v5020_v15 = vpack.i.bf16 %v7390_v60, %v7382_v48  ;;  %v3922_v58 = vpack.c.bf16 %v7390_v60, %v7382_v48  ;;  %v3924_v35 = vpack.c.bf16 %v7386_v6, %v7378_v27  ;;  %2319 = vmatprep.mubr.f32.mxu1 %v3597_v34  ;;  %vm9024_vm3 = vmmov %vm9019_vm1 }
 0x9d9   : > { %5016 = vrot.lane.b32.xlu0 %v5015_v61, %s5776_s11  ;;  %5021 = vrot.lane.b32.xlu1 %v5020_v15, %s5776_s11 }
 0x9dd   : > { %5026 = vrot.lane.b32.xlu0 %v7252_v51, %s5775_s10  ;;  %5031 = vrot.lane.b32.xlu1 %v7256_v13, %s5775_s10 }
 0x9e1   : > { %5036 = vrot.lane.b32.xlu0 %v7300_v17, %s5775_s10  ;;  %5046 = vrot.lane.b32.xlu1 %v7304_v2, %s5775_s10 }
 0x9e5   : > { %5041 = vrot.lane.b32.xlu0 %v7176_v63, %s5775_s10  ;;  %5051 = vrot.lane.b32.xlu1 %v7180_v11, %s5775_s10 }
 0x9e9   : > { %5056 = vrot.lane.b32.xlu0 %v5005_v10, %s5775_s10  ;;  %5061 = vrot.lane.b32.xlu1 %v5010_v36, %s5775_s10 }
 0x9ed   : > { %5066 = vrot.lane.b32.xlu0 %v5015_v61, %s5775_s10  ;;  %5071 = vrot.lane.b32.xlu1 %v5020_v15, %s5775_s10 }
 0x9f1   : > { %5076 = vrot.lane.b32.xlu0 %v7252_v51, %s5774_s9  ;;  %5081 = vrot.lane.b32.xlu1 %v7256_v13, %s5774_s9 }
 0x9f5   : > { %5086 = vrot.lane.b32.xlu0 %v7300_v17, %s5774_s9  ;;  %5096 = vrot.lane.b32.xlu1 %v7304_v2, %s5774_s9 }
 0x9f9   : > { %5091 = vrot.lane.b32.xlu0 %v7176_v63, %s5774_s9  ;;  %5101 = vrot.lane.b32.xlu1 %v7180_v11, %s5774_s9 }
 0x9fd   : > { %5106 = vrot.lane.b32.xlu0 %v5005_v10, %s5774_s9  ;;  %5111 = vrot.lane.b32.xlu1 %v5010_v36, %s5774_s9 }
 0xa01   : > { %5116 = vrot.lane.b32.xlu0 %v5015_v61, %s5774_s9  ;;  %5121 = vrot.lane.b32.xlu1 %v5020_v15, %s5774_s9 }
 0xa05   : > { %5126 = vrot.lane.b32.xlu0 %v7252_v51, %s5773_s8  ;;  %5131 = vrot.lane.b32.xlu1 %v7256_v13, %s5773_s8 }
 0xa09   : > { %5136 = vrot.lane.b32.xlu0 %v7300_v17, %s5773_s8  ;;  %5146 = vrot.lane.b32.xlu1 %v7304_v2, %s5773_s8 }
 0xa0d   : > { %5141 = vrot.lane.b32.xlu0 %v7176_v63, %s5773_s8  ;;  %5151 = vrot.lane.b32.xlu1 %v7180_v11, %s5773_s8 }
 0xa11   : > { %5156 = vrot.lane.b32.xlu0 %v5005_v10, %s5773_s8  ;;  %5161 = vrot.lane.b32.xlu1 %v5010_v36, %s5773_s8 }
 0xa15   : > { %5166 = vrot.lane.b32.xlu0 %v5015_v61, %s5773_s8  ;;  %5171 = vrot.lane.b32.xlu1 %v5020_v15, %s5773_s8 }
 0xa34   : > { %v4977_v51 = vpop.permute.xlu0 %4976  ;;  %v4982_v13 = vpop.permute.xlu1 %4981 }
 0xa35   : > { %v4979_v17 = vunpack.i.h.bf16 %v4977_v51  ;;  %v4978_v41 = vunpack.i.l.bf16 %v4977_v51  ;;  %v4984_v52 = vunpack.i.h.bf16 %v4982_v13  ;;  %v4983_v2 = vunpack.i.l.bf16 %v4982_v13 }
 0xa37   : > { %v2018_v63 = vsel %vm9019_vm1, %v4979_v17, %v4984_v52  ;;  %v2017_v11 = vsel %vm9020_vm2, %v4978_v41, %v4983_v2  ;;  %v2019_v10 = vsel %vm9021_vm14, %v4983_v2, %v4978_v41  ;;  %v2020_v36 = vsel %vm9022_vm4, %v4984_v52, %v4979_v17  ;;  %vm9026_vm2 = vmmov %vm9019_vm1 }
 0xa38   : > { %v3866_v55 = vpack.c.bf16 %v2020_v36, %v2019_v10  ;;  %v3868_v50 = vpack.c.bf16 %v2018_v63, %v2017_v11  ;;  %vm9027_vm14 = vmmov %vm9019_vm1 }
 0xa39   : > { %vm9028_vm4 = vmmov %vm9019_vm1 }
 0xa3a   : > { %3867 = vmatprep.subr.bf16.mxu1 %v3866_v55 }
 0xa3b   : > { %3869 = vmatpush1.bf16.msra.mxu1 %v3868_v50 }
 0xa3c   : > { %v4987_v40 = vpop.permute.xlu0 %4986  ;;  %v4997_v16 = vpop.permute.xlu1 %4996 }
 0xa3d   : > { %v4989_v0 = vunpack.i.h.bf16 %v4987_v40  ;;  %v4988_v7 = vunpack.i.l.bf16 %v4987_v40  ;;  %v4999_v31 = vunpack.i.h.bf16 %v4997_v16  ;;  %v4998_v46 = vunpack.i.l.bf16 %v4997_v16 }
 0xa3f   : > { %v2030_v54 = vsel %vm9023_vm15, %v4989_v0, %v4999_v31  ;;  %v2029_v61 = vsel %vm9024_vm3, %v4988_v7, %v4998_v46  ;;  %v2031_v15 = vsel %vm9025_vm5, %v4998_v46, %v4988_v7  ;;  %v2032_v57 = vsel %vm9019_vm1, %v4999_v31, %v4989_v0  ;;  %vm9029_vm15 = vmmov %vm9019_vm1 }
 0xa40   : > { %v4992_v45 = vpop.permute.xlu0 %4991  ;;  %v3870_v34 = vpack.c.bf16 %v2032_v57, %v2031_v15  ;;  %v3872_v51 = vpack.c.bf16 %v2030_v54, %v2029_v61  ;;  %vm9030_vm3 = vmmov %vm9019_vm1 }
 0xa41   : > { %v4994_v13 = vunpack.i.h.bf16 %v4992_v45  ;;  %v4993_v17 = vunpack.i.l.bf16 %v4992_v45  ;;  %v5002_v41 = vpop.permute.xlu1 %5001  ;;  %vm9031_vm5 = vmmov %vm9019_vm1 }
 0xa42   : > { %v5004_v52 = vunpack.i.h.bf16 %v5002_v41  ;;  %v5003_v2 = vunpack.i.l.bf16 %v5002_v41  ;;  %3871 = vmatprep.subr.bf16.mxu1 %v3870_v34 }
 0xa43   : > { %3873 = vmatpush1.bf16.msra.mxu1 %v3872_v51 }
 0xa44   : > { %v2042_v63 = vsel %vm9026_vm2, %v4994_v13, %v5004_v52  ;;  %v2041_v11 = vsel %vm9027_vm14, %v4993_v17, %v5003_v2  ;;  %v5007_v10 = vpop.permute.xlu0 %5006  ;;  %v2043_v36 = vsel %vm9028_vm4, %v5003_v2, %v4993_v17  ;;  %v2044_v55 = vsel %vm9029_vm15, %v5004_v52, %v4994_v13  ;;  %vm9032_vm2 = vmmov %vm9019_vm1 }
 0xa45   : > { %v5009_v50 = vunpack.i.h.bf16 %v5007_v10  ;;  %v5008_v40 = vunpack.i.l.bf16 %v5007_v10  ;;  %v5012_v16 = vpop.permute.xlu1 %5011  ;;  %v3874_v0 = vpack.c.bf16 %v2044_v55, %v2043_v36  ;;  %v3876_v7 = vpack.c.bf16 %v2042_v63, %v2041_v11  ;;  %vm9033_vm14 = vmmov %vm9019_vm1 }
 0xa46   : > { %v5014_v31 = vunpack.i.h.bf16 %v5012_v16  ;;  %v5013_v46 = vunpack.i.l.bf16 %v5012_v16  ;;  %vm9034_vm4 = vmmov %vm9019_vm1 }
 0xa47   : > { %3875 = vmatprep.subr.bf16.mxu1 %v3874_v0  ;;  %vm9035_vm15 = vmmov %vm9019_vm1 }
 0xa48   : > { %v2054_v54 = vsel %vm9030_vm3, %v5009_v50, %v5014_v31  ;;  %v2053_v61 = vsel %vm9031_vm5, %v5008_v40, %v5013_v46  ;;  %3877 = vmatpush1.bf16.msra.mxu1 %v3876_v7  ;;  %v2055_v15 = vsel %vm9019_vm1, %v5013_v46, %v5008_v40  ;;  %v2056_v57 = vsel %vm9032_vm2, %v5014_v31, %v5009_v50  ;;  %vm9036_vm3 = vmmov %vm9019_vm1 }
 0xa49   : > { %v3878_v45 = vpack.c.bf16 %v2056_v57, %v2055_v15  ;;  %v3880_v34 = vpack.c.bf16 %v2054_v54, %v2053_v61  ;;  %vm9037_vm5 = vcmp.lt.s32.totalorder %v5917_v38, 112 }
 0xa4a   : > { %vm9038_vm1 = vmmov %vm9037_vm5 }
 0xa4b   : > { %3879 = vmatprep.subr.bf16.mxu1 %v3878_v45  ;;  %v5017_v51 = vpop.permute.xlu0 %5016  ;;  %v5022_v13 = vpop.permute.xlu1 %5021  ;;  %vm9039_vm2 = vmmov %vm9038_vm1 }
 0xa4c   : > { %3881 = vmatpush1.bf16.msra.mxu1 %v3880_v34  ;;  %v5019_v17 = vunpack.i.h.bf16 %v5017_v51  ;;  %v5018_v41 = vunpack.i.l.bf16 %v5017_v51  ;;  %v5024_v52 = vunpack.i.h.bf16 %v5022_v13  ;;  %v5023_v2 = vunpack.i.l.bf16 %v5022_v13 }
 0xa4e   : > { %v2066_v63 = vsel %vm9033_vm14, %v5019_v17, %v5024_v52  ;;  %v2065_v11 = vsel %vm9034_vm4, %v5018_v41, %v5023_v2  ;;  %v2067_v10 = vsel %vm9035_vm15, %v5023_v2, %v5018_v41  ;;  %v2068_v36 = vsel %vm9036_vm3, %v5024_v52, %v5019_v17  ;;  %vm9040_vm14 = vmmov %vm9038_vm1 }
 0xa4f   : > { %v5027_v55 = vpop.permute.xlu0 %5026  ;;  %v5032_v50 = vpop.permute.xlu1 %5031  ;;  %v3882_v40 = vpack.c.bf16 %v2068_v36, %v2067_v10  ;;  %v3884_v16 = vpack.c.bf16 %v2066_v63, %v2065_v11  ;;  %vm9041_vm4 = vmmov %vm9038_vm1 }
 0xa50   : > { %v5029_v0 = vunpack.i.h.bf16 %v5027_v55  ;;  %v5028_v7 = vunpack.i.l.bf16 %v5027_v55  ;;  %v5034_v31 = vunpack.i.h.bf16 %v5032_v50  ;;  %v5033_v46 = vunpack.i.l.bf16 %v5032_v50  ;;  %vm9042_vm15 = vmmov %vm9038_vm1 }
 0xa51   : > { %3883 = vmatprep.subr.bf16.mxu1 %v3882_v40  ;;  %vm9043_vm3 = vmmov %vm9038_vm1 }
 0xa52   : > { %v2078_v54 = vsel %vm9037_vm5, %v5029_v0, %v5034_v31  ;;  %v2077_v61 = vsel %vm9038_vm1, %v5028_v7, %v5033_v46  ;;  %3885 = vmatpush1.bf16.msra.mxu1 %v3884_v16  ;;  %v2079_v15 = vsel %vm9039_vm2, %v5033_v46, %v5028_v7  ;;  %v2080_v57 = vsel %vm9040_vm14, %v5034_v31, %v5029_v0  ;;  %vm9044_vm5 = vmmov %vm9038_vm1 }
 0xa53   : > { %v5037_v45 = vpop.permute.xlu0 %5036  ;;  %v5047_v34 = vpop.permute.xlu1 %5046  ;;  %v3886_v51 = vpack.c.bf16 %v2080_v57, %v2079_v15  ;;  %v3888_v13 = vpack.c.bf16 %v2078_v54, %v2077_v61  ;;  %vm9045_vm2 = vmmov %vm9038_vm1 }
 0xa54   : > { %v5039_v17 = vunpack.i.h.bf16 %v5037_v45  ;;  %v5038_v41 = vunpack.i.l.bf16 %v5037_v45  ;;  %v5049_v52 = vunpack.i.h.bf16 %v5047_v34  ;;  %v5048_v2 = vunpack.i.l.bf16 %v5047_v34  ;;  %vm9046_vm14 = vmmov %vm9038_vm1 }
 0xa55   : > { %3887 = vmatprep.subr.bf16.mxu1 %v3886_v51 }
 0xa56   : > { %v2090_v63 = vsel %vm9041_vm4, %v5039_v17, %v5049_v52  ;;  %v2089_v11 = vsel %vm9042_vm15, %v5038_v41, %v5048_v2  ;;  %3889 = vmatpush1.bf16.msra.mxu1 %v3888_v13  ;;  %v2091_v10 = vsel %vm9043_vm3, %v5048_v2, %v5038_v41  ;;  %v2092_v36 = vsel %vm9044_vm5, %v5049_v52, %v5039_v17  ;;  %vm9047_vm4 = vmmov %vm9038_vm1 }
 0xa57   : > { %v5042_v55 = vpop.permute.xlu0 %5041  ;;  %v5052_v50 = vpop.permute.xlu1 %5051  ;;  %v3890_v40 = vpack.c.bf16 %v2092_v36, %v2091_v10  ;;  %v3892_v16 = vpack.c.bf16 %v2090_v63, %v2089_v11  ;;  %vm9048_vm15 = vmmov %vm9038_vm1 }
 0xa58   : > { %v5044_v0 = vunpack.i.h.bf16 %v5042_v55  ;;  %v5043_v7 = vunpack.i.l.bf16 %v5042_v55  ;;  %v5054_v31 = vunpack.i.h.bf16 %v5052_v50  ;;  %v5053_v46 = vunpack.i.l.bf16 %v5052_v50  ;;  %vm9049_vm3 = vmmov %vm9038_vm1 }
 0xa59   : > { %3891 = vmatprep.subr.bf16.mxu1 %v3890_v40  ;;  %vm9050_vm5 = vmmov %vm9038_vm1 }
 0xa5a   : > { %v2102_v54 = vsel %vm9038_vm1, %v5044_v0, %v5054_v31  ;;  %v2101_v61 = vsel %vm9045_vm2, %v5043_v7, %v5053_v46  ;;  %3893 = vmatpush1.bf16.msra.mxu1 %v3892_v16  ;;  %v2103_v15 = vsel %vm9046_vm14, %v5053_v46, %v5043_v7  ;;  %v2104_v57 = vsel %vm9047_vm4, %v5054_v31, %v5044_v0  ;;  %vm9051_vm2 = vmmov %vm9038_vm1 }
 0xa5b   : > { %v5057_v45 = vpop.permute.xlu0 %5056  ;;  %v5062_v34 = vpop.permute.xlu1 %5061  ;;  %v3894_v51 = vpack.c.bf16 %v2104_v57, %v2103_v15  ;;  %v3896_v13 = vpack.c.bf16 %v2102_v54, %v2101_v61  ;;  %vm9052_vm14 = vmmov %vm9038_vm1 }
 0xa5c   : > { %v5059_v17 = vunpack.i.h.bf16 %v5057_v45  ;;  %v5058_v41 = vunpack.i.l.bf16 %v5057_v45  ;;  %v5064_v52 = vunpack.i.h.bf16 %v5062_v34  ;;  %v5063_v2 = vunpack.i.l.bf16 %v5062_v34  ;;  %vm9053_vm4 = vmmov %vm9038_vm1 }
 0xa5d   : > { %3895 = vmatprep.subr.bf16.mxu1 %v3894_v51 }
 0xa5e   : > { %v2114_v63 = vsel %vm9048_vm15, %v5059_v17, %v5064_v52  ;;  %v2113_v11 = vsel %vm9049_vm3, %v5058_v41, %v5063_v2  ;;  %3897 = vmatpush1.bf16.msra.mxu1 %v3896_v13  ;;  %v2115_v10 = vsel %vm9050_vm5, %v5063_v2, %v5058_v41  ;;  %v2116_v36 = vsel %vm9038_vm1, %v5064_v52, %v5059_v17  ;;  %vm9054_vm15 = vmmov %vm9038_vm1 }
 0xa5f   : > { %v5067_v55 = vpop.permute.xlu0 %5066  ;;  %v5072_v50 = vpop.permute.xlu1 %5071  ;;  %v3898_v40 = vpack.c.bf16 %v2116_v36, %v2115_v10  ;;  %v3900_v16 = vpack.c.bf16 %v2114_v63, %v2113_v11  ;;  %vm9055_vm3 = vcmp.lt.s32.totalorder %v5917_v38, 16 }
 0xa60   : > { %v5069_v0 = vunpack.i.h.bf16 %v5067_v55  ;;  %v5068_v7 = vunpack.i.l.bf16 %v5067_v55  ;;  %v5074_v31 = vunpack.i.h.bf16 %v5072_v50  ;;  %v5073_v46 = vunpack.i.l.bf16 %v5072_v50  ;;  %vm9056_vm5 = vmmov %vm9055_vm3  ;;  %v3596_v50 = vld [vmem:[%s8782_s3 + $0x40] sm:$0xff] }
 0xa61   : > { %3899 = vmatprep.subr.bf16.mxu1 %v3898_v40  ;;  %vm9057_vm1 = vmmov %vm9055_vm3 }
 0xa62   : > { %v2126_v54 = vsel %vm9051_vm2, %v5069_v0, %v5074_v31  ;;  %v2125_v61 = vsel %vm9052_vm14, %v5068_v7, %v5073_v46  ;;  %3901 = vmatpush1.bf16.msra.mxu1 %v3900_v16  ;;  %v2127_v15 = vsel %vm9053_vm4, %v5073_v46, %v5068_v7  ;;  %v2128_v57 = vsel %vm9054_vm15, %v5074_v31, %v5069_v0  ;;  %vm9058_vm2 = vmmov %vm9057_vm1  ;;  %v3601_v31 = vld [vmem:[%s8782_s3 + $0x68] sm:$0x1] }
 0xa63   : > { %v5077_v45 = vpop.permute.xlu0 %5076  ;;  %v5082_v34 = vpop.permute.xlu1 %5081  ;;  %v3902_v51 = vpack.c.bf16 %v2128_v57, %v2127_v15  ;;  %v3904_v13 = vpack.c.bf16 %v2126_v54, %v2125_v61  ;;  %vm9059_vm14 = vmmov %vm9057_vm1 }
 0xa64   : > { %v5079_v44 = vunpack.i.h.bf16 %v5077_v45  ;;  %v5078_v30 = vunpack.i.l.bf16 %v5077_v45  ;;  %v5084_v47 = vunpack.i.h.bf16 %v5082_v34  ;;  %v5083_v53 = vunpack.i.l.bf16 %v5082_v34  ;;  %vm9060_vm4 = vmmov %vm9057_vm1 }
 0xa65   : > { %3903 = vmatprep.subr.bf16.mxu1 %v3902_v51  ;;  %vm9061_vm15 = vmmov %vm9057_vm1 }
 0xa66   : > { %3905 = vmatpush1.bf16.msra.mxu1 %v3904_v13  ;;  %v2137_v59 = vsel %vm9055_vm3, %v5078_v30, %v5083_v53  ;;  %v2138_v29 = vsel %vm9056_vm5, %v5079_v44, %v5084_v47  ;;  %v2140_v9 = vsel %vm9057_vm1, %v5084_v47, %v5079_v44  ;;  %v2139_v62 = vsel %vm9058_vm2, %v5083_v53, %v5078_v30  ;;  %vm9062_vm3 = vmmov %vm9057_vm1  ;;  %v3600_v13 = vld [vmem:[%s8782_s3 + $0x60] sm:$0x1] }
 0xa67   : > { %v5087_v17 = vpop.permute.xlu0 %5086  ;;  %v5097_v41 = vpop.permute.xlu1 %5096  ;;  %3907 = vmatprep.subr.bf16.mxu1 %v3906_v56  ;;  %v3928_v48 = vpack.c.bf16 %v2140_v9, %v2139_v62  ;;  %vm9063_vm5 = vmmov %vm9057_vm1 }
 0xa68   : > { %v5088_v18 = vunpack.i.l.bf16 %v5087_v17  ;;  %v5099_v5 = vunpack.i.h.bf16 %v5097_v41  ;;  %v5098_v25 = vunpack.i.l.bf16 %v5097_v41  ;;  %vm9064_vm2 = vmmov %vm9057_vm1 }
 0xa6a   : > { %3909 = vmatpush1.bf16.msra.mxu1 %v3908_v33  ;;  %v2149_v39 = vsel %vm9059_vm14, %v5088_v18, %v5098_v25  ;;  %v2151_v60 = vsel %vm9062_vm3, %v5098_v25, %v5088_v18  ;;  %vm9065_vm14 = vmmov %vm9057_vm1 }
 0xa6b   : > { %v5092_v52 = vpop.permute.xlu0 %5091  ;;  %v5102_v2 = vpop.permute.xlu1 %5101  ;;  %3911 = vmatprep.subr.bf16.mxu1 %v3910_v4  ;;  %vm9068_vm3 = vmmov %vm9057_vm1 }
 0xa6c   : > { %v5094_v49 = vunpack.i.h.bf16 %v5092_v52  ;;  %v5093_v4 = vunpack.i.l.bf16 %v5092_v52  ;;  %v5103_v26 = vunpack.i.l.bf16 %v5102_v2  ;;  %v3599_v52 = vld [vmem:[%s8782_s3 + $0x58] sm:$0xff] }
 0xa6e   : > { %3913 = vmatpush1.bf16.msra.mxu1 %v3912_v3  ;;  %v5104_v3 = vunpack.i.h.bf16 %v5102_v2  ;;  %v2161_v6 = vsel %vm9063_vm5, %v5093_v4, %v5103_v26  ;;  %v2163_v16 = vsel %vm9065_vm14, %v5103_v26, %v5093_v4  ;;  %vm9069_vm5 = vmmov %vm9057_vm1  ;;  %vm9071_vm14 = vcmask 130048  }
 0xa6f   : > { %v7552_v63 = vpop.permute.xlu0 %5106  ;;  %v7554_v11 = vpop.permute.xlu1 %5111  ;;  %3915 = vmatprep.subr.bf16.mxu1 %v3914_v19  ;;  %v5089_v19 = vunpack.i.h.bf16 %v5087_v17 }
 0xa70   : > { %v5108_v10 = vunpack.i.l.bf16 %v7552_v63  ;;  %v5114_v36 = vunpack.i.h.bf16 %v7554_v11  ;;  %v5113_v55 = vunpack.i.l.bf16 %v7554_v11  ;;  %v2164_v40 = vsel %vm9064_vm2, %v5104_v3, %v5094_v49  ;;  %vm9070_vm2 = vmmov %vm9057_vm1 }
 0xa71   : > { %v2150_v37 = vsel %vm9060_vm4, %v5089_v19, %v5099_v5  ;;  %vm9066_vm4 = vmmov %vm9057_vm1  ;;  %v3936_v41 = vpack.c.bf16 %v2164_v40, %v2163_v16 }
 0xa72   : > { %3917 = vmatpush1.bf16.msra.mxu1 %v3916_v28  ;;  %v3926_v28 = vpack.c.bf16 %v2138_v29, %v2137_v59  ;;  %v3930_v27 = vpack.c.bf16 %v2150_v37, %v2149_v39  ;;  %v2173_v34 = vsel %vm9066_vm4, %v5108_v10, %v5113_v55  ;;  %v2175_v2 = vsel %vm9069_vm5, %v5113_v55, %v5108_v10  ;;  %vm9072_vm4 = vmmov %vm9057_vm1 }
 0xa73   : > { %3919 = vmatprep.subr.bf16.mxu1 %v3918_v1  ;;  %v7565_v56 = vpop.permute.xlu0 %5116  ;;  %v7567_v33 = vpop.permute.xlu1 %5121 }
 0xa74   : > { %v5119_v46 = vunpack.i.h.bf16 %v7565_v56  ;;  %v5118_v54 = vunpack.i.l.bf16 %v7565_v56  ;;  %v5124_v61 = vunpack.i.h.bf16 %v7567_v33  ;;  %v5123_v15 = vunpack.i.l.bf16 %v7567_v33 }
 0xa76   : > { %3921 = vmatpush1.bf16.msra.mxu1 %v3920_v8  ;;  %v2152_v8 = vsel %vm9061_vm15, %v5099_v5, %v5089_v19  ;;  %vm9067_vm15 = vmmov %vm9057_vm1  ;;  %v2185_v11 = vsel %vm9057_vm1, %v5118_v54, %v5123_v15  ;;  %v2186_v44 = vsel %vm9070_vm2, %v5119_v46, %v5124_v61  ;;  %v2188_v29 = vsel %vm9072_vm4, %v5124_v61, %v5119_v46 }
 0xa77   : > { %3923 = vmatprep.subr.bf16.mxu1 %v3922_v58  ;;  %v7590_v20 = vpop.permute.xlu0 %5126  ;;  %v7592_v1 = vpop.permute.xlu1 %5131  ;;  %v2162_v58 = vsel %vm9057_vm1, %v5094_v49, %v5104_v3  ;;  %v3932_v0 = vpack.c.bf16 %v2152_v8, %v2151_v60  ;;  %v3942_v5 = vpack.c.bf16 %v2186_v44, %v2185_v11 }
 0xa78   : > { %v3934_v7 = vpack.c.bf16 %v2162_v58, %v2161_v6  ;;  %v5129_v30 = vunpack.i.h.bf16 %v7590_v20  ;;  %v5128_v47 = vunpack.i.l.bf16 %v7590_v20  ;;  %v5134_v53 = vunpack.i.h.bf16 %v7592_v1 }
 0xa79   : > { %v5133_v56 = vunpack.i.l.bf16 %v7592_v1 }
 0xa7a   : > { %3925 = vmatpush1.bf16.msra.mxu1 %v3924_v35  ;;  %v5109_v35 = vunpack.i.h.bf16 %v7552_v63 }
 0xa7b   : > { %3927 = vmatprep.subr.bf16.mxu1 %v3926_v28  ;;  %v5137_v57 = vpop.permute.xlu0 %5136  ;;  %v5147_v45 = vpop.permute.xlu1 %5146 }
 0xa7c   : > { %v2174_v51 = vsel %vm9067_vm15, %v5109_v35, %v5114_v36  ;;  %v2176_v17 = vsel %vm9068_vm3, %v5114_v36, %v5109_v35  ;;  %vm9073_vm15 = vmmov %vm9057_vm1  ;;  %v5139_v25 = vunpack.i.h.bf16 %v5137_v57  ;;  %v5138_v9 = vunpack.i.l.bf16 %v5137_v57 }
 0xa7d   : > { %v3938_v63 = vpack.c.bf16 %v2174_v51, %v2173_v34  ;;  %v2187_v19 = vsel %vm9073_vm15, %v5123_v15, %v5118_v54  ;;  %v3940_v18 = vpack.c.bf16 %v2176_v17, %v2175_v2  ;;  %v5149_v62 = vunpack.i.h.bf16 %v5147_v45 }
 0xa7e   : > { %3929 = vmatpush1.bf16.msra.mxu1 %v3928_v48  ;;  %v5148_v28 = vunpack.i.l.bf16 %v5147_v45  ;;  %vm9074_vm3 = vcmp.lt.s32.totalorder %v5917_v38, 32  ;;  %v3944_v26 = vpack.c.bf16 %v2188_v29, %v2187_v19  ;;  %v3598_v19 = vld [vmem:[%s8782_s3 + $0x50] sm:$0xff] }
 0xa7f   : > { %3931 = vmatprep.subr.bf16.mxu1 %v3930_v27  ;;  %v5142_v33 = vpop.permute.xlu0 %5141  ;;  %v5152_v59 = vpop.permute.xlu1 %5151  ;;  %v2197_v49 = vsel %vm9074_vm3, %v5128_v47, %v5133_v56  ;;  %vm9075_vm5 = vmmov %vm9074_vm3 }
 0xa80   : > { %v2198_v4 = vsel %vm9075_vm5, %v5129_v30, %v5134_v53  ;;  %vm9076_vm1 = vmmov %vm9074_vm3  ;;  %v5144_v60 = vunpack.i.h.bf16 %v5142_v33  ;;  %v5143_v27 = vunpack.i.l.bf16 %v5142_v33  ;;  %v5154_v6 = vunpack.i.h.bf16 %v5152_v59 }
 0xa81   : > { %2320 = vmatmul.mubr.f32.vlgmr.msra.gmra.mrb[20].mxu1 %v3596_v50  ;;  %v2200_v3 = vsel %vm9076_vm1, %v5134_v53, %v5129_v30  ;;  %vm9077_vm2 = vmmov %vm9076_vm1  ;;  %v3946_v1 = vpack.c.bf16 %v2198_v4, %v2197_v49  ;;  %v5153_v58 = vunpack.i.l.bf16 %v5152_v59 }
 0xa82   : > { %3933 = vmatpush1.bf16.msra.mxu1 %v3932_v0  ;;  %2325 = vmatprep.mubr.f32.mxu1 %v3601_v31  ;;  %v2199_v39 = vsel %vm9077_vm2, %v5133_v56, %v5128_v47  ;;  %vm9079_vm4 = vmmov %vm9076_vm1  ;;  %v2222_v31 = vsel %vm9076_vm1, %v5144_v60, %v5154_v6 }
 0xa83   : > { %3935 = vmatprep.subr.bf16.mxu1 %v3934_v7  ;;  %v5157_v37 = vpop.permute.xlu0 %5156  ;;  %v5162_v20 = vpop.permute.xlu1 %5161  ;;  %v2210_v48 = vsel %vm9079_vm4, %v5139_v25, %v5149_v62  ;;  %vm9080_vm15 = vmmov %vm9076_vm1  ;;  %v3948_v36 = vpack.c.bf16 %v2200_v3, %v2199_v39 }
 0xa84   : > { %v2212_v35 = vsel %vm9080_vm15, %v5149_v62, %v5139_v25  ;;  %vm9081_vm3 = vmmov %vm9076_vm1  ;;  %v5159_v50 = vunpack.i.h.bf16 %v5157_v37  ;;  %v5158_v40 = vunpack.i.l.bf16 %v5157_v37  ;;  %v5164_v16 = vunpack.i.h.bf16 %v5162_v20 }
 0xa85   : > { %2326 = vmatmul.mubr.f32.gmra.mrb[18].mxu1 %v3600_v13  ;;  %v2211_v10 = vsel %vm9081_vm3, %v5148_v28, %v5138_v9  ;;  %v5163_v0 = vunpack.i.l.bf16 %v5162_v20  ;;  %vm9082_vm5 = vmmov %vm9076_vm1 }
 0xa86   : > { %3937 = vmatpush1.bf16.msra.mxu1 %v3936_v41  ;;  %3604 = vmatprep.mubr.msk.f32.mxu1 %vm9071_vm14, %v3599_v52  ;;  %vm9078_vm14 = vmmov %vm9076_vm1  ;;  %v2221_v7 = vsel %vm9082_vm5, %v5143_v27, %v5153_v58  ;;  %v3952_v15 = vpack.c.bf16 %v2212_v35, %v2211_v10 }
 0xa87   : > { %3939 = vmatprep.subr.bf16.mxu1 %v3938_v63  ;;  %v2209_v8 = vsel %vm9078_vm14, %v5138_v9, %v5148_v28  ;;  %v5167_v46 = vpop.permute.xlu0 %5166  ;;  %v5172_v54 = vpop.permute.xlu1 %5171  ;;  %vm9083_vm2 = vmmov %vm9076_vm1  ;;  %v3954_v45 = vpack.c.bf16 %v2222_v31, %v2221_v7 }
 0xa88   : > { %v3950_v55 = vpack.c.bf16 %v2210_v48, %v2209_v8  ;;  %v2224_v61 = vsel %vm9083_vm2, %v5154_v6, %v5144_v60  ;;  %vm9084_vm14 = vmmov %vm9076_vm1  ;;  %v5169_v13 = vunpack.i.h.bf16 %v5167_v46  ;;  %v5168_v17 = vunpack.i.l.bf16 %v5167_v46 }
 0xa89   : > { %v2223_v57 = vsel %vm9084_vm14, %v5153_v58, %v5143_v27  ;;  %vm9085_vm4 = vmmov %vm9076_vm1  ;;  %v5174_v41 = vunpack.i.h.bf16 %v5172_v54  ;;  %v5173_v52 = vunpack.i.l.bf16 %v5172_v54 }
 0xa8a   : > { %3941 = vmatpush1.bf16.msra.mxu1 %v3940_v18  ;;  %v2233_v34 = vsel %vm9085_vm4, %v5158_v40, %v5163_v0  ;;  %vm9086_vm15 = vmmov %vm9076_vm1  ;;  %v3956_v2 = vpack.c.bf16 %v2224_v61, %v2223_v57  ;;  %v789_v18 = vmul.f32 2.0, %v6161_v12 }
 0xa8b   : > { %3943 = vmatprep.subr.bf16.mxu1 %v3942_v5  ;;  %v2234_v51 = vsel %vm9086_vm15, %v5159_v50, %v5164_v16  ;;  %vm9087_vm3 = vmmov %vm9076_vm1  ;;  %v2245_v30 = vsel %vm9076_vm1, %v5168_v17, %v5173_v52  ;;  %v790_v5 = vmul.f32 2.0, %v6165_v14  ;;  %vm9092_vm15 = vcmp.lt.s32.totalorder %v5917_v38, 14 }
 0xa8c   : > { %v2236_v63 = vsel %vm9087_vm3, %v5164_v16, %v5159_v50  ;;  %vm9088_vm5 = vmmov %vm9076_vm1  ;;  %v3958_v44 = vpack.c.bf16 %v2234_v51, %v2233_v34  ;;  %v791_v25 = vmul.f32 %v789_v18, %v6170_v21 }
 0xa8d   : > { %v2235_v11 = vsel %vm9088_vm5, %v5163_v0, %v5158_v40  ;;  %vm9089_vm2 = vmmov %vm9076_vm1  ;;  %v792_v62 = vmul.f32 %v790_v5, %v6176_v22 }
 0xa8e   : > { %3945 = vmatpush1.bf16.msra.mxu1 %v3944_v26  ;;  %v2246_v47 = vsel %vm9089_vm2, %v5169_v13, %v5174_v41  ;;  %v3960_v53 = vpack.c.bf16 %v2236_v63, %v2235_v11  ;;  %vm9090_vm14 = vmmov %vm9076_vm1  ;;  %vm9096_vm2 = vcmp.lt.s32.totalorder %v5917_v38, 126 }
 0xa8f   : > { %3947 = vmatprep.subr.bf16.mxu1 %v3946_v1  ;;  %v2248_v56 = vsel %vm9090_vm14, %v5174_v41, %v5169_v13  ;;  %vm9091_vm4 = vmmov %vm9076_vm1  ;;  %v3962_v59 = vpack.c.bf16 %v2246_v47, %v2245_v30 }
 0xa90   : > { %v2247_v33 = vsel %vm9091_vm4, %v5173_v52, %v5168_v17  ;;  %vm9093_vm3 = vmmov %vm9092_vm15 }
 0xa91   : > { %v3964_v29 = vpack.c.bf16 %v2248_v56, %v2247_v33  ;;  %vm9094_vm5 = vmmov %vm9093_vm3 }
 0xa92   : > { %3949 = vmatpush1.bf16.msra.mxu1 %v3948_v36  ;;  %vm9095_vm1 = vmmov %vm9093_vm3 }
 0xa93   : > { %3951 = vmatprep.subr.bf16.mxu1 %v3950_v55  ;;  %vm9097_vm14 = vmmov %vm9096_vm2 }
 0xa94   : > { %vm9098_vm4 = vmmov %vm9096_vm2 }
 0xa96   : > { %3953 = vmatpush1.bf16.msra.mxu1 %v3952_v15 }
 0xa97   : > { %3955 = vmatprep.subr.bf16.mxu1 %v3954_v45 }
 0xa9a   : > { %3957 = vmatpush1.bf16.msra.mxu1 %v3956_v2 }
 0xa9b   : > { %3959 = vmatprep.subr.bf16.mxu1 %v3958_v44 }
 0xa9e   : > { %3961 = vmatpush1.bf16.msra.mxu1 %v3960_v53 }
 0xa9f   : > { %3963 = vmatprep.subr.bf16.mxu1 %v3962_v59 }
 0xaa2   : > { %3965 = vmatpush1.bf16.msra.mxu1 %v3964_v29 }
 0xaa5   : > { %2397 = vmatmul.mubr.f32.vlgmr.msra.gmra.mrb[20].mxu1 %v3598_v19 }
 0xb78   : > { %v2398_v9 = vpop.f32.mrb[20].mxu1 }
 0xb79   : > { %v7694_v28 = vmul.f32 %v2398_v9, %v791_v25  ;;  %v7697_v49 = vmul.f32 %v2398_v9, %v6170_v21  ;;  %v2400_v4 = vpop.f32.mrb[21].mxu1 }
 0xb7a   : > { %v7699_v3 = vmul.f32 %v2400_v4, %v792_v62  ;;  %v7702_v26 = vmul.f32 %v2400_v4, %v6176_v22 }
 0xb7b   : > { %v7706_v12 = vpack.i.bf16 %v7697_v49, %v7694_v28  ;;  %v4016_v22 = vpack.c.bf16 %v7697_v49, %v7694_v28 }
 0xb7c   : > { %v7710_v14 = vpack.i.bf16 %v7702_v26, %v7699_v3  ;;  %v4014_v21 = vpack.c.bf16 %v7702_v26, %v7699_v3 }
 0xb7d   : > { %5176 = vrot.lane.b32.xlu0 %v7706_v12, %s5765_s19 }
 0xb7e   : > { %5216 = vrot.lane.b32.xlu1 %v7710_v14, %s5765_s19 }
 0xb81   : > { %5181 = vrot.lane.b32.xlu0 %v7706_v12, %s5772_s7 }
 0xb82   : > { %5221 = vrot.lane.b32.xlu1 %v7710_v14, %s5772_s7 }
 0xb85   : > { %5186 = vrot.lane.b32.xlu0 %v7706_v12, %s5771_s30 }
 0xb86   : > { %5226 = vrot.lane.b32.xlu1 %v7710_v14, %s5771_s30 }
 0xb89   : > { %5191 = vrot.lane.b32.xlu0 %v7706_v12, %s5770_s29 }
 0xb8a   : > { %5231 = vrot.lane.b32.xlu1 %v7710_v14, %s5770_s29 }
 0xb8d   : > { %5196 = vrot.lane.b32.xlu0 %v7706_v12, %s5766_s20 }
 0xb8e   : > { %5236 = vrot.lane.b32.xlu1 %v7710_v14, %s5766_s20 }
 0xb91   : > { %5201 = vrot.lane.b32.xlu0 %v7706_v12, %s5768_s26 }
 0xb92   : > { %5241 = vrot.lane.b32.xlu1 %v7710_v14, %s5768_s26 }
 0xb95   : > { %5206 = vrot.lane.b32.xlu0 %v7706_v12, %s5767_s21 }
 0xb96   : > { %5246 = vrot.lane.b32.xlu1 %v7710_v14, %s5767_s21 }
 0xb99   : > { %5211 = vrot.lane.b32.xlu0 %v7706_v12, %s5769_s27 }
 0xb9a   : > { %5251 = vrot.lane.b32.xlu1 %v7710_v14, %s5769_s27 }
 0xbef   : > { %v5177_v39 = vpop.permute.xlu0 %5176 }
 0xbf0   : > { %v5217_v37 = vpop.permute.xlu1 %5216  ;;  %v5179_v20 = vunpack.i.h.bf16 %v5177_v39  ;;  %v5178_v1 = vunpack.i.l.bf16 %v5177_v39 }
 0xbf1   : > { %v5219_v8 = vunpack.i.h.bf16 %v5217_v37  ;;  %v5218_v48 = vunpack.i.l.bf16 %v5217_v37 }
 0xbf3   : > { %v5182_v60 = vpop.permute.xlu0 %5181  ;;  %v2520_v36 = vsel %vm9092_vm15, %v5179_v20, %v5219_v8  ;;  %v2522_v55 = vsel %vm9093_vm3, %v5219_v8, %v5179_v20  ;;  %v2519_v50 = vsel %vm9094_vm5, %v5178_v1, %v5218_v48  ;;  %v2521_v40 = vsel %vm9095_vm1, %v5218_v48, %v5178_v1  ;;  %vm9099_vm15 = vmmov %vm9096_vm2 }
 0xbf4   : > { %v5184_v27 = vunpack.i.h.bf16 %v5182_v60  ;;  %v5183_v6 = vunpack.i.l.bf16 %v5182_v60  ;;  %v5222_v58 = vpop.permute.xlu1 %5221  ;;  %vm9100_vm3 = vcmp.ge.s32.totalorder %v5923_v42, 14  ;;  %vm9101_vm5 = vcmp.ge.s32.totalorder %v5925_v43, 14 }
 0xbf5   : > { %v5224_v35 = vunpack.i.h.bf16 %v5222_v58  ;;  %v5223_v10 = vunpack.i.l.bf16 %v5222_v58  ;;  %vm9102_vm1 = vmmov %vm9100_vm3 }
 0xbf7   : > { %v2532_v16 = vsel %vm9096_vm2, %v5184_v27, %v5224_v35  ;;  %v2534_v0 = vsel %vm9097_vm14, %v5224_v35, %v5184_v27  ;;  %v2531_v7 = vsel %vm9098_vm4, %v5183_v6, %v5223_v10  ;;  %v2533_v31 = vsel %vm9099_vm15, %v5223_v10, %v5183_v6  ;;  %v5187_v46 = vpop.permute.xlu0 %5186  ;;  %vm9103_vm2 = vmmov %vm9101_vm5 }
 0xbf8   : > { %v7766_v54 = vsel %vm9100_vm3, %v2521_v40, %v2531_v7  ;;  %v7770_v61 = vsel %vm9101_vm5, %v2519_v50, %v2533_v31  ;;  %v7774_v15 = vsel %vm9102_vm1, %v2522_v55, %v2532_v16  ;;  %v7778_v57 = vsel %vm9103_vm2, %v2520_v36, %v2534_v0  ;;  %v5227_v45 = vpop.permute.xlu1 %5226 }
 0xbf9   : > { %v5189_v34 = vunpack.i.h.bf16 %v5187_v46  ;;  %v5229_v51 = vunpack.i.h.bf16 %v5227_v45  ;;  %v5188_v13 = vunpack.i.l.bf16 %v5187_v46  ;;  %v5228_v17 = vunpack.i.l.bf16 %v5227_v45 }
 0xbfa   : > { %v7782_v41 = vpack.i.bf16 %v7774_v15, %v7766_v54  ;;  %v7786_v52 = vpack.i.bf16 %v7778_v57, %v7770_v61  ;;  %vm9104_vm14 = vcmp.lt.s32.totalorder %v5917_v38, 15  ;;  %v4006_v29 = vpack.c.bf16 %v7778_v57, %v7770_v61 }
 0xbfb   : > { %v5192_v2 = vpop.permute.xlu0 %5191  ;;  %v2492_v63 = vsel %vm9104_vm14, %v5189_v34, %v5229_v51  ;;  %vm9105_vm4 = vmmov %vm9104_vm14  ;;  %v4008_v19 = vpack.c.bf16 %v7774_v15, %v7766_v54  ;;  %vm9108_vm5 = vcmp.ge.s32.totalorder %v5925_v43, 15  ;;  %vm9110_vm2 = vcmp.lt.s32.totalorder %v5925_v43, 2 }
 0xbfc   : > { %v2494_v11 = vsel %vm9105_vm4, %v5229_v51, %v5189_v34  ;;  %v5194_v44 = vunpack.i.h.bf16 %v5192_v2  ;;  %v5193_v30 = vunpack.i.l.bf16 %v5192_v2  ;;  %5256 = vrot.lane.b32.xlu0 %v7782_v41, %s5776_s11  ;;  %5261 = vrot.lane.b32.xlu1 %v7786_v52, %s5776_s11  ;;  %v5232_v47 = vpop.permute.xlu1 %5231  ;;  %vm9106_vm15 = vmmov %vm9105_vm4 }
 0xbfd   : > { %v5234_v53 = vunpack.i.h.bf16 %v5232_v47  ;;  %v5233_v56 = vunpack.i.l.bf16 %v5232_v47  ;;  %v2491_v33 = vsel %vm9106_vm15, %v5188_v13, %v5228_v17  ;;  %vm9107_vm3 = vmmov %vm9105_vm4  ;;  %vm9112_vm4 = vcmask 130048  }
 0xbfe   : > { %v2493_v59 = vsel %vm9107_vm3, %v5228_v17, %v5188_v13  ;;  %vm9109_vm1 = vmmov %vm9108_vm5  ;;  %vm9113_vm15 = vcmp.lt.s32.totalorder %v5917_v38, 96 }
 0xbff   : > { %v2504_v18 = vsel %vm561_vm10, %v5194_v44, %v5234_v53  ;;  %v2506_v5 = vsel %vm561_vm10, %v5234_v53, %v5194_v44  ;;  %v2503_v25 = vsel %vm561_vm10, %v5193_v30, %v5233_v56  ;;  %v2505_v9 = vsel %vm561_vm10, %v5233_v56, %v5193_v30  ;;  %v5197_v62 = vpop.permute.xlu0 %5196  ;;  %vm9111_vm14 = vmmov %vm9110_vm2 }
 0xc00   : > { %v7814_v4 = vsel %vm321_vm0, %v2493_v59, %v2503_v25  ;;  %v7818_v39 = vsel %vm9108_vm5, %v2491_v33, %v2505_v9  ;;  %v7822_v37 = vsel %vm321_vm0, %v2494_v11, %v2504_v18  ;;  %v7826_v20 = vsel %vm9109_vm1, %v2492_v63, %v2506_v5  ;;  %v5237_v1 = vpop.permute.xlu1 %5236  ;;  %vm9114_vm3 = vmmov %vm9113_vm15 }
 0xc01   : > { %v5199_v8 = vunpack.i.h.bf16 %v5197_v62  ;;  %v5239_v48 = vunpack.i.h.bf16 %v5237_v1  ;;  %v5198_v60 = vunpack.i.l.bf16 %v5197_v62  ;;  %v5238_v27 = vunpack.i.l.bf16 %v5237_v1  ;;  %vm9115_vm5 = vmmov %vm9114_vm3 }
 0xc02   : > { %v7830_v6 = vpack.i.bf16 %v7822_v37, %v7814_v4  ;;  %v7834_v58 = vpack.i.bf16 %v7826_v20, %v7818_v39  ;;  %v4010_v46 = vpack.c.bf16 %v7826_v20, %v7818_v39  ;;  %v4012_v45 = vpack.c.bf16 %v7822_v37, %v7814_v4  ;;  %vm9116_vm1 = vmmov %vm9114_vm3 }
 0xc03   : > { %v5202_v35 = vpop.permute.xlu0 %5201  ;;  %v2464_v50 = vsel %vm538_vm6, %v5199_v8, %v5239_v48  ;;  %v2466_v40 = vsel %vm538_vm6, %v5239_v48, %v5199_v8  ;;  %v2463_v7 = vsel %vm538_vm6, %v5198_v60, %v5238_v27  ;;  %v2465_v31 = vsel %vm538_vm6, %v5238_v27, %v5198_v60 }
 0xc04   : > { %v5204_v10 = vunpack.i.h.bf16 %v5202_v35  ;;  %v5203_v36 = vunpack.i.l.bf16 %v5202_v35  ;;  %5266 = vrot.lane.b32.xlu0 %v7830_v6, %s5776_s11  ;;  %5276 = vrot.lane.b32.xlu1 %v7834_v58, %s5776_s11  ;;  %v5242_v55 = vpop.permute.xlu1 %5241 }
 0xc05   : > { %v5244_v16 = vunpack.i.h.bf16 %v5242_v55  ;;  %v5243_v0 = vunpack.i.l.bf16 %v5242_v55 }
 0xc07   : > { %v2476_v34 = vsel %vm545_vm8, %v5204_v10, %v5244_v16  ;;  %v2478_v51 = vsel %vm545_vm8, %v5244_v16, %v5204_v10  ;;  %v2475_v13 = vsel %vm545_vm8, %v5203_v36, %v5243_v0  ;;  %v2477_v17 = vsel %vm545_vm8, %v5243_v0, %v5203_v36  ;;  %v5207_v2 = vpop.permute.xlu0 %5206 }
 0xc08   : > { %v7862_v63 = vsel %vm333_vm11, %v2463_v7, %v2477_v17  ;;  %v7866_v11 = vsel %vm334_vm12, %v2465_v31, %v2475_v13  ;;  %v7870_v44 = vsel %vm333_vm11, %v2464_v50, %v2478_v51  ;;  %v7874_v30 = vsel %vm334_vm12, %v2466_v40, %v2476_v34  ;;  %5271 = vrot.lane.b32.xlu0 %v7706_v12, %s5776_s11  ;;  %v5247_v47 = vpop.permute.xlu1 %5246 }
 0xc09   : > { %v5209_v53 = vunpack.i.h.bf16 %v5207_v2  ;;  %5281 = vrot.lane.b32.xlu1 %v7710_v14, %s5776_s11  ;;  %v5249_v56 = vunpack.i.h.bf16 %v5247_v47  ;;  %v5208_v33 = vunpack.i.l.bf16 %v5207_v2  ;;  %v5248_v59 = vunpack.i.l.bf16 %v5247_v47 }
 0xc0a   : > { %v5285_v18 = vpack.i.bf16 %v7870_v44, %v7862_v63  ;;  %v5290_v5 = vpack.i.bf16 %v7874_v30, %v7866_v11  ;;  %v4018_v36 = vpack.c.bf16 %v7874_v30, %v7866_v11  ;;  %v4020_v55 = vpack.c.bf16 %v7870_v44, %v7862_v63 }
 0xc0b   : > { %v5212_v25 = vpop.permute.xlu0 %5211  ;;  %v2436_v8 = vsel %vm522_vm7, %v5209_v53, %v5249_v56  ;;  %v2438_v48 = vsel %vm522_vm7, %v5249_v56, %v5209_v53  ;;  %v2435_v35 = vsel %vm522_vm7, %v5208_v33, %v5248_v59  ;;  %v2437_v10 = vsel %vm522_vm7, %v5248_v59, %v5208_v33  ;;  %v3603_v53 = vld [vmem:[%s8782_s3 + $0x78] sm:$0x1]  ;;  %v3602_v56 = vld [vmem:[%s8782_s3 + $0x70] sm:$0x1]  ;;  %v2420_v33 = vld [vmem:[%s8782_s3 + $0x8] sm:$0xff] }
 0xc0c   : > { %v5214_v9 = vunpack.i.h.bf16 %v5212_v25  ;;  %v5213_v62 = vunpack.i.l.bf16 %v5212_v25  ;;  %5286 = vrot.lane.b32.xlu0 %v5285_v18, %s5776_s11  ;;  %v5252_v1 = vpop.permute.xlu1 %5251  ;;  %3605 = vmatprep.mubr.msk.f32.mxu1 %vm9112_vm4, %v3603_v53  ;;  %vm9119_vm4 = vmmov %vm9116_vm1 }
 0xc0d   : > { %5291 = vrot.lane.b32.xlu1 %v5290_v5, %s5776_s11  ;;  %v5254_v60 = vunpack.i.h.bf16 %v5252_v1  ;;  %v5253_v27 = vunpack.i.l.bf16 %v5252_v1  ;;  %2403 = vmatmul.mubr.f32.gmra.mrb[18].mxu1 %v3602_v56 }
 0xc0e   : > { %2849 = vmatprep.mubr.f32.mxu1 %v2420_v33 }
 0xc0f   : > { %v2448_v50 = vsel %vm529_vm9, %v5214_v9, %v5254_v60  ;;  %v2450_v40 = vsel %vm529_vm9, %v5254_v60, %v5214_v9  ;;  %v2447_v16 = vsel %vm529_vm9, %v5213_v62, %v5253_v27  ;;  %v2449_v0 = vsel %vm529_vm9, %v5253_v27, %v5213_v62 }
 0xc10   : > { %v7908_v7 = vsel %vm339_vm13, %v2435_v35, %v2449_v0  ;;  %v7912_v31 = vsel %vm9110_vm2, %v2437_v10, %v2447_v16  ;;  %v7916_v34 = vsel %vm339_vm13, %v2436_v8, %v2450_v40  ;;  %v7920_v51 = vsel %vm9111_vm14, %v2438_v48, %v2448_v50  ;;  %vm9117_vm2 = vmmov %vm9116_vm1 }
 0xc11   : > { %v5295_v13 = vpack.i.bf16 %v7916_v34, %v7908_v7  ;;  %v5300_v17 = vpack.i.bf16 %v7920_v51, %v7912_v31  ;;  %v4022_v2 = vpack.c.bf16 %v7920_v51, %v7912_v31  ;;  %v4024_v47 = vpack.c.bf16 %v7916_v34, %v7908_v7  ;;  %vm9118_vm14 = vmmov %vm9116_vm1 }
 0xc13   : > { %5296 = vrot.lane.b32.xlu0 %v5295_v13, %s5776_s11  ;;  %5301 = vrot.lane.b32.xlu1 %v5300_v17, %s5776_s11 }
 0xc17   : > { %5306 = vrot.lane.b32.xlu0 %v7782_v41, %s5775_s10  ;;  %5311 = vrot.lane.b32.xlu1 %v7786_v52, %s5775_s10 }
 0xc1b   : > { %5316 = vrot.lane.b32.xlu0 %v7830_v6, %s5775_s10  ;;  %5326 = vrot.lane.b32.xlu1 %v7834_v58, %s5775_s10 }
 0xc1f   : > { %5321 = vrot.lane.b32.xlu0 %v7706_v12, %s5775_s10  ;;  %5331 = vrot.lane.b32.xlu1 %v7710_v14, %s5775_s10 }
 0xc23   : > { %5336 = vrot.lane.b32.xlu0 %v5285_v18, %s5775_s10  ;;  %5341 = vrot.lane.b32.xlu1 %v5290_v5, %s5775_s10 }
 0xc27   : > { %5346 = vrot.lane.b32.xlu0 %v5295_v13, %s5775_s10  ;;  %5351 = vrot.lane.b32.xlu1 %v5300_v17, %s5775_s10 }
 0xc2b   : > { %5356 = vrot.lane.b32.xlu0 %v7782_v41, %s5774_s9  ;;  %5361 = vrot.lane.b32.xlu1 %v7786_v52, %s5774_s9 }
 0xc2f   : > { %5366 = vrot.lane.b32.xlu0 %v7830_v6, %s5774_s9  ;;  %5376 = vrot.lane.b32.xlu1 %v7834_v58, %s5774_s9 }
 0xc33   : > { %5371 = vrot.lane.b32.xlu0 %v7706_v12, %s5774_s9  ;;  %5381 = vrot.lane.b32.xlu1 %v7710_v14, %s5774_s9 }
 0xc37   : > { %5386 = vrot.lane.b32.xlu0 %v5285_v18, %s5774_s9  ;;  %5391 = vrot.lane.b32.xlu1 %v5290_v5, %s5774_s9 }
 0xc3b   : > { %5396 = vrot.lane.b32.xlu0 %v5295_v13, %s5774_s9  ;;  %5401 = vrot.lane.b32.xlu1 %v5300_v17, %s5774_s9 }
 0xc3f   : > { %5406 = vrot.lane.b32.xlu0 %v7782_v41, %s5773_s8  ;;  %5411 = vrot.lane.b32.xlu1 %v7786_v52, %s5773_s8  ;;  %v3591_v41 = vld [vmem:[%s8782_s3 + $0xa8] sm:$0x1] }
 0xc40   : > { %1794 = vmatprep.mubr.f32.mxu0 %v3591_v41 }
 0xc43   : > { %5416 = vrot.lane.b32.xlu0 %v7830_v6, %s5773_s8  ;;  %5426 = vrot.lane.b32.xlu1 %v7834_v58, %s5773_s8 }
 0xc47   : > { %5421 = vrot.lane.b32.xlu0 %v7706_v12, %s5773_s8  ;;  %5431 = vrot.lane.b32.xlu1 %v7710_v14, %s5773_s8  ;;  %v3590_v12 = vld [vmem:[%s8782_s3 + $0xa0] sm:$0x1] }
 0xc48   : > { %1795 = vmatmul.mubr.f32.gmra.mrb[8].mxu0 %v3590_v12 }
 0xc4b   : > { %5436 = vrot.lane.b32.xlu0 %v5285_v18, %s5773_s8  ;;  %5441 = vrot.lane.b32.xlu1 %v5290_v5, %s5773_s8 }
 0xc4f   : > { %5446 = vrot.lane.b32.xlu0 %v5295_v13, %s5773_s8  ;;  %5451 = vrot.lane.b32.xlu1 %v5300_v17, %s5773_s8 }
 0xc6e   : > { %v5257_v52 = vpop.permute.xlu0 %5256  ;;  %v5262_v14 = vpop.permute.xlu1 %5261 }
 0xc6f   : > { %v5259_v6 = vunpack.i.h.bf16 %v5257_v52  ;;  %v5258_v58 = vunpack.i.l.bf16 %v5257_v52  ;;  %v5264_v59 = vunpack.i.h.bf16 %v5262_v14  ;;  %v5263_v18 = vunpack.i.l.bf16 %v5262_v14 }
 0xc71   : > { %v2548_v5 = vsel %vm9113_vm15, %v5259_v6, %v5264_v59  ;;  %v2547_v25 = vsel %vm9114_vm3, %v5258_v58, %v5263_v18  ;;  %v2549_v9 = vsel %vm9115_vm5, %v5263_v18, %v5258_v58  ;;  %v2550_v62 = vsel %vm9116_vm1, %v5264_v59, %v5259_v6  ;;  %vm9120_vm15 = vmmov %vm9116_vm1 }
 0xc72   : > { %v3968_v1 = vpack.c.bf16 %v2548_v5, %v2547_v25  ;;  %v3966_v8 = vpack.c.bf16 %v2550_v62, %v2549_v9  ;;  %vm9121_vm3 = vmmov %vm9116_vm1 }
 0xc73   : > { %vm9122_vm5 = vmmov %vm9116_vm1 }
 0xc74   : > { %3967 = vmatprep.subr.bf16.mxu1 %v3966_v8 }
 0xc75   : > { %3969 = vmatpush1.bf16.msra.mxu1 %v3968_v1 }
 0xc76   : > { %v5267_v48 = vpop.permute.xlu0 %5266  ;;  %v5277_v60 = vpop.permute.xlu1 %5276 }
 0xc77   : > { %v5269_v27 = vunpack.i.h.bf16 %v5267_v48  ;;  %v5268_v35 = vunpack.i.l.bf16 %v5267_v48  ;;  %v5279_v10 = vunpack.i.h.bf16 %v5277_v60  ;;  %v5278_v50 = vunpack.i.l.bf16 %v5277_v60 }
 0xc79   : > { %v2560_v40 = vsel %vm9117_vm2, %v5269_v27, %v5279_v10  ;;  %v2559_v16 = vsel %vm9118_vm14, %v5268_v35, %v5278_v50  ;;  %v2561_v0 = vsel %vm9119_vm4, %v5278_v50, %v5268_v35  ;;  %v2562_v13 = vsel %vm9120_vm15, %v5279_v10, %v5269_v27  ;;  %vm9123_vm2 = vmmov %vm9116_vm1 }
 0xc7a   : > { %v3972_v17 = vpack.c.bf16 %v2560_v40, %v2559_v16  ;;  %v5272_v53 = vpop.permute.xlu0 %5271  ;;  %v3970_v56 = vpack.c.bf16 %v2562_v13, %v2561_v0  ;;  %vm9124_vm14 = vmmov %vm9116_vm1 }
 0xc7b   : > { %v5274_v33 = vunpack.i.h.bf16 %v5272_v53  ;;  %v5273_v41 = vunpack.i.l.bf16 %v5272_v53  ;;  %v5282_v12 = vpop.permute.xlu1 %5281  ;;  %vm9125_vm4 = vmmov %vm9116_vm1 }
 0xc7c   : > { %v5284_v52 = vunpack.i.h.bf16 %v5282_v12  ;;  %v5283_v14 = vunpack.i.l.bf16 %v5282_v12  ;;  %3971 = vmatprep.subr.bf16.mxu1 %v3970_v56  ;;  %vm9126_vm15 = vmmov %vm9116_vm1 }
 0xc7d   : > { %3973 = vmatpush1.bf16.msra.mxu1 %v3972_v17 }
 0xc7e   : > { %v2572_v6 = vsel %vm9121_vm3, %v5274_v33, %v5284_v52  ;;  %v2571_v58 = vsel %vm9122_vm5, %v5273_v41, %v5283_v14  ;;  %v5287_v59 = vpop.permute.xlu0 %5286  ;;  %v2573_v18 = vsel %vm9116_vm1, %v5283_v14, %v5273_v41  ;;  %v2574_v5 = vsel %vm9123_vm2, %v5284_v52, %v5274_v33  ;;  %vm9127_vm3 = vmmov %vm9116_vm1 }
 0xc7f   : > { %v3976_v25 = vpack.c.bf16 %v2572_v6, %v2571_v58  ;;  %v5289_v9 = vunpack.i.h.bf16 %v5287_v59  ;;  %v5288_v62 = vunpack.i.l.bf16 %v5287_v59  ;;  %v5292_v1 = vpop.permute.xlu1 %5291  ;;  %v3974_v8 = vpack.c.bf16 %v2574_v5, %v2573_v18  ;;  %vm9128_vm5 = vmmov %vm9116_vm1 }
 0xc80   : > { %v5294_v48 = vunpack.i.h.bf16 %v5292_v1  ;;  %v5293_v60 = vunpack.i.l.bf16 %v5292_v1  ;;  %vm9129_vm2 = vmmov %vm9116_vm1 }
 0xc81   : > { %3975 = vmatprep.subr.bf16.mxu1 %v3974_v8 }
 0xc82   : > { %v2584_v27 = vsel %vm9124_vm14, %v5289_v9, %v5294_v48  ;;  %v2583_v35 = vsel %vm9125_vm4, %v5288_v62, %v5293_v60  ;;  %3977 = vmatpush1.bf16.msra.mxu1 %v3976_v25  ;;  %v2585_v10 = vsel %vm9126_vm15, %v5293_v60, %v5288_v62  ;;  %v2586_v50 = vsel %vm9127_vm3, %v5294_v48, %v5289_v9  ;;  %vm9130_vm14 = vmmov %vm9116_vm1 }
 0xc83   : > { %v3980_v40 = vpack.c.bf16 %v2584_v27, %v2583_v35  ;;  %v3978_v16 = vpack.c.bf16 %v2586_v50, %v2585_v10  ;;  %vm9131_vm4 = vcmp.lt.s32.totalorder %v5917_v38, 112 }
 0xc84   : > { %vm9132_vm15 = vmmov %vm9131_vm4 }
 0xc85   : > { %3979 = vmatprep.subr.bf16.mxu1 %v3978_v16  ;;  %v5297_v0 = vpop.permute.xlu0 %5296  ;;  %v5302_v13 = vpop.permute.xlu1 %5301  ;;  %vm9133_vm3 = vmmov %vm9131_vm4 }
 0xc86   : > { %3981 = vmatpush1.bf16.msra.mxu1 %v3980_v40  ;;  %v5299_v17 = vunpack.i.h.bf16 %v5297_v0  ;;  %v5298_v53 = vunpack.i.l.bf16 %v5297_v0  ;;  %v5304_v56 = vunpack.i.h.bf16 %v5302_v13  ;;  %v5303_v33 = vunpack.i.l.bf16 %v5302_v13 }
 0xc88   : > { %v2596_v41 = vsel %vm9128_vm5, %v5299_v17, %v5304_v56  ;;  %v2595_v12 = vsel %vm9116_vm1, %v5298_v53, %v5303_v33  ;;  %v2597_v52 = vsel %vm9129_vm2, %v5303_v33, %v5298_v53  ;;  %v2598_v14 = vsel %vm9130_vm14, %v5304_v56, %v5299_v17  ;;  %vm9134_vm5 = vmmov %vm9133_vm3 }
 0xc89   : > { %v3984_v6 = vpack.c.bf16 %v2596_v41, %v2595_v12  ;;  %v5307_v58 = vpop.permute.xlu0 %5306  ;;  %v5312_v59 = vpop.permute.xlu1 %5311  ;;  %v3982_v18 = vpack.c.bf16 %v2598_v14, %v2597_v52  ;;  %vm9135_vm1 = vmmov %vm9133_vm3 }
 0xc8a   : > { %v5309_v5 = vunpack.i.h.bf16 %v5307_v58  ;;  %v5308_v25 = vunpack.i.l.bf16 %v5307_v58  ;;  %v5314_v9 = vunpack.i.h.bf16 %v5312_v59  ;;  %v5313_v62 = vunpack.i.l.bf16 %v5312_v59  ;;  %vm9136_vm2 = vmmov %vm9135_vm1 }
 0xc8b   : > { %3983 = vmatprep.subr.bf16.mxu1 %v3982_v18  ;;  %vm9137_vm14 = vmmov %vm9135_vm1 }
 0xc8c   : > { %v2608_v1 = vsel %vm9131_vm4, %v5309_v5, %v5314_v9  ;;  %v2607_v8 = vsel %vm9132_vm15, %v5308_v25, %v5313_v62  ;;  %3985 = vmatpush1.bf16.msra.mxu1 %v3984_v6  ;;  %v2609_v48 = vsel %vm9133_vm3, %v5313_v62, %v5308_v25  ;;  %v2610_v60 = vsel %vm9134_vm5, %v5314_v9, %v5309_v5  ;;  %vm9138_vm4 = vmmov %vm9135_vm1 }
 0xc8d   : > { %v3988_v27 = vpack.c.bf16 %v2608_v1, %v2607_v8  ;;  %v5317_v35 = vpop.permute.xlu0 %5316  ;;  %v5327_v10 = vpop.permute.xlu1 %5326  ;;  %v3986_v50 = vpack.c.bf16 %v2610_v60, %v2609_v48  ;;  %vm9139_vm15 = vmmov %vm9135_vm1 }
 0xc8e   : > { %v5319_v40 = vunpack.i.h.bf16 %v5317_v35  ;;  %v5318_v16 = vunpack.i.l.bf16 %v5317_v35  ;;  %v5329_v0 = vunpack.i.h.bf16 %v5327_v10  ;;  %v5328_v13 = vunpack.i.l.bf16 %v5327_v10  ;;  %vm9140_vm3 = vmmov %vm9135_vm1 }
 0xc8f   : > { %3987 = vmatprep.subr.bf16.mxu1 %v3986_v50  ;;  %vm9141_vm5 = vmmov %vm9135_vm1 }
 0xc90   : > { %v2620_v17 = vsel %vm9135_vm1, %v5319_v40, %v5329_v0  ;;  %v2619_v53 = vsel %vm9136_vm2, %v5318_v16, %v5328_v13  ;;  %3989 = vmatpush1.bf16.msra.mxu1 %v3988_v27  ;;  %v2621_v56 = vsel %vm9137_vm14, %v5328_v13, %v5318_v16  ;;  %v2622_v33 = vsel %vm9138_vm4, %v5329_v0, %v5319_v40  ;;  %vm9142_vm2 = vmmov %vm9135_vm1 }
 0xc91   : > { %v3992_v41 = vpack.c.bf16 %v2620_v17, %v2619_v53  ;;  %v5322_v12 = vpop.permute.xlu0 %5321  ;;  %v5332_v52 = vpop.permute.xlu1 %5331  ;;  %v3990_v14 = vpack.c.bf16 %v2622_v33, %v2621_v56  ;;  %vm9143_vm14 = vmmov %vm9135_vm1 }
 0xc92   : > { %v5324_v6 = vunpack.i.h.bf16 %v5322_v12  ;;  %v5323_v58 = vunpack.i.l.bf16 %v5322_v12  ;;  %v5334_v59 = vunpack.i.h.bf16 %v5332_v52  ;;  %v5333_v18 = vunpack.i.l.bf16 %v5332_v52  ;;  %vm9144_vm4 = vmmov %vm9135_vm1 }
 0xc93   : > { %3991 = vmatprep.subr.bf16.mxu1 %v3990_v14 }
 0xc94   : > { %v2632_v5 = vsel %vm9139_vm15, %v5324_v6, %v5334_v59  ;;  %v2631_v25 = vsel %vm9140_vm3, %v5323_v58, %v5333_v18  ;;  %3993 = vmatpush1.bf16.msra.mxu1 %v3992_v41  ;;  %v2633_v9 = vsel %vm9141_vm5, %v5333_v18, %v5323_v58  ;;  %v2634_v62 = vsel %vm9135_vm1, %v5334_v59, %v5324_v6  ;;  %vm9145_vm15 = vmmov %vm9135_vm1 }
 0xc95   : > { %v3996_v1 = vpack.c.bf16 %v2632_v5, %v2631_v25  ;;  %v5337_v8 = vpop.permute.xlu0 %5336  ;;  %v5342_v48 = vpop.permute.xlu1 %5341  ;;  %v3994_v60 = vpack.c.bf16 %v2634_v62, %v2633_v9  ;;  %vm9146_vm3 = vmmov %vm9135_vm1 }
 0xc96   : > { %v5339_v27 = vunpack.i.h.bf16 %v5337_v8  ;;  %v5338_v35 = vunpack.i.l.bf16 %v5337_v8  ;;  %v5344_v10 = vunpack.i.h.bf16 %v5342_v48  ;;  %v5343_v50 = vunpack.i.l.bf16 %v5342_v48  ;;  %vm9147_vm5 = vmmov %vm9135_vm1 }
 0xc97   : > { %3995 = vmatprep.subr.bf16.mxu1 %v3994_v60 }
 0xc98   : > { %v2644_v40 = vsel %vm9142_vm2, %v5339_v27, %v5344_v10  ;;  %v2643_v16 = vsel %vm9143_vm14, %v5338_v35, %v5343_v50  ;;  %3997 = vmatpush1.bf16.msra.mxu1 %v3996_v1  ;;  %v2645_v0 = vsel %vm9144_vm4, %v5343_v50, %v5338_v35  ;;  %v2646_v13 = vsel %vm9145_vm15, %v5344_v10, %v5339_v27  ;;  %vm9148_vm2 = vmmov %vm9135_vm1 }
 0xc99   : > { %v4000_v17 = vpack.c.bf16 %v2644_v40, %v2643_v16  ;;  %v5347_v53 = vpop.permute.xlu0 %5346  ;;  %v5352_v56 = vpop.permute.xlu1 %5351  ;;  %v3998_v33 = vpack.c.bf16 %v2646_v13, %v2645_v0  ;;  %vm9149_vm14 = vcmp.lt.s32.totalorder %v5917_v38, 16  ;;  %v2419_v16 = vld [vmem:[%s8782_s3] sm:$0xff] }
 0xc9a   : > { %v5349_v41 = vunpack.i.h.bf16 %v5347_v53  ;;  %v5348_v12 = vunpack.i.l.bf16 %v5347_v53  ;;  %v5354_v52 = vunpack.i.h.bf16 %v5352_v56  ;;  %v5353_v14 = vunpack.i.l.bf16 %v5352_v56  ;;  %vm9150_vm4 = vmmov %vm9149_vm14  ;;  %v2424_v56 = vld [vmem:[%s8782_s3 + $0x28] sm:$0x1] }
 0xc9b   : > { %3999 = vmatprep.subr.bf16.mxu1 %v3998_v33  ;;  %vm9151_vm15 = vmmov %vm9150_vm4 }
 0xc9c   : > { %v2656_v6 = vsel %vm9146_vm3, %v5349_v41, %v5354_v52  ;;  %v2655_v58 = vsel %vm9147_vm5, %v5348_v12, %v5353_v14  ;;  %4001 = vmatpush1.bf16.msra.mxu1 %v4000_v17  ;;  %v2657_v59 = vsel %vm9135_vm1, %v5353_v14, %v5348_v12  ;;  %v2658_v18 = vsel %vm9148_vm2, %v5354_v52, %v5349_v41  ;;  %vm9152_vm3 = vmmov %vm9150_vm4 }
 0xc9d   : > { %v4004_v5 = vpack.c.bf16 %v2656_v6, %v2655_v58  ;;  %v5357_v25 = vpop.permute.xlu0 %5356  ;;  %v5362_v9 = vpop.permute.xlu1 %5361  ;;  %v4002_v62 = vpack.c.bf16 %v2658_v18, %v2657_v59  ;;  %vm9153_vm5 = vmmov %vm9152_vm3  ;;  %v2423_v18 = vld [vmem:[%s8782_s3 + $0x20] sm:$0x1] }
 0xc9e   : > { %v5359_v54 = vunpack.i.h.bf16 %v5357_v25  ;;  %v5358_v61 = vunpack.i.l.bf16 %v5357_v25  ;;  %v5364_v15 = vunpack.i.h.bf16 %v5362_v9  ;;  %v5363_v57 = vunpack.i.l.bf16 %v5362_v9  ;;  %vm9154_vm1 = vmmov %vm9152_vm3  ;;  %v2422_v9 = vld [vmem:[%s8782_s3 + $0x18] sm:$0xff] }
 0xc9f   : > { %4003 = vmatprep.subr.bf16.mxu1 %v4002_v62  ;;  %vm9155_vm2 = vmmov %vm9154_vm1 }
 0xca0   : > { %4005 = vmatpush1.bf16.msra.mxu1 %v4004_v5  ;;  %v2667_v3 = vsel %vm9149_vm14, %v5358_v61, %v5363_v57  ;;  %v2668_v26 = vsel %vm9150_vm4, %v5359_v54, %v5364_v15  ;;  %v2670_v28 = vsel %vm9151_vm15, %v5364_v15, %v5359_v54  ;;  %v2669_v49 = vsel %vm9152_vm3, %v5363_v57, %v5358_v61  ;;  %vm9156_vm14 = vmmov %vm9154_vm1 }
 0xca1   : > { %v5367_v1 = vpop.permute.xlu0 %5366  ;;  %v5377_v8 = vpop.permute.xlu1 %5376  ;;  %4007 = vmatprep.subr.bf16.mxu1 %v4006_v29  ;;  %vm9157_vm4 = vmmov %vm9154_vm1 }
 0xca2   : > { %v5368_v4 = vunpack.i.l.bf16 %v5367_v1  ;;  %v5379_v39 = vunpack.i.h.bf16 %v5377_v8  ;;  %v5378_v37 = vunpack.i.l.bf16 %v5377_v8  ;;  %vm9158_vm15 = vmmov %vm9154_vm1 }
 0xca3   : > { %vm9159_vm3 = vmmov %vm9154_vm1 }
 0xca4   : > { %4009 = vmatpush1.bf16.msra.mxu1 %v4008_v19  ;;  %v2679_v63 = vsel %vm9153_vm5, %v5368_v4, %v5378_v37  ;;  %v2681_v51 = vsel %vm9156_vm14, %v5378_v37, %v5368_v4  ;;  %vm9160_vm5 = vmmov %vm9154_vm1 }
 0xca5   : > { %v5372_v48 = vpop.permute.xlu0 %5371  ;;  %v5382_v60 = vpop.permute.xlu1 %5381  ;;  %4011 = vmatprep.subr.bf16.mxu1 %v4010_v46  ;;  %vm9162_vm14 = vmmov %vm9154_vm1 }
 0xca6   : > { %v5374_v20 = vunpack.i.h.bf16 %v5372_v48  ;;  %v5373_v46 = vunpack.i.l.bf16 %v5372_v48  ;;  %v5383_v11 = vunpack.i.l.bf16 %v5382_v60 }
 0xca8   : > { %4013 = vmatpush1.bf16.msra.mxu1 %v4012_v45  ;;  %v5384_v45 = vunpack.i.h.bf16 %v5382_v60  ;;  %v2691_v34 = vsel %vm9157_vm4, %v5373_v46, %v5383_v11  ;;  %v2693_v17 = vsel %vm9160_vm5, %v5383_v11, %v5373_v46  ;;  %vm9163_vm4 = vmmov %vm9154_vm1  ;;  %vm9166_vm5 = vcmask 130048  }
 0xca9   : > { %v8088_v27 = vpop.permute.xlu0 %5386  ;;  %v8090_v35 = vpop.permute.xlu1 %5391  ;;  %4015 = vmatprep.subr.bf16.mxu1 %v4014_v21  ;;  %v5369_v21 = vunpack.i.h.bf16 %v5367_v1 }
 0xcaa   : > { %v5388_v10 = vunpack.i.l.bf16 %v8088_v27  ;;  %v5394_v50 = vunpack.i.h.bf16 %v8090_v35  ;;  %v5393_v40 = vunpack.i.l.bf16 %v8090_v35  ;;  %v2694_v13 = vsel %vm9159_vm3, %v5384_v45, %v5374_v20  ;;  %vm9165_vm3 = vmmov %vm9154_vm1 }
 0xcab   : > { %v2680_v44 = vsel %vm9154_vm1, %v5369_v21, %v5379_v39  ;;  %v2682_v31 = vsel %vm9155_vm2, %v5379_v39, %v5369_v21  ;;  %vm9161_vm2 = vmmov %vm9154_vm1  ;;  %v4036_v5 = vpack.c.bf16 %v2694_v13, %v2693_v17 }
 0xcac   : > { %4017 = vmatpush1.bf16.msra.mxu1 %v4016_v22  ;;  %v4026_v22 = vpack.c.bf16 %v2668_v26, %v2667_v3  ;;  %v4030_v7 = vpack.c.bf16 %v2680_v44, %v2679_v63  ;;  %v4032_v0 = vpack.c.bf16 %v2682_v31, %v2681_v51  ;;  %v2703_v58 = vsel %vm9154_vm1, %v5388_v10, %v5393_v40 }
 0xcad   : > { %4019 = vmatprep.subr.bf16.mxu1 %v4018_v36  ;;  %v8101_v29 = vpop.permute.xlu0 %5396  ;;  %v8103_v19 = vpop.permute.xlu1 %5401  ;;  %v2705_v62 = vsel %vm9163_vm4, %v5393_v40, %v5388_v10 }
 0xcae   : > { %v5399_v33 = vunpack.i.h.bf16 %v8101_v29  ;;  %v5398_v41 = vunpack.i.l.bf16 %v8101_v29  ;;  %v5404_v12 = vunpack.i.h.bf16 %v8103_v19  ;;  %v5403_v52 = vunpack.i.l.bf16 %v8103_v19 }
 0xcb0   : > { %4021 = vmatpush1.bf16.msra.mxu1 %v4020_v55  ;;  %v4028_v55 = vpack.c.bf16 %v2670_v28, %v2669_v49  ;;  %v2716_v48 = vsel %vm9165_vm3, %v5399_v33, %v5404_v12  ;;  %v2718_v29 = vsel %vm9154_vm1, %v5404_v12, %v5399_v33 }
 0xcb1   : > { %4023 = vmatprep.subr.bf16.mxu1 %v4022_v2  ;;  %v8126_v30 = vpop.permute.xlu0 %5406  ;;  %v8128_v36 = vpop.permute.xlu1 %5411  ;;  %v2692_v2 = vsel %vm9158_vm15, %v5374_v20, %v5384_v45  ;;  %vm9164_vm15 = vmmov %vm9154_vm1 }
 0xcb2   : > { %v4034_v53 = vpack.c.bf16 %v2692_v2, %v2691_v34  ;;  %v2715_v8 = vsel %vm9164_vm15, %v5398_v41, %v5403_v52  ;;  %v5409_v60 = vunpack.i.h.bf16 %v8126_v30  ;;  %v5414_v35 = vunpack.i.h.bf16 %v8128_v36 }
 0xcb3   : > { %v5413_v54 = vunpack.i.l.bf16 %v8128_v36  ;;  %v4042_v3 = vpack.c.bf16 %v2716_v48, %v2715_v8 }
 0xcb4   : > { %4025 = vmatpush1.bf16.msra.mxu1 %v4024_v47  ;;  %v5389_v47 = vunpack.i.h.bf16 %v8088_v27  ;;  %v5408_v27 = vunpack.i.l.bf16 %v8126_v30 }
 0xcb5   : > { %4027 = vmatprep.subr.bf16.mxu1 %v4026_v22  ;;  %v5417_v14 = vpop.permute.xlu0 %5416  ;;  %v5427_v6 = vpop.permute.xlu1 %5426 }
 0xcb6   : > { %v2704_v59 = vsel %vm9161_vm2, %v5389_v47, %v5394_v50  ;;  %v2706_v25 = vsel %vm9162_vm14, %v5394_v50, %v5389_v47  ;;  %vm9167_vm2 = vmmov %vm9154_vm1  ;;  %v5419_v26 = vunpack.i.h.bf16 %v5417_v14  ;;  %v5418_v21 = vunpack.i.l.bf16 %v5417_v14 }
 0xcb7   : > { %v4038_v1 = vpack.c.bf16 %v2704_v59, %v2703_v58  ;;  %v4040_v57 = vpack.c.bf16 %v2706_v25, %v2705_v62  ;;  %v2717_v19 = vsel %vm9167_vm2, %v5403_v52, %v5398_v41  ;;  %v5429_v4 = vunpack.i.h.bf16 %v5427_v6 }
 0xcb8   : > { %4029 = vmatpush1.bf16.msra.mxu1 %v4028_v55  ;;  %v5428_v39 = vunpack.i.l.bf16 %v5427_v6  ;;  %vm9168_vm14 = vcmp.lt.s32.totalorder %v5917_v38, 32  ;;  %v4044_v49 = vpack.c.bf16 %v2718_v29, %v2717_v19  ;;  %v506_v19 = vmul.f32 2.0, %v5872_v23 }
 0xcb9   : > { %4031 = vmatprep.subr.bf16.mxu1 %v4030_v7  ;;  %v5422_v61 = vpop.permute.xlu0 %5421  ;;  %v5432_v15 = vpop.permute.xlu1 %5431  ;;  %v2727_v37 = vsel %vm9168_vm14, %v5408_v27, %v5413_v54  ;;  %vm9169_vm4 = vmmov %vm9168_vm14 }
 0xcba   : > { %v2728_v28 = vsel %vm9169_vm4, %v5409_v60, %v5414_v35  ;;  %vm9170_vm15 = vmmov %vm9169_vm4  ;;  %v5424_v30 = vunpack.i.h.bf16 %v5422_v61  ;;  %v5423_v36 = vunpack.i.l.bf16 %v5422_v61  ;;  %v5434_v55 = vunpack.i.h.bf16 %v5432_v15  ;;  %v2426_v61 = vld [vmem:[%s8782_s3 + $0x38] sm:$0x1] }
 0xcbb   : > { %2850 = vmatmul.mubr.f32.vlgmr.msra.gmra.mrb[22].mxu1 %v2419_v16  ;;  %v2730_v22 = vsel %vm9170_vm15, %v5414_v35, %v5409_v60  ;;  %vm9171_vm3 = vmmov %vm9169_vm4  ;;  %v4046_v11 = vpack.c.bf16 %v2728_v28, %v2727_v37  ;;  %v5433_v31 = vunpack.i.l.bf16 %v5432_v15  ;;  %v2425_v15 = vld [vmem:[%s8782_s3 + $0x30] sm:$0x1] }
 0xcbc   : > { %4033 = vmatpush1.bf16.msra.mxu1 %v4032_v0  ;;  %2855 = vmatprep.mubr.f32.mxu1 %v2424_v56  ;;  %v2729_v20 = vsel %vm9171_vm3, %v5413_v54, %v5408_v27  ;;  %vm9173_vm1 = vmmov %vm9171_vm3  ;;  %v2421_v54 = vld [vmem:[%s8782_s3 + $0x10] sm:$0xff] }
 0xcbd   : > { %4035 = vmatprep.subr.bf16.mxu1 %v4034_v53  ;;  %v5437_v46 = vpop.permute.xlu0 %5436  ;;  %v5442_v45 = vpop.permute.xlu1 %5441  ;;  %v2740_v44 = vsel %vm9173_vm1, %v5419_v26, %v5429_v4  ;;  %v4048_v51 = vpack.c.bf16 %v2730_v22, %v2729_v20  ;;  %vm9174_vm2 = vmmov %vm9173_vm1 }
 0xcbe   : > { %v2742_v7 = vsel %vm9174_vm2, %v5429_v4, %v5419_v26  ;;  %vm9175_vm14 = vmmov %vm9173_vm1  ;;  %v5439_v47 = vunpack.i.h.bf16 %v5437_v46  ;;  %v5438_v10 = vunpack.i.l.bf16 %v5437_v46  ;;  %v5444_v50 = vunpack.i.h.bf16 %v5442_v45  ;;  %v9187_v4 = vld [vmem:[#allocation4_spill] sm:$0xff] }
 0xcbf   : > { %2856 = vmatmul.mubr.f32.gmra.mrb[18].mxu1 %v2423_v18  ;;  %v2741_v34 = vsel %vm9175_vm14, %v5428_v39, %v5418_v21  ;;  %v5443_v40 = vunpack.i.l.bf16 %v5442_v45  ;;  %vm9176_vm4 = vmmov %vm9173_vm1  ;;  %v508_v26 = vmul.f32 %v506_v19, %v5881_v32 }
 0xcc0   : > { %4037 = vmatpush1.bf16.msra.mxu1 %v4036_v5  ;;  %3606 = vmatprep.mubr.msk.f32.mxu1 %vm9166_vm5, %v2422_v9  ;;  %vm9172_vm5 = vmmov %vm9171_vm3  ;;  %v2751_v16 = vsel %vm9176_vm4, %v5423_v36, %v5433_v31  ;;  %v4052_v53 = vpack.c.bf16 %v2742_v7, %v2741_v34 }
 0xcc1   : > { %4039 = vmatprep.subr.bf16.mxu1 %v4038_v1  ;;  %v2739_v63 = vsel %vm9172_vm5, %v5418_v21, %v5428_v39  ;;  %vm9177_vm15 = vmmov %vm9173_vm1  ;;  %v5447_v13 = vpop.permute.xlu0 %5446  ;;  %v5452_v17 = vpop.permute.xlu1 %5451  ;;  %v2763_v12 = vsel %vm9173_vm1, %v5438_v10, %v5443_v40 }
 0xcc2   : > { %v4050_v2 = vpack.c.bf16 %v2740_v44, %v2739_v63  ;;  %v2752_v0 = vsel %vm9177_vm15, %v5424_v30, %v5434_v55  ;;  %vm9178_vm3 = vmmov %vm9173_vm1  ;;  %v5449_v14 = vunpack.i.h.bf16 %v5447_v13  ;;  %v5448_v6 = vunpack.i.l.bf16 %v5447_v13 }
 0xcc3   : > { %v2754_v56 = vsel %vm9178_vm3, %v5434_v55, %v5424_v30  ;;  %vm9179_vm5 = vmmov %vm9173_vm1  ;;  %v4054_v41 = vpack.c.bf16 %v2752_v0, %v2751_v16  ;;  %v5454_v58 = vunpack.i.h.bf16 %v5452_v17  ;;  %v5453_v59 = vunpack.i.l.bf16 %v5452_v17 }
 0xcc4   : > { %4041 = vmatpush1.bf16.msra.mxu1 %v4040_v57  ;;  %v2753_v33 = vsel %vm9179_vm5, %v5433_v31, %v5423_v36  ;;  %vm9180_vm2 = vmmov %vm9173_vm1 }
 0xcc5   : > { %4043 = vmatprep.subr.bf16.mxu1 %v4042_v3  ;;  %v2764_v52 = vsel %vm9180_vm2, %v5439_v47, %v5444_v50  ;;  %v4056_v18 = vpack.c.bf16 %v2754_v56, %v2753_v33  ;;  %vm9181_vm14 = vmmov %vm9173_vm1  ;;  %v2777_v60 = vsel %vm9173_vm1, %v5453_v59, %v5448_v6  ;;  %vm9186_vm2 = vcmask 130048  }
 0xcc6   : > { %v2766_v5 = vsel %vm9181_vm14, %v5444_v50, %v5439_v47  ;;  %vm9182_vm4 = vmmov %vm9173_vm1  ;;  %v4058_v9 = vpack.c.bf16 %v2764_v52, %v2763_v12  ;;  %v507_v3 = vmul.f32 2.0, %v5874_v24  ;;  %vm9188_vm14 = vcmp.lt.s32.totalorder %v5917_v38, 14 }
 0xcc7   : > { %v2765_v25 = vsel %vm9182_vm4, %v5443_v40, %v5438_v10  ;;  %vm9183_vm15 = vmmov %vm9173_vm1 }
 0xcc8   : > { %4045 = vmatpush1.bf16.msra.mxu1 %v4044_v49  ;;  %v2775_v62 = vsel %vm9183_vm15, %v5448_v6, %v5453_v59  ;;  %vm9184_vm3 = vmmov %vm9173_vm1  ;;  %v4060_v8 = vpack.c.bf16 %v2766_v5, %v2765_v25  ;;  %v509_v39 = vmul.f32 %v507_v3, %v9187_v4 }
 0xcc9   : > { %4047 = vmatprep.subr.bf16.mxu1 %v4046_v11  ;;  %v2776_v1 = vsel %vm9184_vm3, %v5449_v14, %v5454_v58  ;;  %vm9185_vm5 = vmmov %vm9173_vm1 }
 0xcca   : > { %v2778_v48 = vsel %vm9185_vm5, %v5454_v58, %v5449_v14  ;;  %v4062_v27 = vpack.c.bf16 %v2776_v1, %v2775_v62  ;;  %vm9189_vm4 = vmmov %vm9188_vm14  ;;  %vm9192_vm5 = vcmp.lt.s32.totalorder %v5917_v38, 126 }
 0xccb   : > { %v4064_v35 = vpack.c.bf16 %v2778_v48, %v2777_v60  ;;  %vm9190_vm15 = vmmov %vm9189_vm4 }
 0xccc   : > { %4049 = vmatpush1.bf16.msra.mxu1 %v4048_v51  ;;  %vm9191_vm3 = vmmov %vm9189_vm4 }
 0xccd   : > { %4051 = vmatprep.subr.bf16.mxu1 %v4050_v2  ;;  %vm9193_vm1 = vmmov %vm9192_vm5 }
 0xcd0   : > { %4053 = vmatpush1.bf16.msra.mxu1 %v4052_v53 }
 0xcd1   : > { %4055 = vmatprep.subr.bf16.mxu1 %v4054_v41 }
 0xcd4   : > { %4057 = vmatpush1.bf16.msra.mxu1 %v4056_v18 }
 0xcd5   : > { %4059 = vmatprep.subr.bf16.mxu1 %v4058_v9 }
 0xcd8   : > { %4061 = vmatpush1.bf16.msra.mxu1 %v4060_v8 }
 0xcd9   : > { %4063 = vmatprep.subr.bf16.mxu1 %v4062_v27 }
 0xcdc   : > { %4065 = vmatpush1.bf16.msra.mxu1 %v4064_v35 }
 0xcdf   : > { %2927 = vmatmul.mubr.f32.vlgmr.msra.gmra.mrb[22].mxu1 %v2421_v54 }
 0xce0   : > { %3607 = vmatprep.mubr.msk.f32.mxu1 %vm9186_vm2, %v2426_v61  ;;  %vm9194_vm2 = vmmov %vm9193_vm1 }
 0xce3   : > { %2933 = vmatmul.mubr.f32.gmra.mrb[18].mxu1 %v2425_v15 }
 0xd1b   : > { %v1796_v57 = vpop.f32.mrb[8].mxu0 }
 0xd1c   : > { %v1798_v29 = vpop.f32.mrb[9].mxu0 }
 0xdb2   : > { %v2928_v21 = vpop.f32.mrb[22].mxu1 }
 0xdb3   : > { %v8237_v37 = vmul.f32 %v2928_v21, %v508_v26  ;;  %v8240_v28 = vmul.f32 %v2928_v21, %v5881_v32  ;;  %v2930_v49 = vpop.f32.mrb[23].mxu1 }
 0xdb4   : > { %v8242_v22 = vmul.f32 %v2930_v49, %v509_v39  ;;  %v8245_v20 = vmul.f32 %v2930_v49, %v9187_v4 }
 0xdb5   : > { %v8249_v23 = vpack.i.bf16 %v8240_v28, %v8237_v37  ;;  %v4116_v44 = vpack.c.bf16 %v8240_v28, %v8237_v37 }
 0xdb6   : > { %v2934_v24 = vpop.f32.mrb[18].mxu1  ;;  %v8253_v46 = vpack.i.bf16 %v8245_v20, %v8242_v22  ;;  %v4114_v63 = vpack.c.bf16 %v8245_v20, %v8242_v22 }
 0xdb7   : > { %v8255_v45 = vadd.f32 %v2934_v24, %v1796_v57  ;;  %5456 = vrot.lane.b32.xlu0 %v8249_v23, %s5765_s19  ;;  %v2936_v32 = vpop.f32.mrb[19].mxu1 }
 0xdb8   : > { %v8259_v11 = vadd.f32 %v2936_v32, %v1798_v29  ;;  %5496 = vrot.lane.b32.xlu1 %v8253_v46, %s5765_s19 }
 0xdbb   : > { %5461 = vrot.lane.b32.xlu0 %v8249_v23, %s5772_s7 }
 0xdbc   : > { %5501 = vrot.lane.b32.xlu1 %v8253_v46, %s5772_s7 }
 0xdbf   : > { %5466 = vrot.lane.b32.xlu0 %v8249_v23, %s5771_s30 }
 0xdc0   : > { %5506 = vrot.lane.b32.xlu1 %v8253_v46, %s5771_s30 }
 0xdc3   : > { %5471 = vrot.lane.b32.xlu0 %v8249_v23, %s5770_s29 }
 0xdc4   : > { %5511 = vrot.lane.b32.xlu1 %v8253_v46, %s5770_s29 }
 0xdc7   : > { %5476 = vrot.lane.b32.xlu0 %v8249_v23, %s5766_s20 }
 0xdc8   : > { %5516 = vrot.lane.b32.xlu1 %v8253_v46, %s5766_s20 }
 0xdcb   : > { %5481 = vrot.lane.b32.xlu0 %v8249_v23, %s5768_s26 }
 0xdcc   : > { %5521 = vrot.lane.b32.xlu1 %v8253_v46, %s5768_s26 }
 0xdcf   : > { %5486 = vrot.lane.b32.xlu0 %v8249_v23, %s5767_s21 }
 0xdd0   : > { %5526 = vrot.lane.b32.xlu1 %v8253_v46, %s5767_s21  ;;  %s3568_s21 = sshll.u32 %s3559_s24, 1 }
 0xdd1   : > { %p282_p8 = scmp.lt.s32.totalorder %s3568_s21, 3 }
 0xdd3   : > { %5491 = vrot.lane.b32.xlu0 %v8249_v23, %s5769_s27  ;;  %s9293_s21 = smov (!%p282_p8, %s3568_s21), 3 }
 0xdd4   : > { %5531 = vrot.lane.b32.xlu1 %v8253_v46, %s5769_s27  ;;  %s284_s23 = scalar_lea.vmem %s8785_s6, %s9293_s21 }
 0xdd7   : > { %5536 = vrot.lane.b32.xlu0 %v8249_v23, %s5776_s11 }
 0xdd8   : > { %5551 = vrot.lane.b32.xlu1 %v8253_v46, %s5776_s11 }
 0xddb   : > { %5541 = vrot.lane.b32.xlu0 %v8249_v23, %s5775_s10 }
 0xddc   : > { %5556 = vrot.lane.b32.xlu1 %v8253_v46, %s5775_s10 }
 0xddf   : > { %5546 = vrot.lane.b32.xlu0 %v8249_v23, %s5774_s9 }
 0xde0   : > { %5561 = vrot.lane.b32.xlu1 %v8253_v46, %s5774_s9 }
 0xe29   : > { %v5457_v30 = vpop.permute.xlu0 %5456 }
 0xe2a   : > { %v5497_v36 = vpop.permute.xlu1 %5496  ;;  %v5459_v55 = vunpack.i.h.bf16 %v5457_v30  ;;  %v5458_v31 = vunpack.i.l.bf16 %v5457_v30 }
 0xe2b   : > { %v5499_v51 = vunpack.i.h.bf16 %v5497_v36  ;;  %v5498_v7 = vunpack.i.l.bf16 %v5497_v36 }
 0xe2d   : > { %v5462_v34 = vpop.permute.xlu0 %5461  ;;  %v3043_v16 = vsel %vm9188_vm14, %v5459_v55, %v5499_v51  ;;  %v3045_v0 = vsel %vm9189_vm4, %v5499_v51, %v5459_v55  ;;  %v3042_v13 = vsel %vm9190_vm15, %v5458_v31, %v5498_v7  ;;  %v3044_v17 = vsel %vm9191_vm3, %v5498_v7, %v5458_v31  ;;  %vm9195_vm14 = vmmov %vm9193_vm1 }
 0xe2e   : > { %v5464_v2 = vunpack.i.h.bf16 %v5462_v34  ;;  %v5463_v47 = vunpack.i.l.bf16 %v5462_v34  ;;  %v5502_v10 = vpop.permute.xlu1 %5501  ;;  %vm9196_vm4 = vcmp.ge.s32.totalorder %v5923_v42, 14  ;;  %vm9197_vm15 = vcmp.ge.s32.totalorder %v5925_v43, 14 }
 0xe2f   : > { %v5504_v50 = vunpack.i.h.bf16 %v5502_v10  ;;  %v5503_v40 = vunpack.i.l.bf16 %v5502_v10  ;;  %vm9198_vm3 = vmmov %vm9196_vm4 }
 0xe31   : > { %v3055_v53 = vsel %vm9192_vm5, %v5464_v2, %v5504_v50  ;;  %v3057_v56 = vsel %vm9193_vm1, %v5504_v50, %v5464_v2  ;;  %v3054_v33 = vsel %vm9194_vm2, %v5463_v47, %v5503_v40  ;;  %v3056_v41 = vsel %vm9195_vm14, %v5503_v40, %v5463_v47  ;;  %v5467_v12 = vpop.permute.xlu0 %5466  ;;  %vm9199_vm5 = vmmov %vm9197_vm15 }
 0xe32   : > { %v8325_v52 = vsel %vm9196_vm4, %v3044_v17, %v3054_v33  ;;  %v8329_v14 = vsel %vm9197_vm15, %v3042_v13, %v3056_v41  ;;  %v8333_v6 = vsel %vm9198_vm3, %v3045_v0, %v3055_v53  ;;  %v8337_v58 = vsel %vm9199_vm5, %v3043_v16, %v3057_v56  ;;  %v5507_v59 = vpop.permute.xlu1 %5506 }
 0xe33   : > { %v5469_v18 = vunpack.i.h.bf16 %v5467_v12  ;;  %v5509_v5 = vunpack.i.h.bf16 %v5507_v59  ;;  %v5468_v25 = vunpack.i.l.bf16 %v5467_v12  ;;  %v5508_v9 = vunpack.i.l.bf16 %v5507_v59 }
 0xe34   : > { %v8341_v62 = vpack.i.bf16 %v8333_v6, %v8325_v52  ;;  %v8345_v1 = vpack.i.bf16 %v8337_v58, %v8329_v14  ;;  %vm9200_vm1 = vcmp.lt.s32.totalorder %v5917_v38, 15  ;;  %v4106_v19 = vpack.c.bf16 %v8337_v58, %v8329_v14 }
 0xe35   : > { %v5472_v8 = vpop.permute.xlu0 %5471  ;;  %v3015_v48 = vsel %vm9200_vm1, %v5469_v18, %v5509_v5  ;;  %vm9201_vm2 = vmmov %vm9200_vm1  ;;  %v4108_v3 = vpack.c.bf16 %v8333_v6, %v8325_v52  ;;  %vm9204_vm15 = vcmp.ge.s32.totalorder %v5925_v43, 15 }
 0xe36   : > { %v3017_v60 = vsel %vm9201_vm2, %v5509_v5, %v5469_v18  ;;  %v5474_v27 = vunpack.i.h.bf16 %v5472_v8  ;;  %v5473_v35 = vunpack.i.l.bf16 %v5472_v8  ;;  %5566 = vrot.lane.b32.xlu0 %v8341_v62, %s5776_s11  ;;  %5571 = vrot.lane.b32.xlu1 %v8345_v1, %s5776_s11  ;;  %v5512_v54 = vpop.permute.xlu1 %5511  ;;  %vm9202_vm14 = vmmov %vm9200_vm1 }
 0xe37   : > { %v5514_v61 = vunpack.i.h.bf16 %v5512_v54  ;;  %v5513_v15 = vunpack.i.l.bf16 %v5512_v54  ;;  %v3014_v57 = vsel %vm9202_vm14, %v5468_v25, %v5508_v9  ;;  %vm9203_vm4 = vmmov %vm9200_vm1 }
 0xe38   : > { %v3016_v29 = vsel %vm9203_vm4, %v5508_v9, %v5468_v25  ;;  %vm9205_vm3 = vmmov %vm9204_vm15 }
 0xe39   : > { %v3027_v26 = vsel %vm561_vm10, %v5474_v27, %v5514_v61  ;;  %v3029_v21 = vsel %vm561_vm10, %v5514_v61, %v5474_v27  ;;  %v3026_v4 = vsel %vm561_vm10, %v5473_v35, %v5513_v15  ;;  %v3028_v39 = vsel %vm561_vm10, %v5513_v15, %v5473_v35  ;;  %v5477_v49 = vpop.permute.xlu0 %5476 }
 0xe3a   : > { %v8373_v24 = vsel %vm321_vm0, %v3016_v29, %v3026_v4  ;;  %v8377_v32 = vsel %vm9204_vm15, %v3014_v57, %v3028_v39  ;;  %v8381_v30 = vsel %vm321_vm0, %v3017_v60, %v3027_v26  ;;  %v8385_v36 = vsel %vm9205_vm3, %v3015_v48, %v3029_v21  ;;  %v5517_v55 = vpop.permute.xlu1 %5516 }
 0xe3b   : > { %v5479_v31 = vunpack.i.h.bf16 %v5477_v49  ;;  %v5519_v51 = vunpack.i.h.bf16 %v5517_v55  ;;  %v5478_v7 = vunpack.i.l.bf16 %v5477_v49  ;;  %v5518_v34 = vunpack.i.l.bf16 %v5517_v55 }
 0xe3c   : > { %v8389_v2 = vpack.i.bf16 %v8381_v30, %v8373_v24  ;;  %v8393_v47 = vpack.i.bf16 %v8385_v36, %v8377_v32  ;;  %v4110_v41 = vpack.c.bf16 %v8385_v36, %v8377_v32  ;;  %v4112_v12 = vpack.c.bf16 %v8381_v30, %v8373_v24 }
 0xe3d   : > { %v5482_v10 = vpop.permute.xlu0 %5481  ;;  %v2987_v0 = vsel %vm538_vm6, %v5479_v31, %v5519_v51  ;;  %v2989_v13 = vsel %vm538_vm6, %v5519_v51, %v5479_v31  ;;  %v2986_v56 = vsel %vm538_vm6, %v5478_v7, %v5518_v34  ;;  %v2988_v33 = vsel %vm538_vm6, %v5518_v34, %v5478_v7 }
 0xe3e   : > { %v5484_v50 = vunpack.i.h.bf16 %v5482_v10  ;;  %v5483_v40 = vunpack.i.l.bf16 %v5482_v10  ;;  %5576 = vrot.lane.b32.xlu0 %v8389_v2, %s5776_s11  ;;  %5586 = vrot.lane.b32.xlu1 %v8393_v47, %s5776_s11  ;;  %v5522_v16 = vpop.permute.xlu1 %5521  ;;  %vm9206_vm6 = vcmp.lt.s32.totalorder %v5925_v43, 2  ;;  %v9208_v43 = vlaneseq }
 0xe3f   : > { %v5524_v17 = vunpack.i.h.bf16 %v5522_v16  ;;  %v5523_v53 = vunpack.i.l.bf16 %v5522_v16 }
 0xe41   : > { %v2999_v59 = vsel %vm545_vm8, %v5484_v50, %v5524_v17  ;;  %v3001_v18 = vsel %vm545_vm8, %v5524_v17, %v5484_v50  ;;  %v2998_v5 = vsel %vm545_vm8, %v5483_v40, %v5523_v53  ;;  %v3000_v25 = vsel %vm545_vm8, %v5523_v53, %v5483_v40  ;;  %v5487_v9 = vpop.permute.xlu0 %5486 }
 0xe42   : > { %v8421_v8 = vsel %vm333_vm11, %v2986_v56, %v3000_v25  ;;  %v8425_v48 = vsel %vm334_vm12, %v2988_v33, %v2998_v5  ;;  %v8429_v60 = vsel %vm333_vm11, %v2987_v0, %v3001_v18  ;;  %v8433_v27 = vsel %vm334_vm12, %v2989_v13, %v2999_v59  ;;  %5581 = vrot.lane.b32.xlu0 %v8249_v23, %s5773_s8  ;;  %v5527_v35 = vpop.permute.xlu1 %5526  ;;  %v8525_v25 = vld [vmem:[%s8783_s4] sm:$0xf] }
 0xe43   : > { %v5489_v54 = vunpack.i.h.bf16 %v5487_v9  ;;  %5591 = vrot.lane.b32.xlu1 %v8253_v46, %s5773_s8  ;;  %v5529_v61 = vunpack.i.h.bf16 %v5527_v35  ;;  %v5488_v15 = vunpack.i.l.bf16 %v5487_v9  ;;  %v5528_v57 = vunpack.i.l.bf16 %v5527_v35 }
 0xe44   : > { %v5595_v29 = vpack.i.bf16 %v8429_v60, %v8421_v8  ;;  %v5600_v26 = vpack.i.bf16 %v8433_v27, %v8425_v48  ;;  %v4118_v34 = vpack.c.bf16 %v8433_v27, %v8425_v48  ;;  %v4120_v10 = vpack.c.bf16 %v8429_v60, %v8421_v8 }
 0xe45   : > { %v5492_v21 = vpop.permute.xlu0 %5491  ;;  %v2959_v49 = vsel %vm522_vm7, %v5489_v54, %v5529_v61  ;;  %v2961_v46 = vsel %vm522_vm7, %v5529_v61, %v5489_v54  ;;  %v2958_v51 = vsel %vm522_vm7, %v5488_v15, %v5528_v57  ;;  %v2960_v7 = vsel %vm522_vm7, %v5528_v57, %v5488_v15  ;;  %vm9207_vm7 = vmmov %vm9206_vm6 }
 0xe46   : > { %v5494_v4 = vunpack.i.h.bf16 %v5492_v21  ;;  %v5493_v39 = vunpack.i.l.bf16 %v5492_v21  ;;  %5596 = vrot.lane.b32.xlu0 %v5595_v29, %s5776_s11  ;;  %v5532_v23 = vpop.permute.xlu1 %5531  ;;  %v8520_v5 = vshrl.u32 %v9208_v43, 7  ;;  %vm9209_vm8 = vcmask 130048  }
 0xe47   : > { %5601 = vrot.lane.b32.xlu1 %v5600_v26, %s5776_s11  ;;  %v5534_v55 = vunpack.i.h.bf16 %v5532_v23  ;;  %v5533_v31 = vunpack.i.l.bf16 %v5532_v23 }
 0xe48   : > { %v3309_v9 = vsub.s32 1, %v8520_v5 }
 0xe49   : > { %v2971_v50 = vsel %vm529_vm9, %v5494_v4, %v5534_v55  ;;  %v2973_v40 = vsel %vm529_vm9, %v5534_v55, %v5494_v4  ;;  %v2970_v16 = vsel %vm529_vm9, %v5493_v39, %v5533_v31  ;;  %v2972_v0 = vsel %vm529_vm9, %v5533_v31, %v5493_v39  ;;  %v5537_v54 = vpop.permute.xlu0 %5536 }
 0xe4a   : > { %v8467_v13 = vsel %vm339_vm13, %v2958_v51, %v2972_v0  ;;  %v8471_v17 = vsel %vm9206_vm6, %v2960_v7, %v2970_v16  ;;  %v8475_v53 = vsel %vm339_vm13, %v2959_v49, %v2973_v40  ;;  %v8479_v56 = vsel %vm9207_vm7, %v2961_v46, %v2971_v50  ;;  %v5552_v61 = vpop.permute.xlu1 %5551 }
 0xe4b   : > { %v5605_v33 = vpack.i.bf16 %v8475_v53, %v8467_v13  ;;  %v5610_v59 = vpack.i.bf16 %v8479_v56, %v8471_v17  ;;  %v4122_v18 = vpack.c.bf16 %v8479_v56, %v8471_v17  ;;  %v3310_v35 = vrot.slane %v8525_v25, %v3309_v9 }
 0xe4c   : > { %vm9210_vm9 = vcmp.lt.s32.totalorder %v5917_v38, 96  ;;  %v5539_v50 = vunpack.i.h.bf16 %v5537_v54  ;;  %v5538_v40 = vunpack.i.l.bf16 %v5537_v54  ;;  %v5554_v16 = vunpack.i.h.bf16 %v5552_v61 }
 0xe4d   : > { %5606 = vrot.lane.b32.xlu0 %v5605_v33, %s5776_s11  ;;  %5611 = vrot.lane.b32.xlu1 %v5610_v59, %s5776_s11  ;;  %v8540_v15 = vpop.permute.xlu0 %5541  ;;  %vm9211_vm10 = vmmov %vm9210_vm9  ;;  %v5553_v0 = vunpack.i.l.bf16 %v5552_v61  ;;  %v3305_v56 = vsub.s32 0, %v8520_v5 }
 0xe4e   : > { %3388 = vmatprep.mubr.f32.mxu0 %v3310_v35  ;;  %v8542_v57 = vpop.permute.xlu1 %5556  ;;  %vm9212_vm11 = vmmov %vm9210_vm9 }
 0xe4f   : > { %vm9213_vm12 = vmmov %vm9210_vm9 }
 0xe50   : > { %vm9214_vm13 = vmmov %vm9210_vm9 }
 0xe51   : > { %5616 = vrot.lane.b32.xlu0 %v8341_v62, %s5775_s10  ;;  %5621 = vrot.lane.b32.xlu1 %v8345_v1, %s5775_s10  ;;  %vm9215_vm0 = vmmov %vm9210_vm9 }
 0xe52   : > { %vm9216_vm5 = vmmov %vm9215_vm0 }
 0xe53   : > { %vm9217_vm1 = vmmov %vm9215_vm0 }
 0xe54   : > { %vm9218_vm2 = vmmov %vm9215_vm0 }
 0xe55   : > { %5626 = vrot.lane.b32.xlu0 %v8389_v2, %s5775_s10  ;;  %5631 = vrot.lane.b32.xlu1 %v8393_v47, %s5775_s10  ;;  %vm9219_vm14 = vmmov %vm9215_vm0 }
 0xe56   : > { %vm9220_vm4 = vmmov %vm9215_vm0 }
 0xe57   : > { %vm9221_vm15 = vmmov %vm9215_vm0 }
 0xe58   : > { %vm9222_vm3 = vmmov %vm9215_vm0 }
 0xe59   : > { %5636 = vrot.lane.b32.xlu0 %v8389_v2, %s5774_s9  ;;  %5641 = vrot.lane.b32.xlu1 %v8393_v47, %s5774_s9  ;;  %vm9223_vm6 = vmmov %vm9215_vm0 }
 0xe5a   : > { %vm9224_vm7 = vmmov %vm9215_vm0 }
 0xe5d   : > { %5646 = vrot.lane.b32.xlu0 %v5595_v29, %s5775_s10  ;;  %5651 = vrot.lane.b32.xlu1 %v5600_v26, %s5775_s10 }
 0xe61   : > { %5656 = vrot.lane.b32.xlu0 %v5605_v33, %s5775_s10  ;;  %5661 = vrot.lane.b32.xlu1 %v5610_v59, %s5775_s10 }
 0xe65   : > { %5666 = vrot.lane.b32.xlu0 %v5595_v29, %s5774_s9  ;;  %5671 = vrot.lane.b32.xlu1 %v5600_v26, %s5774_s9 }
 0xe69   : > { %5676 = vrot.lane.b32.xlu0 %v5605_v33, %s5774_s9  ;;  %5681 = vrot.lane.b32.xlu1 %v5610_v59, %s5774_s9 }
 0xe6d   : > { %5686 = vrot.lane.b32.xlu0 %v8341_v62, %s5773_s8  ;;  %5691 = vrot.lane.b32.xlu1 %v8345_v1, %s5773_s8 }
 0xe71   : > { %5696 = vrot.lane.b32.xlu0 %v8389_v2, %s5773_s8  ;;  %5701 = vrot.lane.b32.xlu1 %v8393_v47, %s5773_s8  ;;  %v3317_v2 = vsub.s32 3, %v8520_v5 }
 0xe73   : > { %v3318_v47 = vrot.slane %v8525_v25, %v3317_v2 }
 0xe75   : > { %5706 = vrot.lane.b32.xlu0 %v5595_v29, %s5773_s8  ;;  %5711 = vrot.lane.b32.xlu1 %v5600_v26, %s5773_s8  ;;  %v8544_v29 = vpop.permute.xlu0 %5546 }
 0xe76   : > { %3608 = vmatprep.mubr.msk.f32.mxu1 %vm9209_vm8, %v3318_v47  ;;  %vm9225_vm8 = vmmov %vm9215_vm0 }
 0xe79   : > { %5716 = vrot.lane.b32.xlu0 %v8341_v62, %s5774_s9  ;;  %5721 = vrot.lane.b32.xlu1 %v8345_v1, %s5774_s9  ;;  %v8546_v62 = vpop.permute.xlu1 %5561 }
 0xe7d   : > { %5726 = vrot.lane.b32.xlu0 %v5605_v33, %s5773_s8  ;;  %5731 = vrot.lane.b32.xlu1 %v5610_v59, %s5773_s8 }
 0xea8   : > { %v5567_v1 = vpop.permute.xlu0 %5566  ;;  %v5572_v26 = vpop.permute.xlu1 %5571 }
 0xea9   : > { %v5569_v21 = vunpack.i.h.bf16 %v5567_v1  ;;  %v5568_v4 = vunpack.i.l.bf16 %v5567_v1  ;;  %v5574_v39 = vunpack.i.h.bf16 %v5572_v26  ;;  %v5573_v23 = vunpack.i.l.bf16 %v5572_v26 }
 0xeaa   : > { %v3096_v1 = vsel %vm9214_vm13, %v5553_v0, %v5538_v40  ;;  %v3097_v26 = vsel %vm9215_vm0, %v5554_v16, %v5539_v50  ;;  %vm9230_vm13 = vcmp.lt.s32.totalorder %v5917_v38, 112 }
 0xeab   : > { %v3071_v49 = vsel %vm9210_vm9, %v5569_v21, %v5574_v39  ;;  %v3070_v46 = vsel %vm9211_vm10, %v5568_v4, %v5573_v23  ;;  %v3072_v55 = vsel %vm9212_vm11, %v5573_v23, %v5568_v4  ;;  %v3073_v31 = vsel %vm9213_vm12, %v5574_v39, %v5569_v21  ;;  %vm9226_vm9 = vmmov %vm9215_vm0 }
 0xeac   : > { %v4068_v51 = vpack.c.bf16 %v3071_v49, %v3070_v46  ;;  %v4066_v7 = vpack.c.bf16 %v3073_v31, %v3072_v55  ;;  %v3095_v55 = vsel %vm9220_vm4, %v5539_v50, %v5554_v16  ;;  %v3094_v31 = vsel %vm9221_vm15, %v5538_v40, %v5553_v0  ;;  %vm9227_vm10 = vmmov %vm9215_vm0 }
 0xead   : > { %vm9228_vm11 = vmmov %vm9215_vm0 }
 0xeae   : > { %4067 = vmatprep.subr.bf16.mxu0 %v4066_v7  ;;  %vm9229_vm12 = vmmov %vm9215_vm0 }
 0xeaf   : > { %4069 = vmatpush1.bf16.msra.mxu0 %v4068_v51  ;;  %v4074_v51 = vpack.c.bf16 %v3097_v26, %v3096_v1  ;;  %vm9231_vm0 = vmmov %vm9230_vm13 }
 0xeb0   : > { %v5577_v33 = vpop.permute.xlu0 %5576  ;;  %v5587_v59 = vpop.permute.xlu1 %5586  ;;  %vm9236_vm4 = vmmov %vm9231_vm0 }
 0xeb1   : > { %v5579_v9 = vunpack.i.h.bf16 %v5577_v33  ;;  %v5578_v35 = vunpack.i.l.bf16 %v5577_v33  ;;  %v5589_v2 = vunpack.i.h.bf16 %v5587_v59  ;;  %v5588_v47 = vunpack.i.l.bf16 %v5587_v59  ;;  %vm9237_vm15 = vmmov %vm9231_vm0 }
 0xeb2   : > { %v4076_v33 = vpack.c.bf16 %v3095_v55, %v3094_v31  ;;  %v5544_v55 = vunpack.i.h.bf16 %v8540_v15  ;;  %v5543_v31 = vunpack.i.l.bf16 %v8540_v15 }
 0xeb3   : > { %v3083_v21 = vsel %vm9216_vm5, %v5579_v9, %v5589_v2  ;;  %v3082_v54 = vsel %vm9217_vm1, %v5578_v35, %v5588_v47  ;;  %v3084_v61 = vsel %vm9218_vm2, %v5588_v47, %v5578_v35  ;;  %v3085_v4 = vsel %vm9219_vm14, %v5589_v2, %v5579_v9  ;;  %vm9232_vm5 = vmmov %vm9231_vm0 }
 0xeb4   : > { %v4072_v39 = vpack.c.bf16 %v3083_v21, %v3082_v54  ;;  %v8568_v23 = vpop.permute.xlu0 %5581  ;;  %v4070_v49 = vpack.c.bf16 %v3085_v4, %v3084_v61  ;;  %vm9233_vm1 = vmmov %vm9231_vm0 }
 0xeb5   : > { %v8570_v46 = vpop.permute.xlu1 %5591  ;;  %vm9234_vm2 = vmmov %vm9231_vm0 }
 0xeb6   : > { %4071 = vmatprep.subr.bf16.mxu0 %v4070_v49  ;;  %vm9235_vm14 = vmmov %vm9231_vm0 }
 0xeb7   : > { %4073 = vmatpush1.bf16.msra.mxu0 %v4072_v39 }
 0xeb8   : > { %v5597_v7 = vpop.permute.xlu0 %5596  ;;  %4075 = vmatprep.subr.bf16.mxu0 %v4074_v51  ;;  %v5559_v51 = vunpack.i.h.bf16 %v8542_v57 }
 0xeb9   : > { %v5599_v59 = vunpack.i.h.bf16 %v5597_v7  ;;  %v5598_v9 = vunpack.i.l.bf16 %v5597_v7  ;;  %v5602_v35 = vpop.permute.xlu1 %5601  ;;  %v5558_v7 = vunpack.i.l.bf16 %v8542_v57 }
 0xeba   : > { %v5604_v2 = vunpack.i.h.bf16 %v5602_v35  ;;  %v5603_v47 = vunpack.i.l.bf16 %v5602_v35 }
 0xebb   : > { %4077 = vmatpush1.bf16.msra.mxu0 %v4076_v33 }
 0xebc   : > { %v3107_v21 = vsel %vm9222_vm3, %v5599_v59, %v5604_v2  ;;  %v3106_v50 = vsel %vm9223_vm6, %v5598_v9, %v5603_v47  ;;  %v3108_v40 = vsel %vm9224_vm7, %v5603_v47, %v5598_v9  ;;  %v3109_v16 = vsel %vm9225_vm8, %v5604_v2, %v5599_v59  ;;  %vm9238_vm3 = vmmov %vm9231_vm0 }
 0xebd   : > { %v4080_v0 = vpack.c.bf16 %v3107_v21, %v3106_v50  ;;  %v4078_v1 = vpack.c.bf16 %v3109_v16, %v3108_v40  ;;  %vm9239_vm6 = vmmov %vm9231_vm0 }
 0xebe   : > { %vm9240_vm7 = vmmov %vm9231_vm0 }
 0xebf   : > { %4079 = vmatprep.subr.bf16.mxu0 %v4078_v1  ;;  %v5607_v26 = vpop.permute.xlu0 %5606  ;;  %v5612_v54 = vpop.permute.xlu1 %5611  ;;  %v3154_v1 = vsel %vm9231_vm0, %v5543_v31, %v5558_v7  ;;  %vm9241_vm8 = vmmov %vm9231_vm0 }
 0xec0   : > { %4081 = vmatpush1.bf16.msra.mxu0 %v4080_v0  ;;  %v5609_v61 = vunpack.i.h.bf16 %v5607_v26  ;;  %v5608_v4 = vunpack.i.l.bf16 %v5607_v26  ;;  %v5614_v39 = vunpack.i.h.bf16 %v5612_v54  ;;  %v5613_v49 = vunpack.i.l.bf16 %v5612_v54 }
 0xec1   : > { %v3155_v0 = vsel %vm9230_vm13, %v5544_v55, %v5559_v51 }
 0xec2   : > { %v3119_v33 = vsel %vm9226_vm9, %v5609_v61, %v5614_v39  ;;  %v3118_v59 = vsel %vm9227_vm10, %v5608_v4, %v5613_v49  ;;  %v3120_v9 = vsel %vm9228_vm11, %v5613_v49, %v5608_v4  ;;  %v3121_v35 = vsel %vm9229_vm12, %v5614_v39, %v5609_v61 }
 0xec3   : > { %v4084_v2 = vpack.c.bf16 %v3119_v33, %v3118_v59  ;;  %v5617_v47 = vpop.permute.xlu0 %5616  ;;  %v5622_v21 = vpop.permute.xlu1 %5621  ;;  %v4082_v15 = vpack.c.bf16 %v3121_v35, %v3120_v9  ;;  %v5549_v39 = vunpack.i.h.bf16 %v8544_v29  ;;  %v3156_v35 = vsel %vm9236_vm4, %v5558_v7, %v5543_v31  ;;  %vm9251_vm4 = vmmov %vm9234_vm2 }
 0xec4   : > { %v5619_v50 = vunpack.i.h.bf16 %v5617_v47  ;;  %v5618_v40 = vunpack.i.l.bf16 %v5617_v47  ;;  %v5624_v16 = vunpack.i.h.bf16 %v5622_v21  ;;  %v5623_v57 = vunpack.i.l.bf16 %v5622_v21 }
 0xec5   : > { %4083 = vmatprep.subr.bf16.mxu0 %v4082_v15  ;;  %vm9242_vm9 = vcmp.lt.s32.totalorder %v5917_v38, 16 }
 0xec6   : > { %v3131_v26 = vsel %vm9232_vm5, %v5619_v50, %v5624_v16  ;;  %v3130_v54 = vsel %vm9233_vm1, %v5618_v40, %v5623_v57  ;;  %4085 = vmatpush1.bf16.msra.mxu0 %v4084_v2  ;;  %v3132_v61 = vsel %vm9234_vm2, %v5623_v57, %v5618_v40  ;;  %v3133_v4 = vsel %vm9235_vm14, %v5624_v16, %v5619_v50  ;;  %vm9243_vm10 = vmmov %vm9242_vm9 }
 0xec7   : > { %v4088_v49 = vpack.c.bf16 %v3131_v26, %v3130_v54  ;;  %v5627_v33 = vpop.permute.xlu0 %5626  ;;  %v5632_v59 = vpop.permute.xlu1 %5631  ;;  %v4086_v9 = vpack.c.bf16 %v3133_v4, %v3132_v61  ;;  %v5548_v2 = vunpack.i.l.bf16 %v8544_v29  ;;  %v5564_v40 = vunpack.i.h.bf16 %v8546_v62  ;;  %vm9244_vm11 = vmmov %vm9242_vm9 }
 0xec8   : > { %v5629_v47 = vunpack.i.h.bf16 %v5627_v33  ;;  %v5628_v21 = vunpack.i.l.bf16 %v5627_v33  ;;  %v5634_v15 = vunpack.i.h.bf16 %v5632_v59  ;;  %v5633_v42 = vunpack.i.l.bf16 %v5632_v59  ;;  %vm9245_vm12 = vmmov %vm9242_vm9 }
 0xec9   : > { %v5563_v57 = vunpack.i.l.bf16 %v8546_v62  ;;  %4087 = vmatprep.subr.bf16.mxu0 %v4086_v9  ;;  %v3157_v50 = vsel %vm9237_vm15, %v5559_v51, %v5544_v55  ;;  %v4096_v59 = vpack.c.bf16 %v3155_v0, %v3154_v1  ;;  %vm9246_vm13 = vmmov %vm9242_vm9 }
 0xeca   : > { %v3143_v16 = vsel %vm9238_vm3, %v5629_v47, %v5634_v15  ;;  %v3142_v31 = vsel %vm9239_vm6, %v5628_v21, %v5633_v42  ;;  %4089 = vmatpush1.bf16.msra.mxu0 %v4088_v49  ;;  %v3144_v7 = vsel %vm9240_vm7, %v5633_v42, %v5628_v21  ;;  %v3145_v29 = vsel %vm9241_vm8, %v5634_v15, %v5629_v47  ;;  %vm9247_vm0 = vmmov %vm9242_vm9 }
 0xecb   : > { %v4092_v26 = vpack.c.bf16 %v3143_v16, %v3142_v31  ;;  %v5637_v54 = vpop.permute.xlu0 %5636  ;;  %v5642_v62 = vpop.permute.xlu1 %5641  ;;  %v4090_v61 = vpack.c.bf16 %v3145_v29, %v3144_v7  ;;  %v4094_v9 = vpack.c.bf16 %v3157_v50, %v3156_v35  ;;  %v3214_v49 = vsel %vm9242_vm9, %v5548_v2, %v5563_v57  ;;  %vm9248_vm5 = vmmov %vm9247_vm0 }
 0xecc   : > { %v5639_v4 = vunpack.i.h.bf16 %v5637_v54  ;;  %v5638_v33 = vunpack.i.l.bf16 %v5637_v54  ;;  %v5644_v55 = vunpack.i.h.bf16 %v5642_v62  ;;  %v5643_v51 = vunpack.i.l.bf16 %v5642_v62  ;;  %vm9249_vm1 = vmmov %vm9247_vm0 }
 0xecd   : > { %4091 = vmatprep.subr.bf16.mxu0 %v4090_v61  ;;  %v3215_v42 = vsel %vm9243_vm10, %v5549_v39, %v5564_v40  ;;  %v3217_v1 = vsel %vm9248_vm5, %v5564_v40, %v5549_v39  ;;  %v3216_v35 = vsel %vm9249_vm1, %v5563_v57, %v5548_v2  ;;  %vm9250_vm14 = vmmov %vm9234_vm2 }
 0xece   : > { %v3205_v47 = vsel %vm9244_vm11, %v5644_v55, %v5639_v4  ;;  %v3204_v21 = vsel %vm9245_vm12, %v5643_v51, %v5638_v33  ;;  %4093 = vmatpush1.bf16.msra.mxu0 %v4092_v26  ;;  %v3202_v15 = vsel %vm9246_vm13, %v5638_v33, %v5643_v51  ;;  %v3203_v0 = vsel %vm9247_vm0, %v5639_v4, %v5644_v55  ;;  %vm9252_vm15 = vmmov %vm9234_vm2 }
 0xecf   : > { %v4132_v50 = vpack.c.bf16 %v3205_v47, %v3204_v21  ;;  %v5647_v16 = vpop.permute.xlu0 %5646  ;;  %v5652_v31 = vpop.permute.xlu1 %5651  ;;  %4095 = vmatprep.subr.bf16.mxu0 %v4094_v9  ;;  %v4130_v7 = vpack.c.bf16 %v3203_v0, %v3202_v15  ;;  %v4134_v61 = vpack.c.bf16 %v3215_v42, %v3214_v49  ;;  %v4136_v40 = vpack.c.bf16 %v3217_v1, %v3216_v35  ;;  %vm9253_vm3 = vmmov %vm9234_vm2 }
 0xed0   : > { %v5649_v29 = vunpack.i.h.bf16 %v5647_v16  ;;  %v5648_v54 = vunpack.i.l.bf16 %v5647_v16  ;;  %v5654_v26 = vunpack.i.h.bf16 %v5652_v31  ;;  %v5653_v62 = vunpack.i.l.bf16 %v5652_v31  ;;  %vm9254_vm6 = vmmov %vm9234_vm2 }
 0xed1   : > { %4131 = vmatprep.subr.bf16.mxu1 %v4130_v7  ;;  %vm9255_vm7 = vmmov %vm9234_vm2 }
 0xed2   : > { %v3167_v4 = vsel %vm9234_vm2, %v5649_v29, %v5654_v26  ;;  %v3166_v39 = vsel %vm9250_vm14, %v5648_v54, %v5653_v62  ;;  %4097 = vmatpush1.bf16.msra.mxu0 %v4096_v59  ;;  %4133 = vmatpush1.bf16.msra.mxu1 %v4132_v50  ;;  %v3168_v2 = vsel %vm9251_vm4, %v5653_v62, %v5648_v54  ;;  %vm9256_vm8 = vmmov %vm9234_vm2  ;;  %vm9264_vm2 = vcmp.lt.s32.totalorder %v5917_v38, 32 }
 0xed3   : > { %v4100_v57 = vpack.c.bf16 %v3167_v4, %v3166_v39  ;;  %v5657_v33 = vpop.permute.xlu0 %5656  ;;  %v5662_v55 = vpop.permute.xlu1 %5661  ;;  %4135 = vmatprep.subr.bf16.mxu1 %v4134_v61  ;;  %v3169_v51 = vsel %vm9252_vm15, %v5654_v26, %v5649_v29  ;;  %vm9257_vm9 = vmmov %vm9247_vm0 }
 0xed4   : > { %v5659_v9 = vunpack.i.h.bf16 %v5657_v33  ;;  %v5658_v49 = vunpack.i.l.bf16 %v5657_v33  ;;  %v5664_v42 = vunpack.i.h.bf16 %v5662_v55  ;;  %v5663_v47 = vunpack.i.l.bf16 %v5662_v55  ;;  %vm9258_vm10 = vmmov %vm9247_vm0 }
 0xed5   : > { %v4098_v21 = vpack.c.bf16 %v3169_v51, %v3168_v2  ;;  %vm9259_vm11 = vmmov %vm9247_vm0 }
 0xed6   : > { %v3179_v59 = vsel %vm9253_vm3, %v5659_v9, %v5664_v42  ;;  %v3178_v15 = vsel %vm9254_vm6, %v5658_v49, %v5663_v47  ;;  %4137 = vmatpush1.bf16.msra.mxu1 %v4136_v40  ;;  %v3180_v0 = vsel %vm9255_vm7, %v5663_v47, %v5658_v49  ;;  %v3181_v1 = vsel %vm9256_vm8, %v5664_v42, %v5659_v9  ;;  %vm9260_vm12 = vmmov %vm9247_vm0 }
 0xed7   : > { %v4104_v35 = vpack.c.bf16 %v3179_v59, %v3178_v15  ;;  %4099 = vmatprep.subr.bf16.mxu0 %v4098_v21  ;;  %v5667_v50 = vpop.permute.xlu0 %5666  ;;  %v5672_v16 = vpop.permute.xlu1 %5671  ;;  %v4102_v31 = vpack.c.bf16 %v3181_v1, %v3180_v0  ;;  %vm9261_vm13 = vmmov %vm9247_vm0 }
 0xed8   : > { %4101 = vmatpush1.bf16.msra.mxu0 %v4100_v57  ;;  %v5669_v7 = vunpack.i.h.bf16 %v5667_v50  ;;  %v5668_v29 = vunpack.i.l.bf16 %v5667_v50  ;;  %v5674_v54 = vunpack.i.h.bf16 %v5672_v16  ;;  %v5673_v26 = vunpack.i.l.bf16 %v5672_v16  ;;  %vm9262_vm5 = vmmov %vm9247_vm0 }
 0xed9   : > { %4103 = vmatprep.subr.bf16.mxu0 %v4102_v31  ;;  %vm9263_vm1 = vmmov %vm9247_vm0  ;;  %v5584_v16 = vunpack.i.h.bf16 %v8568_v23  ;;  %v5583_v31 = vunpack.i.l.bf16 %v8568_v23 }
 0xeda   : > { %v3229_v62 = vsel %vm9257_vm9, %v5674_v54, %v5669_v7  ;;  %v3228_v61 = vsel %vm9258_vm10, %v5673_v26, %v5668_v29  ;;  %v3226_v4 = vsel %vm9259_vm11, %v5668_v29, %v5673_v26  ;;  %v3227_v39 = vsel %vm9260_vm12, %v5669_v7, %v5674_v54  ;;  %vm9265_vm14 = vmmov %vm9264_vm2 }
 0xedb   : > { %v4140_v2 = vpack.c.bf16 %v3229_v62, %v3228_v61  ;;  %v5677_v40 = vpop.permute.xlu0 %5676  ;;  %v5682_v57 = vpop.permute.xlu1 %5681  ;;  %v4138_v33 = vpack.c.bf16 %v3227_v39, %v3226_v4  ;;  %v5594_v7 = vunpack.i.h.bf16 %v8570_v46  ;;  %v5593_v29 = vunpack.i.l.bf16 %v8570_v46  ;;  %vm9266_vm4 = vmmov %vm9264_vm2 }
 0xedc   : > { %4105 = vmatpush1.bf16.msra.mxu0 %v4104_v35  ;;  %v5679_v55 = vunpack.i.h.bf16 %v5677_v40  ;;  %v5678_v51 = vunpack.i.l.bf16 %v5677_v40  ;;  %v5684_v9 = vunpack.i.h.bf16 %v5682_v57  ;;  %v5683_v49 = vunpack.i.l.bf16 %v5682_v57  ;;  %vm9267_vm15 = vmmov %vm9264_vm2 }
 0xedd   : > { %4107 = vmatprep.subr.bf16.mxu0 %v4106_v19  ;;  %4139 = vmatprep.subr.bf16.mxu1 %v4138_v33  ;;  %vm9268_vm3 = vmmov %vm9264_vm2 }
 0xede   : > { %v3241_v42 = vsel %vm9261_vm13, %v5684_v9, %v5679_v55  ;;  %v3240_v47 = vsel %vm9247_vm0, %v5683_v49, %v5678_v51  ;;  %4141 = vmatpush1.bf16.msra.mxu1 %v4140_v2  ;;  %v3238_v21 = vsel %vm9262_vm5, %v5678_v51, %v5683_v49  ;;  %v3239_v59 = vsel %vm9263_vm1, %v5679_v55, %v5684_v9  ;;  %vm9269_vm6 = vmmov %vm9264_vm2 }
 0xedf   : > { %v4144_v15 = vpack.c.bf16 %v3241_v42, %v3240_v47  ;;  %v5687_v0 = vpop.permute.xlu0 %5686  ;;  %v5692_v1 = vpop.permute.xlu1 %5691  ;;  %v4142_v35 = vpack.c.bf16 %v3239_v59, %v3238_v21  ;;  %v3274_v4 = vsel %vm9268_vm3, %v5583_v31, %v5593_v29  ;;  %v3275_v39 = vsel %vm9269_vm6, %v5584_v16, %v5594_v7  ;;  %vm9270_vm7 = vmmov %vm9264_vm2 }
 0xee0   : > { %4109 = vmatpush1.bf16.msra.mxu0 %v4108_v3  ;;  %v5689_v14 = vunpack.i.h.bf16 %v5687_v0  ;;  %v5688_v58 = vunpack.i.l.bf16 %v5687_v0  ;;  %v5694_v19 = vunpack.i.h.bf16 %v5692_v1  ;;  %v5693_v50 = vunpack.i.l.bf16 %v5692_v1  ;;  %vm9271_vm8 = vmmov %vm9264_vm2 }
 0xee1   : > { %4111 = vmatprep.subr.bf16.mxu0 %v4110_v41  ;;  %4143 = vmatprep.subr.bf16.mxu1 %v4142_v35  ;;  %vm9272_vm9 = vmmov %vm9264_vm2  ;;  %v4154_v42 = vpack.c.bf16 %v3275_v39, %v3274_v4  ;;  %v5778_v4 = vmov 1966171168  }
 0xee2   : > { %v3253_v52 = vsel %vm9264_vm2, %v5694_v19, %v5689_v14  ;;  %v3252_v6 = vsel %vm9265_vm14, %v5693_v50, %v5688_v58  ;;  %4145 = vmatpush1.bf16.msra.mxu1 %v4144_v15  ;;  %v3250_v3 = vsel %vm9266_vm4, %v5688_v58, %v5693_v50  ;;  %v3251_v23 = vsel %vm9267_vm15, %v5689_v14, %v5694_v19  ;;  %vm9273_vm10 = vmmov %vm9264_vm2 }
 0xee3   : > { %v4148_v54 = vpack.c.bf16 %v3253_v52, %v3252_v6  ;;  %v5697_v46 = vpop.permute.xlu0 %5696  ;;  %v5702_v26 = vpop.permute.xlu1 %5701  ;;  %v4146_v62 = vpack.c.bf16 %v3251_v23, %v3250_v3  ;;  %vm9274_vm11 = vmmov %vm9264_vm2  ;;  %v3313_v52 = vsub.s32 2, %v8520_v5 }
 0xee4   : > { %4113 = vmatpush1.bf16.msra.mxu0 %v4112_v12  ;;  %v5699_v32 = vunpack.i.h.bf16 %v5697_v46  ;;  %v5698_v36 = vunpack.i.l.bf16 %v5697_v46  ;;  %v5704_v41 = vunpack.i.h.bf16 %v5702_v26  ;;  %v5703_v61 = vunpack.i.l.bf16 %v5702_v26  ;;  %vm9275_vm12 = vmmov %vm9264_vm2 }
 0xee5   : > { %4115 = vmatprep.subr.bf16.mxu0 %v4114_v63  ;;  %4147 = vmatprep.subr.bf16.mxu1 %v4146_v62  ;;  %v3277_v20 = vsel %vm9274_vm11, %v5594_v7, %v5584_v16  ;;  %v3276_v63 = vsel %vm9275_vm12, %v5593_v29, %v5583_v31  ;;  %vm9276_vm13 = vmmov %vm9264_vm2  ;;  %v3314_v26 = vrot.slane %v8525_v25, %v3313_v52  ;;  %v5736_v62 = vld [vmem:[%s5852_s14 + $0x10] sm:$0xff] }
 0xee6   : > { %v3265_v2 = vsel %vm9270_vm7, %v5704_v41, %v5699_v32  ;;  %v3264_v24 = vsel %vm9271_vm8, %v5703_v61, %v5698_v36  ;;  %4149 = vmatpush1.bf16.msra.mxu1 %v4148_v54  ;;  %v3262_v30 = vsel %vm9272_vm9, %v5698_v36, %v5703_v61  ;;  %v3263_v22 = vsel %vm9273_vm10, %v5699_v32, %v5704_v41  ;;  %vm9277_vm0 = vmmov %vm9264_vm2  ;;  %v5737_v36 = vld [vmem:[%s5852_s14 + $0x18] sm:$0xff] }
 0xee7   : > { %v4152_v12 = vpack.c.bf16 %v3265_v2, %v3264_v24  ;;  %v5707_v40 = vpop.permute.xlu0 %5706  ;;  %v5712_v57 = vpop.permute.xlu1 %5711  ;;  %v4150_v33 = vpack.c.bf16 %v3263_v22, %v3262_v30  ;;  %v4156_v59 = vpack.c.bf16 %v3277_v20, %v3276_v63  ;;  %vm9278_vm5 = vmmov %vm9277_vm0  ;;  %vm9280_vm2 = vcmp.lt.s32.totalorder %v5917_v38, 16 }
 0xee8   : > { %4117 = vmatpush1.bf16.msra.mxu0 %v4116_v44  ;;  %v5709_v55 = vunpack.i.h.bf16 %v5707_v40  ;;  %v5708_v51 = vunpack.i.l.bf16 %v5707_v40  ;;  %v5714_v9 = vunpack.i.h.bf16 %v5712_v57  ;;  %v5713_v49 = vunpack.i.l.bf16 %v5712_v57  ;;  %vm9279_vm1 = vmmov %vm9277_vm0 }
 0xee9   : > { %4119 = vmatprep.subr.bf16.mxu0 %v4118_v34  ;;  %4151 = vmatprep.subr.bf16.mxu1 %v4150_v33  ;;  %vm9281_vm14 = vmmov %vm9280_vm2  ;;  %v3306_v54 = vrot.slane %v8525_v25, %v3305_v56  ;;  %v3470_v32 = vmul.f32 0.5, %v5736_v62  ;;  %v3471_v41 = vmul.f32 0.5, %v5737_v36  ;;  %v3484_v38 = vunpack.c.l.s4 %v5778_v4 }
 0xeea   : > { %4153 = vmatpush1.bf16.msra.mxu1 %v4152_v12  ;;  %v3286_v47 = vsel %vm9276_vm13, %v5708_v51, %v5713_v49  ;;  %v3287_v21 = vsel %vm9277_vm0, %v5709_v55, %v5714_v9  ;;  %v3289_v37 = vsel %vm9278_vm5, %v5714_v9, %v5709_v55  ;;  %v3288_v28 = vsel %vm9279_vm1, %v5713_v49, %v5708_v51  ;;  %vm9282_vm4 = vmmov %vm9280_vm2 }
 0xeeb   : > { %v5717_v44 = vpop.permute.xlu0 %5716  ;;  %v5722_v15 = vpop.permute.xlu1 %5721  ;;  %4155 = vmatprep.subr.bf16.mxu1 %v4154_v42  ;;  %v4158_v1 = vpack.c.bf16 %v3287_v21, %v3286_v47  ;;  %vm9283_vm15 = vmmov %vm9280_vm2  ;;  %v3474_v22 = vrot.slane %v3470_v32, 4  ;;  %v3475_v63 = vrot.slane %v3471_v41, 4  ;;  %v3485_v40 = vunpack.c.0.s8 %v3484_v38 }
 0xeec   : > { %4121 = vmatpush1.bf16.msra.mxu0 %v4120_v10  ;;  %v5719_v48 = vunpack.i.h.bf16 %v5717_v44  ;;  %v5718_v27 = vunpack.i.l.bf16 %v5717_v44  ;;  %v5724_v34 = vunpack.i.h.bf16 %v5722_v15  ;;  %v5723_v0 = vunpack.i.l.bf16 %v5722_v15  ;;  %vm9285_vm3 = vmmov %vm9277_vm0 }
 0xeed   : > { %4123 = vmatprep.subr.bf16.mxu0 %v4122_v18  ;;  %v4160_v10 = vpack.c.bf16 %v3289_v37, %v3288_v28  ;;  %v9284_v18 = vpack.c.bf16 %v8475_v53, %v8467_v13  ;;  %vm9286_vm6 = vmmov %vm9277_vm0  ;;  %v3488_v9 = vsub.s32 %v3485_v40, %v8520_v5  ;;  %vm3500_vm9 = vcmp.lt.s32.totalorder %v9208_v43, 256 }
 0xeee   : > { %v3193_v35 = vsel %vm9280_vm2, %v5724_v34, %v5719_v48  ;;  %v3192_v14 = vsel %vm9281_vm14, %v5723_v0, %v5718_v27  ;;  %4157 = vmatpush1.bf16.msra.mxu1 %v4156_v59  ;;  %v3190_v8 = vsel %vm9282_vm4, %v5718_v27, %v5723_v0  ;;  %v3191_v60 = vsel %vm9283_vm15, %v5719_v48, %v5724_v34  ;;  %vm9287_vm7 = vmmov %vm9277_vm0 }
 0xeef   : > { %v4128_v58 = vpack.c.bf16 %v3193_v35, %v3192_v14  ;;  %v5727_v19 = vpop.permute.xlu0 %5726  ;;  %v5732_v50 = vpop.permute.xlu1 %5731  ;;  %4159 = vmatprep.subr.bf16.mxu1 %v4158_v1  ;;  %v4126_v17 = vpack.c.bf16 %v3191_v60, %v3190_v8  ;;  %vm9288_vm8 = vmmov %vm9277_vm0 }
 0xef0   : > { %4125 = vmatpush1.bf16.msra.mxu0 %v9284_v18  ;;  %v5729_v16 = vunpack.i.h.bf16 %v5727_v19  ;;  %v5728_v31 = vunpack.i.l.bf16 %v5727_v19  ;;  %v5734_v7 = vunpack.i.h.bf16 %v5732_v50  ;;  %v5733_v29 = vunpack.i.l.bf16 %v5732_v50 }
 0xef1   : > { %4127 = vmatprep.subr.bf16.mxu0 %v4126_v17 }
 0xef2   : > { %v3301_v6 = vsel %vm9285_vm3, %v5734_v7, %v5729_v16  ;;  %v3300_v3 = vsel %vm9286_vm6, %v5733_v29, %v5728_v31  ;;  %4161 = vmatpush1.bf16.msra.mxu1 %v4160_v10  ;;  %v3298_v13 = vsel %vm9287_vm7, %v5728_v31, %v5733_v29  ;;  %v3299_v53 = vsel %vm9288_vm8, %v5729_v16, %v5734_v7 }
 0xef3   : > { %v4164_v23 = vpack.c.bf16 %v3301_v6, %v3300_v3  ;;  %v4162_v46 = vpack.c.bf16 %v3299_v53, %v3298_v13 }
 0xef4   : > { %4129 = vmatpush1.bf16.msra.mxu0 %v4128_v58 }
 0xef5   : > { %4163 = vmatprep.subr.bf16.mxu1 %v4162_v46 }
 0xef6   : > { %4165 = vmatpush1.bf16.msra.mxu1 %v4164_v23 }
 0xef7   : > { %3389 = vmatmul.mubr.f32.vlgmr.msra.gmra.mrb[10].mxu0 %v3306_v54 }
 0xef9   : > { %3460 = vmatmul.mubr.f32.vlgmr.msra.gmra.mrb[24].mxu1 %v3314_v26 }
 0xfca   : > { %v3390_v61 = vpop.f32.mrb[10].mxu0 }
 0xfcb   : > { %v4181_v39 = vadd.f32 %v8255_v45, %v3390_v61  ;;  %v3392_v2 = vpop.f32.mrb[11].mxu0 }
 0xfcc   : > { %v4184_v24 = vadd.f32 %v8259_v11, %v3392_v2  ;;  %v3461_v30 = vpop.f32.mrb[24].mxu1 }
 0xfcd   : > { %v4182_v25 = vadd.f32 %v4181_v39, %v3461_v30  ;;  %v3463_v20 = vpop.f32.mrb[25].mxu1 }
 0xfce   : > { %v4185_v12 = vadd.f32 %v4184_v24, %v3463_v20 }
 0xfcf   : > { %v3468_v57 = vmul.f32 0.5, %v4182_v25 }
 0xfd0   : > { %v3469_v33 = vmul.f32 0.5, %v4185_v12 }
 0xfd1   : > { %v3478_v55 = vadd.f32 %v3474_v22, %v3468_v57 }
 0xfd2   : > { %v3479_v51 = vadd.f32 %v3475_v63, %v3469_v33 }
 0xfd4   : > { %v3482_v45 = vcombine.low %v3478_v55, %v3479_v51 }
 0xfd6   : > { %v3489_v49 = vrot.slane %v3482_v45, %v3488_v9 }
 0xfd8   : > { %v3496_v11 = vrot.slane %v3489_v49, %v3488_v9 }
 0xfda   : > { %3502 = vst.msk [vmem:[%s284_s23] sm:$0x3] %vm3500_vm9, %v3496_v11 }
 0xfdb PF: > { %p13_p9 = scmp.ge.s32.totalorder %s5831_s25, 4   ;;  %s9289_s21 = smov %s5756_s22 }
 0xfdc   : > { %s9290_s22 = smov %s5840_s28  ;;  %s9291_s23 = smov %s5831_s25 }
 0xfdd   :  { %15 = sbr.rel (!%p13_p9) target bundleno = 2 (0x2), region = 109 }

</bundles_post_ra>
